<compile_context>
chip_gen: v7x
topology: tpu7x:2x2x1
jax: 0.10.0
libtpu: 0.0.40
codegen_flags: <defaults>
</compile_context>

<pallas_src>
import jax
import jax.numpy as jnp
from jax.experimental import pallas as pl
from jax.experimental.pallas import tpu as pltpu


def _round_up(x, m):
    return (x + m - 1) // m * m


# ---------------------------------------------------------------------------
# Kernel 1: LSTM recurrence over TT timesteps per grid step.
#   grid = (batch tiles [parallel], time blocks [arbitrary])
# ---------------------------------------------------------------------------
def lstm_recurrent_kernel(lens_ref, x_ref, wih_ref, whh_ref, b_ref,
                          h_out_ref, h_ref, c_ref, xproj_ref):
    tblk = pl.program_id(1)
    TT, BT, _ = x_ref.shape
    Hp = h_ref.shape[1]

    @pl.when(tblk == 0)
    def _():
        h_ref[...] = jnp.zeros_like(h_ref)
        c_ref[...] = jnp.zeros_like(c_ref)

    lens = lens_ref[...]            # (BT, 1) int32, loaded once per block
    t0 = tblk * TT

    # Hoisted input projection for the whole time block (off the serial
    # chain): one big MXU dot with M = TT*BT, bias folded in once.
    x_flat = x_ref[...].reshape(TT * BT, x_ref.shape[2])
    xproj_ref[...] = (
        jnp.dot(x_flat, wih_ref[...], preferred_element_type=jnp.float32)
        + b_ref[...]
    ).reshape(TT, BT, 4 * Hp)

    for tt in range(TT):            # static unroll over the time block
        # Serial-chain work per step: only the recurrent matmul + gates.
        gates = xproj_ref[tt] + jnp.dot(
            h_ref[...].astype(jnp.bfloat16), whh_ref[...],
            preferred_element_type=jnp.float32)

        # PyTorch gate order i, f, g, o; Hp is a multiple of 128 so every
        # gate slice is lane-aligned.
        i_g = jax.nn.sigmoid(gates[:, 0 * Hp:1 * Hp])
        f_g = jax.nn.sigmoid(gates[:, 1 * Hp:2 * Hp])
        g_g = jnp.tanh(gates[:, 2 * Hp:3 * Hp])
        o_g = jax.nn.sigmoid(gates[:, 3 * Hp:4 * Hp])

        c_new = f_g * c_ref[...] + i_g * g_g
        h_new = o_g * jnp.tanh(c_new)
        h_ref[...] = h_new
        c_ref[...] = c_new

        # pack_padded / pad_packed semantics: padded positions (t >= len[b])
        # are zeroed, so their fc output is exactly the fc bias.  Written
        # batch-first and in bf16 (lane-dense: Hp % 128 == 0).
        valid = lens > (t0 + tt)                    # (BT, 1)
        h_out_ref[:, tt, :] = jnp.where(valid, h_new, 0.0).astype(h_out_ref.dtype)


# ---------------------------------------------------------------------------
# Kernel 2: batched fc projection, tiled over rows and (padded) vocab.
# ---------------------------------------------------------------------------
def fc_kernel(h_ref, w_ref, b_ref, out_ref):
    out_ref[...] = (jnp.dot(h_ref[...], w_ref[...],
                            preferred_element_type=jnp.float32)
                    + b_ref[...]).astype(out_ref.dtype)


def lstm_forward(X, params, max_seq_len):
    embed = params["embed"]        # (V, E)
    w_ih = params["w_ih"]          # (E, 4H)   pre-transposed
    w_hh = params["w_hh"]          # (H, 4H)   pre-transposed
    b = params["b"]                # (1, 4H)   b_ih + b_hh
    w_fc = params["w_fc"]          # (H, V)    pre-transposed
    b_fc = params["b_fc"]          # (1, V)

    B, T = X.shape
    assert T == max_seq_len
    E = embed.shape[1]
    H = w_hh.shape[0]
    V = w_fc.shape[1]

    # Hardware-friendly padded sizes (zero padding keeps the math identical).
    Bp = _round_up(B, 16)          # full bf16 sublane packing
    Ep = _round_up(E, 128)
    Hp = _round_up(H, 128)
    Vp = _round_up(V, 128)
    TT = 16                        # timesteps per grid step
    T_pad = _round_up(T, TT)       # masked extra steps are no-ops

    # Batch tiling: 2 parallel batch tiles when the batch allows it, so a
    # second TensorCore (v7x megacore) can take half the recurrence.
    BT = Bp // 2 if (Bp % 32 == 0) else Bp
    nb = Bp // BT
    nt = T_pad // TT

    lens = jnp.sum(X != 0, axis=-1).astype(jnp.int32)           # (B,)
    lens_p = jnp.zeros((Bp, 1), jnp.int32).at[:B, 0].set(lens)

    # Embedding gather (glue), time-major, bf16, zero-padded to (T_pad, Bp, Ep).
    # TODO(synk): could be folded into kernel 1 via scalar-prefetched ids +
    # row gather; kept as glue since E is small relative to H here.
    x_emb = jnp.take(embed, X, axis=0)                          # (B, T, E)
    x_tm = jnp.transpose(x_emb, (1, 0, 2))                      # (T, B, E)
    x_pad = jnp.zeros((T_pad, Bp, Ep), jnp.bfloat16)
    x_pad = x_pad.at[:T, :B, :E].set(x_tm.astype(jnp.bfloat16))

    # Gate weights padded per-gate to Hp columns.  Zero padding keeps padded
    # hidden channels at exactly 0 through the recurrence
    # (i=f=o=0.5, g=0 => c_pad stays 0, h_pad stays 0).
    w_ih_p = jnp.zeros((Ep, 4 * Hp), jnp.float32)
    w_hh_p = jnp.zeros((Hp, 4 * Hp), jnp.float32)
    b_cat = jnp.zeros((1, 4 * Hp), jnp.float32)
    for g in range(4):
        w_ih_p = w_ih_p.at[:E, g * Hp:g * Hp + H].set(w_ih[:, g * H:(g + 1) * H])
        w_hh_p = w_hh_p.at[:H, g * Hp:g * Hp + H].set(w_hh[:, g * H:(g + 1) * H])
        b_cat = b_cat.at[:, g * Hp:g * Hp + H].set(b[:, g * H:(g + 1) * H])
    w_ih_p = w_ih_p.astype(jnp.bfloat16)
    w_hh_p = w_hh_p.astype(jnp.bfloat16)

    w_fc_p = jnp.zeros((Hp, Vp), jnp.float32).at[:H, :V].set(w_fc).astype(jnp.bfloat16)
    b_fc_p = jnp.zeros((1, Vp), jnp.float32).at[:, :V].set(b_fc)

    # TODO(synk): dropout treated as eval-mode identity (no RNG masking).

    # --- Kernel 1: recurrence, emits masked h, batch-first (Bp, T_pad, Hp) bf16.
    h_bf = pl.pallas_call(
        lstm_recurrent_kernel,
        out_shape=jax.ShapeDtypeStruct((Bp, T_pad, Hp), jnp.bfloat16),
        grid_spec=pltpu.PrefetchScalarGridSpec(
            num_scalar_prefetch=0,
            grid=(nb, nt),
            in_specs=[
                pl.BlockSpec((BT, 1), lambda bi, ti: (bi, 0)),            # lens
                pl.BlockSpec((TT, BT, Ep), lambda bi, ti: (ti, bi, 0)),   # x block
                pl.BlockSpec((Ep, 4 * Hp), lambda bi, ti: (0, 0)),        # W_ih
                pl.BlockSpec((Hp, 4 * Hp), lambda bi, ti: (0, 0)),        # W_hh
                pl.BlockSpec((1, 4 * Hp), lambda bi, ti: (0, 0)),         # bias
            ],
            out_specs=pl.BlockSpec((BT, TT, Hp), lambda bi, ti: (bi, ti, 0)),
            scratch_shapes=[
                pltpu.VMEM((BT, Hp), jnp.float32),            # h state
                pltpu.VMEM((BT, Hp), jnp.float32),            # c state
                pltpu.VMEM((TT, BT, 4 * Hp), jnp.float32),    # hoisted x @ W_ih
            ],
        ),
        compiler_params=pltpu.CompilerParams(
            dimension_semantics=("parallel", "arbitrary"),
            vmem_limit_bytes=64 * 1024 * 1024),
    )(lens_p, x_pad, w_ih_p, w_hh_p, b_cat)

    # h is already batch-first; flattening is a free contiguous reshape.
    rows = Bp * T_pad
    h_rows = h_bf.reshape(rows, Hp)

    # --- Kernel 2: one batched, tiled GEMM for the fc projection. ---
    TV = next(c for c in (512, 256, 128) if Vp % c == 0)
    budget = 24 * 1024 * 1024
    TR = 8
    for c in (2048, 1024, 512, 256, 128, 64, 32, 16, 8):
        if rows % c != 0:
            continue
        need = 2 * (c * Hp * 2 + Hp * TV * 2 + c * TV * 4) + 2 * TV * 4
        if need <= budget:
            TR = c
            break

    nR, nV = rows // TR, Vp // TV
    if nR <= nV:
        # rows outer, vocab inner: W_fc tile re-read nR times (small).
        fc_grid = (nR, nV)
        h_map = lambda r, v: (r, 0)
        w_map = lambda r, v: (0, v)
        b_map = lambda r, v: (0, v)
        o_map = lambda r, v: (r, v)
    else:
        # vocab outer, rows inner: h tile re-read nV times (smaller than nR).
        fc_grid = (nV, nR)
        h_map = lambda v, r: (r, 0)
        w_map = lambda v, r: (0, v)
        b_map = lambda v, r: (0, v)
        o_map = lambda v, r: (r, v)

    logits = pl.pallas_call(
        fc_kernel,
        out_shape=jax.ShapeDtypeStruct((rows, Vp), jnp.float32),
        grid_spec=pltpu.PrefetchScalarGridSpec(
            num_scalar_prefetch=0,
            grid=fc_grid,
            in_specs=[
                pl.BlockSpec((TR, Hp), h_map),    # h rows (bf16)
                pl.BlockSpec((Hp, TV), w_map),    # fc weight V-tile
                pl.BlockSpec((1, TV), b_map),     # fc bias V-tile
            ],
            out_specs=pl.BlockSpec((TR, TV), o_map),
        ),
        compiler_params=pltpu.CompilerParams(
            dimension_semantics=("parallel", "parallel"),
            vmem_limit_bytes=64 * 1024 * 1024),
    )(h_rows, w_fc_p, b_fc_p)

    return logits.reshape(Bp, T_pad, Vp)[:B, :T, :V]    # strip padding (glue)


def lstm_reference(X, params, max_seq_len):
    """Pure-JAX f32 reference implementing the same semantics."""
    embed_table = params["embed"]
    w_ih, w_hh, b = params["w_ih"], params["w_hh"], params["b"]
    w_fc, b_fc = params["w_fc"], params["b_fc"]
    B, T = X.shape
    H = w_hh.shape[0]

    lens = jnp.sum(X != 0, axis=-1)
    x_emb = jnp.take(embed_table, X, axis=0)        # (B, T, E)
    x_tm = jnp.transpose(x_emb, (1, 0, 2))          # (T, B, E)

    def step(carry, x_t):
        h, c = carry
        gates = x_t @ w_ih + h @ w_hh + b
        i_g = jax.nn.sigmoid(gates[:, 0 * H:1 * H])
        f_g = jax.nn.sigmoid(gates[:, 1 * H:2 * H])
        g_g = jnp.tanh(gates[:, 2 * H:3 * H])
        o_g = jax.nn.sigmoid(gates[:, 3 * H:4 * H])
        c_new = f_g * c + i_g * g_g
        h_new = o_g * jnp.tanh(c_new)
        return (h_new, c_new), h_new

    h0 = jnp.zeros((B, H), jnp.float32)
    c0 = jnp.zeros((B, H), jnp.float32)
    _, hs = jax.lax.scan(step, (h0, c0), x_tm)      # (T, B, H)
    hs = jnp.transpose(hs, (1, 0, 2))               # (B, T, H)
    mask = (jnp.arange(T)[None, :] < lens[:, None])[..., None]
    hs = jnp.where(mask, hs, 0.0)
    return hs @ w_fc + b_fc


def make_params(key, vocab_size, embed_dim, hidden_dim):
    ks = jax.random.split(key, 7)
    s = 1.0 / jnp.sqrt(hidden_dim)
    embed = jax.random.normal(ks[0], (vocab_size, embed_dim), jnp.float32)
    w_ih = jax.random.uniform(ks[1], (embed_dim, 4 * hidden_dim), jnp.float32, -s, s)
    w_hh = jax.random.uniform(ks[2], (hidden_dim, 4 * hidden_dim), jnp.float32, -s, s)
    b_ih = jax.random.uniform(ks[3], (4 * hidden_dim,), jnp.float32, -s, s)
    b_hh = jax.random.uniform(ks[4], (4 * hidden_dim,), jnp.float32, -s, s)
    w_fc = jax.random.uniform(ks[5], (hidden_dim, vocab_size), jnp.float32, -s, s)
    b_fc = jax.random.uniform(ks[6], (vocab_size,), jnp.float32, -s, s)
    return {
        "embed": embed,
        "w_ih": w_ih,
        "w_hh": w_hh,
        "b": (b_ih + b_hh).reshape(1, -1),
        "w_fc": w_fc,
        "b_fc": b_fc.reshape(1, -1),
    }


if __name__ == "__main__":
    vocab_size, embed_dim, hidden_dim = 64, 16, 32
    # T=24 -> T_pad=32, TT=16: exercises state carry across time blocks AND
    # the time-padding path.
    max_seq_len, batch = 24, 2

    key = jax.random.PRNGKey(0)
    k_par, k_tok = jax.random.split(key)
    params = make_params(k_par, vocab_size, embed_dim, hidden_dim)

    # Token ids in [1, vocab); zero the tail of the second sequence to
    # exercise the pack/pad (variable-length) path.
    X = jax.random.randint(k_tok, (batch, max_seq_len), 1, vocab_size, jnp.int32)
    X = X.at[1, 5:].set(0)

    out = lstm_forward(X, params, max_seq_len)
    out = jax.block_until_ready(out)

    ref = lstm_reference(X, params, max_seq_len)
    assert out.shape == (batch, max_seq_len, vocab_size)
    max_err = jnp.max(jnp.abs(out - ref))
    assert jnp.allclose(out, ref, atol=2e-2, rtol=2e-2), f"max abs err = {max_err}"

    print("KERNEL_OK")
</pallas_src>

<mosaic_0001>
module attributes {stable_mosaic.version = 11 : i64} {
  func.func @lstm_recurrent_kernel(%arg0: i32, %arg1: i32, %arg2: memref<16x1xi32, #tpu.memory_space<vmem>>, %arg3: memref<16x16x128xbf16, #tpu.memory_space<vmem>>, %arg4: memref<128x512xbf16, #tpu.memory_space<vmem>>, %arg5: memref<128x512xbf16, #tpu.memory_space<vmem>>, %arg6: memref<1x512xf32, #tpu.memory_space<vmem>>, %arg7: memref<16x16x128xbf16, #tpu.memory_space<vmem>>, %arg8: memref<16x128xf32, #tpu.memory_space<vmem>>, %arg9: memref<16x128xf32, #tpu.memory_space<vmem>>, %arg10: memref<16x16x512xf32, #tpu.memory_space<vmem>>) attributes {dimension_semantics = [#tpu.dimension_semantics<parallel>, #tpu.dimension_semantics<arbitrary>], iteration_bounds = array<i64: 1, 2>, scalar_prefetch = 0 : i64, scratch_operands = 3 : i64, tpu.core_type = #tpu.core_type<tc>, window_params = [{transform_indices = @transform_0, window_bounds = array<i64: 16, 1>}, {transform_indices = @transform_1, window_bounds = array<i64: 16, 16, 128>}, {pipeline_mode = #tpu.pipeline_mode<synchronous>, transform_indices = @transform_2, window_bounds = array<i64: 128, 512>}, {pipeline_mode = #tpu.pipeline_mode<synchronous>, transform_indices = @transform_3, window_bounds = array<i64: 128, 512>}, {pipeline_mode = #tpu.pipeline_mode<synchronous>, transform_indices = @transform_4, window_bounds = array<i64: 1, 512>}, {transform_indices = @transform_5, window_bounds = array<i64: 16, 16, 128>}]} {
    %c0_i32 = arith.constant 0 : i32
    %0 = arith.cmpi eq, %arg1, %c0_i32 : i32
    %1 = arith.extui %0 : i1 to i32
    %c0_i32_0 = arith.constant 0 : i32
    %2 = arith.cmpi ne, %1, %c0_i32_0 : i32
    scf.if %2 {
      %cst_334 = arith.constant 0.000000e+00 : f32
      %750 = vector.broadcast %cst_334 : f32 to vector<16x128xf32>
      %c0_335 = arith.constant 0 : index
      %c0_336 = arith.constant 0 : index
      %751 = vector.load %arg8[%c0_335, %c0_336] : memref<16x128xf32, #tpu.memory_space<vmem>>, vector<16x128xf32>
      tpu.vector_store %arg8[%c0_335, %c0_336], %750 {strides = array<i32>} : memref<16x128xf32, #tpu.memory_space<vmem>>, vector<16x128xf32>,
      %cst_337 = arith.constant 0.000000e+00 : f32
      %752 = vector.broadcast %cst_337 : f32 to vector<16x128xf32>
      %c0_338 = arith.constant 0 : index
      %c0_339 = arith.constant 0 : index
      %753 = vector.load %arg9[%c0_338, %c0_339] : memref<16x128xf32, #tpu.memory_space<vmem>>, vector<16x128xf32>
      tpu.vector_store %arg9[%c0_338, %c0_339], %752 {strides = array<i32>} : memref<16x128xf32, #tpu.memory_space<vmem>>, vector<16x128xf32>,
    } else {
    }
    %c0 = arith.constant 0 : index
    %c0_1 = arith.constant 0 : index
    %3 = vector.load %arg2[%c0, %c0_1] : memref<16x1xi32, #tpu.memory_space<vmem>>, vector<16x1xi32>
    %c16_i32 = arith.constant 16 : i32
    %4 = arith.muli %arg1, %c16_i32 : i32
    %c0_2 = arith.constant 0 : index
    %c0_3 = arith.constant 0 : index
    %c0_4 = arith.constant 0 : index
    %5 = vector.load %arg3[%c0_2, %c0_3, %c0_4] : memref<16x16x128xbf16, #tpu.memory_space<vmem>>, vector<16x16x128xbf16>
    %6 = vector.shape_cast %5 : vector<16x16x128xbf16> to vector<256x128xbf16>
    %c0_5 = arith.constant 0 : index
    %c0_6 = arith.constant 0 : index
    %7 = vector.load %arg4[%c0_5, %c0_6] : memref<128x512xbf16, #tpu.memory_space<vmem>>, vector<128x512xbf16>
    %cst = arith.constant dense<0.000000e+00> : vector<256x512xf32>
    %8 = tpu.matmul %6, %7, %cst {dimension_numbers = #tpu.dot_dimension_numbers<[1], [0], [0], [1], [0, 0, 1, 1], [], []>} : vector<256x128xbf16>, vector<128x512xbf16>, vector<256x512xf32> -> vector<256x512xf32>
    %c0_7 = arith.constant 0 : index
    %c0_8 = arith.constant 0 : index
    %9 = vector.load %arg6[%c0_7, %c0_8] : memref<1x512xf32, #tpu.memory_space<vmem>>, vector<1x512xf32>
    %10 = vector.broadcast %9 : vector<1x512xf32> to vector<256x512xf32>
    %11 = arith.addf %8, %10 : vector<256x512xf32>
    %12 = vector.shape_cast %11 : vector<256x512xf32> to vector<16x16x512xf32>
    %c0_9 = arith.constant 0 : index
    %c0_10 = arith.constant 0 : index
    %c0_11 = arith.constant 0 : index
    %13 = vector.load %arg10[%c0_9, %c0_10, %c0_11] : memref<16x16x512xf32, #tpu.memory_space<vmem>>, vector<16x16x512xf32>
    tpu.vector_store %arg10[%c0_9, %c0_10, %c0_11], %12 {strides = array<i32>} : memref<16x16x512xf32, #tpu.memory_space<vmem>>, vector<16x16x512xf32>,
    %c0_12 = arith.constant 0 : index
    %c0_13 = arith.constant 0 : index
    %c0_14 = arith.constant 0 : index
    %14 = vector.load %arg10[%c0_12, %c0_13, %c0_14] : memref<16x16x512xf32, #tpu.memory_space<vmem>>, vector<1x16x512xf32>
    %15 = vector.shape_cast %14 : vector<1x16x512xf32> to vector<16x512xf32>
    %c0_15 = arith.constant 0 : index
    %c0_16 = arith.constant 0 : index
    %16 = vector.load %arg8[%c0_15, %c0_16] : memref<16x128xf32, #tpu.memory_space<vmem>>, vector<16x128xf32>
    %17 = arith.truncf %16 : vector<16x128xf32> to vector<16x128xbf16>
    %c0_17 = arith.constant 0 : index
    %c0_18 = arith.constant 0 : index
    %18 = vector.load %arg5[%c0_17, %c0_18] : memref<128x512xbf16, #tpu.memory_space<vmem>>, vector<128x512xbf16>
    %cst_19 = arith.constant dense<0.000000e+00> : vector<16x512xf32>
    %19 = tpu.matmul %17, %18, %cst_19 {dimension_numbers = #tpu.dot_dimension_numbers<[1], [0], [0], [1], [0, 0, 1, 1], [], []>} : vector<16x128xbf16>, vector<128x512xbf16>, vector<16x512xf32> -> vector<16x512xf32>
    %20 = arith.addf %15, %19 : vector<16x512xf32>
    %21 = vector.extract_strided_slice %20 {offsets = [0, 0], sizes = [16, 128], strides = [1, 1]} : vector<16x512xf32> to vector<16x128xf32>
    %22 = arith.negf %21 : vector<16x128xf32>
    %23 = math.exp %22 : vector<16x128xf32>
    %cst_20 = arith.constant 1.000000e+00 : f32
    %24 = vector.broadcast %cst_20 : f32 to vector<16x128xf32>
    %25 = arith.addf %24, %23 : vector<16x128xf32>
    %26 = arith.divf %24, %25 : vector<16x128xf32>
    %27 = vector.extract_strided_slice %20 {offsets = [0, 128], sizes = [16, 128], strides = [1, 1]} : vector<16x512xf32> to vector<16x128xf32>
    %28 = arith.negf %27 : vector<16x128xf32>
    %29 = math.exp %28 : vector<16x128xf32>
    %cst_21 = arith.constant 1.000000e+00 : f32
    %30 = vector.broadcast %cst_21 : f32 to vector<16x128xf32>
    %31 = arith.addf %30, %29 : vector<16x128xf32>
    %32 = arith.divf %30, %31 : vector<16x128xf32>
    %33 = vector.extract_strided_slice %20 {offsets = [0, 256], sizes = [16, 128], strides = [1, 1]} : vector<16x512xf32> to vector<16x128xf32>
    %34 = math.tanh %33 : vector<16x128xf32>
    %35 = vector.extract_strided_slice %20 {offsets = [0, 384], sizes = [16, 128], strides = [1, 1]} : vector<16x512xf32> to vector<16x128xf32>
    %36 = arith.negf %35 : vector<16x128xf32>
    %37 = math.exp %36 : vector<16x128xf32>
    %cst_22 = arith.constant 1.000000e+00 : f32
    %38 = vector.broadcast %cst_22 : f32 to vector<16x128xf32>
    %39 = arith.addf %38, %37 : vector<16x128xf32>
    %40 = arith.divf %38, %39 : vector<16x128xf32>
    %c0_23 = arith.constant 0 : index
    %c0_24 = arith.constant 0 : index
    %41 = vector.load %arg9[%c0_23, %c0_24] : memref<16x128xf32, #tpu.memory_space<vmem>>, vector<16x128xf32>
    %42 = arith.mulf %32, %41 : vector<16x128xf32>
    %43 = arith.mulf %26, %34 : vector<16x128xf32>
    %44 = arith.addf %42, %43 : vector<16x128xf32>
    %45 = math.tanh %44 : vector<16x128xf32>
    %46 = arith.mulf %40, %45 : vector<16x128xf32>
    %c0_25 = arith.constant 0 : index
    %c0_26 = arith.constant 0 : index
    %47 = vector.load %arg8[%c0_25, %c0_26] : memref<16x128xf32, #tpu.memory_space<vmem>>, vector<16x128xf32>
    tpu.vector_store %arg8[%c0_25, %c0_26], %46 {strides = array<i32>} : memref<16x128xf32, #tpu.memory_space<vmem>>, vector<16x128xf32>,
    %c0_27 = arith.constant 0 : index
    %c0_28 = arith.constant 0 : index
    %48 = vector.load %arg9[%c0_27, %c0_28] : memref<16x128xf32, #tpu.memory_space<vmem>>, vector<16x128xf32>
    tpu.vector_store %arg9[%c0_27, %c0_28], %44 {strides = array<i32>} : memref<16x128xf32, #tpu.memory_space<vmem>>, vector<16x128xf32>,
    %c0_i32_29 = arith.constant 0 : i32
    %49 = arith.addi %4, %c0_i32_29 : i32
    %50 = vector.broadcast %49 : i32 to vector<16x1xi32>
    %51 = arith.cmpi sgt, %3, %50 : vector<16x1xi32>
    %cst_30 = arith.constant 0.000000e+00 : f32
    %52 = vector.shape_cast %51 : vector<16x1xi1> to vector<16x1xi1>
    %53 = vector.broadcast %52 : vector<16x1xi1> to vector<16x128xi1>
    %54 = vector.broadcast %cst_30 : f32 to vector<16x128xf32>
    %55 = arith.select %53, %46, %54 : vector<16x128xi1>, vector<16x128xf32>
    %56 = arith.truncf %55 : vector<16x128xf32> to vector<16x128xbf16>
    %c0_31 = arith.constant 0 : index
    %c0_32 = arith.constant 0 : index
    %c0_33 = arith.constant 0 : index
    %57 = vector.load %arg7[%c0_31, %c0_32, %c0_33] : memref<16x16x128xbf16, #tpu.memory_space<vmem>>, vector<16x1x128xbf16>
    %58 = vector.shape_cast %57 : vector<16x1x128xbf16> to vector<16x128xbf16>
    %59 = vector.shape_cast %56 : vector<16x128xbf16> to vector<16x1x128xbf16>
    tpu.vector_store %arg7[%c0_31, %c0_32, %c0_33], %59 {strides = array<i32>} : memref<16x16x128xbf16, #tpu.memory_space<vmem>>, vector<16x1x128xbf16>,
    %c1 = arith.constant 1 : index
    %c0_34 = arith.constant 0 : index
    %c0_35 = arith.constant 0 : index
    %60 = vector.load %arg10[%c1, %c0_34, %c0_35] : memref<16x16x512xf32, #tpu.memory_space<vmem>>, vector<1x16x512xf32>
    %61 = vector.shape_cast %60 : vector<1x16x512xf32> to vector<16x512xf32>
    %c0_36 = arith.constant 0 : index
    %c0_37 = arith.constant 0 : index
    %62 = vector.load %arg8[%c0_36, %c0_37] : memref<16x128xf32, #tpu.memory_space<vmem>>, vector<16x128xf32>
    %63 = arith.truncf %62 : vector<16x128xf32> to vector<16x128xbf16>
    %c0_38 = arith.constant 0 : index
    %c0_39 = arith.constant 0 : index
    %64 = vector.load %arg5[%c0_38, %c0_39] : memref<128x512xbf16, #tpu.memory_space<vmem>>, vector<128x512xbf16>
    %cst_40 = arith.constant dense<0.000000e+00> : vector<16x512xf32>
    %65 = tpu.matmul %63, %64, %cst_40 {dimension_numbers = #tpu.dot_dimension_numbers<[1], [0], [0], [1], [0, 0, 1, 1], [], []>} : vector<16x128xbf16>, vector<128x512xbf16>, vector<16x512xf32> -> vector<16x512xf32>
    %66 = arith.addf %61, %65 : vector<16x512xf32>
    %67 = vector.extract_strided_slice %66 {offsets = [0, 0], sizes = [16, 128], strides = [1, 1]} : vector<16x512xf32> to vector<16x128xf32>
    %68 = arith.negf %67 : vector<16x128xf32>
    %69 = math.exp %68 : vector<16x128xf32>
    %cst_41 = arith.constant 1.000000e+00 : f32
    %70 = vector.broadcast %cst_41 : f32 to vector<16x128xf32>
    %71 = arith.addf %70, %69 : vector<16x128xf32>
    %72 = arith.divf %70, %71 : vector<16x128xf32>
    %73 = vector.extract_strided_slice %66 {offsets = [0, 128], sizes = [16, 128], strides = [1, 1]} : vector<16x512xf32> to vector<16x128xf32>
    %74 = arith.negf %73 : vector<16x128xf32>
    %75 = math.exp %74 : vector<16x128xf32>
    %cst_42 = arith.constant 1.000000e+00 : f32
    %76 = vector.broadcast %cst_42 : f32 to vector<16x128xf32>
    %77 = arith.addf %76, %75 : vector<16x128xf32>
    %78 = arith.divf %76, %77 : vector<16x128xf32>
    %79 = vector.extract_strided_slice %66 {offsets = [0, 256], sizes = [16, 128], strides = [1, 1]} : vector<16x512xf32> to vector<16x128xf32>
    %80 = math.tanh %79 : vector<16x128xf32>
    %81 = vector.extract_strided_slice %66 {offsets = [0, 384], sizes = [16, 128], strides = [1, 1]} : vector<16x512xf32> to vector<16x128xf32>
    %82 = arith.negf %81 : vector<16x128xf32>
    %83 = math.exp %82 : vector<16x128xf32>
    %cst_43 = arith.constant 1.000000e+00 : f32
    %84 = vector.broadcast %cst_43 : f32 to vector<16x128xf32>
    %85 = arith.addf %84, %83 : vector<16x128xf32>
    %86 = arith.divf %84, %85 : vector<16x128xf32>
    %c0_44 = arith.constant 0 : index
    %c0_45 = arith.constant 0 : index
    %87 = vector.load %arg9[%c0_44, %c0_45] : memref<16x128xf32, #tpu.memory_space<vmem>>, vector<16x128xf32>
    %88 = arith.mulf %78, %87 : vector<16x128xf32>
    %89 = arith.mulf %72, %80 : vector<16x128xf32>
    %90 = arith.addf %88, %89 : vector<16x128xf32>
    %91 = math.tanh %90 : vector<16x128xf32>
    %92 = arith.mulf %86, %91 : vector<16x128xf32>
    %c0_46 = arith.constant 0 : index
    %c0_47 = arith.constant 0 : index
    %93 = vector.load %arg8[%c0_46, %c0_47] : memref<16x128xf32, #tpu.memory_space<vmem>>, vector<16x128xf32>
    tpu.vector_store %arg8[%c0_46, %c0_47], %92 {strides = array<i32>} : memref<16x128xf32, #tpu.memory_space<vmem>>, vector<16x128xf32>,
    %c0_48 = arith.constant 0 : index
    %c0_49 = arith.constant 0 : index
    %94 = vector.load %arg9[%c0_48, %c0_49] : memref<16x128xf32, #tpu.memory_space<vmem>>, vector<16x128xf32>
    tpu.vector_store %arg9[%c0_48, %c0_49], %90 {strides = array<i32>} : memref<16x128xf32, #tpu.memory_space<vmem>>, vector<16x128xf32>,
    %c1_i32 = arith.constant 1 : i32
    %95 = arith.addi %4, %c1_i32 : i32
    %96 = vector.broadcast %95 : i32 to vector<16x1xi32>
    %97 = arith.cmpi sgt, %3, %96 : vector<16x1xi32>
    %cst_50 = arith.constant 0.000000e+00 : f32
    %98 = vector.shape_cast %97 : vector<16x1xi1> to vector<16x1xi1>
    %99 = vector.broadcast %98 : vector<16x1xi1> to vector<16x128xi1>
    %100 = vector.broadcast %cst_50 : f32 to vector<16x128xf32>
    %101 = arith.select %99, %92, %100 : vector<16x128xi1>, vector<16x128xf32>
    %102 = arith.truncf %101 : vector<16x128xf32> to vector<16x128xbf16>
    %c0_51 = arith.constant 0 : index
    %c1_52 = arith.constant 1 : index
    %c0_53 = arith.constant 0 : index
    %103 = vector.load %arg7[%c0_51, %c1_52, %c0_53] : memref<16x16x128xbf16, #tpu.memory_space<vmem>>, vector<16x1x128xbf16>
    %104 = vector.shape_cast %103 : vector<16x1x128xbf16> to vector<16x128xbf16>
    %105 = vector.shape_cast %102 : vector<16x128xbf16> to vector<16x1x128xbf16>
    tpu.vector_store %arg7[%c0_51, %c1_52, %c0_53], %105 {strides = array<i32>} : memref<16x16x128xbf16, #tpu.memory_space<vmem>>, vector<16x1x128xbf16>,
    %c2 = arith.constant 2 : index
    %c0_54 = arith.constant 0 : index
    %c0_55 = arith.constant 0 : index
    %106 = vector.load %arg10[%c2, %c0_54, %c0_55] : memref<16x16x512xf32, #tpu.memory_space<vmem>>, vector<1x16x512xf32>
    %107 = vector.shape_cast %106 : vector<1x16x512xf32> to vector<16x512xf32>
    %c0_56 = arith.constant 0 : index
    %c0_57 = arith.constant 0 : index
    %108 = vector.load %arg8[%c0_56, %c0_57] : memref<16x128xf32, #tpu.memory_space<vmem>>, vector<16x128xf32>
    %109 = arith.truncf %108 : vector<16x128xf32> to vector<16x128xbf16>
    %c0_58 = arith.constant 0 : index
    %c0_59 = arith.constant 0 : index
    %110 = vector.load %arg5[%c0_58, %c0_59] : memref<128x512xbf16, #tpu.memory_space<vmem>>, vector<128x512xbf16>
    %cst_60 = arith.constant dense<0.000000e+00> : vector<16x512xf32>
    %111 = tpu.matmul %109, %110, %cst_60 {dimension_numbers = #tpu.dot_dimension_numbers<[1], [0], [0], [1], [0, 0, 1, 1], [], []>} : vector<16x128xbf16>, vector<128x512xbf16>, vector<16x512xf32> -> vector<16x512xf32>
    %112 = arith.addf %107, %111 : vector<16x512xf32>
    %113 = vector.extract_strided_slice %112 {offsets = [0, 0], sizes = [16, 128], strides = [1, 1]} : vector<16x512xf32> to vector<16x128xf32>
    %114 = arith.negf %113 : vector<16x128xf32>
    %115 = math.exp %114 : vector<16x128xf32>
    %cst_61 = arith.constant 1.000000e+00 : f32
    %116 = vector.broadcast %cst_61 : f32 to vector<16x128xf32>
    %117 = arith.addf %116, %115 : vector<16x128xf32>
    %118 = arith.divf %116, %117 : vector<16x128xf32>
    %119 = vector.extract_strided_slice %112 {offsets = [0, 128], sizes = [16, 128], strides = [1, 1]} : vector<16x512xf32> to vector<16x128xf32>
    %120 = arith.negf %119 : vector<16x128xf32>
    %121 = math.exp %120 : vector<16x128xf32>
    %cst_62 = arith.constant 1.000000e+00 : f32
    %122 = vector.broadcast %cst_62 : f32 to vector<16x128xf32>
    %123 = arith.addf %122, %121 : vector<16x128xf32>
    %124 = arith.divf %122, %123 : vector<16x128xf32>
    %125 = vector.extract_strided_slice %112 {offsets = [0, 256], sizes = [16, 128], strides = [1, 1]} : vector<16x512xf32> to vector<16x128xf32>
    %126 = math.tanh %125 : vector<16x128xf32>
    %127 = vector.extract_strided_slice %112 {offsets = [0, 384], sizes = [16, 128], strides = [1, 1]} : vector<16x512xf32> to vector<16x128xf32>
    %128 = arith.negf %127 : vector<16x128xf32>
    %129 = math.exp %128 : vector<16x128xf32>
    %cst_63 = arith.constant 1.000000e+00 : f32
    %130 = vector.broadcast %cst_63 : f32 to vector<16x128xf32>
    %131 = arith.addf %130, %129 : vector<16x128xf32>
    %132 = arith.divf %130, %131 : vector<16x128xf32>
    %c0_64 = arith.constant 0 : index
    %c0_65 = arith.constant 0 : index
    %133 = vector.load %arg9[%c0_64, %c0_65] : memref<16x128xf32, #tpu.memory_space<vmem>>, vector<16x128xf32>
    %134 = arith.mulf %124, %133 : vector<16x128xf32>
    %135 = arith.mulf %118, %126 : vector<16x128xf32>
    %136 = arith.addf %134, %135 : vector<16x128xf32>
    %137 = math.tanh %136 : vector<16x128xf32>
    %138 = arith.mulf %132, %137 : vector<16x128xf32>
    %c0_66 = arith.constant 0 : index
    %c0_67 = arith.constant 0 : index
    %139 = vector.load %arg8[%c0_66, %c0_67] : memref<16x128xf32, #tpu.memory_space<vmem>>, vector<16x128xf32>
    tpu.vector_store %arg8[%c0_66, %c0_67], %138 {strides = array<i32>} : memref<16x128xf32, #tpu.memory_space<vmem>>, vector<16x128xf32>,
    %c0_68 = arith.constant 0 : index
    %c0_69 = arith.constant 0 : index
    %140 = vector.load %arg9[%c0_68, %c0_69] : memref<16x128xf32, #tpu.memory_space<vmem>>, vector<16x128xf32>
    tpu.vector_store %arg9[%c0_68, %c0_69], %136 {strides = array<i32>} : memref<16x128xf32, #tpu.memory_space<vmem>>, vector<16x128xf32>,
    %c2_i32 = arith.constant 2 : i32
    %141 = arith.addi %4, %c2_i32 : i32
    %142 = vector.broadcast %141 : i32 to vector<16x1xi32>
    %143 = arith.cmpi sgt, %3, %142 : vector<16x1xi32>
    %cst_70 = arith.constant 0.000000e+00 : f32
    %144 = vector.shape_cast %143 : vector<16x1xi1> to vector<16x1xi1>
    %145 = vector.broadcast %144 : vector<16x1xi1> to vector<16x128xi1>
    %146 = vector.broadcast %cst_70 : f32 to vector<16x128xf32>
    %147 = arith.select %145, %138, %146 : vector<16x128xi1>, vector<16x128xf32>
    %148 = arith.truncf %147 : vector<16x128xf32> to vector<16x128xbf16>
    %c0_71 = arith.constant 0 : index
    %c2_72 = arith.constant 2 : index
    %c0_73 = arith.constant 0 : index
    %149 = vector.load %arg7[%c0_71, %c2_72, %c0_73] : memref<16x16x128xbf16, #tpu.memory_space<vmem>>, vector<16x1x128xbf16>
    %150 = vector.shape_cast %149 : vector<16x1x128xbf16> to vector<16x128xbf16>
    %151 = vector.shape_cast %148 : vector<16x128xbf16> to vector<16x1x128xbf16>
    tpu.vector_store %arg7[%c0_71, %c2_72, %c0_73], %151 {strides = array<i32>} : memref<16x16x128xbf16, #tpu.memory_space<vmem>>, vector<16x1x128xbf16>,
    %c3 = arith.constant 3 : index
    %c0_74 = arith.constant 0 : index
    %c0_75 = arith.constant 0 : index
    %152 = vector.load %arg10[%c3, %c0_74, %c0_75] : memref<16x16x512xf32, #tpu.memory_space<vmem>>, vector<1x16x512xf32>
    %153 = vector.shape_cast %152 : vector<1x16x512xf32> to vector<16x512xf32>
    %c0_76 = arith.constant 0 : index
    %c0_77 = arith.constant 0 : index
    %154 = vector.load %arg8[%c0_76, %c0_77] : memref<16x128xf32, #tpu.memory_space<vmem>>, vector<16x128xf32>
    %155 = arith.truncf %154 : vector<16x128xf32> to vector<16x128xbf16>
    %c0_78 = arith.constant 0 : index
    %c0_79 = arith.constant 0 : index
    %156 = vector.load %arg5[%c0_78, %c0_79] : memref<128x512xbf16, #tpu.memory_space<vmem>>, vector<128x512xbf16>
    %cst_80 = arith.constant dense<0.000000e+00> : vector<16x512xf32>
    %157 = tpu.matmul %155, %156, %cst_80 {dimension_numbers = #tpu.dot_dimension_numbers<[1], [0], [0], [1], [0, 0, 1, 1], [], []>} : vector<16x128xbf16>, vector<128x512xbf16>, vector<16x512xf32> -> vector<16x512xf32>
    %158 = arith.addf %153, %157 : vector<16x512xf32>
    %159 = vector.extract_strided_slice %158 {offsets = [0, 0], sizes = [16, 128], strides = [1, 1]} : vector<16x512xf32> to vector<16x128xf32>
    %160 = arith.negf %159 : vector<16x128xf32>
    %161 = math.exp %160 : vector<16x128xf32>
    %cst_81 = arith.constant 1.000000e+00 : f32
    %162 = vector.broadcast %cst_81 : f32 to vector<16x128xf32>
    %163 = arith.addf %162, %161 : vector<16x128xf32>
    %164 = arith.divf %162, %163 : vector<16x128xf32>
    %165 = vector.extract_strided_slice %158 {offsets = [0, 128], sizes = [16, 128], strides = [1, 1]} : vector<16x512xf32> to vector<16x128xf32>
    %166 = arith.negf %165 : vector<16x128xf32>
    %167 = math.exp %166 : vector<16x128xf32>
    %cst_82 = arith.constant 1.000000e+00 : f32
    %168 = vector.broadcast %cst_82 : f32 to vector<16x128xf32>
    %169 = arith.addf %168, %167 : vector<16x128xf32>
    %170 = arith.divf %168, %169 : vector<16x128xf32>
    %171 = vector.extract_strided_slice %158 {offsets = [0, 256], sizes = [16, 128], strides = [1, 1]} : vector<16x512xf32> to vector<16x128xf32>
    %172 = math.tanh %171 : vector<16x128xf32>
    %173 = vector.extract_strided_slice %158 {offsets = [0, 384], sizes = [16, 128], strides = [1, 1]} : vector<16x512xf32> to vector<16x128xf32>
    %174 = arith.negf %173 : vector<16x128xf32>
    %175 = math.exp %174 : vector<16x128xf32>
    %cst_83 = arith.constant 1.000000e+00 : f32
    %176 = vector.broadcast %cst_83 : f32 to vector<16x128xf32>
    %177 = arith.addf %176, %175 : vector<16x128xf32>
    %178 = arith.divf %176, %177 : vector<16x128xf32>
    %c0_84 = arith.constant 0 : index
    %c0_85 = arith.constant 0 : index
    %179 = vector.load %arg9[%c0_84, %c0_85] : memref<16x128xf32, #tpu.memory_space<vmem>>, vector<16x128xf32>
    %180 = arith.mulf %170, %179 : vector<16x128xf32>
    %181 = arith.mulf %164, %172 : vector<16x128xf32>
    %182 = arith.addf %180, %181 : vector<16x128xf32>
    %183 = math.tanh %182 : vector<16x128xf32>
    %184 = arith.mulf %178, %183 : vector<16x128xf32>
    %c0_86 = arith.constant 0 : index
    %c0_87 = arith.constant 0 : index
    %185 = vector.load %arg8[%c0_86, %c0_87] : memref<16x128xf32, #tpu.memory_space<vmem>>, vector<16x128xf32>
    tpu.vector_store %arg8[%c0_86, %c0_87], %184 {strides = array<i32>} : memref<16x128xf32, #tpu.memory_space<vmem>>, vector<16x128xf32>,
    %c0_88 = arith.constant 0 : index
    %c0_89 = arith.constant 0 : index
    %186 = vector.load %arg9[%c0_88, %c0_89] : memref<16x128xf32, #tpu.memory_space<vmem>>, vector<16x128xf32>
    tpu.vector_store %arg9[%c0_88, %c0_89], %182 {strides = array<i32>} : memref<16x128xf32, #tpu.memory_space<vmem>>, vector<16x128xf32>,
    %c3_i32 = arith.constant 3 : i32
    %187 = arith.addi %4, %c3_i32 : i32
    %188 = vector.broadcast %187 : i32 to vector<16x1xi32>
    %189 = arith.cmpi sgt, %3, %188 : vector<16x1xi32>
    %cst_90 = arith.constant 0.000000e+00 : f32
    %190 = vector.shape_cast %189 : vector<16x1xi1> to vector<16x1xi1>
    %191 = vector.broadcast %190 : vector<16x1xi1> to vector<16x128xi1>
    %192 = vector.broadcast %cst_90 : f32 to vector<16x128xf32>
    %193 = arith.select %191, %184, %192 : vector<16x128xi1>, vector<16x128xf32>
    %194 = arith.truncf %193 : vector<16x128xf32> to vector<16x128xbf16>
    %c0_91 = arith.constant 0 : index
    %c3_92 = arith.constant 3 : index
    %c0_93 = arith.constant 0 : index
    %195 = vector.load %arg7[%c0_91, %c3_92, %c0_93] : memref<16x16x128xbf16, #tpu.memory_space<vmem>>, vector<16x1x128xbf16>
    %196 = vector.shape_cast %195 : vector<16x1x128xbf16> to vector<16x128xbf16>
    %197 = vector.shape_cast %194 : vector<16x128xbf16> to vector<16x1x128xbf16>
    tpu.vector_store %arg7[%c0_91, %c3_92, %c0_93], %197 {strides = array<i32>} : memref<16x16x128xbf16, #tpu.memory_space<vmem>>, vector<16x1x128xbf16>,
    %c4 = arith.constant 4 : index
    %c0_94 = arith.constant 0 : index
    %c0_95 = arith.constant 0 : index
    %198 = vector.load %arg10[%c4, %c0_94, %c0_95] : memref<16x16x512xf32, #tpu.memory_space<vmem>>, vector<1x16x512xf32>
    %199 = vector.shape_cast %198 : vector<1x16x512xf32> to vector<16x512xf32>
    %c0_96 = arith.constant 0 : index
    %c0_97 = arith.constant 0 : index
    %200 = vector.load %arg8[%c0_96, %c0_97] : memref<16x128xf32, #tpu.memory_space<vmem>>, vector<16x128xf32>
    %201 = arith.truncf %200 : vector<16x128xf32> to vector<16x128xbf16>
    %c0_98 = arith.constant 0 : index
    %c0_99 = arith.constant 0 : index
    %202 = vector.load %arg5[%c0_98, %c0_99] : memref<128x512xbf16, #tpu.memory_space<vmem>>, vector<128x512xbf16>
    %cst_100 = arith.constant dense<0.000000e+00> : vector<16x512xf32>
    %203 = tpu.matmul %201, %202, %cst_100 {dimension_numbers = #tpu.dot_dimension_numbers<[1], [0], [0], [1], [0, 0, 1, 1], [], []>} : vector<16x128xbf16>, vector<128x512xbf16>, vector<16x512xf32> -> vector<16x512xf32>
    %204 = arith.addf %199, %203 : vector<16x512xf32>
    %205 = vector.extract_strided_slice %204 {offsets = [0, 0], sizes = [16, 128], strides = [1, 1]} : vector<16x512xf32> to vector<16x128xf32>
    %206 = arith.negf %205 : vector<16x128xf32>
    %207 = math.exp %206 : vector<16x128xf32>
    %cst_101 = arith.constant 1.000000e+00 : f32
    %208 = vector.broadcast %cst_101 : f32 to vector<16x128xf32>
    %209 = arith.addf %208, %207 : vector<16x128xf32>
    %210 = arith.divf %208, %209 : vector<16x128xf32>
    %211 = vector.extract_strided_slice %204 {offsets = [0, 128], sizes = [16, 128], strides = [1, 1]} : vector<16x512xf32> to vector<16x128xf32>
    %212 = arith.negf %211 : vector<16x128xf32>
    %213 = math.exp %212 : vector<16x128xf32>
    %cst_102 = arith.constant 1.000000e+00 : f32
    %214 = vector.broadcast %cst_102 : f32 to vector<16x128xf32>
    %215 = arith.addf %214, %213 : vector<16x128xf32>
    %216 = arith.divf %214, %215 : vector<16x128xf32>
    %217 = vector.extract_strided_slice %204 {offsets = [0, 256], sizes = [16, 128], strides = [1, 1]} : vector<16x512xf32> to vector<16x128xf32>
    %218 = math.tanh %217 : vector<16x128xf32>
    %219 = vector.extract_strided_slice %204 {offsets = [0, 384], sizes = [16, 128], strides = [1, 1]} : vector<16x512xf32> to vector<16x128xf32>
    %220 = arith.negf %219 : vector<16x128xf32>
    %221 = math.exp %220 : vector<16x128xf32>
    %cst_103 = arith.constant 1.000000e+00 : f32
    %222 = vector.broadcast %cst_103 : f32 to vector<16x128xf32>
    %223 = arith.addf %222, %221 : vector<16x128xf32>
    %224 = arith.divf %222, %223 : vector<16x128xf32>
    %c0_104 = arith.constant 0 : index
    %c0_105 = arith.constant 0 : index
    %225 = vector.load %arg9[%c0_104, %c0_105] : memref<16x128xf32, #tpu.memory_space<vmem>>, vector<16x128xf32>
    %226 = arith.mulf %216, %225 : vector<16x128xf32>
    %227 = arith.mulf %210, %218 : vector<16x128xf32>
    %228 = arith.addf %226, %227 : vector<16x128xf32>
    %229 = math.tanh %228 : vector<16x128xf32>
    %230 = arith.mulf %224, %229 : vector<16x128xf32>
    %c0_106 = arith.constant 0 : index
    %c0_107 = arith.constant 0 : index
    %231 = vector.load %arg8[%c0_106, %c0_107] : memref<16x128xf32, #tpu.memory_space<vmem>>, vector<16x128xf32>
    tpu.vector_store %arg8[%c0_106, %c0_107], %230 {strides = array<i32>} : memref<16x128xf32, #tpu.memory_space<vmem>>, vector<16x128xf32>,
    %c0_108 = arith.constant 0 : index
    %c0_109 = arith.constant 0 : index
    %232 = vector.load %arg9[%c0_108, %c0_109] : memref<16x128xf32, #tpu.memory_space<vmem>>, vector<16x128xf32>
    tpu.vector_store %arg9[%c0_108, %c0_109], %228 {strides = array<i32>} : memref<16x128xf32, #tpu.memory_space<vmem>>, vector<16x128xf32>,
    %c4_i32 = arith.constant 4 : i32
    %233 = arith.addi %4, %c4_i32 : i32
    %234 = vector.broadcast %233 : i32 to vector<16x1xi32>
    %235 = arith.cmpi sgt, %3, %234 : vector<16x1xi32>
    %cst_110 = arith.constant 0.000000e+00 : f32
    %236 = vector.shape_cast %235 : vector<16x1xi1> to vector<16x1xi1>
    %237 = vector.broadcast %236 : vector<16x1xi1> to vector<16x128xi1>
    %238 = vector.broadcast %cst_110 : f32 to vector<16x128xf32>
    %239 = arith.select %237, %230, %238 : vector<16x128xi1>, vector<16x128xf32>
    %240 = arith.truncf %239 : vector<16x128xf32> to vector<16x128xbf16>
    %c0_111 = arith.constant 0 : index
    %c4_112 = arith.constant 4 : index
    %c0_113 = arith.constant 0 : index
    %241 = vector.load %arg7[%c0_111, %c4_112, %c0_113] : memref<16x16x128xbf16, #tpu.memory_space<vmem>>, vector<16x1x128xbf16>
    %242 = vector.shape_cast %241 : vector<16x1x128xbf16> to vector<16x128xbf16>
    %243 = vector.shape_cast %240 : vector<16x128xbf16> to vector<16x1x128xbf16>
    tpu.vector_store %arg7[%c0_111, %c4_112, %c0_113], %243 {strides = array<i32>} : memref<16x16x128xbf16, #tpu.memory_space<vmem>>, vector<16x1x128xbf16>,
    %c5 = arith.constant 5 : index
    %c0_114 = arith.constant 0 : index
    %c0_115 = arith.constant 0 : index
    %244 = vector.load %arg10[%c5, %c0_114, %c0_115] : memref<16x16x512xf32, #tpu.memory_space<vmem>>, vector<1x16x512xf32>
    %245 = vector.shape_cast %244 : vector<1x16x512xf32> to vector<16x512xf32>
    %c0_116 = arith.constant 0 : index
    %c0_117 = arith.constant 0 : index
    %246 = vector.load %arg8[%c0_116, %c0_117] : memref<16x128xf32, #tpu.memory_space<vmem>>, vector<16x128xf32>
    %247 = arith.truncf %246 : vector<16x128xf32> to vector<16x128xbf16>
    %c0_118 = arith.constant 0 : index
    %c0_119 = arith.constant 0 : index
    %248 = vector.load %arg5[%c0_118, %c0_119] : memref<128x512xbf16, #tpu.memory_space<vmem>>, vector<128x512xbf16>
    %cst_120 = arith.constant dense<0.000000e+00> : vector<16x512xf32>
    %249 = tpu.matmul %247, %248, %cst_120 {dimension_numbers = #tpu.dot_dimension_numbers<[1], [0], [0], [1], [0, 0, 1, 1], [], []>} : vector<16x128xbf16>, vector<128x512xbf16>, vector<16x512xf32> -> vector<16x512xf32>
    %250 = arith.addf %245, %249 : vector<16x512xf32>
    %251 = vector.extract_strided_slice %250 {offsets = [0, 0], sizes = [16, 128], strides = [1, 1]} : vector<16x512xf32> to vector<16x128xf32>
    %252 = arith.negf %251 : vector<16x128xf32>
    %253 = math.exp %252 : vector<16x128xf32>
    %cst_121 = arith.constant 1.000000e+00 : f32
    %254 = vector.broadcast %cst_121 : f32 to vector<16x128xf32>
    %255 = arith.addf %254, %253 : vector<16x128xf32>
    %256 = arith.divf %254, %255 : vector<16x128xf32>
    %257 = vector.extract_strided_slice %250 {offsets = [0, 128], sizes = [16, 128], strides = [1, 1]} : vector<16x512xf32> to vector<16x128xf32>
    %258 = arith.negf %257 : vector<16x128xf32>
    %259 = math.exp %258 : vector<16x128xf32>
    %cst_122 = arith.constant 1.000000e+00 : f32
    %260 = vector.broadcast %cst_122 : f32 to vector<16x128xf32>
    %261 = arith.addf %260, %259 : vector<16x128xf32>
    %262 = arith.divf %260, %261 : vector<16x128xf32>
    %263 = vector.extract_strided_slice %250 {offsets = [0, 256], sizes = [16, 128], strides = [1, 1]} : vector<16x512xf32> to vector<16x128xf32>
    %264 = math.tanh %263 : vector<16x128xf32>
    %265 = vector.extract_strided_slice %250 {offsets = [0, 384], sizes = [16, 128], strides = [1, 1]} : vector<16x512xf32> to vector<16x128xf32>
    %266 = arith.negf %265 : vector<16x128xf32>
    %267 = math.exp %266 : vector<16x128xf32>
    %cst_123 = arith.constant 1.000000e+00 : f32
    %268 = vector.broadcast %cst_123 : f32 to vector<16x128xf32>
    %269 = arith.addf %268, %267 : vector<16x128xf32>
    %270 = arith.divf %268, %269 : vector<16x128xf32>
    %c0_124 = arith.constant 0 : index
    %c0_125 = arith.constant 0 : index
    %271 = vector.load %arg9[%c0_124, %c0_125] : memref<16x128xf32, #tpu.memory_space<vmem>>, vector<16x128xf32>
    %272 = arith.mulf %262, %271 : vector<16x128xf32>
    %273 = arith.mulf %256, %264 : vector<16x128xf32>
    %274 = arith.addf %272, %273 : vector<16x128xf32>
    %275 = math.tanh %274 : vector<16x128xf32>
    %276 = arith.mulf %270, %275 : vector<16x128xf32>
    %c0_126 = arith.constant 0 : index
    %c0_127 = arith.constant 0 : index
    %277 = vector.load %arg8[%c0_126, %c0_127] : memref<16x128xf32, #tpu.memory_space<vmem>>, vector<16x128xf32>
    tpu.vector_store %arg8[%c0_126, %c0_127], %276 {strides = array<i32>} : memref<16x128xf32, #tpu.memory_space<vmem>>, vector<16x128xf32>,
    %c0_128 = arith.constant 0 : index
    %c0_129 = arith.constant 0 : index
    %278 = vector.load %arg9[%c0_128, %c0_129] : memref<16x128xf32, #tpu.memory_space<vmem>>, vector<16x128xf32>
    tpu.vector_store %arg9[%c0_128, %c0_129], %274 {strides = array<i32>} : memref<16x128xf32, #tpu.memory_space<vmem>>, vector<16x128xf32>,
    %c5_i32 = arith.constant 5 : i32
    %279 = arith.addi %4, %c5_i32 : i32
    %280 = vector.broadcast %279 : i32 to vector<16x1xi32>
    %281 = arith.cmpi sgt, %3, %280 : vector<16x1xi32>
    %cst_130 = arith.constant 0.000000e+00 : f32
    %282 = vector.shape_cast %281 : vector<16x1xi1> to vector<16x1xi1>
    %283 = vector.broadcast %282 : vector<16x1xi1> to vector<16x128xi1>
    %284 = vector.broadcast %cst_130 : f32 to vector<16x128xf32>
    %285 = arith.select %283, %276, %284 : vector<16x128xi1>, vector<16x128xf32>
    %286 = arith.truncf %285 : vector<16x128xf32> to vector<16x128xbf16>
    %c0_131 = arith.constant 0 : index
    %c5_132 = arith.constant 5 : index
    %c0_133 = arith.constant 0 : index
    %287 = vector.load %arg7[%c0_131, %c5_132, %c0_133] : memref<16x16x128xbf16, #tpu.memory_space<vmem>>, vector<16x1x128xbf16>
    %288 = vector.shape_cast %287 : vector<16x1x128xbf16> to vector<16x128xbf16>
    %289 = vector.shape_cast %286 : vector<16x128xbf16> to vector<16x1x128xbf16>
    tpu.vector_store %arg7[%c0_131, %c5_132, %c0_133], %289 {strides = array<i32>} : memref<16x16x128xbf16, #tpu.memory_space<vmem>>, vector<16x1x128xbf16>,
    %c6 = arith.constant 6 : index
    %c0_134 = arith.constant 0 : index
    %c0_135 = arith.constant 0 : index
    %290 = vector.load %arg10[%c6, %c0_134, %c0_135] : memref<16x16x512xf32, #tpu.memory_space<vmem>>, vector<1x16x512xf32>
    %291 = vector.shape_cast %290 : vector<1x16x512xf32> to vector<16x512xf32>
    %c0_136 = arith.constant 0 : index
    %c0_137 = arith.constant 0 : index
    %292 = vector.load %arg8[%c0_136, %c0_137] : memref<16x128xf32, #tpu.memory_space<vmem>>, vector<16x128xf32>
    %293 = arith.truncf %292 : vector<16x128xf32> to vector<16x128xbf16>
    %c0_138 = arith.constant 0 : index
    %c0_139 = arith.constant 0 : index
    %294 = vector.load %arg5[%c0_138, %c0_139] : memref<128x512xbf16, #tpu.memory_space<vmem>>, vector<128x512xbf16>
    %cst_140 = arith.constant dense<0.000000e+00> : vector<16x512xf32>
    %295 = tpu.matmul %293, %294, %cst_140 {dimension_numbers = #tpu.dot_dimension_numbers<[1], [0], [0], [1], [0, 0, 1, 1], [], []>} : vector<16x128xbf16>, vector<128x512xbf16>, vector<16x512xf32> -> vector<16x512xf32>
    %296 = arith.addf %291, %295 : vector<16x512xf32>
    %297 = vector.extract_strided_slice %296 {offsets = [0, 0], sizes = [16, 128], strides = [1, 1]} : vector<16x512xf32> to vector<16x128xf32>
    %298 = arith.negf %297 : vector<16x128xf32>
    %299 = math.exp %298 : vector<16x128xf32>
    %cst_141 = arith.constant 1.000000e+00 : f32
    %300 = vector.broadcast %cst_141 : f32 to vector<16x128xf32>
    %301 = arith.addf %300, %299 : vector<16x128xf32>
    %302 = arith.divf %300, %301 : vector<16x128xf32>
    %303 = vector.extract_strided_slice %296 {offsets = [0, 128], sizes = [16, 128], strides = [1, 1]} : vector<16x512xf32> to vector<16x128xf32>
    %304 = arith.negf %303 : vector<16x128xf32>
    %305 = math.exp %304 : vector<16x128xf32>
    %cst_142 = arith.constant 1.000000e+00 : f32
    %306 = vector.broadcast %cst_142 : f32 to vector<16x128xf32>
    %307 = arith.addf %306, %305 : vector<16x128xf32>
    %308 = arith.divf %306, %307 : vector<16x128xf32>
    %309 = vector.extract_strided_slice %296 {offsets = [0, 256], sizes = [16, 128], strides = [1, 1]} : vector<16x512xf32> to vector<16x128xf32>
    %310 = math.tanh %309 : vector<16x128xf32>
    %311 = vector.extract_strided_slice %296 {offsets = [0, 384], sizes = [16, 128], strides = [1, 1]} : vector<16x512xf32> to vector<16x128xf32>
    %312 = arith.negf %311 : vector<16x128xf32>
    %313 = math.exp %312 : vector<16x128xf32>
    %cst_143 = arith.constant 1.000000e+00 : f32
    %314 = vector.broadcast %cst_143 : f32 to vector<16x128xf32>
    %315 = arith.addf %314, %313 : vector<16x128xf32>
    %316 = arith.divf %314, %315 : vector<16x128xf32>
    %c0_144 = arith.constant 0 : index
    %c0_145 = arith.constant 0 : index
    %317 = vector.load %arg9[%c0_144, %c0_145] : memref<16x128xf32, #tpu.memory_space<vmem>>, vector<16x128xf32>
    %318 = arith.mulf %308, %317 : vector<16x128xf32>
    %319 = arith.mulf %302, %310 : vector<16x128xf32>
    %320 = arith.addf %318, %319 : vector<16x128xf32>
    %321 = math.tanh %320 : vector<16x128xf32>
    %322 = arith.mulf %316, %321 : vector<16x128xf32>
    %c0_146 = arith.constant 0 : index
    %c0_147 = arith.constant 0 : index
    %323 = vector.load %arg8[%c0_146, %c0_147] : memref<16x128xf32, #tpu.memory_space<vmem>>, vector<16x128xf32>
    tpu.vector_store %arg8[%c0_146, %c0_147], %322 {strides = array<i32>} : memref<16x128xf32, #tpu.memory_space<vmem>>, vector<16x128xf32>,
    %c0_148 = arith.constant 0 : index
    %c0_149 = arith.constant 0 : index
    %324 = vector.load %arg9[%c0_148, %c0_149] : memref<16x128xf32, #tpu.memory_space<vmem>>, vector<16x128xf32>
    tpu.vector_store %arg9[%c0_148, %c0_149], %320 {strides = array<i32>} : memref<16x128xf32, #tpu.memory_space<vmem>>, vector<16x128xf32>,
    %c6_i32 = arith.constant 6 : i32
    %325 = arith.addi %4, %c6_i32 : i32
    %326 = vector.broadcast %325 : i32 to vector<16x1xi32>
    %327 = arith.cmpi sgt, %3, %326 : vector<16x1xi32>
    %cst_150 = arith.constant 0.000000e+00 : f32
    %328 = vector.shape_cast %327 : vector<16x1xi1> to vector<16x1xi1>
    %329 = vector.broadcast %328 : vector<16x1xi1> to vector<16x128xi1>
    %330 = vector.broadcast %cst_150 : f32 to vector<16x128xf32>
    %331 = arith.select %329, %322, %330 : vector<16x128xi1>, vector<16x128xf32>
    %332 = arith.truncf %331 : vector<16x128xf32> to vector<16x128xbf16>
    %c0_151 = arith.constant 0 : index
    %c6_152 = arith.constant 6 : index
    %c0_153 = arith.constant 0 : index
    %333 = vector.load %arg7[%c0_151, %c6_152, %c0_153] : memref<16x16x128xbf16, #tpu.memory_space<vmem>>, vector<16x1x128xbf16>
    %334 = vector.shape_cast %333 : vector<16x1x128xbf16> to vector<16x128xbf16>
    %335 = vector.shape_cast %332 : vector<16x128xbf16> to vector<16x1x128xbf16>
    tpu.vector_store %arg7[%c0_151, %c6_152, %c0_153], %335 {strides = array<i32>} : memref<16x16x128xbf16, #tpu.memory_space<vmem>>, vector<16x1x128xbf16>,
    %c7 = arith.constant 7 : index
    %c0_154 = arith.constant 0 : index
    %c0_155 = arith.constant 0 : index
    %336 = vector.load %arg10[%c7, %c0_154, %c0_155] : memref<16x16x512xf32, #tpu.memory_space<vmem>>, vector<1x16x512xf32>
    %337 = vector.shape_cast %336 : vector<1x16x512xf32> to vector<16x512xf32>
    %c0_156 = arith.constant 0 : index
    %c0_157 = arith.constant 0 : index
    %338 = vector.load %arg8[%c0_156, %c0_157] : memref<16x128xf32, #tpu.memory_space<vmem>>, vector<16x128xf32>
    %339 = arith.truncf %338 : vector<16x128xf32> to vector<16x128xbf16>
    %c0_158 = arith.constant 0 : index
    %c0_159 = arith.constant 0 : index
    %340 = vector.load %arg5[%c0_158, %c0_159] : memref<128x512xbf16, #tpu.memory_space<vmem>>, vector<128x512xbf16>
    %cst_160 = arith.constant dense<0.000000e+00> : vector<16x512xf32>
    %341 = tpu.matmul %339, %340, %cst_160 {dimension_numbers = #tpu.dot_dimension_numbers<[1], [0], [0], [1], [0, 0, 1, 1], [], []>} : vector<16x128xbf16>, vector<128x512xbf16>, vector<16x512xf32> -> vector<16x512xf32>
    %342 = arith.addf %337, %341 : vector<16x512xf32>
    %343 = vector.extract_strided_slice %342 {offsets = [0, 0], sizes = [16, 128], strides = [1, 1]} : vector<16x512xf32> to vector<16x128xf32>
    %344 = arith.negf %343 : vector<16x128xf32>
    %345 = math.exp %344 : vector<16x128xf32>
    %cst_161 = arith.constant 1.000000e+00 : f32
    %346 = vector.broadcast %cst_161 : f32 to vector<16x128xf32>
    %347 = arith.addf %346, %345 : vector<16x128xf32>
    %348 = arith.divf %346, %347 : vector<16x128xf32>
    %349 = vector.extract_strided_slice %342 {offsets = [0, 128], sizes = [16, 128], strides = [1, 1]} : vector<16x512xf32> to vector<16x128xf32>
    %350 = arith.negf %349 : vector<16x128xf32>
    %351 = math.exp %350 : vector<16x128xf32>
    %cst_162 = arith.constant 1.000000e+00 : f32
    %352 = vector.broadcast %cst_162 : f32 to vector<16x128xf32>
    %353 = arith.addf %352, %351 : vector<16x128xf32>
    %354 = arith.divf %352, %353 : vector<16x128xf32>
    %355 = vector.extract_strided_slice %342 {offsets = [0, 256], sizes = [16, 128], strides = [1, 1]} : vector<16x512xf32> to vector<16x128xf32>
    %356 = math.tanh %355 : vector<16x128xf32>
    %357 = vector.extract_strided_slice %342 {offsets = [0, 384], sizes = [16, 128], strides = [1, 1]} : vector<16x512xf32> to vector<16x128xf32>
    %358 = arith.negf %357 : vector<16x128xf32>
    %359 = math.exp %358 : vector<16x128xf32>
    %cst_163 = arith.constant 1.000000e+00 : f32
    %360 = vector.broadcast %cst_163 : f32 to vector<16x128xf32>
    %361 = arith.addf %360, %359 : vector<16x128xf32>
    %362 = arith.divf %360, %361 : vector<16x128xf32>
    %c0_164 = arith.constant 0 : index
    %c0_165 = arith.constant 0 : index
    %363 = vector.load %arg9[%c0_164, %c0_165] : memref<16x128xf32, #tpu.memory_space<vmem>>, vector<16x128xf32>
    %364 = arith.mulf %354, %363 : vector<16x128xf32>
    %365 = arith.mulf %348, %356 : vector<16x128xf32>
    %366 = arith.addf %364, %365 : vector<16x128xf32>
    %367 = math.tanh %366 : vector<16x128xf32>
    %368 = arith.mulf %362, %367 : vector<16x128xf32>
    %c0_166 = arith.constant 0 : index
    %c0_167 = arith.constant 0 : index
    %369 = vector.load %arg8[%c0_166, %c0_167] : memref<16x128xf32, #tpu.memory_space<vmem>>, vector<16x128xf32>
    tpu.vector_store %arg8[%c0_166, %c0_167], %368 {strides = array<i32>} : memref<16x128xf32, #tpu.memory_space<vmem>>, vector<16x128xf32>,
    %c0_168 = arith.constant 0 : index
    %c0_169 = arith.constant 0 : index
    %370 = vector.load %arg9[%c0_168, %c0_169] : memref<16x128xf32, #tpu.memory_space<vmem>>, vector<16x128xf32>
    tpu.vector_store %arg9[%c0_168, %c0_169], %366 {strides = array<i32>} : memref<16x128xf32, #tpu.memory_space<vmem>>, vector<16x128xf32>,
    %c7_i32 = arith.constant 7 : i32
    %371 = arith.addi %4, %c7_i32 : i32
    %372 = vector.broadcast %371 : i32 to vector<16x1xi32>
    %373 = arith.cmpi sgt, %3, %372 : vector<16x1xi32>
    %cst_170 = arith.constant 0.000000e+00 : f32
    %374 = vector.shape_cast %373 : vector<16x1xi1> to vector<16x1xi1>
    %375 = vector.broadcast %374 : vector<16x1xi1> to vector<16x128xi1>
    %376 = vector.broadcast %cst_170 : f32 to vector<16x128xf32>
    %377 = arith.select %375, %368, %376 : vector<16x128xi1>, vector<16x128xf32>
    %378 = arith.truncf %377 : vector<16x128xf32> to vector<16x128xbf16>
    %c0_171 = arith.constant 0 : index
    %c7_172 = arith.constant 7 : index
    %c0_173 = arith.constant 0 : index
    %379 = vector.load %arg7[%c0_171, %c7_172, %c0_173] : memref<16x16x128xbf16, #tpu.memory_space<vmem>>, vector<16x1x128xbf16>
    %380 = vector.shape_cast %379 : vector<16x1x128xbf16> to vector<16x128xbf16>
    %381 = vector.shape_cast %378 : vector<16x128xbf16> to vector<16x1x128xbf16>
    tpu.vector_store %arg7[%c0_171, %c7_172, %c0_173], %381 {strides = array<i32>} : memref<16x16x128xbf16, #tpu.memory_space<vmem>>, vector<16x1x128xbf16>,
    %c8 = arith.constant 8 : index
    %c0_174 = arith.constant 0 : index
    %c0_175 = arith.constant 0 : index
    %382 = vector.load %arg10[%c8, %c0_174, %c0_175] : memref<16x16x512xf32, #tpu.memory_space<vmem>>, vector<1x16x512xf32>
    %383 = vector.shape_cast %382 : vector<1x16x512xf32> to vector<16x512xf32>
    %c0_176 = arith.constant 0 : index
    %c0_177 = arith.constant 0 : index
    %384 = vector.load %arg8[%c0_176, %c0_177] : memref<16x128xf32, #tpu.memory_space<vmem>>, vector<16x128xf32>
    %385 = arith.truncf %384 : vector<16x128xf32> to vector<16x128xbf16>
    %c0_178 = arith.constant 0 : index
    %c0_179 = arith.constant 0 : index
    %386 = vector.load %arg5[%c0_178, %c0_179] : memref<128x512xbf16, #tpu.memory_space<vmem>>, vector<128x512xbf16>
    %cst_180 = arith.constant dense<0.000000e+00> : vector<16x512xf32>
    %387 = tpu.matmul %385, %386, %cst_180 {dimension_numbers = #tpu.dot_dimension_numbers<[1], [0], [0], [1], [0, 0, 1, 1], [], []>} : vector<16x128xbf16>, vector<128x512xbf16>, vector<16x512xf32> -> vector<16x512xf32>
    %388 = arith.addf %383, %387 : vector<16x512xf32>
    %389 = vector.extract_strided_slice %388 {offsets = [0, 0], sizes = [16, 128], strides = [1, 1]} : vector<16x512xf32> to vector<16x128xf32>
    %390 = arith.negf %389 : vector<16x128xf32>
    %391 = math.exp %390 : vector<16x128xf32>
    %cst_181 = arith.constant 1.000000e+00 : f32
    %392 = vector.broadcast %cst_181 : f32 to vector<16x128xf32>
    %393 = arith.addf %392, %391 : vector<16x128xf32>
    %394 = arith.divf %392, %393 : vector<16x128xf32>
    %395 = vector.extract_strided_slice %388 {offsets = [0, 128], sizes = [16, 128], strides = [1, 1]} : vector<16x512xf32> to vector<16x128xf32>
    %396 = arith.negf %395 : vector<16x128xf32>
    %397 = math.exp %396 : vector<16x128xf32>
    %cst_182 = arith.constant 1.000000e+00 : f32
    %398 = vector.broadcast %cst_182 : f32 to vector<16x128xf32>
    %399 = arith.addf %398, %397 : vector<16x128xf32>
    %400 = arith.divf %398, %399 : vector<16x128xf32>
    %401 = vector.extract_strided_slice %388 {offsets = [0, 256], sizes = [16, 128], strides = [1, 1]} : vector<16x512xf32> to vector<16x128xf32>
    %402 = math.tanh %401 : vector<16x128xf32>
    %403 = vector.extract_strided_slice %388 {offsets = [0, 384], sizes = [16, 128], strides = [1, 1]} : vector<16x512xf32> to vector<16x128xf32>
    %404 = arith.negf %403 : vector<16x128xf32>
    %405 = math.exp %404 : vector<16x128xf32>
    %cst_183 = arith.constant 1.000000e+00 : f32
    %406 = vector.broadcast %cst_183 : f32 to vector<16x128xf32>
    %407 = arith.addf %406, %405 : vector<16x128xf32>
    %408 = arith.divf %406, %407 : vector<16x128xf32>
    %c0_184 = arith.constant 0 : index
    %c0_185 = arith.constant 0 : index
    %409 = vector.load %arg9[%c0_184, %c0_185] : memref<16x128xf32, #tpu.memory_space<vmem>>, vector<16x128xf32>
    %410 = arith.mulf %400, %409 : vector<16x128xf32>
    %411 = arith.mulf %394, %402 : vector<16x128xf32>
    %412 = arith.addf %410, %411 : vector<16x128xf32>
    %413 = math.tanh %412 : vector<16x128xf32>
    %414 = arith.mulf %408, %413 : vector<16x128xf32>
    %c0_186 = arith.constant 0 : index
    %c0_187 = arith.constant 0 : index
    %415 = vector.load %arg8[%c0_186, %c0_187] : memref<16x128xf32, #tpu.memory_space<vmem>>, vector<16x128xf32>
    tpu.vector_store %arg8[%c0_186, %c0_187], %414 {strides = array<i32>} : memref<16x128xf32, #tpu.memory_space<vmem>>, vector<16x128xf32>,
    %c0_188 = arith.constant 0 : index
    %c0_189 = arith.constant 0 : index
    %416 = vector.load %arg9[%c0_188, %c0_189] : memref<16x128xf32, #tpu.memory_space<vmem>>, vector<16x128xf32>
    tpu.vector_store %arg9[%c0_188, %c0_189], %412 {strides = array<i32>} : memref<16x128xf32, #tpu.memory_space<vmem>>, vector<16x128xf32>,
    %c8_i32 = arith.constant 8 : i32
    %417 = arith.addi %4, %c8_i32 : i32
    %418 = vector.broadcast %417 : i32 to vector<16x1xi32>
    %419 = arith.cmpi sgt, %3, %418 : vector<16x1xi32>
    %cst_190 = arith.constant 0.000000e+00 : f32
    %420 = vector.shape_cast %419 : vector<16x1xi1> to vector<16x1xi1>
    %421 = vector.broadcast %420 : vector<16x1xi1> to vector<16x128xi1>
    %422 = vector.broadcast %cst_190 : f32 to vector<16x128xf32>
    %423 = arith.select %421, %414, %422 : vector<16x128xi1>, vector<16x128xf32>
    %424 = arith.truncf %423 : vector<16x128xf32> to vector<16x128xbf16>
    %c0_191 = arith.constant 0 : index
    %c8_192 = arith.constant 8 : index
    %c0_193 = arith.constant 0 : index
    %425 = vector.load %arg7[%c0_191, %c8_192, %c0_193] : memref<16x16x128xbf16, #tpu.memory_space<vmem>>, vector<16x1x128xbf16>
    %426 = vector.shape_cast %425 : vector<16x1x128xbf16> to vector<16x128xbf16>
    %427 = vector.shape_cast %424 : vector<16x128xbf16> to vector<16x1x128xbf16>
    tpu.vector_store %arg7[%c0_191, %c8_192, %c0_193], %427 {strides = array<i32>} : memref<16x16x128xbf16, #tpu.memory_space<vmem>>, vector<16x1x128xbf16>,
    %c9 = arith.constant 9 : index
    %c0_194 = arith.constant 0 : index
    %c0_195 = arith.constant 0 : index
    %428 = vector.load %arg10[%c9, %c0_194, %c0_195] : memref<16x16x512xf32, #tpu.memory_space<vmem>>, vector<1x16x512xf32>
    %429 = vector.shape_cast %428 : vector<1x16x512xf32> to vector<16x512xf32>
    %c0_196 = arith.constant 0 : index
    %c0_197 = arith.constant 0 : index
    %430 = vector.load %arg8[%c0_196, %c0_197] : memref<16x128xf32, #tpu.memory_space<vmem>>, vector<16x128xf32>
    %431 = arith.truncf %430 : vector<16x128xf32> to vector<16x128xbf16>
    %c0_198 = arith.constant 0 : index
    %c0_199 = arith.constant 0 : index
    %432 = vector.load %arg5[%c0_198, %c0_199] : memref<128x512xbf16, #tpu.memory_space<vmem>>, vector<128x512xbf16>
    %cst_200 = arith.constant dense<0.000000e+00> : vector<16x512xf32>
    %433 = tpu.matmul %431, %432, %cst_200 {dimension_numbers = #tpu.dot_dimension_numbers<[1], [0], [0], [1], [0, 0, 1, 1], [], []>} : vector<16x128xbf16>, vector<128x512xbf16>, vector<16x512xf32> -> vector<16x512xf32>
    %434 = arith.addf %429, %433 : vector<16x512xf32>
    %435 = vector.extract_strided_slice %434 {offsets = [0, 0], sizes = [16, 128], strides = [1, 1]} : vector<16x512xf32> to vector<16x128xf32>
    %436 = arith.negf %435 : vector<16x128xf32>
    %437 = math.exp %436 : vector<16x128xf32>
    %cst_201 = arith.constant 1.000000e+00 : f32
    %438 = vector.broadcast %cst_201 : f32 to vector<16x128xf32>
    %439 = arith.addf %438, %437 : vector<16x128xf32>
    %440 = arith.divf %438, %439 : vector<16x128xf32>
    %441 = vector.extract_strided_slice %434 {offsets = [0, 128], sizes = [16, 128], strides = [1, 1]} : vector<16x512xf32> to vector<16x128xf32>
    %442 = arith.negf %441 : vector<16x128xf32>
    %443 = math.exp %442 : vector<16x128xf32>
    %cst_202 = arith.constant 1.000000e+00 : f32
    %444 = vector.broadcast %cst_202 : f32 to vector<16x128xf32>
    %445 = arith.addf %444, %443 : vector<16x128xf32>
    %446 = arith.divf %444, %445 : vector<16x128xf32>
    %447 = vector.extract_strided_slice %434 {offsets = [0, 256], sizes = [16, 128], strides = [1, 1]} : vector<16x512xf32> to vector<16x128xf32>
    %448 = math.tanh %447 : vector<16x128xf32>
    %449 = vector.extract_strided_slice %434 {offsets = [0, 384], sizes = [16, 128], strides = [1, 1]} : vector<16x512xf32> to vector<16x128xf32>
    %450 = arith.negf %449 : vector<16x128xf32>
    %451 = math.exp %450 : vector<16x128xf32>
    %cst_203 = arith.constant 1.000000e+00 : f32
    %452 = vector.broadcast %cst_203 : f32 to vector<16x128xf32>
    %453 = arith.addf %452, %451 : vector<16x128xf32>
    %454 = arith.divf %452, %453 : vector<16x128xf32>
    %c0_204 = arith.constant 0 : index
    %c0_205 = arith.constant 0 : index
    %455 = vector.load %arg9[%c0_204, %c0_205] : memref<16x128xf32, #tpu.memory_space<vmem>>, vector<16x128xf32>
    %456 = arith.mulf %446, %455 : vector<16x128xf32>
    %457 = arith.mulf %440, %448 : vector<16x128xf32>
    %458 = arith.addf %456, %457 : vector<16x128xf32>
    %459 = math.tanh %458 : vector<16x128xf32>
    %460 = arith.mulf %454, %459 : vector<16x128xf32>
    %c0_206 = arith.constant 0 : index
    %c0_207 = arith.constant 0 : index
    %461 = vector.load %arg8[%c0_206, %c0_207] : memref<16x128xf32, #tpu.memory_space<vmem>>, vector<16x128xf32>
    tpu.vector_store %arg8[%c0_206, %c0_207], %460 {strides = array<i32>} : memref<16x128xf32, #tpu.memory_space<vmem>>, vector<16x128xf32>,
    %c0_208 = arith.constant 0 : index
    %c0_209 = arith.constant 0 : index
    %462 = vector.load %arg9[%c0_208, %c0_209] : memref<16x128xf32, #tpu.memory_space<vmem>>, vector<16x128xf32>
    tpu.vector_store %arg9[%c0_208, %c0_209], %458 {strides = array<i32>} : memref<16x128xf32, #tpu.memory_space<vmem>>, vector<16x128xf32>,
    %c9_i32 = arith.constant 9 : i32
    %463 = arith.addi %4, %c9_i32 : i32
    %464 = vector.broadcast %463 : i32 to vector<16x1xi32>
    %465 = arith.cmpi sgt, %3, %464 : vector<16x1xi32>
    %cst_210 = arith.constant 0.000000e+00 : f32
    %466 = vector.shape_cast %465 : vector<16x1xi1> to vector<16x1xi1>
    %467 = vector.broadcast %466 : vector<16x1xi1> to vector<16x128xi1>
    %468 = vector.broadcast %cst_210 : f32 to vector<16x128xf32>
    %469 = arith.select %467, %460, %468 : vector<16x128xi1>, vector<16x128xf32>
    %470 = arith.truncf %469 : vector<16x128xf32> to vector<16x128xbf16>
    %c0_211 = arith.constant 0 : index
    %c9_212 = arith.constant 9 : index
    %c0_213 = arith.constant 0 : index
    %471 = vector.load %arg7[%c0_211, %c9_212, %c0_213] : memref<16x16x128xbf16, #tpu.memory_space<vmem>>, vector<16x1x128xbf16>
    %472 = vector.shape_cast %471 : vector<16x1x128xbf16> to vector<16x128xbf16>
    %473 = vector.shape_cast %470 : vector<16x128xbf16> to vector<16x1x128xbf16>
    tpu.vector_store %arg7[%c0_211, %c9_212, %c0_213], %473 {strides = array<i32>} : memref<16x16x128xbf16, #tpu.memory_space<vmem>>, vector<16x1x128xbf16>,
    %c10 = arith.constant 10 : index
    %c0_214 = arith.constant 0 : index
    %c0_215 = arith.constant 0 : index
    %474 = vector.load %arg10[%c10, %c0_214, %c0_215] : memref<16x16x512xf32, #tpu.memory_space<vmem>>, vector<1x16x512xf32>
    %475 = vector.shape_cast %474 : vector<1x16x512xf32> to vector<16x512xf32>
    %c0_216 = arith.constant 0 : index
    %c0_217 = arith.constant 0 : index
    %476 = vector.load %arg8[%c0_216, %c0_217] : memref<16x128xf32, #tpu.memory_space<vmem>>, vector<16x128xf32>
    %477 = arith.truncf %476 : vector<16x128xf32> to vector<16x128xbf16>
    %c0_218 = arith.constant 0 : index
    %c0_219 = arith.constant 0 : index
    %478 = vector.load %arg5[%c0_218, %c0_219] : memref<128x512xbf16, #tpu.memory_space<vmem>>, vector<128x512xbf16>
    %cst_220 = arith.constant dense<0.000000e+00> : vector<16x512xf32>
    %479 = tpu.matmul %477, %478, %cst_220 {dimension_numbers = #tpu.dot_dimension_numbers<[1], [0], [0], [1], [0, 0, 1, 1], [], []>} : vector<16x128xbf16>, vector<128x512xbf16>, vector<16x512xf32> -> vector<16x512xf32>
    %480 = arith.addf %475, %479 : vector<16x512xf32>
    %481 = vector.extract_strided_slice %480 {offsets = [0, 0], sizes = [16, 128], strides = [1, 1]} : vector<16x512xf32> to vector<16x128xf32>
    %482 = arith.negf %481 : vector<16x128xf32>
    %483 = math.exp %482 : vector<16x128xf32>
    %cst_221 = arith.constant 1.000000e+00 : f32
    %484 = vector.broadcast %cst_221 : f32 to vector<16x128xf32>
    %485 = arith.addf %484, %483 : vector<16x128xf32>
    %486 = arith.divf %484, %485 : vector<16x128xf32>
    %487 = vector.extract_strided_slice %480 {offsets = [0, 128], sizes = [16, 128], strides = [1, 1]} : vector<16x512xf32> to vector<16x128xf32>
    %488 = arith.negf %487 : vector<16x128xf32>
    %489 = math.exp %488 : vector<16x128xf32>
    %cst_222 = arith.constant 1.000000e+00 : f32
    %490 = vector.broadcast %cst_222 : f32 to vector<16x128xf32>
    %491 = arith.addf %490, %489 : vector<16x128xf32>
    %492 = arith.divf %490, %491 : vector<16x128xf32>
    %493 = vector.extract_strided_slice %480 {offsets = [0, 256], sizes = [16, 128], strides = [1, 1]} : vector<16x512xf32> to vector<16x128xf32>
    %494 = math.tanh %493 : vector<16x128xf32>
    %495 = vector.extract_strided_slice %480 {offsets = [0, 384], sizes = [16, 128], strides = [1, 1]} : vector<16x512xf32> to vector<16x128xf32>
    %496 = arith.negf %495 : vector<16x128xf32>
    %497 = math.exp %496 : vector<16x128xf32>
    %cst_223 = arith.constant 1.000000e+00 : f32
    %498 = vector.broadcast %cst_223 : f32 to vector<16x128xf32>
    %499 = arith.addf %498, %497 : vector<16x128xf32>
    %500 = arith.divf %498, %499 : vector<16x128xf32>
    %c0_224 = arith.constant 0 : index
    %c0_225 = arith.constant 0 : index
    %501 = vector.load %arg9[%c0_224, %c0_225] : memref<16x128xf32, #tpu.memory_space<vmem>>, vector<16x128xf32>
    %502 = arith.mulf %492, %501 : vector<16x128xf32>
    %503 = arith.mulf %486, %494 : vector<16x128xf32>
    %504 = arith.addf %502, %503 : vector<16x128xf32>
    %505 = math.tanh %504 : vector<16x128xf32>
    %506 = arith.mulf %500, %505 : vector<16x128xf32>
    %c0_226 = arith.constant 0 : index
    %c0_227 = arith.constant 0 : index
    %507 = vector.load %arg8[%c0_226, %c0_227] : memref<16x128xf32, #tpu.memory_space<vmem>>, vector<16x128xf32>
    tpu.vector_store %arg8[%c0_226, %c0_227], %506 {strides = array<i32>} : memref<16x128xf32, #tpu.memory_space<vmem>>, vector<16x128xf32>,
    %c0_228 = arith.constant 0 : index
    %c0_229 = arith.constant 0 : index
    %508 = vector.load %arg9[%c0_228, %c0_229] : memref<16x128xf32, #tpu.memory_space<vmem>>, vector<16x128xf32>
    tpu.vector_store %arg9[%c0_228, %c0_229], %504 {strides = array<i32>} : memref<16x128xf32, #tpu.memory_space<vmem>>, vector<16x128xf32>,
    %c10_i32 = arith.constant 10 : i32
    %509 = arith.addi %4, %c10_i32 : i32
    %510 = vector.broadcast %509 : i32 to vector<16x1xi32>
    %511 = arith.cmpi sgt, %3, %510 : vector<16x1xi32>
    %cst_230 = arith.constant 0.000000e+00 : f32
    %512 = vector.shape_cast %511 : vector<16x1xi1> to vector<16x1xi1>
    %513 = vector.broadcast %512 : vector<16x1xi1> to vector<16x128xi1>
    %514 = vector.broadcast %cst_230 : f32 to vector<16x128xf32>
    %515 = arith.select %513, %506, %514 : vector<16x128xi1>, vector<16x128xf32>
    %516 = arith.truncf %515 : vector<16x128xf32> to vector<16x128xbf16>
    %c0_231 = arith.constant 0 : index
    %c10_232 = arith.constant 10 : index
    %c0_233 = arith.constant 0 : index
    %517 = vector.load %arg7[%c0_231, %c10_232, %c0_233] : memref<16x16x128xbf16, #tpu.memory_space<vmem>>, vector<16x1x128xbf16>
    %518 = vector.shape_cast %517 : vector<16x1x128xbf16> to vector<16x128xbf16>
    %519 = vector.shape_cast %516 : vector<16x128xbf16> to vector<16x1x128xbf16>
    tpu.vector_store %arg7[%c0_231, %c10_232, %c0_233], %519 {strides = array<i32>} : memref<16x16x128xbf16, #tpu.memory_space<vmem>>, vector<16x1x128xbf16>,
    %c11 = arith.constant 11 : index
    %c0_234 = arith.constant 0 : index
    %c0_235 = arith.constant 0 : index
    %520 = vector.load %arg10[%c11, %c0_234, %c0_235] : memref<16x16x512xf32, #tpu.memory_space<vmem>>, vector<1x16x512xf32>
    %521 = vector.shape_cast %520 : vector<1x16x512xf32> to vector<16x512xf32>
    %c0_236 = arith.constant 0 : index
    %c0_237 = arith.constant 0 : index
    %522 = vector.load %arg8[%c0_236, %c0_237] : memref<16x128xf32, #tpu.memory_space<vmem>>, vector<16x128xf32>
    %523 = arith.truncf %522 : vector<16x128xf32> to vector<16x128xbf16>
    %c0_238 = arith.constant 0 : index
    %c0_239 = arith.constant 0 : index
    %524 = vector.load %arg5[%c0_238, %c0_239] : memref<128x512xbf16, #tpu.memory_space<vmem>>, vector<128x512xbf16>
    %cst_240 = arith.constant dense<0.000000e+00> : vector<16x512xf32>
    %525 = tpu.matmul %523, %524, %cst_240 {dimension_numbers = #tpu.dot_dimension_numbers<[1], [0], [0], [1], [0, 0, 1, 1], [], []>} : vector<16x128xbf16>, vector<128x512xbf16>, vector<16x512xf32> -> vector<16x512xf32>
    %526 = arith.addf %521, %525 : vector<16x512xf32>
    %527 = vector.extract_strided_slice %526 {offsets = [0, 0], sizes = [16, 128], strides = [1, 1]} : vector<16x512xf32> to vector<16x128xf32>
    %528 = arith.negf %527 : vector<16x128xf32>
    %529 = math.exp %528 : vector<16x128xf32>
    %cst_241 = arith.constant 1.000000e+00 : f32
    %530 = vector.broadcast %cst_241 : f32 to vector<16x128xf32>
    %531 = arith.addf %530, %529 : vector<16x128xf32>
    %532 = arith.divf %530, %531 : vector<16x128xf32>
    %533 = vector.extract_strided_slice %526 {offsets = [0, 128], sizes = [16, 128], strides = [1, 1]} : vector<16x512xf32> to vector<16x128xf32>
    %534 = arith.negf %533 : vector<16x128xf32>
    %535 = math.exp %534 : vector<16x128xf32>
    %cst_242 = arith.constant 1.000000e+00 : f32
    %536 = vector.broadcast %cst_242 : f32 to vector<16x128xf32>
    %537 = arith.addf %536, %535 : vector<16x128xf32>
    %538 = arith.divf %536, %537 : vector<16x128xf32>
    %539 = vector.extract_strided_slice %526 {offsets = [0, 256], sizes = [16, 128], strides = [1, 1]} : vector<16x512xf32> to vector<16x128xf32>
    %540 = math.tanh %539 : vector<16x128xf32>
    %541 = vector.extract_strided_slice %526 {offsets = [0, 384], sizes = [16, 128], strides = [1, 1]} : vector<16x512xf32> to vector<16x128xf32>
    %542 = arith.negf %541 : vector<16x128xf32>
    %543 = math.exp %542 : vector<16x128xf32>
    %cst_243 = arith.constant 1.000000e+00 : f32
    %544 = vector.broadcast %cst_243 : f32 to vector<16x128xf32>
    %545 = arith.addf %544, %543 : vector<16x128xf32>
    %546 = arith.divf %544, %545 : vector<16x128xf32>
    %c0_244 = arith.constant 0 : index
    %c0_245 = arith.constant 0 : index
    %547 = vector.load %arg9[%c0_244, %c0_245] : memref<16x128xf32, #tpu.memory_space<vmem>>, vector<16x128xf32>
    %548 = arith.mulf %538, %547 : vector<16x128xf32>
    %549 = arith.mulf %532, %540 : vector<16x128xf32>
    %550 = arith.addf %548, %549 : vector<16x128xf32>
    %551 = math.tanh %550 : vector<16x128xf32>
    %552 = arith.mulf %546, %551 : vector<16x128xf32>
    %c0_246 = arith.constant 0 : index
    %c0_247 = arith.constant 0 : index
    %553 = vector.load %arg8[%c0_246, %c0_247] : memref<16x128xf32, #tpu.memory_space<vmem>>, vector<16x128xf32>
    tpu.vector_store %arg8[%c0_246, %c0_247], %552 {strides = array<i32>} : memref<16x128xf32, #tpu.memory_space<vmem>>, vector<16x128xf32>,
    %c0_248 = arith.constant 0 : index
    %c0_249 = arith.constant 0 : index
    %554 = vector.load %arg9[%c0_248, %c0_249] : memref<16x128xf32, #tpu.memory_space<vmem>>, vector<16x128xf32>
    tpu.vector_store %arg9[%c0_248, %c0_249], %550 {strides = array<i32>} : memref<16x128xf32, #tpu.memory_space<vmem>>, vector<16x128xf32>,
    %c11_i32 = arith.constant 11 : i32
    %555 = arith.addi %4, %c11_i32 : i32
    %556 = vector.broadcast %555 : i32 to vector<16x1xi32>
    %557 = arith.cmpi sgt, %3, %556 : vector<16x1xi32>
    %cst_250 = arith.constant 0.000000e+00 : f32
    %558 = vector.shape_cast %557 : vector<16x1xi1> to vector<16x1xi1>
    %559 = vector.broadcast %558 : vector<16x1xi1> to vector<16x128xi1>
    %560 = vector.broadcast %cst_250 : f32 to vector<16x128xf32>
    %561 = arith.select %559, %552, %560 : vector<16x128xi1>, vector<16x128xf32>
    %562 = arith.truncf %561 : vector<16x128xf32> to vector<16x128xbf16>
    %c0_251 = arith.constant 0 : index
    %c11_252 = arith.constant 11 : index
    %c0_253 = arith.constant 0 : index
    %563 = vector.load %arg7[%c0_251, %c11_252, %c0_253] : memref<16x16x128xbf16, #tpu.memory_space<vmem>>, vector<16x1x128xbf16>
    %564 = vector.shape_cast %563 : vector<16x1x128xbf16> to vector<16x128xbf16>
    %565 = vector.shape_cast %562 : vector<16x128xbf16> to vector<16x1x128xbf16>
    tpu.vector_store %arg7[%c0_251, %c11_252, %c0_253], %565 {strides = array<i32>} : memref<16x16x128xbf16, #tpu.memory_space<vmem>>, vector<16x1x128xbf16>,
    %c12 = arith.constant 12 : index
    %c0_254 = arith.constant 0 : index
    %c0_255 = arith.constant 0 : index
    %566 = vector.load %arg10[%c12, %c0_254, %c0_255] : memref<16x16x512xf32, #tpu.memory_space<vmem>>, vector<1x16x512xf32>
    %567 = vector.shape_cast %566 : vector<1x16x512xf32> to vector<16x512xf32>
    %c0_256 = arith.constant 0 : index
    %c0_257 = arith.constant 0 : index
    %568 = vector.load %arg8[%c0_256, %c0_257] : memref<16x128xf32, #tpu.memory_space<vmem>>, vector<16x128xf32>
    %569 = arith.truncf %568 : vector<16x128xf32> to vector<16x128xbf16>
    %c0_258 = arith.constant 0 : index
    %c0_259 = arith.constant 0 : index
    %570 = vector.load %arg5[%c0_258, %c0_259] : memref<128x512xbf16, #tpu.memory_space<vmem>>, vector<128x512xbf16>
    %cst_260 = arith.constant dense<0.000000e+00> : vector<16x512xf32>
    %571 = tpu.matmul %569, %570, %cst_260 {dimension_numbers = #tpu.dot_dimension_numbers<[1], [0], [0], [1], [0, 0, 1, 1], [], []>} : vector<16x128xbf16>, vector<128x512xbf16>, vector<16x512xf32> -> vector<16x512xf32>
    %572 = arith.addf %567, %571 : vector<16x512xf32>
    %573 = vector.extract_strided_slice %572 {offsets = [0, 0], sizes = [16, 128], strides = [1, 1]} : vector<16x512xf32> to vector<16x128xf32>
    %574 = arith.negf %573 : vector<16x128xf32>
    %575 = math.exp %574 : vector<16x128xf32>
    %cst_261 = arith.constant 1.000000e+00 : f32
    %576 = vector.broadcast %cst_261 : f32 to vector<16x128xf32>
    %577 = arith.addf %576, %575 : vector<16x128xf32>
    %578 = arith.divf %576, %577 : vector<16x128xf32>
    %579 = vector.extract_strided_slice %572 {offsets = [0, 128], sizes = [16, 128], strides = [1, 1]} : vector<16x512xf32> to vector<16x128xf32>
    %580 = arith.negf %579 : vector<16x128xf32>
    %581 = math.exp %580 : vector<16x128xf32>
    %cst_262 = arith.constant 1.000000e+00 : f32
    %582 = vector.broadcast %cst_262 : f32 to vector<16x128xf32>
    %583 = arith.addf %582, %581 : vector<16x128xf32>
    %584 = arith.divf %582, %583 : vector<16x128xf32>
    %585 = vector.extract_strided_slice %572 {offsets = [0, 256], sizes = [16, 128], strides = [1, 1]} : vector<16x512xf32> to vector<16x128xf32>
    %586 = math.tanh %585 : vector<16x128xf32>
    %587 = vector.extract_strided_slice %572 {offsets = [0, 384], sizes = [16, 128], strides = [1, 1]} : vector<16x512xf32> to vector<16x128xf32>
    %588 = arith.negf %587 : vector<16x128xf32>
    %589 = math.exp %588 : vector<16x128xf32>
    %cst_263 = arith.constant 1.000000e+00 : f32
    %590 = vector.broadcast %cst_263 : f32 to vector<16x128xf32>
    %591 = arith.addf %590, %589 : vector<16x128xf32>
    %592 = arith.divf %590, %591 : vector<16x128xf32>
    %c0_264 = arith.constant 0 : index
    %c0_265 = arith.constant 0 : index
    %593 = vector.load %arg9[%c0_264, %c0_265] : memref<16x128xf32, #tpu.memory_space<vmem>>, vector<16x128xf32>
    %594 = arith.mulf %584, %593 : vector<16x128xf32>
    %595 = arith.mulf %578, %586 : vector<16x128xf32>
    %596 = arith.addf %594, %595 : vector<16x128xf32>
    %597 = math.tanh %596 : vector<16x128xf32>
    %598 = arith.mulf %592, %597 : vector<16x128xf32>
    %c0_266 = arith.constant 0 : index
    %c0_267 = arith.constant 0 : index
    %599 = vector.load %arg8[%c0_266, %c0_267] : memref<16x128xf32, #tpu.memory_space<vmem>>, vector<16x128xf32>
    tpu.vector_store %arg8[%c0_266, %c0_267], %598 {strides = array<i32>} : memref<16x128xf32, #tpu.memory_space<vmem>>, vector<16x128xf32>,
    %c0_268 = arith.constant 0 : index
    %c0_269 = arith.constant 0 : index
    %600 = vector.load %arg9[%c0_268, %c0_269] : memref<16x128xf32, #tpu.memory_space<vmem>>, vector<16x128xf32>
    tpu.vector_store %arg9[%c0_268, %c0_269], %596 {strides = array<i32>} : memref<16x128xf32, #tpu.memory_space<vmem>>, vector<16x128xf32>,
    %c12_i32 = arith.constant 12 : i32
    %601 = arith.addi %4, %c12_i32 : i32
    %602 = vector.broadcast %601 : i32 to vector<16x1xi32>
    %603 = arith.cmpi sgt, %3, %602 : vector<16x1xi32>
    %cst_270 = arith.constant 0.000000e+00 : f32
    %604 = vector.shape_cast %603 : vector<16x1xi1> to vector<16x1xi1>
    %605 = vector.broadcast %604 : vector<16x1xi1> to vector<16x128xi1>
    %606 = vector.broadcast %cst_270 : f32 to vector<16x128xf32>
    %607 = arith.select %605, %598, %606 : vector<16x128xi1>, vector<16x128xf32>
    %608 = arith.truncf %607 : vector<16x128xf32> to vector<16x128xbf16>
    %c0_271 = arith.constant 0 : index
    %c12_272 = arith.constant 12 : index
    %c0_273 = arith.constant 0 : index
    %609 = vector.load %arg7[%c0_271, %c12_272, %c0_273] : memref<16x16x128xbf16, #tpu.memory_space<vmem>>, vector<16x1x128xbf16>
    %610 = vector.shape_cast %609 : vector<16x1x128xbf16> to vector<16x128xbf16>
    %611 = vector.shape_cast %608 : vector<16x128xbf16> to vector<16x1x128xbf16>
    tpu.vector_store %arg7[%c0_271, %c12_272, %c0_273], %611 {strides = array<i32>} : memref<16x16x128xbf16, #tpu.memory_space<vmem>>, vector<16x1x128xbf16>,
    %c13 = arith.constant 13 : index
    %c0_274 = arith.constant 0 : index
    %c0_275 = arith.constant 0 : index
    %612 = vector.load %arg10[%c13, %c0_274, %c0_275] : memref<16x16x512xf32, #tpu.memory_space<vmem>>, vector<1x16x512xf32>
    %613 = vector.shape_cast %612 : vector<1x16x512xf32> to vector<16x512xf32>
    %c0_276 = arith.constant 0 : index
    %c0_277 = arith.constant 0 : index
    %614 = vector.load %arg8[%c0_276, %c0_277] : memref<16x128xf32, #tpu.memory_space<vmem>>, vector<16x128xf32>
    %615 = arith.truncf %614 : vector<16x128xf32> to vector<16x128xbf16>
    %c0_278 = arith.constant 0 : index
    %c0_279 = arith.constant 0 : index
    %616 = vector.load %arg5[%c0_278, %c0_279] : memref<128x512xbf16, #tpu.memory_space<vmem>>, vector<128x512xbf16>
    %cst_280 = arith.constant dense<0.000000e+00> : vector<16x512xf32>
    %617 = tpu.matmul %615, %616, %cst_280 {dimension_numbers = #tpu.dot_dimension_numbers<[1], [0], [0], [1], [0, 0, 1, 1], [], []>} : vector<16x128xbf16>, vector<128x512xbf16>, vector<16x512xf32> -> vector<16x512xf32>
    %618 = arith.addf %613, %617 : vector<16x512xf32>
    %619 = vector.extract_strided_slice %618 {offsets = [0, 0], sizes = [16, 128], strides = [1, 1]} : vector<16x512xf32> to vector<16x128xf32>
    %620 = arith.negf %619 : vector<16x128xf32>
    %621 = math.exp %620 : vector<16x128xf32>
    %cst_281 = arith.constant 1.000000e+00 : f32
    %622 = vector.broadcast %cst_281 : f32 to vector<16x128xf32>
    %623 = arith.addf %622, %621 : vector<16x128xf32>
    %624 = arith.divf %622, %623 : vector<16x128xf32>
    %625 = vector.extract_strided_slice %618 {offsets = [0, 128], sizes = [16, 128], strides = [1, 1]} : vector<16x512xf32> to vector<16x128xf32>
    %626 = arith.negf %625 : vector<16x128xf32>
    %627 = math.exp %626 : vector<16x128xf32>
    %cst_282 = arith.constant 1.000000e+00 : f32
    %628 = vector.broadcast %cst_282 : f32 to vector<16x128xf32>
    %629 = arith.addf %628, %627 : vector<16x128xf32>
    %630 = arith.divf %628, %629 : vector<16x128xf32>
    %631 = vector.extract_strided_slice %618 {offsets = [0, 256], sizes = [16, 128], strides = [1, 1]} : vector<16x512xf32> to vector<16x128xf32>
    %632 = math.tanh %631 : vector<16x128xf32>
    %633 = vector.extract_strided_slice %618 {offsets = [0, 384], sizes = [16, 128], strides = [1, 1]} : vector<16x512xf32> to vector<16x128xf32>
    %634 = arith.negf %633 : vector<16x128xf32>
    %635 = math.exp %634 : vector<16x128xf32>
    %cst_283 = arith.constant 1.000000e+00 : f32
    %636 = vector.broadcast %cst_283 : f32 to vector<16x128xf32>
    %637 = arith.addf %636, %635 : vector<16x128xf32>
    %638 = arith.divf %636, %637 : vector<16x128xf32>
    %c0_284 = arith.constant 0 : index
    %c0_285 = arith.constant 0 : index
    %639 = vector.load %arg9[%c0_284, %c0_285] : memref<16x128xf32, #tpu.memory_space<vmem>>, vector<16x128xf32>
    %640 = arith.mulf %630, %639 : vector<16x128xf32>
    %641 = arith.mulf %624, %632 : vector<16x128xf32>
    %642 = arith.addf %640, %641 : vector<16x128xf32>
    %643 = math.tanh %642 : vector<16x128xf32>
    %644 = arith.mulf %638, %643 : vector<16x128xf32>
    %c0_286 = arith.constant 0 : index
    %c0_287 = arith.constant 0 : index
    %645 = vector.load %arg8[%c0_286, %c0_287] : memref<16x128xf32, #tpu.memory_space<vmem>>, vector<16x128xf32>
    tpu.vector_store %arg8[%c0_286, %c0_287], %644 {strides = array<i32>} : memref<16x128xf32, #tpu.memory_space<vmem>>, vector<16x128xf32>,
    %c0_288 = arith.constant 0 : index
    %c0_289 = arith.constant 0 : index
    %646 = vector.load %arg9[%c0_288, %c0_289] : memref<16x128xf32, #tpu.memory_space<vmem>>, vector<16x128xf32>
    tpu.vector_store %arg9[%c0_288, %c0_289], %642 {strides = array<i32>} : memref<16x128xf32, #tpu.memory_space<vmem>>, vector<16x128xf32>,
    %c13_i32 = arith.constant 13 : i32
    %647 = arith.addi %4, %c13_i32 : i32
    %648 = vector.broadcast %647 : i32 to vector<16x1xi32>
    %649 = arith.cmpi sgt, %3, %648 : vector<16x1xi32>
    %cst_290 = arith.constant 0.000000e+00 : f32
    %650 = vector.shape_cast %649 : vector<16x1xi1> to vector<16x1xi1>
    %651 = vector.broadcast %650 : vector<16x1xi1> to vector<16x128xi1>
    %652 = vector.broadcast %cst_290 : f32 to vector<16x128xf32>
    %653 = arith.select %651, %644, %652 : vector<16x128xi1>, vector<16x128xf32>
    %654 = arith.truncf %653 : vector<16x128xf32> to vector<16x128xbf16>
    %c0_291 = arith.constant 0 : index
    %c13_292 = arith.constant 13 : index
    %c0_293 = arith.constant 0 : index
    %655 = vector.load %arg7[%c0_291, %c13_292, %c0_293] : memref<16x16x128xbf16, #tpu.memory_space<vmem>>, vector<16x1x128xbf16>
    %656 = vector.shape_cast %655 : vector<16x1x128xbf16> to vector<16x128xbf16>
    %657 = vector.shape_cast %654 : vector<16x128xbf16> to vector<16x1x128xbf16>
    tpu.vector_store %arg7[%c0_291, %c13_292, %c0_293], %657 {strides = array<i32>} : memref<16x16x128xbf16, #tpu.memory_space<vmem>>, vector<16x1x128xbf16>,
    %c14 = arith.constant 14 : index
    %c0_294 = arith.constant 0 : index
    %c0_295 = arith.constant 0 : index
    %658 = vector.load %arg10[%c14, %c0_294, %c0_295] : memref<16x16x512xf32, #tpu.memory_space<vmem>>, vector<1x16x512xf32>
    %659 = vector.shape_cast %658 : vector<1x16x512xf32> to vector<16x512xf32>
    %c0_296 = arith.constant 0 : index
    %c0_297 = arith.constant 0 : index
    %660 = vector.load %arg8[%c0_296, %c0_297] : memref<16x128xf32, #tpu.memory_space<vmem>>, vector<16x128xf32>
    %661 = arith.truncf %660 : vector<16x128xf32> to vector<16x128xbf16>
    %c0_298 = arith.constant 0 : index
    %c0_299 = arith.constant 0 : index
    %662 = vector.load %arg5[%c0_298, %c0_299] : memref<128x512xbf16, #tpu.memory_space<vmem>>, vector<128x512xbf16>
    %cst_300 = arith.constant dense<0.000000e+00> : vector<16x512xf32>
    %663 = tpu.matmul %661, %662, %cst_300 {dimension_numbers = #tpu.dot_dimension_numbers<[1], [0], [0], [1], [0, 0, 1, 1], [], []>} : vector<16x128xbf16>, vector<128x512xbf16>, vector<16x512xf32> -> vector<16x512xf32>
    %664 = arith.addf %659, %663 : vector<16x512xf32>
    %665 = vector.extract_strided_slice %664 {offsets = [0, 0], sizes = [16, 128], strides = [1, 1]} : vector<16x512xf32> to vector<16x128xf32>
    %666 = arith.negf %665 : vector<16x128xf32>
    %667 = math.exp %666 : vector<16x128xf32>
    %cst_301 = arith.constant 1.000000e+00 : f32
    %668 = vector.broadcast %cst_301 : f32 to vector<16x128xf32>
    %669 = arith.addf %668, %667 : vector<16x128xf32>
    %670 = arith.divf %668, %669 : vector<16x128xf32>
    %671 = vector.extract_strided_slice %664 {offsets = [0, 128], sizes = [16, 128], strides = [1, 1]} : vector<16x512xf32> to vector<16x128xf32>
    %672 = arith.negf %671 : vector<16x128xf32>
    %673 = math.exp %672 : vector<16x128xf32>
    %cst_302 = arith.constant 1.000000e+00 : f32
    %674 = vector.broadcast %cst_302 : f32 to vector<16x128xf32>
    %675 = arith.addf %674, %673 : vector<16x128xf32>
    %676 = arith.divf %674, %675 : vector<16x128xf32>
    %677 = vector.extract_strided_slice %664 {offsets = [0, 256], sizes = [16, 128], strides = [1, 1]} : vector<16x512xf32> to vector<16x128xf32>
    %678 = math.tanh %677 : vector<16x128xf32>
    %679 = vector.extract_strided_slice %664 {offsets = [0, 384], sizes = [16, 128], strides = [1, 1]} : vector<16x512xf32> to vector<16x128xf32>
    %680 = arith.negf %679 : vector<16x128xf32>
    %681 = math.exp %680 : vector<16x128xf32>
    %cst_303 = arith.constant 1.000000e+00 : f32
    %682 = vector.broadcast %cst_303 : f32 to vector<16x128xf32>
    %683 = arith.addf %682, %681 : vector<16x128xf32>
    %684 = arith.divf %682, %683 : vector<16x128xf32>
    %c0_304 = arith.constant 0 : index
    %c0_305 = arith.constant 0 : index
    %685 = vector.load %arg9[%c0_304, %c0_305] : memref<16x128xf32, #tpu.memory_space<vmem>>, vector<16x128xf32>
    %686 = arith.mulf %676, %685 : vector<16x128xf32>
    %687 = arith.mulf %670, %678 : vector<16x128xf32>
    %688 = arith.addf %686, %687 : vector<16x128xf32>
    %689 = math.tanh %688 : vector<16x128xf32>
    %690 = arith.mulf %684, %689 : vector<16x128xf32>
    %c0_306 = arith.constant 0 : index
    %c0_307 = arith.constant 0 : index
    %691 = vector.load %arg8[%c0_306, %c0_307] : memref<16x128xf32, #tpu.memory_space<vmem>>, vector<16x128xf32>
    tpu.vector_store %arg8[%c0_306, %c0_307], %690 {strides = array<i32>} : memref<16x128xf32, #tpu.memory_space<vmem>>, vector<16x128xf32>,
    %c0_308 = arith.constant 0 : index
    %c0_309 = arith.constant 0 : index
    %692 = vector.load %arg9[%c0_308, %c0_309] : memref<16x128xf32, #tpu.memory_space<vmem>>, vector<16x128xf32>
    tpu.vector_store %arg9[%c0_308, %c0_309], %688 {strides = array<i32>} : memref<16x128xf32, #tpu.memory_space<vmem>>, vector<16x128xf32>,
    %c14_i32 = arith.constant 14 : i32
    %693 = arith.addi %4, %c14_i32 : i32
    %694 = vector.broadcast %693 : i32 to vector<16x1xi32>
    %695 = arith.cmpi sgt, %3, %694 : vector<16x1xi32>
    %cst_310 = arith.constant 0.000000e+00 : f32
    %696 = vector.shape_cast %695 : vector<16x1xi1> to vector<16x1xi1>
    %697 = vector.broadcast %696 : vector<16x1xi1> to vector<16x128xi1>
    %698 = vector.broadcast %cst_310 : f32 to vector<16x128xf32>
    %699 = arith.select %697, %690, %698 : vector<16x128xi1>, vector<16x128xf32>
    %700 = arith.truncf %699 : vector<16x128xf32> to vector<16x128xbf16>
    %c0_311 = arith.constant 0 : index
    %c14_312 = arith.constant 14 : index
    %c0_313 = arith.constant 0 : index
    %701 = vector.load %arg7[%c0_311, %c14_312, %c0_313] : memref<16x16x128xbf16, #tpu.memory_space<vmem>>, vector<16x1x128xbf16>
    %702 = vector.shape_cast %701 : vector<16x1x128xbf16> to vector<16x128xbf16>
    %703 = vector.shape_cast %700 : vector<16x128xbf16> to vector<16x1x128xbf16>
    tpu.vector_store %arg7[%c0_311, %c14_312, %c0_313], %703 {strides = array<i32>} : memref<16x16x128xbf16, #tpu.memory_space<vmem>>, vector<16x1x128xbf16>,
    %c15 = arith.constant 15 : index
    %c0_314 = arith.constant 0 : index
    %c0_315 = arith.constant 0 : index
    %704 = vector.load %arg10[%c15, %c0_314, %c0_315] : memref<16x16x512xf32, #tpu.memory_space<vmem>>, vector<1x16x512xf32>
    %705 = vector.shape_cast %704 : vector<1x16x512xf32> to vector<16x512xf32>
    %c0_316 = arith.constant 0 : index
    %c0_317 = arith.constant 0 : index
    %706 = vector.load %arg8[%c0_316, %c0_317] : memref<16x128xf32, #tpu.memory_space<vmem>>, vector<16x128xf32>
    %707 = arith.truncf %706 : vector<16x128xf32> to vector<16x128xbf16>
    %c0_318 = arith.constant 0 : index
    %c0_319 = arith.constant 0 : index
    %708 = vector.load %arg5[%c0_318, %c0_319] : memref<128x512xbf16, #tpu.memory_space<vmem>>, vector<128x512xbf16>
    %cst_320 = arith.constant dense<0.000000e+00> : vector<16x512xf32>
    %709 = tpu.matmul %707, %708, %cst_320 {dimension_numbers = #tpu.dot_dimension_numbers<[1], [0], [0], [1], [0, 0, 1, 1], [], []>} : vector<16x128xbf16>, vector<128x512xbf16>, vector<16x512xf32> -> vector<16x512xf32>
    %710 = arith.addf %705, %709 : vector<16x512xf32>
    %711 = vector.extract_strided_slice %710 {offsets = [0, 0], sizes = [16, 128], strides = [1, 1]} : vector<16x512xf32> to vector<16x128xf32>
    %712 = arith.negf %711 : vector<16x128xf32>
    %713 = math.exp %712 : vector<16x128xf32>
    %cst_321 = arith.constant 1.000000e+00 : f32
    %714 = vector.broadcast %cst_321 : f32 to vector<16x128xf32>
    %715 = arith.addf %714, %713 : vector<16x128xf32>
    %716 = arith.divf %714, %715 : vector<16x128xf32>
    %717 = vector.extract_strided_slice %710 {offsets = [0, 128], sizes = [16, 128], strides = [1, 1]} : vector<16x512xf32> to vector<16x128xf32>
    %718 = arith.negf %717 : vector<16x128xf32>
    %719 = math.exp %718 : vector<16x128xf32>
    %cst_322 = arith.constant 1.000000e+00 : f32
    %720 = vector.broadcast %cst_322 : f32 to vector<16x128xf32>
    %721 = arith.addf %720, %719 : vector<16x128xf32>
    %722 = arith.divf %720, %721 : vector<16x128xf32>
    %723 = vector.extract_strided_slice %710 {offsets = [0, 256], sizes = [16, 128], strides = [1, 1]} : vector<16x512xf32> to vector<16x128xf32>
    %724 = math.tanh %723 : vector<16x128xf32>
    %725 = vector.extract_strided_slice %710 {offsets = [0, 384], sizes = [16, 128], strides = [1, 1]} : vector<16x512xf32> to vector<16x128xf32>
    %726 = arith.negf %725 : vector<16x128xf32>
    %727 = math.exp %726 : vector<16x128xf32>
    %cst_323 = arith.constant 1.000000e+00 : f32
    %728 = vector.broadcast %cst_323 : f32 to vector<16x128xf32>
    %729 = arith.addf %728, %727 : vector<16x128xf32>
    %730 = arith.divf %728, %729 : vector<16x128xf32>
    %c0_324 = arith.constant 0 : index
    %c0_325 = arith.constant 0 : index
    %731 = vector.load %arg9[%c0_324, %c0_325] : memref<16x128xf32, #tpu.memory_space<vmem>>, vector<16x128xf32>
    %732 = arith.mulf %722, %731 : vector<16x128xf32>
    %733 = arith.mulf %716, %724 : vector<16x128xf32>
    %734 = arith.addf %732, %733 : vector<16x128xf32>
    %735 = math.tanh %734 : vector<16x128xf32>
    %736 = arith.mulf %730, %735 : vector<16x128xf32>
    %c0_326 = arith.constant 0 : index
    %c0_327 = arith.constant 0 : index
    %737 = vector.load %arg8[%c0_326, %c0_327] : memref<16x128xf32, #tpu.memory_space<vmem>>, vector<16x128xf32>
    tpu.vector_store %arg8[%c0_326, %c0_327], %736 {strides = array<i32>} : memref<16x128xf32, #tpu.memory_space<vmem>>, vector<16x128xf32>,
    %c0_328 = arith.constant 0 : index
    %c0_329 = arith.constant 0 : index
    %738 = vector.load %arg9[%c0_328, %c0_329] : memref<16x128xf32, #tpu.memory_space<vmem>>, vector<16x128xf32>
    tpu.vector_store %arg9[%c0_328, %c0_329], %734 {strides = array<i32>} : memref<16x128xf32, #tpu.memory_space<vmem>>, vector<16x128xf32>,
    %c15_i32 = arith.constant 15 : i32
    %739 = arith.addi %4, %c15_i32 : i32
    %740 = vector.broadcast %739 : i32 to vector<16x1xi32>
    %741 = arith.cmpi sgt, %3, %740 : vector<16x1xi32>
    %cst_330 = arith.constant 0.000000e+00 : f32
    %742 = vector.shape_cast %741 : vector<16x1xi1> to vector<16x1xi1>
    %743 = vector.broadcast %742 : vector<16x1xi1> to vector<16x128xi1>
    %744 = vector.broadcast %cst_330 : f32 to vector<16x128xf32>
    %745 = arith.select %743, %736, %744 : vector<16x128xi1>, vector<16x128xf32>
    %746 = arith.truncf %745 : vector<16x128xf32> to vector<16x128xbf16>
    %c0_331 = arith.constant 0 : index
    %c15_332 = arith.constant 15 : index
    %c0_333 = arith.constant 0 : index
    %747 = vector.load %arg7[%c0_331, %c15_332, %c0_333] : memref<16x16x128xbf16, #tpu.memory_space<vmem>>, vector<16x1x128xbf16>
    %748 = vector.shape_cast %747 : vector<16x1x128xbf16> to vector<16x128xbf16>
    %749 = vector.shape_cast %746 : vector<16x128xbf16> to vector<16x1x128xbf16>
    tpu.vector_store %arg7[%c0_331, %c15_332, %c0_333], %749 {strides = array<i32>} : memref<16x16x128xbf16, #tpu.memory_space<vmem>>, vector<16x1x128xbf16>,
    return
  }
  func.func @transform_0(%arg0: i32, %arg1: i32) -> (i32, i32) {
    %c0_i32 = arith.constant 0 : i32
    %c0_i32_0 = arith.constant 0 : i32
    return %arg0, %c0_i32 : i32, i32
  }
  func.func @transform_1(%arg0: i32, %arg1: i32) -> (i32, i32, i32) {
    %c0_i32 = arith.constant 0 : i32
    %c0_i32_0 = arith.constant 0 : i32
    return %arg1, %arg0, %c0_i32 : i32, i32, i32
  }
  func.func @transform_2(%arg0: i32, %arg1: i32) -> (i32, i32) {
    %c0_i32 = arith.constant 0 : i32
    %c0_i32_0 = arith.constant 0 : i32
    %c0_i32_1 = arith.constant 0 : i32
    return %c0_i32, %c0_i32_0 : i32, i32
  }
  func.func @transform_3(%arg0: i32, %arg1: i32) -> (i32, i32) {
    %c0_i32 = arith.constant 0 : i32
    %c0_i32_0 = arith.constant 0 : i32
    %c0_i32_1 = arith.constant 0 : i32
    return %c0_i32, %c0_i32_0 : i32, i32
  }
  func.func @transform_4(%arg0: i32, %arg1: i32) -> (i32, i32) {
    %c0_i32 = arith.constant 0 : i32
    %c0_i32_0 = arith.constant 0 : i32
    %c0_i32_1 = arith.constant 0 : i32
    return %c0_i32, %c0_i32_0 : i32, i32
  }
  func.func @transform_5(%arg0: i32, %arg1: i32) -> (i32, i32, i32) {
    %c0_i32 = arith.constant 0 : i32
    %c0_i32_0 = arith.constant 0 : i32
    return %arg0, %arg1, %c0_i32 : i32, i32, i32
  }
}

</mosaic_0001>

<bundles_post_ra>
// kernel: tpu_custom_call.1
= control target key start
LH: loop header
LB: loop body
LE: loop exit
PB: predicated region body
PF: predicated region fallthrough
CT: control target
= control target key end

     0   :  { %s17054_s0 = inlined_call_operand.hbm [shape: s32[16,1], index: 0, kind: input, shape index: {}]   ;;  %s17055_s1 = inlined_call_operand.hbm [shape: bf16[32,16,128], index: 1, kind: input, shape index: {}]   ;;  %s17056_s2 = inlined_call_operand.hbm [shape: bf16[128,512], index: 2, kind: input, shape index: {}]   ;;  %s17057_s3 = inlined_call_operand.hbm [shape: bf16[128,512], index: 3, kind: input, shape index: {}]   ;;  %s17058_s4 = inlined_call_operand.hbm [shape: f32[1,512], index: 4, kind: input, shape index: {}]   ;;  %s17059_s5 = inlined_call_operand.hbm [shape: bf16[16,32,128], index: 5, kind: output, shape index: {}]  }
   0x1   :  { %17094 = sst [smem:[#allocation41_spill]] %s17056_s2 }
   0x2   :  { %10 = vsyncpa [#allocation6], 0 }
   0x3   :  { %11 = vsyncpa [#allocation9], 0 }
   0x4   :  { %13 = vsyncpa [#allocation9 + $0x1], 0 }
   0x5   :  { %14 = vsyncpa [#allocation12], 0 }
   0x6   :  { %15 = vsyncpa [#allocation7], 0 }
   0x7   :  { %17 = vsyncpa [#allocation7 + $0x1], 0  ;;  %s13877_s18 = smov 0   ;;  %s13879_s19 = smov 0  }
   0x8   :  { %s13881_s20 = smov 0   ;;  %s13883_s21 = smov 0  }
   0x9   :  { %s13885_s22 = smov 0   ;;  %s13887_s23 = smov 0  }
   0xa LB: > { %s13908_s24 = sadd.s32 4294967295, %s13823_s23   ;;  %s11425_s25 = sadd.s32 4294967294, %s13823_s23   ;;  %s13823_s23 = sphi %s13887_s23, %s23_s23   ;;  %s13819_s22 = sphi %s13885_s22, %s17184_s22   ;;  %s13815_s21 = sphi %s13883_s21, %s17183_s21   ;;  %s13811_s20 = sphi %s13881_s20, %s17182_s20   ;;  %s13807_s19 = sphi %s13879_s19, %s17181_s19   ;;  %s13803_s18 = sphi %s13877_s18, %s17180_s18  }
   0xb   : > { %p83_p0 = scmp.ne.s32.totalorder %s13807_s19, %s13803_s18  ;;  %p17060_p1 = scmp.eq.s32.totalorder %s13908_s24, 0 }
   0xc   : > { %p178_p3 = scmp.eq.s32.totalorder %s11425_s25, 1  ;;  %p11426_p5 = scmp.ge.s32.totalorder %s13823_s23, 1 }
   0xd   : > { %p13917_p4 = por %p17060_p1, %p83_p0  ;;  %p185_p7 = scmp.lt.s32.totalorder %s13823_s23, 3 }
   0xe   : > { %p13922_p6 = por %p178_p3, %p83_p0  ;;  %s13825_s29 = smov [#allocation10]  }
   0xf   : > { %s17095_s26 = scalar_select %p13917_p4, 1, 0 }
  0x10   : > { %s17096_s27 = scalar_select %p13922_p6, 1, 0 }
  0x11   : > { %p13927_p8 = pnand %p11426_p5, %p185_p7  ;;  %s213_s30 = sshll.u32 %s13825_s29, 4  ;;  %s13931_s30 = int_to_ptr.vmem [resolvable:$true] %s213_s30 }
  0x12   : > { %s13826_s7 = smov [#allocation11]   ;;  %s17099_s2 = sld [smem:[#allocation41_spill]] }
  0x13   : > { %s17097_s28 = scalar_select %p13927_p8, 1, 0 }
  0x14   : > { %p12535_p9 = pneg %p13927_p8  ;;  %s226_s8 = sshll.u32 %s13826_s7, 4  ;;  %s13942_s8 = int_to_ptr.vmem [resolvable:$true] %s226_s8 }
  0x16   : > { %p13938_p11 = pnand %p12535_p9, %p17060_p1 }
  0x18   : > { %s13615_s11 = scalar_lea.hbm %s17099_s2, 4096  ;;  %p13952_p13 = pneg %p13938_p11 }
  0x19   : > { %p13616_p12 = scmp.ne.s32.totalorder %s17099_s2, %s13615_s11  ;;  %p13622_p5 = scmp.lt.u32.totalorder %s13615_s11, %s17099_s2 }
  0x1b   : > { %p13618_p0 = pnand %p13952_p13, %p13616_p12 }
  0x1d   : > { %p13619_p3 = pneg %p13618_p0 }
  0x1f   : > { %p13624_p7 = pnand %p13622_p5, %p13619_p3 }
  0x21   : > { %13627 = shalt.err (!%p13624_p7)
}
  0x22   : > { %s13628_s17 = scalar_lea.vmem %s13931_s30, 4096  ;;  %p13636_p2 = scmp.lt.s32.totalorder %s13931_s30, %s13931_s30 }
  0x23   : > { %p13629_p9 = scmp.ne.s32.totalorder %s13931_s30, %s13628_s17  ;;  %p13637_p6 = scmp.lt.s32.totalorder %s13628_s17, %s13628_s17 }
  0x25   : > { %p13631_p10 = pnand %p13629_p9, %p13952_p13  ;;  %p13638_p12 = por %p13637_p6, %p13636_p2 }
  0x27   : > { %p13632_p1 = pneg %p13631_p10 }
  0x29   : > { %p13639_p0 = pnand %p13638_p12, %p13632_p1 }
  0x2b   : > { %13642 = shalt.err (!%p13639_p0)
}
  0x2c   : > { %s13827_s25 = smov 256   ;;  %s13828_s29 = smov 16  }
  0x2d   : > { %12541 = dma.hbm_to_vmem [thread:$0]  (!%p13938_p11), %s17099_s2, 4096, %s13931_s30, [#allocation9], %s13827_s25, %s13827_s25, %s13828_s29  }
  0x2e   : > { %s13643_s12 = scalar_lea.hbm %s17057_s3, 4096 }
  0x2f   : > { %p13644_p2 = scmp.ne.s32.totalorder %s17057_s3, %s13643_s12  ;;  %p13650_p10 = scmp.lt.u32.totalorder %s13643_s12, %s17057_s3 }
  0x31   : > { %p13646_p1 = pnand %p13644_p2, %p13952_p13 }
  0x33   : > { %p13647_p6 = pneg %p13646_p1 }
  0x35   : > { %p13652_p3 = pnand %p13650_p10, %p13647_p6 }
  0x37   : > { %13655 = shalt.err (!%p13652_p3)
}
  0x38   : > { %s13656_s30 = scalar_lea.vmem %s13942_s8, 4096  ;;  %p13664_p12 = scmp.lt.s32.totalorder %s13942_s8, %s13942_s8 }
  0x39   : > { %p13657_p5 = scmp.ne.s32.totalorder %s13942_s8, %s13656_s30  ;;  %p13665_p0 = scmp.lt.s32.totalorder %s13656_s30, %s13656_s30 }
  0x3b   : > { %p13659_p7 = pnand %p13657_p5, %p13952_p13  ;;  %p13666_p2 = por %p13665_p0, %p13664_p12 }
  0x3d   : > { %p13660_p9 = pneg %p13659_p7 }
  0x3f   : > { %p13667_p1 = pnand %p13666_p2, %p13660_p9 }
  0x41   : > { %13670 = shalt.err (!%p13667_p1)
}
  0x42   : > { %12544 = dma.hbm_to_vmem [thread:$0]  (!%p13938_p11), %s17057_s3, 4096, %s13942_s8, [#allocation12], %s13827_s25, %s13827_s25, %s13828_s29  }
  0x43   : > { %s13829_s10 = smov [#allocation5]   ;;  %s13671_s15 = scalar_lea.hbm %s17054_s0, 256 }
  0x44   : > { %s200_s11 = sshll.u32 %s13829_s10, 4  ;;  %p13672_p6 = scmp.ne.s32.totalorder %s17054_s0, %s13671_s15  ;;  %s201_s11 = int_to_ptr.vmem [resolvable:$true] %s200_s11 }
  0x45   : > { %p13678_p5 = scmp.lt.u32.totalorder %s13671_s15, %s17054_s0 }
  0x46   : > { %p13674_p10 = pnand %p13672_p6, %p13952_p13 }
  0x48   : > { %p13675_p3 = pneg %p13674_p10 }
  0x4a   : > { %p13680_p7 = pnand %p13678_p5, %p13675_p3 }
  0x4c   : > { %13683 = shalt.err (!%p13680_p7)
}
  0x4d   : > { %s13684_s8 = scalar_lea.vmem %s201_s11, 256  ;;  %p13692_p2 = scmp.lt.s32.totalorder %s201_s11, %s201_s11 }
  0x4e   : > { %p13685_p9 = scmp.ne.s32.totalorder %s201_s11, %s13684_s8  ;;  %p13693_p1 = scmp.lt.s32.totalorder %s13684_s8, %s13684_s8 }
  0x50   : > { %p13687_p12 = pnand %p13685_p9, %p13952_p13  ;;  %p13694_p4 = por %p13693_p1, %p13692_p2 }
  0x52   : > { %p13688_p0 = pneg %p13687_p12 }
  0x54   : > { %p13695_p8 = pnand %p13694_p4, %p13688_p0 }
  0x56   : > { %13698 = shalt.err (!%p13695_p8)
}
  0x57   : > { %s13830_s25 = smov 128   ;;  %s13831_s29 = smov 8  }
  0x58   : > { %12538 = dma.hbm_to_vmem [thread:$0]  (!%p13938_p11), %s17054_s0, 256, %s201_s11, [#allocation6], %s13830_s25, %s13830_s25, %s13831_s29  }
  0x59   : > { %s13832_s9 = smov [#allocation13]   ;;  %s13699_s15 = scalar_lea.hbm %s17058_s4, 64 }
  0x5a   : > { %s240_s10 = sshll.u32 %s13832_s9, 4  ;;  %p13700_p4 = scmp.ne.s32.totalorder %s17058_s4, %s13699_s15  ;;  %s241_s10 = int_to_ptr.vmem [resolvable:$true] %s240_s10 }
  0x5b   : > { %p13706_p10 = scmp.lt.u32.totalorder %s13699_s15, %s17058_s4 }
  0x5c   : > { %p13702_p8 = pnand %p13700_p4, %p13952_p13 }
  0x5e   : > { %p13703_p6 = pneg %p13702_p8 }
  0x60   : > { %p13708_p3 = pnand %p13706_p10, %p13703_p6 }
  0x62   : > { %13711 = shalt.err (!%p13708_p3)
}
  0x63   : > { %s13712_s11 = scalar_lea.vmem %s241_s10, 64  ;;  %p13720_p12 = scmp.lt.s32.totalorder %s241_s10, %s241_s10 }
  0x64   : > { %p13713_p5 = scmp.ne.s32.totalorder %s241_s10, %s13712_s11  ;;  %p13721_p0 = scmp.lt.s32.totalorder %s13712_s11, %s13712_s11 }
  0x66   : > { %p13715_p7 = pnand %p13713_p5, %p13952_p13  ;;  %p13722_p2 = por %p13721_p0, %p13720_p12 }
  0x68   : > { %p13716_p9 = pneg %p13715_p7 }
  0x6a   : > { %p13723_p1 = pnand %p13722_p2, %p13716_p9 }
  0x6c   : > { %13726 = shalt.err (!%p13723_p1)
}
  0x6d   : > { %12547 = dma.hbm_to_vmem [thread:$0]  (!%p13938_p11), %s17058_s4, 64, %s241_s10, [#allocation12]  }
  0x6e   : > { %s32_s14 = sadd.s32 1, %s13819_s22  ;;  %s70_s2 = sadd.s32 1, %s13811_s20 }
  0x6f   : > { %p33_p13 = scmp.ge.s32.totalorder %s32_s14, 2  ;;  %p77_p4 = scmp.ne.s32.totalorder %s13811_s20, %s13807_s19 }
  0x70   : > { %p78_p8 = scmp.eq.s32.totalorder %s13823_s23, 0  ;;  %p12560_p6 = scmp.lt.s32.totalorder %s13823_s23, 2 }
  0x71   : > { %s17186_s14 = smov (%p33_p13, %s32_s14), 0  ;;  %p17101_p3 = scmp.eq.s32.totalorder %s13908_s24, 1 }
  0x72   : > { %p79_p10 = por %p78_p8, %p77_p4  ;;  %s65_s7 = ssub.s32 %s13819_s22, %s17186_s14 }
  0x73   : > { %p14042_p5 = por %p17101_p3, %p77_p4  ;;  %s251_s9 = sand.u32 1, %s13823_s23  }
  0x74   : > { %p68_p7 = scmp.eq.s32.totalorder %s65_s7, 0  ;;  %s253_s12 = sand.u32 1, %s13811_s20  }
  0x75   : > { %s12251_s10 = sshll.u32 %s13819_s22, 11  ;;  %s11432_s15 = sshll.u32 %s253_s12, 7 }
  0x76   : > { %s14052_s13 = scalar_select %p68_p7, %s13811_s20, %s70_s2  }
  0x77   : > { %s14057_s30 = scalar_lea.hbm %s17055_s1, %s12251_s10  ;;  %p14059_p11 = pnand %p12560_p6, %p79_p10 }
  0x78   : > { %s255_s11 = scalar_lea.vmem [#allocation8], %s11432_s15  ;;  %s14065_s29 = scalar_lea.sflag [#allocation9], %s251_s9 }
  0x79   : > { %s265_s25 = sshll.u32 %s255_s11, 4  ;;  %s13727_s2 = scalar_lea.hbm %s14057_s30, 2048  ;;  %s14063_s25 = int_to_ptr.vmem [resolvable:$true] %s265_s25 }
  0x7a   : > { %p13728_p9 = scmp.ne.s32.totalorder %s14057_s30, %s13727_s2  ;;  %p13729_p12 = pneg %p14059_p11 }
  0x7b   : > { %s13732_s10 = scalar_lea.hbm %s17055_s1, 4096  ;;  %p13733_p1 = scmp.lt.u32.totalorder %s14057_s30, %s17055_s1 }
  0x7c   : > { %p13730_p0 = pnand %p13729_p12, %p13728_p9  ;;  %p13734_p13 = scmp.lt.u32.totalorder %s13732_s10, %s13727_s2 }
  0x7d   : > { %p13736_p8 = scmp.lt.u32.totalorder %s13727_s2, %s14057_s30 }
  0x7e   : > { %p13731_p2 = pneg %p13730_p0  ;;  %p13735_p4 = por %p13734_p13, %p13733_p1 }
  0x80   : > { %p13737_p6 = por %p13736_p8, %p13735_p4 }
  0x82   : > { %p13738_p10 = pnand %p13737_p6, %p13731_p2 }
  0x84   : > { %13741 = shalt.err (!%p13738_p10)
}
  0x85   : > { %s13742_s9 = scalar_lea.vmem %s14063_s25, 2048  ;;  %s13833_s15 = smov [#allocation8]  }
  0x86   : > { %p13743_p3 = scmp.ne.s32.totalorder %s14063_s25, %s13742_s9  ;;  %s13747_s11 = sshll.u32 %s13833_s15, 4  ;;  %s13748_s11 = int_to_ptr.vmem [resolvable:$false] %s13747_s11 }
  0x87   : > { %s13749_s7 = scalar_lea.vmem %s13748_s11, 4096  ;;  %p13750_p0 = scmp.lt.s32.totalorder %s14063_s25, %s13748_s11 }
  0x88   : > { %p13745_p7 = pnand %p13743_p3, %p13729_p12  ;;  %p13751_p1 = scmp.lt.s32.totalorder %s13749_s7, %s13742_s9 }
  0x8a   : > { %p13746_p9 = pneg %p13745_p7  ;;  %p13752_p13 = por %p13751_p1, %p13750_p0 }
  0x8c   : > { %p13753_p4 = pnand %p13752_p13, %p13746_p9 }
  0x8e   : > { %13756 = shalt.err (!%p13753_p4)
}
  0x8f   : > { %s13834_s2 = smov 64   ;;  %s13835_s12 = smov 4  }
  0x90   : > { %12551 = dma.hbm_to_vmem [thread:$0]  (!%p14059_p11), %s14057_s30, 2048, %s14063_s25, %s14065_s29, %s13834_s2, %s13834_s2, %s13835_s12  }
  0x91   : > { %p17104_p12 = scmp.ne.s32.totalorder %s17097_s28, 0 }
  0x93   : > { %277 = sbr.rel (%p17104_p12) target bundleno = 4582 (0x11e6), region = 40 }
  0x9a   : > { %p17105_p2 = scmp.eq.s32.totalorder %s13908_s24, 0 }
  0x9c   : > { %13782 = dma.done.wait (%p17105_p2), [#allocation6], 256   ;;  %p17106_p8 = pmov %p17105_p2 }
  0x9d   : > { %s283_s10 = sand.u32 1, %s13908_s24   ;;  %s285_s16 = sand.u32 1, %s13807_s19  }
  0x9e   : > { %13784 = vsyncadd (%p17106_p8), [#allocation6], 4294967040  ;;  %s11438_s17 = sshll.u32 %s285_s16, 7  ;;  %s284_s9 = scalar_lea.sflag [#allocation9], %s283_s10 }
  0x9f   : > { %s14103_s8 = scalar_lea.vmem [#allocation8], %s11438_s17  ;;  %p17107_p11 = scmp.ne.s32.totalorder %s17095_s26, 0 }
  0xa1   : > { %13786 = dma.done.wait (%p17107_p11), %s284_s9, 2048  }
  0xa2   : > { %13788 = vsyncadd (%p17107_p11), %s284_s9, 4294965248  ;;  %p17108_p6 = pmov %p17105_p2 }
  0xa3   : > { %p17109_p10 = pmov %p17105_p2 }
  0xa4   : > { %13790 = dma.done.wait (%p17108_p6), [#allocation9], 4096  }
  0xa5   : > { %13792 = vsyncadd (%p17109_p10), [#allocation9], 4294963200  ;;  %p17110_p3 = pmov %p17105_p2 }
  0xa6   : > { %p17111_p7 = pmov %p17105_p2 }
  0xa7   : > { %13794 = dma.done.wait (%p17110_p3), [#allocation12], 4160  }
  0xa8   : > { %13796 = vsyncadd (%p17111_p7), [#allocation12], 4294963136  ;;  %s14117_s28 = scalar_lea.vmem [#allocation14], %s11438_s17  ;;  %p11443_p9 = scmp.ne.s32.totalorder %s13815_s21, 0 }
  0xa9   : > { %v13836_v0 = vmov (!%p11443_p9), 0.0  }
  0xaa   : > { %335 = sbr.rel (%p11443_p9) target bundleno = 177 (0xb1), region = 64  ;;  %336 = vst [vmem:[#allocation2] sm:$0xff] (!%p11443_p9), %v13836_v0  ;;  %337 = vst [vmem:[#allocation2 + $0x8] sm:$0xff] (!%p11443_p9), %v13836_v0 }
  0xab   : > { %338 = vst [vmem:[#allocation3] sm:$0xff] (!%p11443_p9), %v13836_v0  ;;  %339 = vst [vmem:[#allocation3 + $0x8] sm:$0xff] (!%p11443_p9), %v13836_v0 }
  0xb1 PF: > { %v12637_v1 = vld [vmem:[#allocation10 + $0x4] ss:$16 sps:$4 sm:$0xff]   ;;  %v12639_v2 = vld [vmem:[#allocation10 + $0xc] ss:$16 sps:$4 sm:$0xff]   ;;  %v17063_v3 = vmov 0   ;;  %s14201_s24 = sshll.u32 %s13815_s21, 4 }
  0xb2   : > { %717 = vmatprep.mubr.bf16.mxu0 %v17063_v3  ;;  %910 = vmatprep.mubr.bf16.mxu1 %v17063_v3  ;;  %v12641_v4 = vld [vmem:[#allocation10] ss:$16 sps:$4 sm:$0xff]   ;;  %v12642_v5 = vld [vmem:[#allocation10 + $0x8] ss:$16 sps:$4 sm:$0xff]   ;;  %v12643_v6 = vld [vmem:[#allocation10 + $0x24] ss:$16 sps:$4 sm:$0xff]  }
  0xb3   : > { %685 = vmatprep.subr.bf16.mxu0 %v12637_v1  ;;  %12635 = vset.pattern.permute.xlu0 %v17063_v3  ;;  %v12645_v7 = vld [vmem:[#allocation10 + $0x2c] ss:$16 sps:$4 sm:$0xff]   ;;  %v12647_v8 = vld [vmem:[#allocation10 + $0x20] ss:$16 sps:$4 sm:$0xff]   ;;  %v12648_v9 = vld [vmem:[#allocation10 + $0x28] ss:$16 sps:$4 sm:$0xff]   ;;  %v1550_v1 = vstv %s14201_s24 }
  0xb4   : > { %878 = vmatprep.subr.bf16.mxu1 %v12639_v2  ;;  %12636 = vset.pattern.permute.xlu1 %v17063_v3  ;;  %v12649_v10 = vld [vmem:[#allocation10 + $0x44] ss:$16 sps:$4 sm:$0xff]   ;;  %v12651_v11 = vld [vmem:[#allocation10 + $0x4c] ss:$16 sps:$4 sm:$0xff]   ;;  %v12653_v12 = vld [vmem:[#allocation10 + $0x40] ss:$16 sps:$4 sm:$0xff]  }
  0xb5   : > { %686 = vmatpush1.bf16.msra.mxu0 %v12641_v4  ;;  %879 = vmatpush1.bf16.msra.mxu1 %v12642_v5  ;;  %v12654_v13 = vld [vmem:[#allocation10 + $0x48] ss:$16 sps:$4 sm:$0xff]   ;;  %v12655_v14 = vld [vmem:[#allocation10 + $0x64] ss:$16 sps:$4 sm:$0xff]   ;;  %v12657_v15 = vld [vmem:[#allocation10 + $0x6c] ss:$16 sps:$4 sm:$0xff]  }
  0xb6   : > { %687 = vmatprep.subr.bf16.mxu0 %v12643_v6  ;;  %880 = vmatprep.subr.bf16.mxu1 %v12645_v7  ;;  %v12659_v16 = vld [vmem:[#allocation10 + $0x60] ss:$16 sps:$4 sm:$0xff]   ;;  %v12660_v17 = vld [vmem:[#allocation10 + $0x68] ss:$16 sps:$4 sm:$0xff]   ;;  %v12661_v18 = vld [vmem:[#allocation10 + $0x84] ss:$16 sps:$4 sm:$0xff]  }
  0xb7   : > { %v12663_v19 = vld [vmem:[#allocation10 + $0x8c] ss:$16 sps:$4 sm:$0xff]   ;;  %v12665_v20 = vld [vmem:[#allocation10 + $0x80] ss:$16 sps:$4 sm:$0xff]   ;;  %v12666_v21 = vld [vmem:[#allocation10 + $0x88] ss:$16 sps:$4 sm:$0xff]  }
  0xb8   : > { %v12667_v22 = vld [vmem:[#allocation10 + $0xa4] ss:$16 sps:$4 sm:$0xff]   ;;  %v12669_v23 = vld [vmem:[#allocation10 + $0xac] ss:$16 sps:$4 sm:$0xff]   ;;  %v12671_v24 = vld [vmem:[#allocation10 + $0xa0] ss:$16 sps:$4 sm:$0xff]  }
  0xb9   : > { %688 = vmatpush1.bf16.msra.mxu0 %v12647_v8  ;;  %881 = vmatpush1.bf16.msra.mxu1 %v12648_v9  ;;  %v12672_v25 = vld [vmem:[#allocation10 + $0xa8] ss:$16 sps:$4 sm:$0xff]   ;;  %v12673_v26 = vld [vmem:[#allocation10 + $0xc4] ss:$16 sps:$4 sm:$0xff]   ;;  %v12675_v27 = vld [vmem:[#allocation10 + $0xcc] ss:$16 sps:$4 sm:$0xff]  }
  0xba   : > { %689 = vmatprep.subr.bf16.mxu0 %v12649_v10  ;;  %882 = vmatprep.subr.bf16.mxu1 %v12651_v11  ;;  %v12677_v28 = vld [vmem:[#allocation10 + $0xc0] ss:$16 sps:$4 sm:$0xff]   ;;  %v12678_v29 = vld [vmem:[#allocation10 + $0xc8] ss:$16 sps:$4 sm:$0xff]   ;;  %v12679_v30 = vld [vmem:[#allocation10 + $0xe4] ss:$16 sps:$4 sm:$0xff]  }
  0xbb   : > { %v12681_v31 = vld [vmem:[#allocation10 + $0xec] ss:$16 sps:$4 sm:$0xff]   ;;  %v12683_v32 = vld [vmem:[#allocation10 + $0xe0] ss:$16 sps:$4 sm:$0xff]   ;;  %v12684_v33 = vld [vmem:[#allocation10 + $0xe8] ss:$16 sps:$4 sm:$0xff]  }
  0xbc   : > { %v14124_v34 = vld [vmem:[#allocation11 + $0x4] ss:$16 sps:$4 sm:$0xff]   ;;  %v14126_v35 = vld [vmem:[#allocation11 + $0xc] ss:$16 sps:$4 sm:$0xff]   ;;  %v14129_v37 = vld [vmem:[#allocation11] ss:$16 sps:$4 sm:$0xff]  }
  0xbd   : > { %690 = vmatpush1.bf16.msra.mxu0 %v12653_v12  ;;  %883 = vmatpush1.bf16.msra.mxu1 %v12654_v13  ;;  %v12685_v36 = vld [vmem:[%s14103_s8] sm:$0xff]   ;;  %v14135_v39 = vld [vmem:[#allocation11 + $0x8] ss:$16 sps:$4 sm:$0xff]   ;;  %v14137_v40 = vld [vmem:[#allocation11 + $0x2c] ss:$16 sps:$4 sm:$0xff]   ;;  %s2179_s26 = sadd.s32 1, %s14201_s24 }
  0xbe   : > { %691 = vmatprep.subr.bf16.mxu0 %v12655_v14  ;;  %884 = vmatprep.subr.bf16.mxu1 %v12657_v15  ;;  %v14133_v38 = vld [vmem:[#allocation11 + $0x24] ss:$16 sps:$4 sm:$0xff]   ;;  %v14141_v41 = vld [vmem:[#allocation11 + $0x20] ss:$16 sps:$4 sm:$0xff]   ;;  %v14148_v43 = vld [vmem:[#allocation11 + $0x28] ss:$16 sps:$4 sm:$0xff]  }
  0xbf   : > { %v14145_v42 = vld [vmem:[#allocation11 + $0x44] ss:$16 sps:$4 sm:$0xff]   ;;  %v12689_v44 = vld [vmem:[%s14103_s8 + $0x8] sm:$0xff]   ;;  %v14152_v45 = vld [vmem:[#allocation11 + $0x40] ss:$16 sps:$4 sm:$0xff]   ;;  %vm1776_vm6 = vcmask 1040384  }
  0xc0   : > { %v14155_v46 = vld [vmem:[#allocation11 + $0x48] ss:$16 sps:$4 sm:$0xff]   ;;  %v14158_v47 = vld [vmem:[#allocation11 + $0x4c] ss:$16 sps:$4 sm:$0xff]   ;;  %v14161_v48 = vld [vmem:[#allocation11 + $0x64] ss:$16 sps:$4 sm:$0xff]  }
  0xc1   : > { %692 = vmatpush1.bf16.msra.mxu0 %v12659_v16  ;;  %885 = vmatpush1.bf16.msra.mxu1 %v12660_v17  ;;  %v14163_v49 = vld [vmem:[#allocation11 + $0x6c] ss:$16 sps:$4 sm:$0xff]   ;;  %v12693_v50 = vld [vmem:[%s14103_s8 + $0x10] sm:$0xff]   ;;  %v14174_v52 = vld [vmem:[#allocation11 + $0x68] ss:$16 sps:$4 sm:$0xff]   ;;  %s2808_s30 = sadd.s32 2, %s14201_s24 }
  0xc2   : > { %693 = vmatprep.subr.bf16.mxu0 %v12661_v18  ;;  %886 = vmatprep.subr.bf16.mxu1 %v12663_v19  ;;  %v14170_v51 = vld [vmem:[#allocation11 + $0x60] ss:$16 sps:$4 sm:$0xff]   ;;  %v14176_v53 = vld [vmem:[#allocation11 + $0x84] ss:$16 sps:$4 sm:$0xff]   ;;  %v14181_v55 = vld [vmem:[#allocation11 + $0x88] ss:$16 sps:$4 sm:$0xff]  }
  0xc3   : > { %v14179_v54 = vld [vmem:[#allocation11 + $0x80] ss:$16 sps:$4 sm:$0xff]   ;;  %v14184_v56 = vld [vmem:[#allocation11 + $0x8c] ss:$16 sps:$4 sm:$0xff]   ;;  %v14188_v57 = vld [vmem:[#allocation11 + $0xa4] ss:$16 sps:$4 sm:$0xff]  }
  0xc4   : > { %v14190_v58 = vld [vmem:[#allocation11 + $0xac] ss:$16 sps:$4 sm:$0xff]   ;;  %v14196_v59 = vld [vmem:[#allocation11 + $0xa0] ss:$16 sps:$4 sm:$0xff]   ;;  %v14198_v60 = vld [vmem:[#allocation11 + $0xa8] ss:$16 sps:$4 sm:$0xff]  }
  0xc5   : > { %694 = vmatpush1.bf16.msra.mxu0 %v12665_v20  ;;  %887 = vmatpush1.bf16.msra.mxu1 %v12666_v21  ;;  %v14205_v61 = vld [vmem:[#allocation11 + $0xc4] ss:$16 sps:$4 sm:$0xff]   ;;  %v12697_v62 = vld [vmem:[%s14103_s8 + $0x18] sm:$0xff]   ;;  %v14209_v63 = vld [vmem:[#allocation11 + $0xc0] ss:$16 sps:$4 sm:$0xff]   ;;  %s3438_s25 = sadd.s32 3, %s14201_s24 }
  0xc6   : > { %695 = vmatprep.subr.bf16.mxu0 %v12667_v22  ;;  %888 = vmatprep.subr.bf16.mxu1 %v12669_v23  ;;  %v14212_v0 = vld [vmem:[#allocation11 + $0xcc] ss:$16 sps:$4 sm:$0xff]   ;;  %v14217_v2 = vld [vmem:[#allocation11 + $0xc8] ss:$16 sps:$4 sm:$0xff]   ;;  %v14219_v4 = vld [vmem:[#allocation11 + $0xe4] ss:$16 sps:$4 sm:$0xff]  }
  0xc7   : > { %v14221_v5 = vld [vmem:[#allocation11 + $0xe0] ss:$16 sps:$4 sm:$0xff]   ;;  %v14223_v6 = vld [vmem:[#allocation11 + $0xec] ss:$16 sps:$4 sm:$0xff]   ;;  %v14229_v8 = vld [vmem:[#allocation11 + $0xe8] ss:$16 sps:$4 sm:$0xff]  }
  0xc8   : > { %v14225_v7 = vld [vmem:[#allocation5] sm:$0xff]  ;;  %v14232_v9 = vld [vmem:[#allocation5 + $0x8] sm:$0xff]  ;;  %v12701_v10 = vld [vmem:[%s14103_s8 + $0x20] sm:$0xff]   ;;  %vm1777_vm7 = vsmask.f32 256  ;;  %s4067_s29 = sadd.s32 4, %s14201_s24 }
  0xc9   : > { %696 = vmatpush1.bf16.msra.mxu0 %v12671_v24  ;;  %889 = vmatpush1.bf16.msra.mxu1 %v12672_v25  ;;  %vm1551_vm0 = vcmp.gt.s32.totalorder %v14225_v7, %v1550_v1  ;;  %vm1552_vm1 = vcmp.gt.s32.totalorder %v14232_v9, %v1550_v1  ;;  %v12705_v13 = vld [vmem:[%s14103_s8 + $0x28] sm:$0xff]   ;;  %v12709_v14 = vld [vmem:[%s14103_s8 + $0x30] sm:$0xff]   ;;  %v12713_v15 = vld [vmem:[%s14103_s8 + $0x38] sm:$0xff]   ;;  %vm2406_vm13 = vsmask.f32 7938  ;;  %s5326_s15 = sadd.s32 6, %s14201_s24 }
  0xca   : > { %697 = vmatprep.subr.bf16.mxu0 %v12673_v26  ;;  %890 = vmatprep.subr.bf16.mxu1 %v12675_v27  ;;  %v1553_v11 = vsel %vm1551_vm0, 1, %v17063_v3  ;;  %v1554_v12 = vsel %vm1552_vm1, 1, %v17063_v3  ;;  %v12717_v16 = vld [vmem:[%s14103_s8 + $0x40] sm:$0xff]   ;;  %v12721_v17 = vld [vmem:[%s14103_s8 + $0x48] sm:$0xff]   ;;  %v12725_v18 = vld [vmem:[%s14103_s8 + $0x50] sm:$0xff]   ;;  %v2180_v27 = vstv %s2179_s26  ;;  %s6585_s11 = sadd.s32 8, %s14201_s24 }
  0xcb   : > { %1556 = vperm.xlu0 %12635, %v1553_v11   ;;  %v12729_v19 = vld [vmem:[%s14103_s8 + $0x58] sm:$0xff]   ;;  %v12733_v20 = vld [vmem:[%s14103_s8 + $0x60] sm:$0xff]   ;;  %v12737_v21 = vld [vmem:[%s14103_s8 + $0x68] sm:$0xff]   ;;  %vm2181_vm2 = vcmp.gt.s32.totalorder %v14225_v7, %v2180_v27  ;;  %vm2182_vm3 = vcmp.gt.s32.totalorder %v14232_v9, %v2180_v27  ;;  %v13838_v27 = vmov 1966171168   ;;  %s7839_s7 = sadd.s32 10, %s14201_s24 }
  0xcc   : > { %v12741_v22 = vld [vmem:[%s14103_s8 + $0x70] sm:$0xff]   ;;  %v12745_v23 = vld [vmem:[%s14103_s8 + $0x78] sm:$0xff]   ;;  %v1534_v11 = vld [vmem:[#allocation3] sm:$0xff]  ;;  %s9093_s2 = sadd.s32 12, %s14201_s24  ;;  %s10347_s12 = sadd.s32 14, %s14201_s24 }
  0xcd   : > { %698 = vmatpush1.bf16.msra.mxu0 %v12677_v28  ;;  %891 = vmatpush1.bf16.msra.mxu1 %v12678_v29  ;;  %v1207_v24 = vld [vmem:[#allocation2] sm:$0xff]  ;;  %v1208_v25 = vld [vmem:[#allocation2 + $0x8] sm:$0xff]  ;;  %v2183_v28 = vsel %vm2181_vm2, 1, %v17063_v3  ;;  %v2184_v29 = vsel %vm2182_vm3, 1, %v17063_v3  ;;  %vm14363_vm8 = vmand %vm1776_vm6, %vm1777_vm7  ;;  %vm3035_vm3 = vcmask 1041409   ;;  %s4697_s10 = sadd.s32 5, %s14201_s24 }
  0xce   : > { %699 = vmatprep.subr.bf16.mxu0 %v12679_v30  ;;  %892 = vmatprep.subr.bf16.mxu1 %v12681_v31  ;;  %v1209_v26 = vpack.c.bf16 %v1208_v25, %v1207_v24  ;;  %v409_v30 = vlaneseq  ;;  %vm14576_vm14 = vmand %vm1776_vm6, %vm2406_vm13  ;;  %s5956_s17 = sadd.s32 7, %s14201_s24  ;;  %s7212_s9 = sadd.s32 9, %s14201_s24 }
  0xcf   : > { %1559 = vperm.xlu0 %12635, %v1554_v12   ;;  %2186 = vperm.xlu1 %12636, %v2183_v28   ;;  %v1569_v28 = vunpack.c.l.s4 %v13838_v27  ;;  %s8466_s8 = sadd.s32 11, %s14201_s24  ;;  %s9720_s26 = sadd.s32 13, %s14201_s24 }
  0xd0   : > { %v14319_v31 = vshrl.u32 %v409_v30, 7 }
  0xd1   : > { %700 = vmatpush1.bf16.msra.mxu0 %v12683_v32  ;;  %893 = vmatpush1.bf16.msra.mxu1 %v12684_v33  ;;  %v407_v33 = vld [vmem:[#allocation13] sm:$0xf] }
  0xd2   : > { %1402 = vmatprep.subr.bf16.mxu0 %v14124_v34  ;;  %1445 = vmatprep.subr.bf16.mxu1 %v14126_v35  ;;  %v411_v32 = vsub.s32 0, %v14319_v31 }
  0xd3   : > { %2189 = vperm.xlu1 %12636, %v2184_v29  }
  0xd4   : > { %718 = vmatmul.mubr.bf16.vlgmr.msra.gmra.mrb[0].mxu0 %v12685_v36  ;;  %911 = vmatmul.mubr.bf16.vlgmr.msra.gmra.mrb[0].mxu1 %v12685_v36 }
  0xd5   : > { %1403 = vmatpush1.bf16.msra.mxu0 %v14129_v37  ;;  %727 = vmatprep.mubr.bf16.mxu0 %v17063_v3 }
  0xd6   : > { %920 = vmatprep.mubr.bf16.mxu1 %v17063_v3  ;;  %1404 = vmatprep.subr.bf16.mxu0 %v14133_v38 }
  0xd7   : > { %1446 = vmatpush1.bf16.msra.mxu1 %v14135_v39 }
  0xd8   : > { %1447 = vmatprep.subr.bf16.mxu1 %v14137_v40 }
  0xd9   : > { %1405 = vmatpush1.bf16.msra.mxu0 %v14141_v41 }
  0xda   : > { %1406 = vmatprep.subr.bf16.mxu0 %v14145_v42 }
  0xdb   : > { %1448 = vmatpush1.bf16.msra.mxu1 %v14148_v43 }
  0xdc   : > { %728 = vmatmul.mubr.bf16.gmra.mrb[4].mxu0 %v12689_v44  ;;  %921 = vmatmul.mubr.bf16.gmra.mrb[4].mxu1 %v12689_v44 }
  0xdd   : > { %737 = vmatprep.mubr.bf16.mxu0 %v17063_v3  ;;  %930 = vmatprep.mubr.bf16.mxu1 %v17063_v3 }
  0xde   : > { %1407 = vmatpush1.bf16.msra.mxu0 %v14152_v45  ;;  %1449 = vmatprep.subr.bf16.mxu1 %v14158_v47 }
  0xdf   : > { %1408 = vmatprep.subr.bf16.mxu0 %v14161_v48  ;;  %1450 = vmatpush1.bf16.msra.mxu1 %v14155_v46 }
  0xe0   : > { %1451 = vmatprep.subr.bf16.mxu1 %v14163_v49 }
  0xe2   : > { %1409 = vmatpush1.bf16.msra.mxu0 %v14170_v51 }
  0xe3   : > { %1410 = vmatprep.subr.bf16.mxu0 %v14176_v53  ;;  %1452 = vmatpush1.bf16.msra.mxu1 %v14174_v52 }
  0xe4   : > { %738 = vmatmul.mubr.bf16.gmra.mrb[8].mxu0 %v12693_v50  ;;  %931 = vmatmul.mubr.bf16.gmra.mrb[8].mxu1 %v12693_v50 }
  0xe5   : > { %747 = vmatprep.mubr.bf16.mxu0 %v17063_v3  ;;  %940 = vmatprep.mubr.bf16.mxu1 %v17063_v3 }
  0xe6   : > { %1411 = vmatpush1.bf16.msra.mxu0 %v14179_v54  ;;  %1453 = vmatprep.subr.bf16.mxu1 %v14184_v56 }
  0xe7   : > { %1412 = vmatprep.subr.bf16.mxu0 %v14188_v57  ;;  %1454 = vmatpush1.bf16.msra.mxu1 %v14181_v55 }
  0xe8   : > { %1455 = vmatprep.subr.bf16.mxu1 %v14190_v58 }
  0xea   : > { %1413 = vmatpush1.bf16.msra.mxu0 %v14196_v59 }
  0xeb   : > { %1414 = vmatprep.subr.bf16.mxu0 %v14205_v61  ;;  %1456 = vmatpush1.bf16.msra.mxu1 %v14198_v60 }
  0xec   : > { %748 = vmatmul.mubr.bf16.gmra.mrb[12].mxu0 %v12697_v62  ;;  %941 = vmatmul.mubr.bf16.gmra.mrb[12].mxu1 %v12697_v62 }
  0xed   : > { %757 = vmatprep.mubr.bf16.mxu0 %v17063_v3  ;;  %950 = vmatprep.mubr.bf16.mxu1 %v17063_v3 }
  0xee   : > { %1415 = vmatpush1.bf16.msra.mxu0 %v14209_v63  ;;  %1457 = vmatprep.subr.bf16.mxu1 %v14212_v0 }
  0xef   : > { %1416 = vmatprep.subr.bf16.mxu0 %v14219_v4  ;;  %1458 = vmatpush1.bf16.msra.mxu1 %v14217_v2 }
  0xf0   : > { %1459 = vmatprep.subr.bf16.mxu1 %v14223_v6 }
  0xf2   : > { %1417 = vmatpush1.bf16.msra.mxu0 %v14221_v5 }
  0xf3   : > { %1460 = vmatpush1.bf16.msra.mxu1 %v14229_v8  ;;  %2031 = vmatprep.subr.bf16.mxu0 %v14124_v34  ;;  %v415_v34 = vsub.s32 1, %v14319_v31 }
  0xf4   : > { %758 = vmatmul.mubr.bf16.gmra.mrb[16].mxu0 %v12701_v10  ;;  %951 = vmatmul.mubr.bf16.gmra.mrb[16].mxu1 %v12701_v10 }
  0xf5   : > { %767 = vmatprep.mubr.bf16.mxu0 %v17063_v3  ;;  %960 = vmatprep.mubr.bf16.mxu1 %v17063_v3  ;;  %v14325_v36 = vrot.slane %v407_v33, %v415_v34 }
  0xf6   : > { %2074 = vmatprep.subr.bf16.mxu1 %v14126_v35  ;;  %v14323_v35 = vrot.slane %v407_v33, %v411_v32 }
  0xfc   : > { %768 = vmatmul.mubr.bf16.gmra.mrb[20].mxu0 %v12705_v13  ;;  %961 = vmatmul.mubr.bf16.gmra.mrb[20].mxu1 %v12705_v13 }
  0xfd   : > { %777 = vmatprep.mubr.bf16.mxu0 %v17063_v3  ;;  %970 = vmatprep.mubr.bf16.mxu1 %v17063_v3 }
 0x104   : > { %778 = vmatmul.mubr.bf16.gmra.mrb[24].mxu0 %v12709_v14  ;;  %971 = vmatmul.mubr.bf16.gmra.mrb[24].mxu1 %v12709_v14 }
 0x105   : > { %787 = vmatprep.mubr.bf16.mxu0 %v17063_v3  ;;  %980 = vmatprep.mubr.bf16.mxu1 %v17063_v3 }
 0x10c   : > { %788 = vmatmul.mubr.bf16.gmra.mrb[28].mxu0 %v12713_v15  ;;  %981 = vmatmul.mubr.bf16.gmra.mrb[28].mxu1 %v12713_v15 }
 0x10d   : > { %797 = vmatprep.mubr.bf16.mxu0 %v17063_v3  ;;  %990 = vmatprep.mubr.bf16.mxu1 %v17063_v3 }
 0x114   : > { %798 = vmatmul.mubr.bf16.gmra.mrb[32].mxu0 %v12717_v16  ;;  %991 = vmatmul.mubr.bf16.gmra.mrb[32].mxu1 %v12717_v16 }
 0x115   : > { %807 = vmatprep.mubr.bf16.mxu0 %v17063_v3  ;;  %1000 = vmatprep.mubr.bf16.mxu1 %v17063_v3 }
 0x11c   : > { %808 = vmatmul.mubr.bf16.gmra.mrb[36].mxu0 %v12721_v17  ;;  %1001 = vmatmul.mubr.bf16.gmra.mrb[36].mxu1 %v12721_v17 }
 0x11d   : > { %817 = vmatprep.mubr.bf16.mxu0 %v17063_v3  ;;  %1010 = vmatprep.mubr.bf16.mxu1 %v17063_v3 }
 0x124   : > { %818 = vmatmul.mubr.bf16.gmra.mrb[40].mxu0 %v12725_v18  ;;  %1011 = vmatmul.mubr.bf16.gmra.mrb[40].mxu1 %v12725_v18  ;;  %v1535_v18 = vld [vmem:[#allocation3 + $0x8] sm:$0xff] }
 0x125   : > { %827 = vmatprep.mubr.bf16.mxu0 %v17063_v3  ;;  %1020 = vmatprep.mubr.bf16.mxu1 %v17063_v3 }
 0x12c   : > { %828 = vmatmul.mubr.bf16.gmra.mrb[44].mxu0 %v12729_v19  ;;  %1021 = vmatmul.mubr.bf16.gmra.mrb[44].mxu1 %v12729_v19 }
 0x12d   : > { %837 = vmatprep.mubr.bf16.mxu0 %v17063_v3  ;;  %1030 = vmatprep.mubr.bf16.mxu1 %v17063_v3 }
 0x134   : > { %838 = vmatmul.mubr.bf16.gmra.mrb[48].mxu0 %v12733_v20  ;;  %1031 = vmatmul.mubr.bf16.gmra.mrb[48].mxu1 %v12733_v20 }
 0x135   : > { %847 = vmatprep.mubr.bf16.mxu0 %v17063_v3  ;;  %1040 = vmatprep.mubr.bf16.mxu1 %v17063_v3 }
 0x13c   : > { %848 = vmatmul.mubr.bf16.gmra.mrb[52].mxu0 %v12737_v21  ;;  %1041 = vmatmul.mubr.bf16.gmra.mrb[52].mxu1 %v12737_v21 }
 0x13d   : > { %857 = vmatprep.mubr.bf16.mxu0 %v17063_v3  ;;  %1050 = vmatprep.mubr.bf16.mxu1 %v17063_v3 }
 0x144   : > { %858 = vmatmul.mubr.bf16.gmra.mrb[56].mxu0 %v12741_v22  ;;  %1051 = vmatmul.mubr.bf16.gmra.mrb[56].mxu1 %v12741_v22 }
 0x145   : > { %867 = vmatprep.mubr.bf16.mxu0 %v17063_v3  ;;  %1060 = vmatprep.mubr.bf16.mxu1 %v17063_v3 }
 0x14c   : > { %868 = vmatmul.mubr.bf16.gmra.mrb[60].mxu0 %v12745_v23  ;;  %1061 = vmatmul.mubr.bf16.gmra.mrb[60].mxu1 %v12745_v23 }
 0x14d   : > { %1434 = vmatprep.mubr.bf16.mxu0 %v17063_v3  ;;  %1477 = vmatprep.mubr.bf16.mxu1 %v17063_v3 }
 0x154   : > { %1435 = vmatmul.mubr.bf16.vlgmr.msra.gmra.mrb[0].mxu0 %v1209_v26  ;;  %1478 = vmatmul.mubr.bf16.vlgmr.msra.gmra.mrb[0].mxu1 %v1209_v26  ;;  %v1557_v26 = vpop.permute.xlu0 %1556 }
 0x155   : > { %2032 = vmatpush1.bf16.msra.mxu0 %v14129_v37  ;;  %2075 = vmatpush1.bf16.msra.mxu1 %v14135_v39  ;;  %v423_v39 = vsub.s32 3, %v14319_v31  ;;  %vm1561_vm4 = vcmp.eq.s32.totalorder %v1557_v26, 1  ;;  %v1782_v26 = vld [vmem:[%s14117_s28 + $0x8] sm:$0x1] }
 0x156   : > { %2033 = vmatprep.subr.bf16.mxu0 %v14133_v38  ;;  %2076 = vmatprep.subr.bf16.mxu1 %v14137_v40 }
 0x157   : > { %2063 = vmatprep.mubr.bf16.mxu0 %v17063_v3  ;;  %2106 = vmatprep.mubr.bf16.mxu1 %v17063_v3 }
 0x158   : > { %v1560_v30 = vpop.permute.xlu0 %1559 }
 0x159   : > { %2034 = vmatpush1.bf16.msra.mxu0 %v14141_v41  ;;  %2077 = vmatpush1.bf16.msra.mxu1 %v14148_v43  ;;  %vm1562_vm5 = vcmp.eq.s32.totalorder %v1560_v30, 1 }
 0x15a   : > { %2035 = vmatprep.subr.bf16.mxu0 %v14145_v42  ;;  %2078 = vmatprep.subr.bf16.mxu1 %v14158_v47  ;;  %v419_v47 = vsub.s32 2, %v14319_v31 }
 0x15d   : > { %2036 = vmatpush1.bf16.msra.mxu0 %v14152_v45  ;;  %2079 = vmatpush1.bf16.msra.mxu1 %v14155_v46 }
 0x15e   : > { %2037 = vmatprep.subr.bf16.mxu0 %v14161_v48  ;;  %2080 = vmatprep.subr.bf16.mxu1 %v14163_v49 }
 0x161   : > { %2038 = vmatpush1.bf16.msra.mxu0 %v14170_v51  ;;  %2081 = vmatpush1.bf16.msra.mxu1 %v14174_v52  ;;  %v14332_v52 = vrot.slane %v407_v33, %v423_v39 }
 0x162   : > { %2039 = vmatprep.subr.bf16.mxu0 %v14176_v53  ;;  %2082 = vmatprep.subr.bf16.mxu1 %v14184_v56  ;;  %v14335_v56 = vrot.slane %v407_v33, %v419_v47  ;;  %v1570_v33 = vunpack.c.0.s8 %v1569_v28 }
 0x165   : > { %2040 = vmatpush1.bf16.msra.mxu0 %v14179_v54  ;;  %2083 = vmatpush1.bf16.msra.mxu1 %v14181_v55 }
 0x166   : > { %2041 = vmatprep.subr.bf16.mxu0 %v14188_v57  ;;  %2084 = vmatprep.subr.bf16.mxu1 %v14190_v58 }
 0x169   : > { %2042 = vmatpush1.bf16.msra.mxu0 %v14196_v59  ;;  %2085 = vmatpush1.bf16.msra.mxu1 %v14198_v60 }
 0x16a   : > { %2043 = vmatprep.subr.bf16.mxu0 %v14205_v61  ;;  %2086 = vmatprep.subr.bf16.mxu1 %v14212_v0 }
 0x16d   : > { %2044 = vmatpush1.bf16.msra.mxu0 %v14209_v63  ;;  %2087 = vmatpush1.bf16.msra.mxu1 %v14217_v2 }
 0x16e   : > { %2045 = vmatprep.subr.bf16.mxu0 %v14219_v4  ;;  %2088 = vmatprep.subr.bf16.mxu1 %v14223_v6 }
 0x171   : > { %2046 = vmatpush1.bf16.msra.mxu0 %v14221_v5  ;;  %2089 = vmatpush1.bf16.msra.mxu1 %v14229_v8 }
 0x227   : > { %v1436_v37 = vpop.f32.mrb[0].mxu0  ;;  %v1479_v38 = vpop.f32.mrb[0].mxu1 }
 0x228   : > { %v12253_v40 = vadd.f32 %v1436_v37, %v14323_v35  ;;  %v1438_v41 = vpop.f32.mrb[1].mxu0  ;;  %v1481_v42 = vpop.f32.mrb[1].mxu1  ;;  %v12317_v58 = vadd.f32 %v1479_v38, %v14335_v56 }
 0x229   : > { %v12254_v43 = vadd.f32 %v1438_v41, %v14325_v36  ;;  %v1440_v44 = vpop.f32.mrb[2].mxu0  ;;  %v1483_v45 = vpop.f32.mrb[2].mxu1  ;;  %v12318_v57 = vadd.f32 %v1481_v42, %v14332_v52  ;;  %v14348_v42 = vsub.s32 %v1570_v33, %v14319_v31  ;;  %v1788_v33 = vld [vmem:[%s14117_s28 + $0x18] sm:$0x1] }
 0x22a   : > { %v11525_v46 = vmul.f32 -1.442695, %v12253_v40  ;;  %v12255_v48 = vadd.f32 %v1440_v44, %v14323_v35  ;;  %v1442_v49 = vpop.f32.mrb[3].mxu0  ;;  %v1485_v50 = vpop.f32.mrb[3].mxu1  ;;  %v12319_v61 = vadd.f32 %v1483_v45, %v14335_v56  ;;  %v13839_v40 = vmov 286326784  }
 0x22b   : > { %v11527_v51 = vmul.f32 -1.442695, %v12254_v43  ;;  %v12256_v53 = vadd.f32 %v1442_v49, %v14325_v36  ;;  %v11529_v59 = vmul.f32 -1.442695, %v12318_v57  ;;  %v12320_v60 = vadd.f32 %v1485_v50, %v14332_v52  ;;  %17112 = vst [vmem:[#allocation22_spill] sm:$0xff] %v14348_v42 }
 0x22c   : > { %13085 = vpow2.f32 %v11525_v46  ;;  %v11526_v54 = vmul.f32 -1.442695, %v12255_v48  ;;  %v1649_v41 = vunpack.c.l.s4 %v13839_v40 }
 0x22d   : > { %13087 = vpow2.f32 %v11527_v51  ;;  %v11528_v55 = vmul.f32 -1.442695, %v12256_v53  ;;  %v11530_v1 = vmul.f32 -1.442695, %v12320_v60 }
 0x22e   : > { %13089 = vpow2.f32 %v11526_v54  ;;  %v1650_v48 = vunpack.c.0.s8 %v1649_v41  ;;  %v1794_v41 = vld [vmem:[%s14117_s28 + $0x28] sm:$0x1] }
 0x22f   : > { %13091 = vpow2.f32 %v11528_v55 }
 0x230   : > { %13093 = vtanh.f32 %v12317_v58  ;;  %v14357_v57 = vsub.s32 %v1650_v48, %v14319_v31 }
 0x231   : > { %13095 = vpow2.f32 %v11529_v59 }
 0x232   : > { %13097 = vtanh.f32 %v12319_v61 }
 0x236   : > { %v13086_v62 = vpop.eup %13085 }
 0x237   : > { %v13088_v63 = vpop.eup %13087  ;;  %v1502_v0 = vadd.f32 1.0, %v13086_v62 }
 0x238   : > { %v1514_v2 = vadd.f32 1.0, %v13088_v63  ;;  %v13090_v4 = vpop.eup %13089 }
 0x239   : > { %13099 = vrcp.f32 %v1502_v0  ;;  %v1503_v5 = vadd.f32 1.0, %v13090_v4  ;;  %v13092_v6 = vpop.eup %13091 }
 0x23a   : > { %13101 = vrcp.f32 %v1514_v2  ;;  %v1515_v7 = vadd.f32 1.0, %v13092_v6  ;;  %v13094_v8 = vpop.eup %13093 }
 0x23b   : > { %13103 = vpow2.f32 %v11530_v1  ;;  %v13096_v9 = vpop.eup %13095 }
 0x23c   : > { %13105 = vrcp.f32 %v1503_v5  ;;  %v13098_v10 = vpop.eup %13097  ;;  %v1528_v19 = vadd.f32 1.0, %v13096_v9 }
 0x23d   : > { %13107 = vrcp.f32 %v1515_v7 }
 0x243   : > { %v13100_v12 = vpop.eup %13099 }
 0x244   : > { %v13102_v13 = vpop.eup %13101  ;;  %v1538_v14 = vmul.f32 %v13100_v12, %v13094_v8 }
 0x245   : > { %v13104_v15 = vpop.eup %13103  ;;  %v1536_v16 = vmul.f32 %v13102_v13, %v1534_v11 }
 0x246   : > { %v13106_v17 = vpop.eup %13105  ;;  %v1529_v23 = vadd.f32 1.0, %v13104_v15 }
 0x247   : > { %v1539_v20 = vmul.f32 %v13106_v17, %v13098_v10  ;;  %v14341_v21 = vadd.f32 %v1538_v14, %v1536_v16  ;;  %v13108_v22 = vpop.eup %13107 }
 0x248   : > { %v1537_v24 = vmul.f32 %v13108_v22, %v1535_v18 }
 0x249   : > { %13109 = vtanh.f32 %v14341_v21 }
 0x24a   : > { %13111 = vrcp.f32 %v1528_v19  ;;  %v14344_v25 = vadd.f32 %v1539_v20, %v1537_v24  ;;  %v1779_v24 = vld [vmem:[%s14117_s28] sm:$0x1] }
 0x24b   : > { %13113 = vrcp.f32 %v1529_v23  ;;  %v17113_v23 = vmov 0 }
 0x24c   : > { %13115 = vtanh.f32 %v14344_v25  ;;  %v17114_v23 = vsel %vm14363_vm8, 4294967295, %v17113_v23 }
 0x24d   : > { %17115 = vst [vmem:[#allocation23_spill] sm:$0xff] %v17114_v23 }
 0x253   : > { %v13110_v29 = vpop.eup %13109 }
 0x254   : > { %v13112_v32 = vpop.eup %13111 }
 0x255   : > { %v13114_v34 = vpop.eup %13113  ;;  %v1544_v37 = vmul.f32 %v13112_v32, %v13110_v29  ;;  %v1785_v32 = vld [vmem:[%s14117_s28 + $0x10] sm:$0x1] }
 0x256   : > { %v13116_v38 = vpop.eup %13115 }
 0x257   : > { %v1545_v39 = vmul.f32 %v13116_v38, %v13114_v34  ;;  %v1563_v43 = vsel %vm1561_vm4, %v1544_v37, 0.0  ;;  %v1791_v34 = vld [vmem:[%s14117_s28 + $0x20] sm:$0x1]  ;;  %vm3036_vm4 = vsmask.f32 1280 }
 0x259   : > { %v1564_v44 = vsel %vm1562_vm5, %v1545_v39, 0.0  ;;  %v1838_v45 = vpack.c.bf16 %v1545_v39, %v1544_v37  ;;  %vm14726_vm5 = vmand %vm3035_vm3, %vm3036_vm4 }
 0x25a   : > { %v1565_v46 = vpack.c.bf16 %v1564_v44, %v1563_v43  ;;  %v11531_v47 = vpack.c.bf16 %v1564_v44, %v1564_v44  ;;  %v1797_v43 = vld [vmem:[%s14117_s28 + $0x30] sm:$0x1]  ;;  %v1800_v44 = vld [vmem:[%s14117_s28 + $0x38] sm:$0x1] }
 0x25b   : > { %2064 = vmatmul.mubr.bf16.vlgmr.msra.gmra.mrb[4].mxu0 %v1838_v45  ;;  %2107 = vmatmul.mubr.bf16.vlgmr.msra.gmra.mrb[4].mxu1 %v1838_v45 }
 0x25c   : > { %v1574_v49 = vrot.slane %v1565_v46, %v14348_v42  ;;  %v1581_v50 = vrot.slane %v11531_v47, %v14348_v42  ;;  %2692 = vmatprep.mubr.bf16.mxu0 %v17063_v3  ;;  %2735 = vmatprep.mubr.bf16.mxu1 %v17063_v3 }
 0x25e   : > { %v1582_v51 = vcombine.high %v1574_v49, %v1574_v49  ;;  %v1583_v53 = vcombine.high %v1581_v50, %v1581_v50  ;;  %v1590_v54 = vrot.slane %v1574_v49, %v14348_v42  ;;  %v1597_v55 = vrot.slane %v1581_v50, %v14348_v42  ;;  %v1803_v49 = vld [vmem:[%s14117_s28 + $0x40] sm:$0x1]  ;;  %v1806_v50 = vld [vmem:[%s14117_s28 + $0x48] sm:$0x1] }
 0x260   : > { %v1604_v58 = vrot.slane %v1582_v51, %v14348_v42  ;;  %v1611_v59 = vrot.slane %v1583_v53, %v14348_v42  ;;  %v1612_v60 = vcombine.high %v1590_v54, %v1590_v54  ;;  %v1613_v61 = vcombine.high %v1597_v55, %v1597_v55  ;;  %v1809_v51 = vld [vmem:[%s14117_s28 + $0x50] sm:$0x1] }
 0x261   : > { %v1617_v62 = vunpack.i.h.s16 %v1590_v54  ;;  %v1625_v63 = vunpack.i.h.s16 %v1597_v55  ;;  %v11532_v0 = vpack.i.b16 %v1590_v54, %v1590_v54  ;;  %v11536_v1 = vpack.i.b16 %v1597_v55, %v1597_v55 }
 0x262   : > { %v1614_v2 = vcombine.high %v1604_v58, %v1604_v58  ;;  %v1615_v4 = vcombine.high %v1611_v59, %v1611_v59  ;;  %v1619_v5 = vunpack.i.h.s16 %v1604_v58  ;;  %v1621_v6 = vunpack.i.h.s16 %v1612_v60 }
 0x263   : > { %v1627_v7 = vunpack.i.h.s16 %v1611_v59  ;;  %v1629_v8 = vunpack.i.h.s16 %v1613_v61  ;;  %v1633_v31 = vpack.i.b16 %v1617_v62, %v1617_v62  ;;  %v11533_v9 = vpack.i.b16 %v1604_v58, %v1604_v58 }
 0x264   : > { %v1623_v10 = vunpack.i.h.s16 %v1614_v2  ;;  %v1631_v11 = vunpack.i.h.s16 %v1615_v4  ;;  %v1635_v12 = vpack.i.b16 %v1619_v5, %v1619_v5  ;;  %v11534_v13 = vpack.i.b16 %v1612_v60, %v1612_v60  ;;  %v1815_v60 = vld [vmem:[%s14117_s28 + $0x60] sm:$0x1] }
 0x265   : > { %v1637_v14 = vpack.i.b16 %v1621_v6, %v1621_v6  ;;  %v11535_v15 = vpack.i.b16 %v1614_v2, %v1614_v2  ;;  %v1641_v16 = vpack.i.b16 %v1625_v63, %v1625_v63  ;;  %v11537_v17 = vpack.i.b16 %v1611_v59, %v1611_v59  ;;  %v1812_v59 = vld [vmem:[%s14117_s28 + $0x58] sm:$0x1]  ;;  %v1821_v2 = vld [vmem:[%s14117_s28 + $0x70] sm:$0x1] }
 0x266   : > { %v1639_v18 = vpack.i.b16 %v1623_v10, %v1623_v10  ;;  %v1643_v19 = vpack.i.b16 %v1627_v7, %v1627_v7  ;;  %v11538_v20 = vpack.i.b16 %v1613_v61, %v1613_v61  ;;  %v1645_v22 = vpack.i.b16 %v1629_v8, %v1629_v8  ;;  %v1818_v61 = vld [vmem:[%s14117_s28 + $0x68] sm:$0x1] }
 0x267   : > { %v11539_v27 = vpack.i.b16 %v1615_v4, %v1615_v4  ;;  %v1647_v28 = vpack.i.b16 %v1631_v11, %v1631_v11  ;;  %v1654_v29 = vrot.slane %v11532_v0, %v14357_v57  ;;  %v1661_v30 = vrot.slane %v1633_v31, %v14357_v57  ;;  %v1824_v4 = vld [vmem:[%s14117_s28 + $0x78] sm:$0x1] }
 0x268   : > { %v1668_v37 = vrot.slane %v11533_v9, %v14357_v57  ;;  %v1675_v38 = vrot.slane %v1635_v12, %v14357_v57  ;;  %v1682_v39 = vrot.slane %v11534_v13, %v14357_v57  ;;  %v1689_v40 = vrot.slane %v1637_v14, %v14357_v57 }
 0x269   : > { %v1696_v45 = vrot.slane %v11535_v15, %v14357_v57  ;;  %v1703_v46 = vrot.slane %v1639_v18, %v14357_v57  ;;  %v1710_v47 = vrot.slane %v11536_v1, %v14357_v57  ;;  %v1717_v48 = vrot.slane %v1641_v16, %v14357_v57  ;;  %v14447_v18 = vld [vmem:[#allocation11 + $0x4] ss:$16 sps:$4 sm:$0xff]  }
 0x26a   : > { %v1724_v53 = vrot.slane %v11537_v17, %v14357_v57  ;;  %v1731_v54 = vrot.slane %v1643_v19, %v14357_v57  ;;  %v1738_v55 = vrot.slane %v11538_v20, %v14357_v57  ;;  %v1745_v58 = vrot.slane %v1645_v22, %v14357_v57  ;;  %v14449_v19 = vld [vmem:[#allocation11 + $0xc] ss:$16 sps:$4 sm:$0xff]   ;;  %v14451_v20 = vld [vmem:[#allocation11] ss:$16 sps:$4 sm:$0xff]   ;;  %v14453_v22 = vld [vmem:[#allocation11 + $0x8] ss:$16 sps:$4 sm:$0xff]   ;;  %2660 = vmatprep.subr.bf16.mxu0 %v14447_v18 }
 0x26b   : > { %v1752_v62 = vrot.slane %v11539_v27, %v14357_v57  ;;  %v1759_v63 = vrot.slane %v1647_v28, %v14357_v57  ;;  %v1780_v0 = vsel %vm14363_vm8, %v1654_v29, %v1779_v24  ;;  %v1783_v1 = vsel %vm14363_vm8, %v1661_v30, %v1782_v26  ;;  %2703 = vmatprep.subr.bf16.mxu1 %v14449_v19  ;;  %v14459_v24 = vld [vmem:[#allocation11 + $0x24] ss:$16 sps:$4 sm:$0xff]   ;;  %v14461_v26 = vld [vmem:[#allocation11 + $0x2c] ss:$16 sps:$4 sm:$0xff]   ;;  %v14463_v27 = vld [vmem:[#allocation11 + $0x20] ss:$16 sps:$4 sm:$0xff]  }
 0x26c   : > { %1781 = vst [vmem:[%s14117_s28] sm:$0x1] %v1780_v0  ;;  %1784 = vst [vmem:[%s14117_s28 + $0x8] sm:$0x1] %v1783_v1  ;;  %v1786_v5 = vsel %vm14363_vm8, %v1668_v37, %v1785_v32  ;;  %v1789_v6 = vsel %vm14363_vm8, %v1675_v38, %v1788_v33  ;;  %v1792_v7 = vsel %vm14363_vm8, %v1682_v39, %v1791_v34  ;;  %2661 = vmatpush1.bf16.msra.mxu0 %v14451_v20  ;;  %v14465_v28 = vld [vmem:[#allocation11 + $0x28] ss:$16 sps:$4 sm:$0xff]  }
 0x26d   : > { %v1795_v8 = vsel %vm14363_vm8, %v1689_v40, %v1794_v41  ;;  %1787 = vst [vmem:[%s14117_s28 + $0x10] sm:$0x1] %v1786_v5  ;;  %1790 = vst [vmem:[%s14117_s28 + $0x18] sm:$0x1] %v1789_v6  ;;  %v1798_v31 = vsel %vm14363_vm8, %v1696_v45, %v1797_v43  ;;  %v1801_v9 = vsel %vm14363_vm8, %v1703_v46, %v1800_v44  ;;  %2704 = vmatpush1.bf16.msra.mxu1 %v14453_v22  ;;  %v14471_v29 = vld [vmem:[#allocation11 + $0x40] ss:$16 sps:$4 sm:$0xff]  }
 0x26e   : > { %1793 = vst [vmem:[%s14117_s28 + $0x20] sm:$0x1] %v1792_v7  ;;  %1796 = vst [vmem:[%s14117_s28 + $0x28] sm:$0x1] %v1795_v8  ;;  %v1804_v10 = vsel %vm14363_vm8, %v1710_v47, %v1803_v49  ;;  %v1807_v11 = vsel %vm14363_vm8, %v1717_v48, %v1806_v50  ;;  %v1810_v12 = vsel %vm14363_vm8, %v1724_v53, %v1809_v51  ;;  %2662 = vmatprep.subr.bf16.mxu0 %v14459_v24  ;;  %v14473_v30 = vld [vmem:[#allocation11 + $0x44] ss:$16 sps:$4 sm:$0xff]  }
 0x26f   : > { %1799 = vst [vmem:[%s14117_s28 + $0x30] sm:$0x1] %v1798_v31  ;;  %1802 = vst [vmem:[%s14117_s28 + $0x38] sm:$0x1] %v1801_v9  ;;  %v1813_v13 = vsel %vm14363_vm8, %v1731_v54, %v1812_v59  ;;  %v1816_v14 = vsel %vm14363_vm8, %v1738_v55, %v1815_v60  ;;  %v1819_v15 = vsel %vm14363_vm8, %v1745_v58, %v1818_v61  ;;  %2705 = vmatprep.subr.bf16.mxu1 %v14461_v26  ;;  %v14475_v32 = vld [vmem:[#allocation11 + $0x48] ss:$16 sps:$4 sm:$0xff]  }
 0x270   : > { %1805 = vst [vmem:[%s14117_s28 + $0x40] sm:$0x1] %v1804_v10  ;;  %1808 = vst [vmem:[%s14117_s28 + $0x48] sm:$0x1] %v1807_v11  ;;  %v1822_v16 = vsel %vm14363_vm8, %v1752_v62, %v1821_v2  ;;  %v1825_v17 = vsel %vm14363_vm8, %v1759_v63, %v1824_v4  ;;  %2663 = vmatpush1.bf16.msra.mxu0 %v14463_v27  ;;  %v14477_v33 = vld [vmem:[#allocation11 + $0x4c] ss:$16 sps:$4 sm:$0xff]   ;;  %v2809_v60 = vstv %s2808_s30 }
 0x271   : > { %1811 = vst [vmem:[%s14117_s28 + $0x50] sm:$0x1] %v1810_v12  ;;  %1814 = vst [vmem:[%s14117_s28 + $0x58] sm:$0x1] %v1813_v13  ;;  %2706 = vmatpush1.bf16.msra.mxu1 %v14465_v28  ;;  %v14479_v34 = vld [vmem:[#allocation11 + $0x64] ss:$16 sps:$4 sm:$0xff]   ;;  %2664 = vmatprep.subr.bf16.mxu0 %v14473_v30 }
 0x272   : > { %1817 = vst [vmem:[%s14117_s28 + $0x60] sm:$0x1] %v1816_v14  ;;  %1820 = vst [vmem:[%s14117_s28 + $0x68] sm:$0x1] %v1819_v15  ;;  %v14482_v37 = vld [vmem:[#allocation11 + $0x6c] ss:$16 sps:$4 sm:$0xff]   ;;  %2707 = vmatprep.subr.bf16.mxu1 %v14477_v33 }
 0x273   : > { %1823 = vst [vmem:[%s14117_s28 + $0x70] sm:$0x1] %v1822_v16  ;;  %1826 = vst [vmem:[%s14117_s28 + $0x78] sm:$0x1] %v1825_v17  ;;  %v14486_v38 = vld [vmem:[#allocation11 + $0x60] ss:$16 sps:$4 sm:$0xff]  }
 0x274   : > { %2665 = vmatpush1.bf16.msra.mxu0 %v14471_v29  ;;  %v14490_v39 = vld [vmem:[#allocation11 + $0x68] ss:$16 sps:$4 sm:$0xff]   ;;  %v13597_v40 = vld [vmem:[#allocation11 + $0x84] ss:$16 sps:$4 sm:$0xff]   ;;  %v13598_v41 = vld [vmem:[#allocation11 + $0x8c] ss:$16 sps:$4 sm:$0xff]  }
 0x275   : > { %2708 = vmatpush1.bf16.msra.mxu1 %v14475_v32  ;;  %2666 = vmatprep.subr.bf16.mxu0 %v14479_v34  ;;  %v13599_v43 = vld [vmem:[#allocation11 + $0x80] ss:$16 sps:$4 sm:$0xff]   ;;  %v13600_v44 = vld [vmem:[#allocation11 + $0x88] ss:$16 sps:$4 sm:$0xff]   ;;  %v13601_v45 = vld [vmem:[#allocation11 + $0xa4] ss:$16 sps:$4 sm:$0xff]  }
 0x276   : > { %2709 = vmatprep.subr.bf16.mxu1 %v14482_v37  ;;  %v13602_v46 = vld [vmem:[#allocation11 + $0xac] ss:$16 sps:$4 sm:$0xff]   ;;  %v13603_v47 = vld [vmem:[#allocation11 + $0xa0] ss:$16 sps:$4 sm:$0xff]   ;;  %v13604_v48 = vld [vmem:[#allocation11 + $0xa8] ss:$16 sps:$4 sm:$0xff]  }
 0x277   : > { %v14495_v49 = vld [vmem:[#allocation11 + $0xc4] ss:$16 sps:$4 sm:$0xff]   ;;  %v14497_v50 = vld [vmem:[#allocation11 + $0xcc] ss:$16 sps:$4 sm:$0xff]   ;;  %v14499_v51 = vld [vmem:[#allocation11 + $0xc0] ss:$16 sps:$4 sm:$0xff]  }
 0x278   : > { %2667 = vmatpush1.bf16.msra.mxu0 %v14486_v38  ;;  %v14501_v53 = vld [vmem:[#allocation11 + $0xc8] ss:$16 sps:$4 sm:$0xff]   ;;  %v14507_v54 = vld [vmem:[#allocation11 + $0xe4] ss:$16 sps:$4 sm:$0xff]   ;;  %v14509_v55 = vld [vmem:[#allocation11 + $0xec] ss:$16 sps:$4 sm:$0xff]  }
 0x279   : > { %2710 = vmatpush1.bf16.msra.mxu1 %v14490_v39  ;;  %2668 = vmatprep.subr.bf16.mxu0 %v13597_v40  ;;  %v14511_v58 = vld [vmem:[#allocation11 + $0xe0] ss:$16 sps:$4 sm:$0xff]   ;;  %v14513_v59 = vld [vmem:[#allocation11 + $0xe8] ss:$16 sps:$4 sm:$0xff]   ;;  %s10974_s30 = sadd.s32 15, %s14201_s24  ;;  %s11250_s24 = scalar_lea.sflag [#allocation7], %s285_s16 }
 0x27a   : > { %2711 = vmatprep.subr.bf16.mxu1 %v13598_v41  ;;  %v14522_v61 = vld [vmem:[#allocation5] sm:$0xff]  ;;  %v14525_v62 = vld [vmem:[#allocation5 + $0x8] sm:$0xff] }
 0x27b   : > { %vm2810_vm9 = vcmp.gt.s32.totalorder %v14522_v61, %v2809_v60  ;;  %vm2811_vm10 = vcmp.gt.s32.totalorder %v14525_v62, %v2809_v60 }
 0x27c   : > { %2669 = vmatpush1.bf16.msra.mxu0 %v13599_v43  ;;  %v2812_v63 = vsel %vm2810_vm9, 1, %v17063_v3  ;;  %v2813_v0 = vsel %vm2811_vm10, 1, %v17063_v3 }
 0x27d   : > { %2712 = vmatpush1.bf16.msra.mxu1 %v13600_v44  ;;  %2670 = vmatprep.subr.bf16.mxu0 %v13601_v45 }
 0x27e   : > { %2713 = vmatprep.subr.bf16.mxu1 %v13602_v46  ;;  %2815 = vperm.xlu0 %12635, %v2812_v63  }
 0x27f   : > { %2818 = vperm.xlu1 %12636, %v2813_v0  }
 0x280   : > { %2671 = vmatpush1.bf16.msra.mxu0 %v13603_v47 }
 0x281   : > { %2714 = vmatpush1.bf16.msra.mxu1 %v13604_v48  ;;  %2672 = vmatprep.subr.bf16.mxu0 %v14495_v49 }
 0x282   : > { %2715 = vmatprep.subr.bf16.mxu1 %v14497_v50 }
 0x284   : > { %2673 = vmatpush1.bf16.msra.mxu0 %v14499_v51 }
 0x285   : > { %2716 = vmatpush1.bf16.msra.mxu1 %v14501_v53  ;;  %2674 = vmatprep.subr.bf16.mxu0 %v14507_v54 }
 0x286   : > { %2717 = vmatprep.subr.bf16.mxu1 %v14509_v55 }
 0x288   : > { %2675 = vmatpush1.bf16.msra.mxu0 %v14511_v58 }
 0x289   : > { %2718 = vmatpush1.bf16.msra.mxu1 %v14513_v59  ;;  %3290 = vmatprep.subr.bf16.mxu0 %v14447_v18 }
 0x28a   : > { %3333 = vmatprep.subr.bf16.mxu1 %v14449_v19 }
 0x32e   : > { %v2065_v1 = vpop.f32.mrb[4].mxu0  ;;  %v2108_v2 = vpop.f32.mrb[4].mxu1 }
 0x32f   : > { %v12257_v4 = vadd.f32 %v2065_v1, %v14323_v35  ;;  %v2067_v5 = vpop.f32.mrb[5].mxu0  ;;  %v2110_v6 = vpop.f32.mrb[5].mxu1  ;;  %v12321_v18 = vadd.f32 %v2108_v2, %v14335_v56 }
 0x330   : > { %v12258_v7 = vadd.f32 %v2067_v5, %v14325_v36  ;;  %v2069_v8 = vpop.f32.mrb[6].mxu0  ;;  %v2112_v31 = vpop.f32.mrb[6].mxu1  ;;  %v12322_v17 = vadd.f32 %v2110_v6, %v14332_v52 }
 0x331   : > { %v11572_v9 = vmul.f32 -1.442695, %v12257_v4  ;;  %v12259_v10 = vadd.f32 %v2069_v8, %v14323_v35  ;;  %v2071_v11 = vpop.f32.mrb[7].mxu0  ;;  %v2114_v12 = vpop.f32.mrb[7].mxu1  ;;  %v12323_v41 = vadd.f32 %v2112_v31, %v14335_v56 }
 0x332   : > { %v11574_v13 = vmul.f32 -1.442695, %v12258_v7  ;;  %v12260_v14 = vadd.f32 %v2071_v11, %v14325_v36  ;;  %v11576_v19 = vmul.f32 -1.442695, %v12322_v17  ;;  %v12324_v40 = vadd.f32 %v2114_v12, %v14332_v52  ;;  %v2187_v17 = vpop.permute.xlu1 %2186 }
 0x333   : > { %13117 = vpow2.f32 %v11572_v9  ;;  %v11573_v15 = vmul.f32 -1.442695, %v12259_v10  ;;  %vm2191_vm11 = vcmp.eq.s32.totalorder %v2187_v17, 1 }
 0x334   : > { %13119 = vpow2.f32 %v11574_v13  ;;  %v11575_v16 = vmul.f32 -1.442695, %v12260_v14  ;;  %v11577_v46 = vmul.f32 -1.442695, %v12324_v40 }
 0x335   : > { %13121 = vpow2.f32 %v11573_v15 }
 0x336   : > { %13123 = vpow2.f32 %v11575_v16 }
 0x337   : > { %13125 = vtanh.f32 %v12321_v18 }
 0x338   : > { %13127 = vpow2.f32 %v11576_v19 }
 0x339   : > { %13129 = vtanh.f32 %v12323_v41 }
 0x33d   : > { %v13118_v43 = vpop.eup %13117 }
 0x33e   : > { %v13120_v44 = vpop.eup %13119  ;;  %v2131_v45 = vadd.f32 1.0, %v13118_v43 }
 0x33f   : > { %v2143_v47 = vadd.f32 1.0, %v13120_v44  ;;  %v13122_v48 = vpop.eup %13121 }
 0x340   : > { %13131 = vrcp.f32 %v2131_v45  ;;  %v2132_v60 = vadd.f32 1.0, %v13122_v48  ;;  %v13124_v63 = vpop.eup %13123 }
 0x341   : > { %13133 = vrcp.f32 %v2143_v47  ;;  %v2144_v0 = vadd.f32 1.0, %v13124_v63  ;;  %v13126_v1 = vpop.eup %13125 }
 0x342   : > { %13135 = vpow2.f32 %v11577_v46  ;;  %v13128_v2 = vpop.eup %13127 }
 0x343   : > { %13137 = vrcp.f32 %v2132_v60  ;;  %v13130_v4 = vpop.eup %13129  ;;  %v2157_v10 = vadd.f32 1.0, %v13128_v2 }
 0x344   : > { %13139 = vrcp.f32 %v2144_v0 }
 0x34a   : > { %v13132_v5 = vpop.eup %13131 }
 0x34b   : > { %v13134_v6 = vpop.eup %13133  ;;  %v2167_v7 = vmul.f32 %v13132_v5, %v13126_v1 }
 0x34c   : > { %v13136_v8 = vpop.eup %13135  ;;  %v2165_v31 = vmul.f32 %v13134_v6, %v14341_v21  ;;  %v2190_v21 = vpop.permute.xlu1 %2189 }
 0x34d   : > { %v13138_v9 = vpop.eup %13137  ;;  %v2158_v14 = vadd.f32 1.0, %v13136_v8  ;;  %vm2192_vm12 = vcmp.eq.s32.totalorder %v2190_v21, 1 }
 0x34e   : > { %v2168_v11 = vmul.f32 %v13138_v9, %v13130_v4  ;;  %v14539_v12 = vadd.f32 %v2167_v7, %v2165_v31  ;;  %v13140_v13 = vpop.eup %13139 }
 0x34f   : > { %v2166_v15 = vmul.f32 %v13140_v13, %v14344_v25 }
 0x350   : > { %13141 = vtanh.f32 %v14539_v12 }
 0x351   : > { %13143 = vrcp.f32 %v2157_v10  ;;  %v14543_v16 = vadd.f32 %v2168_v11, %v2166_v15 }
 0x352   : > { %13145 = vrcp.f32 %v2158_v14 }
 0x353   : > { %13147 = vtanh.f32 %v14543_v16 }
 0x35a   : > { %v13142_v18 = vpop.eup %13141 }
 0x35b   : > { %v13144_v19 = vpop.eup %13143 }
 0x35c   : > { %v13146_v40 = vpop.eup %13145  ;;  %v2173_v41 = vmul.f32 %v13144_v19, %v13142_v18 }
 0x35d   : > { %v13148_v43 = vpop.eup %13147 }
 0x35e   : > { %v2174_v44 = vmul.f32 %v13148_v43, %v13146_v40  ;;  %v2193_v45 = vsel %vm2191_vm11, %v2173_v41, 0.0  ;;  %vm3665_vm11 = vsmask.f32 7942 }
 0x360   : > { %v2194_v25 = vsel %vm2192_vm12, %v2174_v44, 0.0  ;;  %v2467_v46 = vpack.c.bf16 %v2174_v44, %v2173_v41  ;;  %vm14935_vm12 = vmand %vm3035_vm3, %vm3665_vm11 }
 0x361   : > { %v2195_v47 = vpack.c.bf16 %v2194_v25, %v2193_v45  ;;  %v11578_v48 = vpack.c.bf16 %v2194_v25, %v2194_v25 }
 0x362   : > { %2693 = vmatmul.mubr.bf16.vlgmr.msra.gmra.mrb[8].mxu0 %v2467_v46  ;;  %2736 = vmatmul.mubr.bf16.vlgmr.msra.gmra.mrb[8].mxu1 %v2467_v46 }
 0x363   : > { %v2204_v60 = vrot.slane %v2195_v47, %v14348_v42  ;;  %v2211_v63 = vrot.slane %v11578_v48, %v14348_v42  ;;  %3291 = vmatpush1.bf16.msra.mxu0 %v14451_v20  ;;  %3334 = vmatpush1.bf16.msra.mxu1 %v14453_v22 }
 0x364   : > { %3292 = vmatprep.subr.bf16.mxu0 %v14459_v24  ;;  %3335 = vmatprep.subr.bf16.mxu1 %v14461_v26 }
 0x365   : > { %v2212_v0 = vcombine.high %v2204_v60, %v2204_v60  ;;  %v2213_v1 = vcombine.high %v2211_v63, %v2211_v63  ;;  %v2220_v2 = vrot.slane %v2204_v60, %v14348_v42  ;;  %v2227_v4 = vrot.slane %v2211_v63, %v14348_v42  ;;  %3322 = vmatprep.mubr.bf16.mxu0 %v17063_v3 }
 0x366   : > { %3365 = vmatprep.mubr.bf16.mxu1 %v17063_v3 }
 0x367   : > { %v2234_v5 = vrot.slane %v2212_v0, %v14348_v42  ;;  %v2241_v20 = vrot.slane %v2213_v1, %v14348_v42  ;;  %v2242_v22 = vcombine.high %v2220_v2, %v2220_v2  ;;  %v2243_v6 = vcombine.high %v2227_v4, %v2227_v4  ;;  %3293 = vmatpush1.bf16.msra.mxu0 %v14463_v27 }
 0x368   : > { %v2247_v24 = vunpack.i.h.s16 %v2220_v2  ;;  %v2255_v26 = vunpack.i.h.s16 %v2227_v4  ;;  %v11579_v7 = vpack.i.b16 %v2220_v2, %v2220_v2  ;;  %v11583_v8 = vpack.i.b16 %v2227_v4, %v2227_v4  ;;  %3336 = vmatpush1.bf16.msra.mxu1 %v14465_v28  ;;  %3294 = vmatprep.subr.bf16.mxu0 %v14473_v30  ;;  %v2408_v4 = vld [vmem:[%s14117_s28] sm:$0x1] }
 0x369   : > { %v2244_v31 = vcombine.high %v2234_v5, %v2234_v5  ;;  %v2245_v9 = vcombine.high %v2241_v20, %v2241_v20  ;;  %v2249_v10 = vunpack.i.h.s16 %v2234_v5  ;;  %v2251_v11 = vunpack.i.h.s16 %v2242_v22  ;;  %3337 = vmatprep.subr.bf16.mxu1 %v14477_v33 }
 0x36a   : > { %v2257_v13 = vunpack.i.h.s16 %v2241_v20  ;;  %v2259_v14 = vunpack.i.h.s16 %v2243_v6  ;;  %v2263_v15 = vpack.i.b16 %v2247_v24, %v2247_v24  ;;  %v11580_v17 = vpack.i.b16 %v2234_v5, %v2234_v5  ;;  %v2411_v5 = vld [vmem:[%s14117_s28 + $0x8] sm:$0x1]  ;;  %v2414_v24 = vld [vmem:[%s14117_s28 + $0x10] sm:$0x1] }
 0x36b   : > { %v2253_v18 = vunpack.i.h.s16 %v2244_v31  ;;  %v2261_v27 = vunpack.i.h.s16 %v2245_v9  ;;  %v2265_v21 = vpack.i.b16 %v2249_v10, %v2249_v10  ;;  %v11581_v19 = vpack.i.b16 %v2242_v22, %v2242_v22  ;;  %3295 = vmatpush1.bf16.msra.mxu0 %v14471_v29  ;;  %v2423_v10 = vld [vmem:[%s14117_s28 + $0x28] sm:$0x1] }
 0x36c   : > { %v2267_v40 = vpack.i.b16 %v2251_v11, %v2251_v11  ;;  %v11582_v28 = vpack.i.b16 %v2244_v31, %v2244_v31  ;;  %v2271_v41 = vpack.i.b16 %v2255_v26, %v2255_v26  ;;  %v11584_v30 = vpack.i.b16 %v2241_v20, %v2241_v20  ;;  %3338 = vmatpush1.bf16.msra.mxu1 %v14475_v32  ;;  %v2417_v26 = vld [vmem:[%s14117_s28 + $0x18] sm:$0x1]  ;;  %v2426_v11 = vld [vmem:[%s14117_s28 + $0x30] sm:$0x1] }
 0x36d   : > { %v2269_v43 = vpack.i.b16 %v2253_v18, %v2253_v18  ;;  %v14564_v44 = vpack.i.b16 %v2257_v13, %v2257_v13  ;;  %v11585_v33 = vpack.i.b16 %v2243_v6, %v2243_v6  ;;  %v14566_v45 = vpack.i.b16 %v2259_v14, %v2259_v14  ;;  %3296 = vmatprep.subr.bf16.mxu0 %v14479_v34  ;;  %v2429_v13 = vld [vmem:[%s14117_s28 + $0x38] sm:$0x1] }
 0x36e   : > { %v11586_v25 = vpack.i.b16 %v2245_v9, %v2245_v9  ;;  %v14569_v46 = vpack.i.b16 %v2261_v27, %v2261_v27  ;;  %v2284_v29 = vrot.slane %v11579_v7, %v14357_v57  ;;  %v2291_v47 = vrot.slane %v2263_v15, %v14357_v57  ;;  %3339 = vmatprep.subr.bf16.mxu1 %v14482_v37  ;;  %v2420_v7 = vld [vmem:[%s14117_s28 + $0x20] sm:$0x1] }
 0x36f   : > { %v17116_v32 = vmov 0  ;;  %v2298_v48 = vrot.slane %v11580_v17, %v14357_v57  ;;  %v2305_v34 = vrot.slane %v2265_v21, %v14357_v57  ;;  %v2312_v60 = vrot.slane %v11581_v19, %v14357_v57  ;;  %3297 = vmatpush1.bf16.msra.mxu0 %v14486_v38  ;;  %v2432_v27 = vld [vmem:[%s14117_s28 + $0x40] sm:$0x1]  ;;  %v2435_v21 = vld [vmem:[%s14117_s28 + $0x48] sm:$0x1] }
 0x370   : > { %v17117_v32 = vsel %vm14576_vm14, 4294967295, %v17116_v32  ;;  %v2319_v63 = vrot.slane %v2267_v40, %v14357_v57  ;;  %v2326_v37 = vrot.slane %v11582_v28, %v14357_v57  ;;  %v2333_v0 = vrot.slane %v2269_v43, %v14357_v57  ;;  %3340 = vmatpush1.bf16.msra.mxu1 %v14490_v39  ;;  %v2438_v19 = vld [vmem:[%s14117_s28 + $0x50] sm:$0x1]  ;;  %v2441_v43 = vld [vmem:[%s14117_s28 + $0x58] sm:$0x1] }
 0x371   : > { %17118 = vst [vmem:[#allocation24_spill] sm:$0xff] %v17117_v32  ;;  %v2340_v1 = vrot.slane %v11583_v8, %v14357_v57  ;;  %v2347_v2 = vrot.slane %v2271_v41, %v14357_v57  ;;  %v2354_v20 = vrot.slane %v11584_v30, %v14357_v57  ;;  %v2361_v38 = vrot.slane %v14564_v44, %v14357_v57  ;;  %v2444_v44 = vld [vmem:[%s14117_s28 + $0x60] sm:$0x1] }
 0x372   : > { %v2368_v22 = vrot.slane %v11585_v33, %v14357_v57  ;;  %v2375_v6 = vrot.slane %v14566_v45, %v14357_v57  ;;  %v2382_v8 = vrot.slane %v11586_v25, %v14357_v57  ;;  %v2389_v39 = vrot.slane %v14569_v46, %v14357_v57  ;;  %v2447_v33 = vld [vmem:[%s14117_s28 + $0x68] sm:$0x1] }
 0x373   : > { %v2409_v31 = vsel %vm14576_vm14, %v2284_v29, %v2408_v4  ;;  %v2412_v9 = vsel %vm14576_vm14, %v2291_v47, %v2411_v5  ;;  %v2415_v14 = vsel %vm14576_vm14, %v2298_v48, %v2414_v24  ;;  %v2418_v15 = vsel %vm14576_vm14, %v2305_v34, %v2417_v26  ;;  %v2450_v47 = vld [vmem:[%s14117_s28 + $0x70] sm:$0x1]  ;;  %v2453_v48 = vld [vmem:[%s14117_s28 + $0x78] sm:$0x1]  ;;  %v14679_v5 = vld [vmem:[#allocation11 + $0xa0] ss:$16 sps:$4 sm:$0xff]  }
 0x374   : > { %2410 = vst [vmem:[%s14117_s28] sm:$0x1] %v2409_v31  ;;  %2413 = vst [vmem:[%s14117_s28 + $0x8] sm:$0x1] %v2412_v9  ;;  %v2421_v17 = vsel %vm14576_vm14, %v2312_v60, %v2420_v7  ;;  %v2424_v18 = vsel %vm14576_vm14, %v2319_v63, %v2423_v10  ;;  %v2427_v40 = vsel %vm14576_vm14, %v2326_v37, %v2426_v11  ;;  %v14663_v63 = vld [vmem:[#allocation11 + $0x80] ss:$16 sps:$4 sm:$0xff]  }
 0x375   : > { %2416 = vst [vmem:[%s14117_s28 + $0x10] sm:$0x1] %v2415_v14  ;;  %2419 = vst [vmem:[%s14117_s28 + $0x18] sm:$0x1] %v2418_v15  ;;  %v2430_v28 = vsel %vm14576_vm14, %v2333_v0, %v2429_v13  ;;  %v2433_v41 = vsel %vm14576_vm14, %v2340_v1, %v2432_v27  ;;  %v2436_v30 = vsel %vm14576_vm14, %v2347_v2, %v2435_v21  ;;  %v14665_v37 = vld [vmem:[#allocation11 + $0x84] ss:$16 sps:$4 sm:$0xff]  }
 0x376   : > { %2422 = vst [vmem:[%s14117_s28 + $0x20] sm:$0x1] %v2421_v17  ;;  %2425 = vst [vmem:[%s14117_s28 + $0x28] sm:$0x1] %v2424_v18  ;;  %v2439_v45 = vsel %vm14576_vm14, %v2354_v20, %v2438_v19  ;;  %v2442_v25 = vsel %vm14576_vm14, %v2361_v38, %v2441_v43  ;;  %v2445_v46 = vsel %vm14576_vm14, %v2368_v22, %v2444_v44  ;;  %v14667_v0 = vld [vmem:[#allocation11 + $0x88] ss:$16 sps:$4 sm:$0xff]   ;;  %3298 = vmatprep.subr.bf16.mxu0 %v14665_v37 }
 0x377   : > { %2428 = vst [vmem:[%s14117_s28 + $0x30] sm:$0x1] %v2427_v40  ;;  %2431 = vst [vmem:[%s14117_s28 + $0x38] sm:$0x1] %v2430_v28  ;;  %v2448_v29 = vsel %vm14576_vm14, %v2375_v6, %v2447_v33  ;;  %v2451_v34 = vsel %vm14576_vm14, %v2382_v8, %v2450_v47  ;;  %v2454_v60 = vsel %vm14576_vm14, %v2389_v39, %v2453_v48  ;;  %v14669_v1 = vld [vmem:[#allocation11 + $0x8c] ss:$16 sps:$4 sm:$0xff]   ;;  %3299 = vmatpush1.bf16.msra.mxu0 %v14663_v63 }
 0x378   : > { %2434 = vst [vmem:[%s14117_s28 + $0x40] sm:$0x1] %v2433_v41  ;;  %2437 = vst [vmem:[%s14117_s28 + $0x48] sm:$0x1] %v2436_v30  ;;  %3341 = vmatprep.subr.bf16.mxu1 %v14669_v1  ;;  %v14675_v2 = vld [vmem:[#allocation11 + $0xa4] ss:$16 sps:$4 sm:$0xff]   ;;  %v3439_v38 = vstv %s3438_s25 }
 0x379   : > { %2440 = vst [vmem:[%s14117_s28 + $0x50] sm:$0x1] %v2439_v45  ;;  %2443 = vst [vmem:[%s14117_s28 + $0x58] sm:$0x1] %v2442_v25  ;;  %3342 = vmatpush1.bf16.msra.mxu1 %v14667_v0  ;;  %v14677_v4 = vld [vmem:[#allocation11 + $0xac] ss:$16 sps:$4 sm:$0xff]   ;;  %3300 = vmatprep.subr.bf16.mxu0 %v14675_v2  ;;  %vm3440_vm15 = vcmp.gt.s32.totalorder %v14522_v61, %v3439_v38  ;;  %vm3441_vm0 = vcmp.gt.s32.totalorder %v14525_v62, %v3439_v38 }
 0x37a   : > { %2446 = vst [vmem:[%s14117_s28 + $0x60] sm:$0x1] %v2445_v46  ;;  %2449 = vst [vmem:[%s14117_s28 + $0x68] sm:$0x1] %v2448_v29  ;;  %v14681_v20 = vld [vmem:[#allocation11 + $0xa8] ss:$16 sps:$4 sm:$0xff]   ;;  %3343 = vmatprep.subr.bf16.mxu1 %v14677_v4 }
 0x37b   : > { %2452 = vst [vmem:[%s14117_s28 + $0x70] sm:$0x1] %v2451_v34  ;;  %2455 = vst [vmem:[%s14117_s28 + $0x78] sm:$0x1] %v2454_v60  ;;  %3301 = vmatpush1.bf16.msra.mxu0 %v14679_v5 }
 0x37c   : > { %3302 = vmatprep.subr.bf16.mxu0 %v14495_v49  ;;  %v3442_v49 = vsel %vm3440_vm15, 1, %v17063_v3 }
 0x37d   : > { %3344 = vmatpush1.bf16.msra.mxu1 %v14681_v20  ;;  %3445 = vperm.xlu0 %12635, %v3442_v49  }
 0x37e   : > { %3345 = vmatprep.subr.bf16.mxu1 %v14497_v50  ;;  %v3443_v50 = vsel %vm3441_vm0, 1, %v17063_v3 }
 0x37f   : > { %3303 = vmatpush1.bf16.msra.mxu0 %v14499_v51  ;;  %3448 = vperm.xlu1 %12636, %v3443_v50  }
 0x380   : > { %3304 = vmatprep.subr.bf16.mxu0 %v14507_v54 }
 0x381   : > { %3346 = vmatpush1.bf16.msra.mxu1 %v14501_v53 }
 0x382   : > { %3347 = vmatprep.subr.bf16.mxu1 %v14509_v55 }
 0x383   : > { %3305 = vmatpush1.bf16.msra.mxu0 %v14511_v58 }
 0x385   : > { %3348 = vmatpush1.bf16.msra.mxu1 %v14513_v59 }
 0x435   : > { %v2694_v51 = vpop.f32.mrb[8].mxu0  ;;  %v2737_v53 = vpop.f32.mrb[8].mxu1 }
 0x436   : > { %v12261_v54 = vadd.f32 %v2694_v51, %v14323_v35  ;;  %v2696_v55 = vpop.f32.mrb[9].mxu0  ;;  %v2739_v58 = vpop.f32.mrb[9].mxu1  ;;  %v12325_v13 = vadd.f32 %v2737_v53, %v14335_v56 }
 0x437   : > { %v12262_v59 = vadd.f32 %v2696_v55, %v14325_v36  ;;  %v2698_v22 = vpop.f32.mrb[10].mxu0  ;;  %v2741_v6 = vpop.f32.mrb[10].mxu1  ;;  %v12326_v11 = vadd.f32 %v2739_v58, %v14332_v52 }
 0x438   : > { %v11619_v24 = vmul.f32 -1.442695, %v12261_v54  ;;  %v12263_v26 = vadd.f32 %v2698_v22, %v14323_v35  ;;  %v2700_v7 = vpop.f32.mrb[11].mxu0  ;;  %v2743_v8 = vpop.f32.mrb[11].mxu1  ;;  %v12327_v17 = vadd.f32 %v2741_v6, %v14335_v56 }
 0x439   : > { %v11621_v39 = vmul.f32 -1.442695, %v12262_v59  ;;  %v12264_v31 = vadd.f32 %v2700_v7, %v14325_v36  ;;  %v11623_v14 = vmul.f32 -1.442695, %v12326_v11  ;;  %v12328_v15 = vadd.f32 %v2743_v8, %v14332_v52  ;;  %v2816_v58 = vpop.permute.xlu0 %2815 }
 0x43a   : > { %13149 = vpow2.f32 %v11619_v24  ;;  %v11620_v9 = vmul.f32 -1.442695, %v12263_v26  ;;  %vm2820_vm1 = vcmp.eq.s32.totalorder %v2816_v58, 1 }
 0x43b   : > { %13151 = vpow2.f32 %v11621_v39  ;;  %v11622_v10 = vmul.f32 -1.442695, %v12264_v31  ;;  %v11624_v19 = vmul.f32 -1.442695, %v12328_v15 }
 0x43c   : > { %13153 = vpow2.f32 %v11620_v9 }
 0x43d   : > { %13155 = vpow2.f32 %v11622_v10 }
 0x43e   : > { %13157 = vtanh.f32 %v12325_v13 }
 0x43f   : > { %13159 = vpow2.f32 %v11623_v14 }
 0x440   : > { %13161 = vtanh.f32 %v12327_v17 }
 0x444   : > { %v13150_v18 = vpop.eup %13149 }
 0x445   : > { %v13152_v27 = vpop.eup %13151  ;;  %v2760_v21 = vadd.f32 1.0, %v13150_v18 }
 0x446   : > { %v2772_v40 = vadd.f32 1.0, %v13152_v27  ;;  %v13154_v28 = vpop.eup %13153 }
 0x447   : > { %13163 = vrcp.f32 %v2760_v21  ;;  %v2761_v41 = vadd.f32 1.0, %v13154_v28  ;;  %v13156_v30 = vpop.eup %13155 }
 0x448   : > { %13165 = vrcp.f32 %v2772_v40  ;;  %v2773_v43 = vadd.f32 1.0, %v13156_v30  ;;  %v13158_v44 = vpop.eup %13157 }
 0x449   : > { %13167 = vpow2.f32 %v11624_v19  ;;  %v13160_v33 = vpop.eup %13159 }
 0x44a   : > { %13169 = vrcp.f32 %v2761_v41  ;;  %v13162_v45 = vpop.eup %13161  ;;  %v2786_v60 = vadd.f32 1.0, %v13160_v33 }
 0x44b   : > { %13171 = vrcp.f32 %v2773_v43 }
 0x451   : > { %v13164_v25 = vpop.eup %13163 }
 0x452   : > { %v13166_v46 = vpop.eup %13165  ;;  %v2796_v29 = vmul.f32 %v13164_v25, %v13158_v44 }
 0x453   : > { %v13168_v47 = vpop.eup %13167  ;;  %v2794_v48 = vmul.f32 %v13166_v46, %v14539_v12  ;;  %v2819_v12 = vpop.permute.xlu1 %2818 }
 0x454   : > { %v13170_v34 = vpop.eup %13169  ;;  %v2787_v51 = vadd.f32 1.0, %v13168_v47  ;;  %vm2821_vm2 = vcmp.eq.s32.totalorder %v2819_v12, 1 }
 0x455   : > { %v2797_v38 = vmul.f32 %v13170_v34, %v13162_v45  ;;  %v14709_v49 = vadd.f32 %v2796_v29, %v2794_v48  ;;  %v13172_v50 = vpop.eup %13171 }
 0x456   : > { %v2795_v53 = vmul.f32 %v13172_v50, %v14543_v16 }
 0x457   : > { %13173 = vtanh.f32 %v14709_v49 }
 0x458   : > { %13175 = vrcp.f32 %v2786_v60  ;;  %v14713_v54 = vadd.f32 %v2797_v38, %v2795_v53 }
 0x459   : > { %13177 = vrcp.f32 %v2787_v51 }
 0x45a   : > { %13179 = vtanh.f32 %v14713_v54 }
 0x461   : > { %v13174_v55 = vpop.eup %13173 }
 0x462   : > { %v13176_v59 = vpop.eup %13175 }
 0x463   : > { %v13178_v22 = vpop.eup %13177  ;;  %v2802_v6 = vmul.f32 %v13176_v59, %v13174_v55 }
 0x464   : > { %v13180_v24 = vpop.eup %13179 }
 0x465   : > { %v2803_v26 = vmul.f32 %v13180_v24, %v13178_v22  ;;  %v2822_v7 = vsel %vm2820_vm1, %v2802_v6, 0.0  ;;  %v17119_v22 = vmov 0  ;;  %v3041_v24 = vld [vmem:[%s14117_s28 + $0x8] sm:$0x2] }
 0x466   : > { %v17120_v22 = vsel %vm14726_vm5, 4294967295, %v17119_v22 }
 0x467   : > { %v2823_v16 = vsel %vm2821_vm2, %v2803_v26, 0.0  ;;  %v3097_v8 = vpack.c.bf16 %v2803_v26, %v2802_v6  ;;  %17121 = vst [vmem:[#allocation25_spill] sm:$0xff] %v17120_v22  ;;  %v3038_v6 = vld [vmem:[%s14117_s28] sm:$0x2] }
 0x468   : > { %v2824_v39 = vpack.c.bf16 %v2823_v16, %v2822_v7  ;;  %v11625_v31 = vpack.c.bf16 %v2823_v16, %v2823_v16 }
 0x469   : > { %3323 = vmatmul.mubr.bf16.vlgmr.msra.gmra.mrb[12].mxu0 %v3097_v8  ;;  %3366 = vmatmul.mubr.bf16.vlgmr.msra.gmra.mrb[12].mxu1 %v3097_v8 }
 0x46a   : > { %v2833_v9 = vrot.slane %v2824_v39, %v14348_v42  ;;  %v2840_v10 = vrot.slane %v11625_v31, %v14348_v42  ;;  %3951 = vmatprep.mubr.bf16.mxu0 %v17063_v3  ;;  %3994 = vmatprep.mubr.bf16.mxu1 %v17063_v3  ;;  %v3044_v39 = vld [vmem:[%s14117_s28 + $0x10] sm:$0x2]  ;;  %v3047_v31 = vld [vmem:[%s14117_s28 + $0x18] sm:$0x2] }
 0x46c   : > { %v2841_v11 = vcombine.high %v2833_v9, %v2833_v9  ;;  %v2842_v13 = vcombine.high %v2840_v10, %v2840_v10  ;;  %v2849_v14 = vrot.slane %v2833_v9, %v14348_v42  ;;  %v2856_v15 = vrot.slane %v2840_v10, %v14348_v42  ;;  %v3050_v9 = vld [vmem:[%s14117_s28 + $0x20] sm:$0x2] }
 0x46e   : > { %v2863_v17 = vrot.slane %v2841_v11, %v14348_v42  ;;  %v2870_v18 = vrot.slane %v2842_v13, %v14348_v42  ;;  %v2871_v27 = vcombine.high %v2849_v14, %v2849_v14  ;;  %v2872_v21 = vcombine.high %v2856_v15, %v2856_v15 }
 0x46f   : > { %v2876_v19 = vunpack.i.h.s16 %v2849_v14  ;;  %v2884_v40 = vunpack.i.h.s16 %v2856_v15  ;;  %v11626_v28 = vpack.i.b16 %v2849_v14, %v2849_v14  ;;  %v11630_v41 = vpack.i.b16 %v2856_v15, %v2856_v15  ;;  %v3053_v15 = vld [vmem:[%s14117_s28 + $0x28] sm:$0x2] }
 0x470   : > { %v2873_v30 = vcombine.high %v2863_v17, %v2863_v17  ;;  %v2874_v43 = vcombine.high %v2870_v18, %v2870_v18  ;;  %v2878_v44 = vunpack.i.h.s16 %v2863_v17  ;;  %v2880_v33 = vunpack.i.h.s16 %v2871_v27 }
 0x471   : > { %v2886_v45 = vunpack.i.h.s16 %v2870_v18  ;;  %v2888_v25 = vunpack.i.h.s16 %v2872_v21  ;;  %v2892_v46 = vpack.i.b16 %v2876_v19, %v2876_v19  ;;  %v11627_v29 = vpack.i.b16 %v2863_v17, %v2863_v17  ;;  %v3056_v17 = vld [vmem:[%s14117_s28 + $0x30] sm:$0x2] }
 0x472   : > { %v2882_v47 = vunpack.i.h.s16 %v2873_v30  ;;  %v2890_v48 = vunpack.i.h.s16 %v2874_v43  ;;  %v2894_v34 = vpack.i.b16 %v2878_v44, %v2878_v44  ;;  %v11628_v60 = vpack.i.b16 %v2871_v27, %v2871_v27 }
 0x473   : > { %v2896_v38 = vpack.i.b16 %v2880_v33, %v2880_v33  ;;  %v11629_v50 = vpack.i.b16 %v2873_v30, %v2873_v30  ;;  %v2900_v51 = vpack.i.b16 %v2884_v40, %v2884_v40  ;;  %v11631_v53 = vpack.i.b16 %v2870_v18, %v2870_v18  ;;  %v3059_v18 = vld [vmem:[%s14117_s28 + $0x38] sm:$0x2]  ;;  %v3065_v30 = vld [vmem:[%s14117_s28 + $0x48] sm:$0x2] }
 0x474   : > { %v2898_v55 = vpack.i.b16 %v2882_v47, %v2882_v47  ;;  %v2902_v58 = vpack.i.b16 %v2886_v45, %v2886_v45  ;;  %v11632_v12 = vpack.i.b16 %v2872_v21, %v2872_v21  ;;  %v2904_v59 = vpack.i.b16 %v2888_v25, %v2888_v25 }
 0x475   : > { %v11633_v26 = vpack.i.b16 %v2874_v43, %v2874_v43  ;;  %v2906_v7 = vpack.i.b16 %v2890_v48, %v2890_v48  ;;  %v2913_v16 = vrot.slane %v11626_v28, %v14357_v57  ;;  %v2920_v8 = vrot.slane %v2892_v46, %v14357_v57  ;;  %v3062_v28 = vld [vmem:[%s14117_s28 + $0x40] sm:$0x2]  ;;  %v3068_v43 = vld [vmem:[%s14117_s28 + $0x50] sm:$0x2]  ;;  %v3071_v46 = vld [vmem:[%s14117_s28 + $0x58] sm:$0x2] }
 0x476   : > { %v2927_v10 = vrot.slane %v11627_v29, %v14357_v57  ;;  %v2934_v11 = vrot.slane %v2894_v34, %v14357_v57  ;;  %v2941_v13 = vrot.slane %v11628_v60, %v14357_v57  ;;  %v2948_v14 = vrot.slane %v2896_v38, %v14357_v57  ;;  %v3077_v29 = vld [vmem:[%s14117_s28 + $0x68] sm:$0x2]  ;;  %v3080_v38 = vld [vmem:[%s14117_s28 + $0x70] sm:$0x2] }
 0x477   : > { %v2955_v27 = vrot.slane %v11629_v50, %v14357_v57  ;;  %v2962_v21 = vrot.slane %v2898_v55, %v14357_v57  ;;  %v2969_v19 = vrot.slane %v11630_v41, %v14357_v57  ;;  %v2976_v40 = vrot.slane %v2900_v51, %v14357_v57  ;;  %v3074_v41 = vld [vmem:[%s14117_s28 + $0x60] sm:$0x2]  ;;  %v3083_v50 = vld [vmem:[%s14117_s28 + $0x78] sm:$0x2] }
 0x478   : > { %v2983_v44 = vrot.slane %v11631_v53, %v14357_v57  ;;  %v2990_v33 = vrot.slane %v2902_v58, %v14357_v57  ;;  %v2997_v45 = vrot.slane %v11632_v12, %v14357_v57  ;;  %v3004_v25 = vrot.slane %v2904_v59, %v14357_v57 }
 0x479   : > { %v3011_v47 = vrot.slane %v11633_v26, %v14357_v57  ;;  %v3018_v48 = vrot.slane %v2906_v7, %v14357_v57  ;;  %v3039_v34 = vsel %vm14726_vm5, %v2913_v16, %v3038_v6  ;;  %v3042_v60 = vsel %vm14726_vm5, %v2920_v8, %v3041_v24 }
 0x47a   : > { %3040 = vst [vmem:[%s14117_s28] sm:$0x2] %v3039_v34  ;;  %3043 = vst [vmem:[%s14117_s28 + $0x8] sm:$0x2] %v3042_v60  ;;  %v3045_v51 = vsel %vm14726_vm5, %v2927_v10, %v3044_v39  ;;  %v3048_v53 = vsel %vm14726_vm5, %v2934_v11, %v3047_v31  ;;  %v3051_v55 = vsel %vm14726_vm5, %v2941_v13, %v3050_v9  ;;  %v12799_v9 = vld [vmem:[#allocation11 + $0x4] ss:$16 sps:$4 sm:$0xff]  }
 0x47b   : > { %v3054_v58 = vsel %vm14726_vm5, %v2948_v14, %v3053_v15  ;;  %3046 = vst [vmem:[%s14117_s28 + $0x10] sm:$0x2] %v3045_v51  ;;  %3049 = vst [vmem:[%s14117_s28 + $0x18] sm:$0x2] %v3048_v53  ;;  %v3057_v12 = vsel %vm14726_vm5, %v2955_v27, %v3056_v17  ;;  %v3060_v59 = vsel %vm14726_vm5, %v2962_v21, %v3059_v18  ;;  %v12802_v10 = vld [vmem:[#allocation11 + $0xc] ss:$16 sps:$4 sm:$0xff]   ;;  %3919 = vmatprep.subr.bf16.mxu0 %v12799_v9 }
 0x47c   : > { %3052 = vst [vmem:[%s14117_s28 + $0x20] sm:$0x2] %v3051_v55  ;;  %3055 = vst [vmem:[%s14117_s28 + $0x28] sm:$0x2] %v3054_v58  ;;  %v3063_v6 = vsel %vm14726_vm5, %v2969_v19, %v3062_v28  ;;  %v3066_v24 = vsel %vm14726_vm5, %v2976_v40, %v3065_v30  ;;  %v3069_v26 = vsel %vm14726_vm5, %v2983_v44, %v3068_v43  ;;  %v14810_v11 = vld [vmem:[#allocation11] ss:$16 sps:$4 sm:$0xff]   ;;  %3962 = vmatprep.subr.bf16.mxu1 %v12802_v10 }
 0x47d   : > { %3058 = vst [vmem:[%s14117_s28 + $0x30] sm:$0x2] %v3057_v12  ;;  %3061 = vst [vmem:[%s14117_s28 + $0x38] sm:$0x2] %v3060_v59  ;;  %v3072_v7 = vsel %vm14726_vm5, %v2990_v33, %v3071_v46  ;;  %v3075_v16 = vsel %vm14726_vm5, %v2997_v45, %v3074_v41  ;;  %v3078_v8 = vsel %vm14726_vm5, %v3004_v25, %v3077_v29  ;;  %v14812_v13 = vld [vmem:[#allocation11 + $0x8] ss:$16 sps:$4 sm:$0xff]   ;;  %3920 = vmatpush1.bf16.msra.mxu0 %v14810_v11 }
 0x47e   : > { %3064 = vst [vmem:[%s14117_s28 + $0x40] sm:$0x2] %v3063_v6  ;;  %3067 = vst [vmem:[%s14117_s28 + $0x48] sm:$0x2] %v3066_v24  ;;  %v3081_v39 = vsel %vm14726_vm5, %v3011_v47, %v3080_v38  ;;  %v3084_v31 = vsel %vm14726_vm5, %v3018_v48, %v3083_v50  ;;  %3963 = vmatpush1.bf16.msra.mxu1 %v14812_v13  ;;  %v14816_v14 = vld [vmem:[#allocation11 + $0x24] ss:$16 sps:$4 sm:$0xff]  }
 0x47f   : > { %3070 = vst [vmem:[%s14117_s28 + $0x50] sm:$0x2] %v3069_v26  ;;  %3073 = vst [vmem:[%s14117_s28 + $0x58] sm:$0x2] %v3072_v7  ;;  %v14818_v15 = vld [vmem:[#allocation11 + $0x2c] ss:$16 sps:$4 sm:$0xff]   ;;  %3921 = vmatprep.subr.bf16.mxu0 %v14816_v14 }
 0x480   : > { %3076 = vst [vmem:[%s14117_s28 + $0x60] sm:$0x2] %v3075_v16  ;;  %3079 = vst [vmem:[%s14117_s28 + $0x68] sm:$0x2] %v3078_v8  ;;  %v14820_v17 = vld [vmem:[#allocation11 + $0x20] ss:$16 sps:$4 sm:$0xff]   ;;  %3964 = vmatprep.subr.bf16.mxu1 %v14818_v15 }
 0x481   : > { %3082 = vst [vmem:[%s14117_s28 + $0x70] sm:$0x2] %v3081_v39  ;;  %3085 = vst [vmem:[%s14117_s28 + $0x78] sm:$0x2] %v3084_v31  ;;  %v14822_v18 = vld [vmem:[#allocation11 + $0x28] ss:$16 sps:$4 sm:$0xff]   ;;  %3922 = vmatpush1.bf16.msra.mxu0 %v14820_v17 }
 0x482   : > { %3965 = vmatpush1.bf16.msra.mxu1 %v14822_v18  ;;  %v14828_v27 = vld [vmem:[#allocation11 + $0x40] ss:$16 sps:$4 sm:$0xff]   ;;  %v14830_v21 = vld [vmem:[#allocation11 + $0x44] ss:$16 sps:$4 sm:$0xff]   ;;  %v14832_v19 = vld [vmem:[#allocation11 + $0x48] ss:$16 sps:$4 sm:$0xff]  }
 0x483   : > { %v14834_v40 = vld [vmem:[#allocation11 + $0x4c] ss:$16 sps:$4 sm:$0xff]   ;;  %v14836_v28 = vld [vmem:[#allocation11 + $0x64] ss:$16 sps:$4 sm:$0xff]   ;;  %3923 = vmatprep.subr.bf16.mxu0 %v14830_v21  ;;  %v14843_v43 = vld [vmem:[#allocation11 + $0x60] ss:$16 sps:$4 sm:$0xff]  }
 0x484   : > { %v14839_v30 = vld [vmem:[#allocation11 + $0x6c] ss:$16 sps:$4 sm:$0xff]   ;;  %3966 = vmatprep.subr.bf16.mxu1 %v14834_v40  ;;  %v14847_v44 = vld [vmem:[#allocation11 + $0x68] ss:$16 sps:$4 sm:$0xff]   ;;  %v14860_v33 = vld [vmem:[#allocation11 + $0xc4] ss:$16 sps:$4 sm:$0xff]  }
 0x485   : > { %3924 = vmatpush1.bf16.msra.mxu0 %v14828_v27  ;;  %v14862_v45 = vld [vmem:[#allocation11 + $0xcc] ss:$16 sps:$4 sm:$0xff]   ;;  %v14864_v25 = vld [vmem:[#allocation11 + $0xc0] ss:$16 sps:$4 sm:$0xff]  }
 0x486   : > { %3967 = vmatpush1.bf16.msra.mxu1 %v14832_v19  ;;  %3925 = vmatprep.subr.bf16.mxu0 %v14836_v28 }
 0x487   : > { %3968 = vmatprep.subr.bf16.mxu1 %v14839_v30 }
 0x489   : > { %3926 = vmatpush1.bf16.msra.mxu0 %v14843_v43 }
 0x48a   : > { %3969 = vmatpush1.bf16.msra.mxu1 %v14847_v44  ;;  %3927 = vmatprep.subr.bf16.mxu0 %v14665_v37  ;;  %v14866_v37 = vld [vmem:[#allocation11 + $0xc8] ss:$16 sps:$4 sm:$0xff]  }
 0x48b   : > { %3970 = vmatprep.subr.bf16.mxu1 %v14669_v1  ;;  %v14876_v1 = vld [vmem:[#allocation11 + $0xe0] ss:$16 sps:$4 sm:$0xff]  }
 0x48d   : > { %3928 = vmatpush1.bf16.msra.mxu0 %v14663_v63  ;;  %v14872_v63 = vld [vmem:[#allocation11 + $0xe4] ss:$16 sps:$4 sm:$0xff]  }
 0x48e   : > { %3971 = vmatpush1.bf16.msra.mxu1 %v14667_v0  ;;  %3929 = vmatprep.subr.bf16.mxu0 %v14675_v2  ;;  %v14874_v0 = vld [vmem:[#allocation11 + $0xec] ss:$16 sps:$4 sm:$0xff]   ;;  %v14878_v2 = vld [vmem:[#allocation11 + $0xe8] ss:$16 sps:$4 sm:$0xff]  }
 0x48f   : > { %3972 = vmatprep.subr.bf16.mxu1 %v14677_v4  ;;  %v4068_v4 = vstv %s4067_s29 }
 0x490   : > { %vm4069_vm6 = vcmp.gt.s32.totalorder %v14522_v61, %v4068_v4  ;;  %vm4070_vm7 = vcmp.gt.s32.totalorder %v14525_v62, %v4068_v4 }
 0x491   : > { %3930 = vmatpush1.bf16.msra.mxu0 %v14679_v5  ;;  %v4071_v5 = vsel %vm4069_vm6, 1, %v17063_v3 }
 0x492   : > { %3973 = vmatpush1.bf16.msra.mxu1 %v14681_v20  ;;  %3931 = vmatprep.subr.bf16.mxu0 %v14860_v33  ;;  %v4072_v20 = vsel %vm4070_vm7, 1, %v17063_v3 }
 0x493   : > { %3974 = vmatprep.subr.bf16.mxu1 %v14862_v45  ;;  %4074 = vperm.xlu0 %12635, %v4071_v5  }
 0x494   : > { %4077 = vperm.xlu1 %12636, %v4072_v20  }
 0x495   : > { %3932 = vmatpush1.bf16.msra.mxu0 %v14864_v25 }
 0x496   : > { %3975 = vmatpush1.bf16.msra.mxu1 %v14866_v37  ;;  %3933 = vmatprep.subr.bf16.mxu0 %v14872_v63 }
 0x497   : > { %3976 = vmatprep.subr.bf16.mxu1 %v14874_v0 }
 0x499   : > { %3934 = vmatpush1.bf16.msra.mxu0 %v14876_v1 }
 0x49a   : > { %3977 = vmatpush1.bf16.msra.mxu1 %v14878_v2  ;;  %4549 = vmatprep.subr.bf16.mxu0 %v12799_v9 }
 0x49b   : > { %4592 = vmatprep.subr.bf16.mxu1 %v12802_v10 }
 0x53c   : > { %v3324_v46 = vpop.f32.mrb[12].mxu0  ;;  %v3367_v41 = vpop.f32.mrb[12].mxu1 }
 0x53d   : > { %v12265_v29 = vadd.f32 %v3324_v46, %v14323_v35  ;;  %v3326_v47 = vpop.f32.mrb[13].mxu0  ;;  %v3369_v48 = vpop.f32.mrb[13].mxu1  ;;  %v12329_v6 = vadd.f32 %v3367_v41, %v14335_v56 }
 0x53e   : > { %v12266_v34 = vadd.f32 %v3326_v47, %v14325_v36  ;;  %v3328_v60 = vpop.f32.mrb[14].mxu0  ;;  %v3371_v38 = vpop.f32.mrb[14].mxu1  ;;  %v12330_v59 = vadd.f32 %v3369_v48, %v14332_v52 }
 0x53f   : > { %v11666_v50 = vmul.f32 -1.442695, %v12265_v29  ;;  %v12267_v61 = vadd.f32 %v3328_v60, %v14323_v35  ;;  %v3330_v62 = vpop.f32.mrb[15].mxu0  ;;  %v3373_v51 = vpop.f32.mrb[15].mxu1  ;;  %v12331_v7 = vadd.f32 %v3371_v38, %v14335_v56 }
 0x540   : > { %v11668_v53 = vmul.f32 -1.442695, %v12266_v34  ;;  %v12268_v55 = vadd.f32 %v3330_v62, %v14325_v36  ;;  %v11670_v24 = vmul.f32 -1.442695, %v12330_v59  ;;  %v12332_v26 = vadd.f32 %v3373_v51, %v14332_v52 }
 0x541   : > { %13181 = vpow2.f32 %v11666_v50  ;;  %v11667_v58 = vmul.f32 -1.442695, %v12267_v61 }
 0x542   : > { %13183 = vpow2.f32 %v11668_v53  ;;  %v11669_v12 = vmul.f32 -1.442695, %v12268_v55  ;;  %v11671_v31 = vmul.f32 -1.442695, %v12332_v26 }
 0x543   : > { %13185 = vpow2.f32 %v11667_v58 }
 0x544   : > { %13187 = vpow2.f32 %v11669_v12 }
 0x545   : > { %13189 = vtanh.f32 %v12329_v6  ;;  %v3446_v6 = vpop.permute.xlu0 %3445 }
 0x546   : > { %13191 = vpow2.f32 %v11670_v24  ;;  %vm3450_vm9 = vcmp.eq.s32.totalorder %v3446_v6, 1 }
 0x547   : > { %13193 = vtanh.f32 %v12331_v7 }
 0x54b   : > { %v13182_v16 = vpop.eup %13181 }
 0x54c   : > { %v13184_v8 = vpop.eup %13183  ;;  %v3390_v39 = vadd.f32 1.0, %v13182_v16 }
 0x54d   : > { %v3402_v9 = vadd.f32 1.0, %v13184_v8  ;;  %v13186_v10 = vpop.eup %13185 }
 0x54e   : > { %13195 = vrcp.f32 %v3390_v39  ;;  %v3391_v4 = vadd.f32 1.0, %v13186_v10  ;;  %v13188_v5 = vpop.eup %13187 }
 0x54f   : > { %13197 = vrcp.f32 %v3402_v9  ;;  %v3403_v20 = vadd.f32 1.0, %v13188_v5  ;;  %v13190_v46 = vpop.eup %13189 }
 0x550   : > { %13199 = vpow2.f32 %v11671_v31  ;;  %v13192_v41 = vpop.eup %13191 }
 0x551   : > { %13201 = vrcp.f32 %v3391_v4  ;;  %v13194_v29 = vpop.eup %13193  ;;  %v3416_v61 = vadd.f32 1.0, %v13192_v41 }
 0x552   : > { %13203 = vrcp.f32 %v3403_v20 }
 0x558   : > { %v13196_v47 = vpop.eup %13195 }
 0x559   : > { %v13198_v48 = vpop.eup %13197  ;;  %v3426_v34 = vmul.f32 %v13196_v47, %v13190_v46 }
 0x55a   : > { %v13200_v60 = vpop.eup %13199  ;;  %v3424_v38 = vmul.f32 %v13198_v48, %v14709_v49  ;;  %v3449_v49 = vpop.permute.xlu1 %3448 }
 0x55b   : > { %v13202_v50 = vpop.eup %13201  ;;  %v3417_v55 = vadd.f32 1.0, %v13200_v60  ;;  %vm3451_vm10 = vcmp.eq.s32.totalorder %v3449_v49, 1 }
 0x55c   : > { %v3427_v62 = vmul.f32 %v13202_v50, %v13194_v29  ;;  %v14898_v51 = vadd.f32 %v3426_v34, %v3424_v38  ;;  %v13204_v53 = vpop.eup %13203 }
 0x55d   : > { %v3425_v58 = vmul.f32 %v13204_v53, %v14713_v54 }
 0x55e   : > { %13205 = vtanh.f32 %v14898_v51 }
 0x55f   : > { %13207 = vrcp.f32 %v3416_v61  ;;  %v14902_v12 = vadd.f32 %v3427_v62, %v3425_v58 }
 0x560   : > { %13209 = vrcp.f32 %v3417_v55 }
 0x561   : > { %13211 = vtanh.f32 %v14902_v12 }
 0x568   : > { %v13206_v59 = vpop.eup %13205 }
 0x569   : > { %v13208_v24 = vpop.eup %13207 }
 0x56a   : > { %v13210_v26 = vpop.eup %13209  ;;  %v3432_v7 = vmul.f32 %v13208_v24, %v13206_v59 }
 0x56b   : > { %v13212_v16 = vpop.eup %13211 }
 0x56c   : > { %v3433_v8 = vmul.f32 %v13212_v16, %v13210_v26  ;;  %v3452_v39 = vsel %vm3450_vm9, %v3432_v7, 0.0 }
 0x56e   : > { %v3453_v54 = vsel %vm3451_vm10, %v3433_v8, 0.0  ;;  %v3726_v31 = vpack.c.bf16 %v3433_v8, %v3432_v7 }
 0x56f   : > { %v3454_v9 = vpack.c.bf16 %v3453_v54, %v3452_v39  ;;  %v11672_v10 = vpack.c.bf16 %v3453_v54, %v3453_v54 }
 0x570   : > { %3952 = vmatmul.mubr.bf16.vlgmr.msra.gmra.mrb[16].mxu0 %v3726_v31  ;;  %3995 = vmatmul.mubr.bf16.vlgmr.msra.gmra.mrb[16].mxu1 %v3726_v31 }
 0x571   : > { %v3463_v4 = vrot.slane %v3454_v9, %v14348_v42  ;;  %v3470_v5 = vrot.slane %v11672_v10, %v14348_v42  ;;  %4550 = vmatpush1.bf16.msra.mxu0 %v14810_v11  ;;  %4593 = vmatpush1.bf16.msra.mxu1 %v14812_v13 }
 0x572   : > { %4551 = vmatprep.subr.bf16.mxu0 %v14816_v14  ;;  %4594 = vmatprep.subr.bf16.mxu1 %v14818_v15 }
 0x573   : > { %v3471_v20 = vcombine.high %v3463_v4, %v3463_v4  ;;  %v3472_v46 = vcombine.high %v3470_v5, %v3470_v5  ;;  %v3479_v41 = vrot.slane %v3463_v4, %v14348_v42  ;;  %v3486_v29 = vrot.slane %v3470_v5, %v14348_v42  ;;  %4581 = vmatprep.mubr.bf16.mxu0 %v17063_v3 }
 0x574   : > { %4624 = vmatprep.mubr.bf16.mxu1 %v17063_v3 }
 0x575   : > { %v3493_v47 = vrot.slane %v3471_v20, %v14348_v42  ;;  %v3500_v11 = vrot.slane %v3472_v46, %v14348_v42  ;;  %v3501_v13 = vcombine.high %v3479_v41, %v3479_v41  ;;  %v3502_v48 = vcombine.high %v3486_v29, %v3486_v29  ;;  %4552 = vmatpush1.bf16.msra.mxu0 %v14820_v17 }
 0x576   : > { %v3506_v14 = vunpack.i.h.s16 %v3479_v41  ;;  %v3514_v15 = vunpack.i.h.s16 %v3486_v29  ;;  %v11673_v34 = vpack.i.b16 %v3479_v41, %v3479_v41  ;;  %v11677_v60 = vpack.i.b16 %v3486_v29, %v3486_v29  ;;  %4595 = vmatpush1.bf16.msra.mxu1 %v14822_v18  ;;  %4553 = vmatprep.subr.bf16.mxu0 %v14830_v21  ;;  %v3667_v29 = vld [vmem:[%s14117_s28] sm:$0x2] }
 0x577   : > { %v3503_v38 = vcombine.high %v3493_v47, %v3493_v47  ;;  %v3504_v50 = vcombine.high %v3500_v11, %v3500_v11  ;;  %v3508_v61 = vunpack.i.h.s16 %v3493_v47  ;;  %v3510_v62 = vunpack.i.h.s16 %v3501_v13  ;;  %4596 = vmatprep.subr.bf16.mxu1 %v14834_v40 }
 0x578   : > { %v3516_v53 = vunpack.i.h.s16 %v3500_v11  ;;  %v3518_v55 = vunpack.i.h.s16 %v3502_v48  ;;  %v3522_v58 = vpack.i.b16 %v3506_v14, %v3506_v14  ;;  %v11674_v59 = vpack.i.b16 %v3493_v47, %v3493_v47  ;;  %v3670_v47 = vld [vmem:[%s14117_s28 + $0x8] sm:$0x2]  ;;  %v3673_v14 = vld [vmem:[%s14117_s28 + $0x10] sm:$0x2] }
 0x579   : > { %v3512_v6 = vunpack.i.h.s16 %v3503_v38  ;;  %v3520_v17 = vunpack.i.h.s16 %v3504_v50  ;;  %v3524_v49 = vpack.i.b16 %v3508_v61, %v3508_v61  ;;  %v11675_v24 = vpack.i.b16 %v3501_v13, %v3501_v13  ;;  %4554 = vmatpush1.bf16.msra.mxu0 %v14828_v27 }
 0x57a   : > { %v3526_v26 = vpack.i.b16 %v3510_v62, %v3510_v62  ;;  %v11676_v18 = vpack.i.b16 %v3503_v38, %v3503_v38  ;;  %v3530_v7 = vpack.i.b16 %v3514_v15, %v3514_v15  ;;  %v11678_v21 = vpack.i.b16 %v3500_v11, %v3500_v11  ;;  %4597 = vmatpush1.bf16.msra.mxu1 %v14832_v19  ;;  %v3676_v15 = vld [vmem:[%s14117_s28 + $0x18] sm:$0x2] }
 0x57b   : > { %v3528_v16 = vpack.i.b16 %v3512_v6, %v3512_v6  ;;  %v14923_v8 = vpack.i.b16 %v3516_v53, %v3516_v53  ;;  %v11679_v40 = vpack.i.b16 %v3502_v48, %v3502_v48  ;;  %v14925_v39 = vpack.i.b16 %v3518_v55, %v3518_v55  ;;  %4555 = vmatprep.subr.bf16.mxu0 %v14836_v28  ;;  %v3682_v53 = vld [vmem:[%s14117_s28 + $0x28] sm:$0x2]  ;;  %v3697_v55 = vld [vmem:[%s14117_s28 + $0x50] sm:$0x2] }
 0x57c   : > { %v11680_v54 = vpack.i.b16 %v3504_v50, %v3504_v50  ;;  %v14928_v31 = vpack.i.b16 %v3520_v17, %v3520_v17  ;;  %v3543_v27 = vrot.slane %v11673_v34, %v14357_v57  ;;  %v3550_v9 = vrot.slane %v3522_v58, %v14357_v57  ;;  %4598 = vmatprep.subr.bf16.mxu1 %v14839_v30  ;;  %v3679_v34 = vld [vmem:[%s14117_s28 + $0x20] sm:$0x2] }
 0x57d   : > { %v17122_v19 = vmov 0  ;;  %v3557_v10 = vrot.slane %v11674_v59, %v14357_v57  ;;  %v3564_v28 = vrot.slane %v3524_v49, %v14357_v57  ;;  %v3571_v4 = vrot.slane %v11675_v24, %v14357_v57  ;;  %4556 = vmatpush1.bf16.msra.mxu0 %v14843_v43  ;;  %v3685_v49 = vld [vmem:[%s14117_s28 + $0x30] sm:$0x2]  ;;  %v3688_v24 = vld [vmem:[%s14117_s28 + $0x38] sm:$0x2] }
 0x57e   : > { %v17123_v19 = vsel %vm14935_vm12, 4294967295, %v17122_v19  ;;  %v3578_v5 = vrot.slane %v3526_v26, %v14357_v57  ;;  %v3585_v30 = vrot.slane %v11676_v18, %v14357_v57  ;;  %v3592_v20 = vrot.slane %v3528_v16, %v14357_v57  ;;  %4599 = vmatpush1.bf16.msra.mxu1 %v14847_v44  ;;  %v3694_v44 = vld [vmem:[%s14117_s28 + $0x48] sm:$0x2]  ;;  %v3700_v26 = vld [vmem:[%s14117_s28 + $0x58] sm:$0x2] }
 0x57f   : > { %17124 = vst [vmem:[#allocation26_spill] sm:$0xff] %v17123_v19  ;;  %v3599_v46 = vrot.slane %v11677_v60, %v14357_v57  ;;  %v3606_v41 = vrot.slane %v3530_v7, %v14357_v57  ;;  %v3613_v11 = vrot.slane %v11678_v21, %v14357_v57  ;;  %v3620_v43 = vrot.slane %v14923_v8, %v14357_v57  ;;  %v3691_v60 = vld [vmem:[%s14117_s28 + $0x40] sm:$0x2]  ;;  %v3706_v7 = vld [vmem:[%s14117_s28 + $0x68] sm:$0x2] }
 0x580   : > { %v3627_v13 = vrot.slane %v11679_v40, %v14357_v57  ;;  %v3634_v48 = vrot.slane %v14925_v39, %v14357_v57  ;;  %v3641_v38 = vrot.slane %v11680_v54, %v14357_v57  ;;  %v3648_v50 = vrot.slane %v14928_v31, %v14357_v57  ;;  %v3703_v18 = vld [vmem:[%s14117_s28 + $0x60] sm:$0x2]  ;;  %v3709_v39 = vld [vmem:[%s14117_s28 + $0x70] sm:$0x2]  ;;  %v3712_v54 = vld [vmem:[%s14117_s28 + $0x78] sm:$0x2] }
 0x581   : > { %v3668_v61 = vsel %vm14935_vm12, %v3543_v27, %v3667_v29  ;;  %v3671_v62 = vsel %vm14935_vm12, %v3550_v9, %v3670_v47  ;;  %v3674_v58 = vsel %vm14935_vm12, %v3557_v10, %v3673_v14  ;;  %v3677_v59 = vsel %vm14935_vm12, %v3564_v28, %v3676_v15  ;;  %v15036_v29 = vld [vmem:[#allocation11 + $0xac] ss:$16 sps:$4 sm:$0xff]   ;;  %v15038_v47 = vld [vmem:[#allocation11 + $0xa0] ss:$16 sps:$4 sm:$0xff]  }
 0x582   : > { %3669 = vst [vmem:[%s14117_s28] sm:$0x2] %v3668_v61  ;;  %3672 = vst [vmem:[%s14117_s28 + $0x8] sm:$0x2] %v3671_v62  ;;  %v3680_v6 = vsel %vm14935_vm12, %v3571_v4, %v3679_v34  ;;  %v3683_v17 = vsel %vm14935_vm12, %v3578_v5, %v3682_v53  ;;  %v3686_v21 = vsel %vm14935_vm12, %v3585_v30, %v3685_v49  ;;  %v15022_v5 = vld [vmem:[#allocation11 + $0x80] ss:$16 sps:$4 sm:$0xff]   ;;  %v10348_v15 = vstv %s10347_s12 }
 0x583   : > { %3675 = vst [vmem:[%s14117_s28 + $0x10] sm:$0x2] %v3674_v58  ;;  %3678 = vst [vmem:[%s14117_s28 + $0x18] sm:$0x2] %v3677_v59  ;;  %v3689_v16 = vsel %vm14935_vm12, %v3592_v20, %v3688_v24  ;;  %v3692_v8 = vsel %vm14935_vm12, %v3599_v46, %v3691_v60  ;;  %v3695_v40 = vsel %vm14935_vm12, %v3606_v41, %v3694_v44  ;;  %v15024_v30 = vld [vmem:[#allocation11 + $0x84] ss:$16 sps:$4 sm:$0xff]   ;;  %v4698_v44 = vstv %s4697_s10 }
 0x584   : > { %3681 = vst [vmem:[%s14117_s28 + $0x20] sm:$0x2] %v3680_v6  ;;  %3684 = vst [vmem:[%s14117_s28 + $0x28] sm:$0x2] %v3683_v17  ;;  %v3698_v31 = vsel %vm14935_vm12, %v3613_v11, %v3697_v55  ;;  %v3701_v27 = vsel %vm14935_vm12, %v3620_v43, %v3700_v26  ;;  %v3704_v9 = vsel %vm14935_vm12, %v3627_v13, %v3703_v18  ;;  %v15026_v20 = vld [vmem:[#allocation11 + $0x88] ss:$16 sps:$4 sm:$0xff]   ;;  %4557 = vmatprep.subr.bf16.mxu0 %v15024_v30 }
 0x585   : > { %3687 = vst [vmem:[%s14117_s28 + $0x30] sm:$0x2] %v3686_v21  ;;  %3690 = vst [vmem:[%s14117_s28 + $0x38] sm:$0x2] %v3689_v16  ;;  %v3707_v10 = vsel %vm14935_vm12, %v3634_v48, %v3706_v7  ;;  %v3710_v28 = vsel %vm14935_vm12, %v3641_v38, %v3709_v39  ;;  %v3713_v4 = vsel %vm14935_vm12, %v3648_v50, %v3712_v54  ;;  %v15028_v46 = vld [vmem:[#allocation11 + $0x8c] ss:$16 sps:$4 sm:$0xff]   ;;  %4558 = vmatpush1.bf16.msra.mxu0 %v15022_v5 }
 0x586   : > { %3693 = vst [vmem:[%s14117_s28 + $0x40] sm:$0x2] %v3692_v8  ;;  %3696 = vst [vmem:[%s14117_s28 + $0x48] sm:$0x2] %v3695_v40  ;;  %4600 = vmatprep.subr.bf16.mxu1 %v15028_v46  ;;  %v15034_v41 = vld [vmem:[#allocation11 + $0xa4] ss:$16 sps:$4 sm:$0xff]   ;;  %v5327_v43 = vstv %s5326_s15  ;;  %v6586_v13 = vstv %s6585_s11 }
 0x587   : > { %3699 = vst [vmem:[%s14117_s28 + $0x50] sm:$0x2] %v3698_v31  ;;  %3702 = vst [vmem:[%s14117_s28 + $0x58] sm:$0x2] %v3701_v27  ;;  %4601 = vmatpush1.bf16.msra.mxu1 %v15026_v20  ;;  %v15040_v11 = vld [vmem:[#allocation11 + $0xa8] ss:$16 sps:$4 sm:$0xff]   ;;  %4559 = vmatprep.subr.bf16.mxu0 %v15034_v41 }
 0x588   : > { %3705 = vst [vmem:[%s14117_s28 + $0x60] sm:$0x2] %v3704_v9  ;;  %3708 = vst [vmem:[%s14117_s28 + $0x68] sm:$0x2] %v3707_v10  ;;  %4602 = vmatprep.subr.bf16.mxu1 %v15036_v29 }
 0x589   : > { %3711 = vst [vmem:[%s14117_s28 + $0x70] sm:$0x2] %v3710_v28  ;;  %3714 = vst [vmem:[%s14117_s28 + $0x78] sm:$0x2] %v3713_v4  ;;  %4560 = vmatpush1.bf16.msra.mxu0 %v15038_v47 }
 0x58a   : > { %4561 = vmatprep.subr.bf16.mxu0 %v14860_v33  ;;  %v13607_v33 = vld [vmem:[#allocation5] sm:$0xff] }
 0x58b   : > { %4603 = vmatpush1.bf16.msra.mxu1 %v15040_v11  ;;  %vm5328_vm13 = vcmp.gt.s32.totalorder %v13607_v33, %v5327_v43  ;;  %vm6587_vm0 = vcmp.gt.s32.totalorder %v13607_v33, %v6586_v13  ;;  %vm10349_vm7 = vcmp.gt.s32.totalorder %v13607_v33, %v10348_v15  ;;  %vm4699_vm10 = vcmp.gt.s32.totalorder %v13607_v33, %v4698_v44 }
 0x58c   : > { %4604 = vmatprep.subr.bf16.mxu1 %v14862_v45  ;;  %v13608_v45 = vld [vmem:[#allocation5 + $0x8] sm:$0xff]  ;;  %v10351_v38 = vsel %vm10349_vm7, 1, %v17063_v3  ;;  %v4701_v61 = vsel %vm4699_vm10, 1, %v17063_v3 }
 0x58d   : > { %4562 = vmatpush1.bf16.msra.mxu0 %v14864_v25  ;;  %vm5329_vm15 = vcmp.gt.s32.totalorder %v13608_v45, %v5327_v43  ;;  %vm6588_vm1 = vcmp.gt.s32.totalorder %v13608_v45, %v6586_v13  ;;  %v5330_v25 = vsel %vm5328_vm13, 1, %v17063_v3  ;;  %vm10350_vm9 = vcmp.gt.s32.totalorder %v13608_v45, %v10348_v15 }
 0x58e   : > { %4563 = vmatprep.subr.bf16.mxu0 %v14872_v63  ;;  %5333 = vperm.xlu0 %12635, %v5330_v25   ;;  %v7840_v63 = vstv %s7839_s7  ;;  %v10352_v50 = vsel %vm10350_vm9, 1, %v17063_v3  ;;  %vm4700_vm11 = vcmp.gt.s32.totalorder %v13608_v45, %v4698_v44 }
 0x58f   : > { %4605 = vmatpush1.bf16.msra.mxu1 %v14866_v37  ;;  %v5331_v37 = vsel %vm5329_vm15, 1, %v17063_v3  ;;  %vm7841_vm2 = vcmp.gt.s32.totalorder %v13607_v33, %v7840_v63  ;;  %vm7842_vm3 = vcmp.gt.s32.totalorder %v13608_v45, %v7840_v63  ;;  %v4702_v62 = vsel %vm4700_vm11, 1, %v17063_v3 }
 0x590   : > { %4606 = vmatprep.subr.bf16.mxu1 %v14874_v0  ;;  %5336 = vperm.xlu1 %12636, %v5331_v37   ;;  %v6589_v0 = vsel %vm6587_vm0, 1, %v17063_v3  ;;  %v7843_v48 = vsel %vm7841_vm2, 1, %v17063_v3  ;;  %v7844_v14 = vsel %vm7842_vm3, 1, %v17063_v3  ;;  %vm4294_vm0 = vcmask 1042434  }
 0x591   : > { %4564 = vmatpush1.bf16.msra.mxu0 %v14876_v1  ;;  %v6590_v1 = vsel %vm6588_vm1, 1, %v17063_v3  ;;  %vm4295_vm1 = vsmask.f32 2304 }
 0x592   : > { %6592 = vperm.xlu0 %12635, %v6589_v0   ;;  %vm15098_vm2 = vmand %vm4294_vm0, %vm4295_vm1 }
 0x593   : > { %4607 = vmatpush1.bf16.msra.mxu1 %v14878_v2  ;;  %v9094_v2 = vstv %s9093_s2 }
 0x594   : > { %6595 = vperm.xlu1 %12636, %v6590_v1   ;;  %vm9095_vm4 = vcmp.gt.s32.totalorder %v13607_v33, %v9094_v2  ;;  %vm9096_vm6 = vcmp.gt.s32.totalorder %v13608_v45, %v9094_v2 }
 0x595   : > { %v9097_v34 = vsel %vm9095_vm4, 1, %v17063_v3  ;;  %v9098_v60 = vsel %vm9096_vm6, 1, %v17063_v3  ;;  %vm4924_vm6 = vsmask.f32 7946 }
 0x596   : > { %7846 = vperm.xlu0 %12635, %v7843_v48   ;;  %vm15322_vm7 = vmand %vm4294_vm0, %vm4924_vm6  ;;  %vm5554_vm0 = vsmask.f32 3328  ;;  %vm6183_vm6 = vsmask.f32 7950 }
 0x598   : > { %7849 = vperm.xlu1 %12636, %v7844_v14  }
 0x59a   : > { %9100 = vperm.xlu0 %12635, %v9097_v34  }
 0x59c   : > { %9103 = vperm.xlu1 %12636, %v9098_v60  }
 0x59e   : > { %10354 = vperm.xlu0 %12635, %v10351_v38  }
 0x5a0   : > { %10357 = vperm.xlu1 %12636, %v10352_v50  }
 0x5a2   : > { %4704 = vperm.xlu0 %12635, %v4701_v61  }
 0x5a4   : > { %4707 = vperm.xlu1 %12636, %v4702_v62  }
 0x643   : > { %v3953_v53 = vpop.f32.mrb[16].mxu0  ;;  %v3996_v55 = vpop.f32.mrb[16].mxu1 }
 0x644   : > { %v12269_v58 = vadd.f32 %v3953_v53, %v14323_v35  ;;  %v3955_v59 = vpop.f32.mrb[17].mxu0  ;;  %v3998_v6 = vpop.f32.mrb[17].mxu1  ;;  %v12333_v31 = vadd.f32 %v3996_v55, %v14335_v56 }
 0x645   : > { %v12270_v17 = vadd.f32 %v3955_v59, %v14325_v36  ;;  %v3957_v49 = vpop.f32.mrb[18].mxu0  ;;  %v4000_v24 = vpop.f32.mrb[18].mxu1  ;;  %v12334_v54 = vadd.f32 %v3998_v6, %v14332_v52 }
 0x646   : > { %v11713_v26 = vmul.f32 -1.442695, %v12269_v58  ;;  %v12271_v18 = vadd.f32 %v3957_v49, %v14323_v35  ;;  %v3959_v7 = vpop.f32.mrb[19].mxu0  ;;  %v4002_v21 = vpop.f32.mrb[19].mxu1  ;;  %v12335_v10 = vadd.f32 %v4000_v24, %v14335_v56 }
 0x647   : > { %v11715_v16 = vmul.f32 -1.442695, %v12270_v17  ;;  %v12272_v8 = vadd.f32 %v3959_v7, %v14325_v36  ;;  %v11717_v27 = vmul.f32 -1.442695, %v12334_v54  ;;  %v12336_v9 = vadd.f32 %v4002_v21, %v14332_v52  ;;  %v4075_v6 = vpop.permute.xlu0 %4074 }
 0x648   : > { %13213 = vpow2.f32 %v11713_v26  ;;  %v11714_v40 = vmul.f32 -1.442695, %v12271_v18  ;;  %vm4079_vm13 = vcmp.eq.s32.totalorder %v4075_v6, 1 }
 0x649   : > { %13215 = vpow2.f32 %v11715_v16  ;;  %v11716_v39 = vmul.f32 -1.442695, %v12272_v8  ;;  %v11718_v13 = vmul.f32 -1.442695, %v12336_v9 }
 0x64a   : > { %13217 = vpow2.f32 %v11714_v40 }
 0x64b   : > { %13219 = vpow2.f32 %v11716_v39 }
 0x64c   : > { %13221 = vtanh.f32 %v12333_v31 }
 0x64d   : > { %13223 = vpow2.f32 %v11717_v27 }
 0x64e   : > { %13225 = vtanh.f32 %v12335_v10 }
 0x652   : > { %v13214_v28 = vpop.eup %13213 }
 0x653   : > { %v13216_v4 = vpop.eup %13215  ;;  %v4019_v43 = vadd.f32 1.0, %v13214_v28 }
 0x654   : > { %v4031_v33 = vadd.f32 1.0, %v13216_v4  ;;  %v13218_v45 = vpop.eup %13217 }
 0x655   : > { %13227 = vrcp.f32 %v4019_v43  ;;  %v4020_v25 = vadd.f32 1.0, %v13218_v45  ;;  %v13220_v37 = vpop.eup %13219 }
 0x656   : > { %13229 = vrcp.f32 %v4031_v33  ;;  %v4032_v63 = vadd.f32 1.0, %v13220_v37  ;;  %v13222_v0 = vpop.eup %13221 }
 0x657   : > { %13231 = vpow2.f32 %v11718_v13  ;;  %v13224_v1 = vpop.eup %13223 }
 0x658   : > { %13233 = vrcp.f32 %v4020_v25  ;;  %v13226_v2 = vpop.eup %13225  ;;  %v4045_v38 = vadd.f32 1.0, %v13224_v1 }
 0x659   : > { %13235 = vrcp.f32 %v4032_v63 }
 0x65f   : > { %v13228_v48 = vpop.eup %13227 }
 0x660   : > { %v13230_v14 = vpop.eup %13229  ;;  %v4055_v15 = vmul.f32 %v13228_v48, %v13222_v0 }
 0x661   : > { %v13232_v34 = vpop.eup %13231  ;;  %v4053_v60 = vmul.f32 %v13230_v14, %v14898_v51  ;;  %v4078_v51 = vpop.permute.xlu1 %4077 }
 0x662   : > { %v13234_v44 = vpop.eup %13233  ;;  %v4046_v53 = vadd.f32 1.0, %v13232_v34  ;;  %vm4080_vm15 = vcmp.eq.s32.totalorder %v4078_v51, 1 }
 0x663   : > { %v4056_v50 = vmul.f32 %v13234_v44, %v13226_v2  ;;  %v15081_v61 = vadd.f32 %v4055_v15, %v4053_v60  ;;  %v13236_v62 = vpop.eup %13235 }
 0x664   : > { %v4054_v55 = vmul.f32 %v13236_v62, %v14902_v12 }
 0x665   : > { %13237 = vtanh.f32 %v15081_v61 }
 0x666   : > { %13239 = vrcp.f32 %v4045_v38  ;;  %v15085_v58 = vadd.f32 %v4056_v50, %v4054_v55 }
 0x667   : > { %13241 = vrcp.f32 %v4046_v53 }
 0x668   : > { %13243 = vtanh.f32 %v15085_v58 }
 0x66f   : > { %v13238_v59 = vpop.eup %13237 }
 0x670   : > { %v13240_v17 = vpop.eup %13239 }
 0x671   : > { %v13242_v49 = vpop.eup %13241  ;;  %v4061_v24 = vmul.f32 %v13240_v17, %v13238_v59 }
 0x672   : > { %v13244_v26 = vpop.eup %13243 }
 0x673   : > { %v4062_v18 = vmul.f32 %v13244_v26, %v13242_v49  ;;  %v4081_v7 = vsel %vm4079_vm13, %v4061_v24, 0.0  ;;  %v17125_v49 = vmov 0  ;;  %v4300_v26 = vld [vmem:[%s14117_s28 + $0x8] sm:$0x4] }
 0x674   : > { %v17126_v49 = vsel %vm15098_vm2, 4294967295, %v17125_v49 }
 0x675   : > { %v4082_v12 = vsel %vm4080_vm15, %v4062_v18, 0.0  ;;  %v4356_v21 = vpack.c.bf16 %v4062_v18, %v4061_v24  ;;  %17127 = vst [vmem:[#allocation27_spill] sm:$0xff] %v17126_v49  ;;  %v4297_v24 = vld [vmem:[%s14117_s28] sm:$0x4]  ;;  %vm5553_vm15 = vcmask 1043459  }
 0x676   : > { %v4083_v16 = vpack.c.bf16 %v4082_v12, %v4081_v7  ;;  %v11719_v8 = vpack.c.bf16 %v4082_v12, %v4082_v12  ;;  %vm15489_vm1 = vmand %vm5553_vm15, %vm5554_vm0 }
 0x677   : > { %4582 = vmatmul.mubr.bf16.vlgmr.msra.gmra.mrb[20].mxu0 %v4356_v21  ;;  %4625 = vmatmul.mubr.bf16.vlgmr.msra.gmra.mrb[20].mxu1 %v4356_v21 }
 0x678   : > { %v4092_v40 = vrot.slane %v4083_v16, %v14348_v42  ;;  %v4099_v39 = vrot.slane %v11719_v8, %v14348_v42  ;;  %5210 = vmatprep.mubr.bf16.mxu0 %v17063_v3  ;;  %5253 = vmatprep.mubr.bf16.mxu1 %v17063_v3  ;;  %v4303_v16 = vld [vmem:[%s14117_s28 + $0x10] sm:$0x4]  ;;  %v4306_v8 = vld [vmem:[%s14117_s28 + $0x18] sm:$0x4] }
 0x67a   : > { %v4100_v54 = vcombine.high %v4092_v40, %v4092_v40  ;;  %v4101_v31 = vcombine.high %v4099_v39, %v4099_v39  ;;  %v4108_v27 = vrot.slane %v4092_v40, %v14348_v42  ;;  %v4115_v9 = vrot.slane %v4099_v39, %v14348_v42  ;;  %v4309_v40 = vld [vmem:[%s14117_s28 + $0x20] sm:$0x4] }
 0x67c   : > { %v4122_v10 = vrot.slane %v4100_v54, %v14348_v42  ;;  %v4129_v28 = vrot.slane %v4101_v31, %v14348_v42  ;;  %v4130_v4 = vcombine.high %v4108_v27, %v4108_v27  ;;  %v4131_v43 = vcombine.high %v4115_v9, %v4115_v9 }
 0x67d   : > { %v4135_v13 = vunpack.i.h.s16 %v4108_v27  ;;  %v4143_v33 = vunpack.i.h.s16 %v4115_v9  ;;  %v11720_v45 = vpack.i.b16 %v4108_v27, %v4108_v27  ;;  %v11724_v25 = vpack.i.b16 %v4115_v9, %v4115_v9  ;;  %v4312_v9 = vld [vmem:[%s14117_s28 + $0x28] sm:$0x4] }
 0x67e   : > { %v4132_v37 = vcombine.high %v4122_v10, %v4122_v10  ;;  %v4133_v63 = vcombine.high %v4129_v28, %v4129_v28  ;;  %v4137_v0 = vunpack.i.h.s16 %v4122_v10  ;;  %v4139_v1 = vunpack.i.h.s16 %v4130_v4 }
 0x67f   : > { %v4145_v2 = vunpack.i.h.s16 %v4129_v28  ;;  %v4147_v48 = vunpack.i.h.s16 %v4131_v43  ;;  %v4151_v14 = vpack.i.b16 %v4135_v13, %v4135_v13  ;;  %v11721_v15 = vpack.i.b16 %v4122_v10, %v4122_v10  ;;  %v4315_v10 = vld [vmem:[%s14117_s28 + $0x30] sm:$0x4] }
 0x680   : > { %v4141_v34 = vunpack.i.h.s16 %v4132_v37  ;;  %v4149_v60 = vunpack.i.h.s16 %v4133_v63  ;;  %v4153_v44 = vpack.i.b16 %v4137_v0, %v4137_v0  ;;  %v11722_v38 = vpack.i.b16 %v4130_v4, %v4130_v4 }
 0x681   : > { %v4155_v50 = vpack.i.b16 %v4139_v1, %v4139_v1  ;;  %v11723_v62 = vpack.i.b16 %v4132_v37, %v4132_v37  ;;  %v4159_v53 = vpack.i.b16 %v4143_v33, %v4143_v33  ;;  %v11725_v55 = vpack.i.b16 %v4129_v28, %v4129_v28  ;;  %v4318_v28 = vld [vmem:[%s14117_s28 + $0x38] sm:$0x4]  ;;  %v4324_v37 = vld [vmem:[%s14117_s28 + $0x48] sm:$0x4] }
 0x682   : > { %v4157_v59 = vpack.i.b16 %v4141_v34, %v4141_v34  ;;  %v4161_v6 = vpack.i.b16 %v4145_v2, %v4145_v2  ;;  %v11726_v51 = vpack.i.b16 %v4131_v43, %v4131_v43  ;;  %v4163_v17 = vpack.i.b16 %v4147_v48, %v4147_v48 }
 0x683   : > { %v11727_v18 = vpack.i.b16 %v4133_v63, %v4133_v63  ;;  %v4165_v7 = vpack.i.b16 %v4149_v60, %v4149_v60  ;;  %v4172_v12 = vrot.slane %v11720_v45, %v14357_v57  ;;  %v4179_v21 = vrot.slane %v4151_v14, %v14357_v57  ;;  %v4321_v45 = vld [vmem:[%s14117_s28 + $0x40] sm:$0x4]  ;;  %v4327_v63 = vld [vmem:[%s14117_s28 + $0x50] sm:$0x4]  ;;  %v4330_v14 = vld [vmem:[%s14117_s28 + $0x58] sm:$0x4] }
 0x684   : > { %v4186_v39 = vrot.slane %v11721_v15, %v14357_v57  ;;  %v4193_v54 = vrot.slane %v4153_v44, %v14357_v57  ;;  %v4200_v31 = vrot.slane %v11722_v38, %v14357_v57  ;;  %v4207_v27 = vrot.slane %v4155_v50, %v14357_v57  ;;  %v4336_v15 = vld [vmem:[%s14117_s28 + $0x68] sm:$0x4]  ;;  %v4339_v50 = vld [vmem:[%s14117_s28 + $0x70] sm:$0x4] }
 0x685   : > { %v4214_v4 = vrot.slane %v11723_v62, %v14357_v57  ;;  %v4221_v43 = vrot.slane %v4157_v59, %v14357_v57  ;;  %v4228_v13 = vrot.slane %v11724_v25, %v14357_v57  ;;  %v4235_v33 = vrot.slane %v4159_v53, %v14357_v57  ;;  %v4333_v25 = vld [vmem:[%s14117_s28 + $0x60] sm:$0x4]  ;;  %v4342_v62 = vld [vmem:[%s14117_s28 + $0x78] sm:$0x4] }
 0x686   : > { %v4242_v0 = vrot.slane %v11725_v55, %v14357_v57  ;;  %v4249_v1 = vrot.slane %v4161_v6, %v14357_v57  ;;  %v4256_v2 = vrot.slane %v11726_v51, %v14357_v57  ;;  %v4263_v48 = vrot.slane %v4163_v17, %v14357_v57 }
 0x687   : > { %v4270_v34 = vrot.slane %v11727_v18, %v14357_v57  ;;  %v4277_v60 = vrot.slane %v4165_v7, %v14357_v57  ;;  %v4298_v44 = vsel %vm15098_vm2, %v4172_v12, %v4297_v24  ;;  %v4301_v38 = vsel %vm15098_vm2, %v4179_v21, %v4300_v26 }
 0x688   : > { %4299 = vst [vmem:[%s14117_s28] sm:$0x4] %v4298_v44  ;;  %4302 = vst [vmem:[%s14117_s28 + $0x8] sm:$0x4] %v4301_v38  ;;  %v4304_v53 = vsel %vm15098_vm2, %v4186_v39, %v4303_v16  ;;  %v4307_v55 = vsel %vm15098_vm2, %v4193_v54, %v4306_v8  ;;  %v4310_v59 = vsel %vm15098_vm2, %v4200_v31, %v4309_v40  ;;  %v12847_v40 = vld [vmem:[#allocation11 + $0x4] ss:$16 sps:$4 sm:$0xff]  }
 0x689   : > { %v4313_v6 = vsel %vm15098_vm2, %v4207_v27, %v4312_v9  ;;  %4305 = vst [vmem:[%s14117_s28 + $0x10] sm:$0x4] %v4304_v53  ;;  %4308 = vst [vmem:[%s14117_s28 + $0x18] sm:$0x4] %v4307_v55  ;;  %v4316_v51 = vsel %vm15098_vm2, %v4214_v4, %v4315_v10  ;;  %v4319_v17 = vsel %vm15098_vm2, %v4221_v43, %v4318_v28  ;;  %v12850_v39 = vld [vmem:[#allocation11 + $0xc] ss:$16 sps:$4 sm:$0xff]   ;;  %5178 = vmatprep.subr.bf16.mxu0 %v12847_v40 }
 0x68a   : > { %4311 = vst [vmem:[%s14117_s28 + $0x20] sm:$0x4] %v4310_v59  ;;  %4314 = vst [vmem:[%s14117_s28 + $0x28] sm:$0x4] %v4313_v6  ;;  %v4322_v24 = vsel %vm15098_vm2, %v4228_v13, %v4321_v45  ;;  %v4325_v26 = vsel %vm15098_vm2, %v4235_v33, %v4324_v37  ;;  %v4328_v18 = vsel %vm15098_vm2, %v4242_v0, %v4327_v63  ;;  %v15182_v54 = vld [vmem:[#allocation11] ss:$16 sps:$4 sm:$0xff]   ;;  %5221 = vmatprep.subr.bf16.mxu1 %v12850_v39 }
 0x68b   : > { %4317 = vst [vmem:[%s14117_s28 + $0x30] sm:$0x4] %v4316_v51  ;;  %4320 = vst [vmem:[%s14117_s28 + $0x38] sm:$0x4] %v4319_v17  ;;  %v4331_v7 = vsel %vm15098_vm2, %v4249_v1, %v4330_v14  ;;  %v4334_v12 = vsel %vm15098_vm2, %v4256_v2, %v4333_v25  ;;  %v4337_v21 = vsel %vm15098_vm2, %v4263_v48, %v4336_v15  ;;  %v15184_v31 = vld [vmem:[#allocation11 + $0x8] ss:$16 sps:$4 sm:$0xff]   ;;  %5179 = vmatpush1.bf16.msra.mxu0 %v15182_v54 }
 0x68c   : > { %4323 = vst [vmem:[%s14117_s28 + $0x40] sm:$0x4] %v4322_v24  ;;  %4326 = vst [vmem:[%s14117_s28 + $0x48] sm:$0x4] %v4325_v26  ;;  %v4340_v16 = vsel %vm15098_vm2, %v4270_v34, %v4339_v50  ;;  %v4343_v8 = vsel %vm15098_vm2, %v4277_v60, %v4342_v62  ;;  %5222 = vmatpush1.bf16.msra.mxu1 %v15184_v31  ;;  %v15188_v27 = vld [vmem:[#allocation11 + $0x24] ss:$16 sps:$4 sm:$0xff]  }
 0x68d   : > { %4329 = vst [vmem:[%s14117_s28 + $0x50] sm:$0x4] %v4328_v18  ;;  %4332 = vst [vmem:[%s14117_s28 + $0x58] sm:$0x4] %v4331_v7  ;;  %v15190_v9 = vld [vmem:[#allocation11 + $0x2c] ss:$16 sps:$4 sm:$0xff]   ;;  %5180 = vmatprep.subr.bf16.mxu0 %v15188_v27 }
 0x68e   : > { %4335 = vst [vmem:[%s14117_s28 + $0x60] sm:$0x4] %v4334_v12  ;;  %4338 = vst [vmem:[%s14117_s28 + $0x68] sm:$0x4] %v4337_v21  ;;  %v15192_v10 = vld [vmem:[#allocation11 + $0x20] ss:$16 sps:$4 sm:$0xff]   ;;  %5223 = vmatprep.subr.bf16.mxu1 %v15190_v9  ;;  %v15264_v12 = vpop.permute.xlu0 %5333  ;;  %v15266_v21 = vpop.permute.xlu1 %5336 }
 0x68f   : > { %4341 = vst [vmem:[%s14117_s28 + $0x70] sm:$0x4] %v4340_v16  ;;  %4344 = vst [vmem:[%s14117_s28 + $0x78] sm:$0x4] %v4343_v8  ;;  %v15194_v28 = vld [vmem:[#allocation11 + $0x28] ss:$16 sps:$4 sm:$0xff]   ;;  %5181 = vmatpush1.bf16.msra.mxu0 %v15192_v10 }
 0x690   : > { %5224 = vmatpush1.bf16.msra.mxu1 %v15194_v28  ;;  %v15200_v4 = vld [vmem:[#allocation11 + $0x40] ss:$16 sps:$4 sm:$0xff]   ;;  %v15202_v43 = vld [vmem:[#allocation11 + $0x44] ss:$16 sps:$4 sm:$0xff]   ;;  %v15204_v13 = vld [vmem:[#allocation11 + $0x48] ss:$16 sps:$4 sm:$0xff]  }
 0x691   : > { %v15206_v33 = vld [vmem:[#allocation11 + $0x4c] ss:$16 sps:$4 sm:$0xff]   ;;  %5182 = vmatprep.subr.bf16.mxu0 %v15202_v43  ;;  %v15209_v45 = vld [vmem:[#allocation11 + $0x64] ss:$16 sps:$4 sm:$0xff]   ;;  %v15215_v63 = vld [vmem:[#allocation11 + $0x60] ss:$16 sps:$4 sm:$0xff]  }
 0x692   : > { %v15211_v37 = vld [vmem:[#allocation11 + $0x6c] ss:$16 sps:$4 sm:$0xff]   ;;  %5225 = vmatprep.subr.bf16.mxu1 %v15206_v33  ;;  %v15219_v0 = vld [vmem:[#allocation11 + $0x68] ss:$16 sps:$4 sm:$0xff]   ;;  %v15232_v1 = vld [vmem:[#allocation11 + $0xc4] ss:$16 sps:$4 sm:$0xff]  }
 0x693   : > { %5183 = vmatpush1.bf16.msra.mxu0 %v15200_v4  ;;  %v15234_v2 = vld [vmem:[#allocation11 + $0xcc] ss:$16 sps:$4 sm:$0xff]   ;;  %v15236_v48 = vld [vmem:[#allocation11 + $0xc0] ss:$16 sps:$4 sm:$0xff]   ;;  %vm5338_vm11 = vcmp.eq.s32.totalorder %v15264_v12, 1  ;;  %vm5339_vm13 = vcmp.eq.s32.totalorder %v15266_v21, 1 }
 0x694   : > { %5226 = vmatpush1.bf16.msra.mxu1 %v15204_v13  ;;  %5184 = vmatprep.subr.bf16.mxu0 %v15209_v45 }
 0x695   : > { %5227 = vmatprep.subr.bf16.mxu1 %v15211_v37 }
 0x697   : > { %5185 = vmatpush1.bf16.msra.mxu0 %v15215_v63 }
 0x698   : > { %5228 = vmatpush1.bf16.msra.mxu1 %v15219_v0  ;;  %5186 = vmatprep.subr.bf16.mxu0 %v15024_v30  ;;  %v15238_v30 = vld [vmem:[#allocation11 + $0xc8] ss:$16 sps:$4 sm:$0xff]  }
 0x699   : > { %5229 = vmatprep.subr.bf16.mxu1 %v15028_v46  ;;  %v15248_v46 = vld [vmem:[#allocation11 + $0xe0] ss:$16 sps:$4 sm:$0xff]  }
 0x69b   : > { %5187 = vmatpush1.bf16.msra.mxu0 %v15022_v5  ;;  %v15244_v5 = vld [vmem:[#allocation11 + $0xe4] ss:$16 sps:$4 sm:$0xff]  }
 0x69c   : > { %5230 = vmatpush1.bf16.msra.mxu1 %v15026_v20  ;;  %5188 = vmatprep.subr.bf16.mxu0 %v15034_v41  ;;  %v15246_v20 = vld [vmem:[#allocation11 + $0xec] ss:$16 sps:$4 sm:$0xff]   ;;  %v15250_v41 = vld [vmem:[#allocation11 + $0xe8] ss:$16 sps:$4 sm:$0xff]  }
 0x69d   : > { %5231 = vmatprep.subr.bf16.mxu1 %v15036_v29 }
 0x69f   : > { %5189 = vmatpush1.bf16.msra.mxu0 %v15038_v47 }
 0x6a0   : > { %5232 = vmatpush1.bf16.msra.mxu1 %v15040_v11  ;;  %5190 = vmatprep.subr.bf16.mxu0 %v15232_v1 }
 0x6a1   : > { %5233 = vmatprep.subr.bf16.mxu1 %v15234_v2 }
 0x6a3   : > { %5191 = vmatpush1.bf16.msra.mxu0 %v15236_v48 }
 0x6a4   : > { %5234 = vmatpush1.bf16.msra.mxu1 %v15238_v30  ;;  %5192 = vmatprep.subr.bf16.mxu0 %v15244_v5 }
 0x6a5   : > { %5235 = vmatprep.subr.bf16.mxu1 %v15246_v20 }
 0x6a7   : > { %5193 = vmatpush1.bf16.msra.mxu0 %v15248_v46 }
 0x6a8   : > { %5236 = vmatpush1.bf16.msra.mxu1 %v15250_v41  ;;  %5808 = vmatprep.subr.bf16.mxu0 %v12847_v40 }
 0x6a9   : > { %5851 = vmatprep.subr.bf16.mxu1 %v12850_v39 }
 0x74a   : > { %v4583_v29 = vpop.f32.mrb[20].mxu0  ;;  %v4626_v47 = vpop.f32.mrb[20].mxu1 }
 0x74b   : > { %v12273_v11 = vadd.f32 %v4583_v29, %v14323_v35  ;;  %v4585_v14 = vpop.f32.mrb[21].mxu0  ;;  %v4628_v25 = vpop.f32.mrb[21].mxu1  ;;  %v12337_v17 = vadd.f32 %v4626_v47, %v14335_v56 }
 0x74c   : > { %v12274_v15 = vadd.f32 %v4585_v14, %v14325_v36  ;;  %v4587_v34 = vpop.f32.mrb[22].mxu0  ;;  %v4630_v60 = vpop.f32.mrb[22].mxu1  ;;  %v12338_v51 = vadd.f32 %v4628_v25, %v14332_v52 }
 0x74d   : > { %v11760_v44 = vmul.f32 -1.442695, %v12273_v11  ;;  %v12275_v38 = vadd.f32 %v4587_v34, %v14323_v35  ;;  %v4589_v50 = vpop.f32.mrb[23].mxu0  ;;  %v4632_v62 = vpop.f32.mrb[23].mxu1  ;;  %v12339_v18 = vadd.f32 %v4630_v60, %v14335_v56 }
 0x74e   : > { %v11762_v53 = vmul.f32 -1.442695, %v12274_v15  ;;  %v12276_v55 = vadd.f32 %v4589_v50, %v14325_v36  ;;  %v11764_v24 = vmul.f32 -1.442695, %v12338_v51  ;;  %v12340_v26 = vadd.f32 %v4632_v62, %v14332_v52  ;;  %v15268_v25 = vpop.permute.xlu0 %6592  ;;  %v15270_v15 = vpop.permute.xlu1 %6595 }
 0x74f   : > { %13245 = vpow2.f32 %v11760_v44  ;;  %v11761_v59 = vmul.f32 -1.442695, %v12275_v38  ;;  %17128 = vst [vmem:[#allocation28_spill] sm:$0xff] %v15268_v25  ;;  %17129 = vst [vmem:[#allocation29_spill] sm:$0xff] %v15270_v15  ;;  %v5562_v15 = vld [vmem:[%s14117_s28 + $0x10] sm:$0x8] }
 0x750   : > { %13247 = vpow2.f32 %v11762_v53  ;;  %v11763_v6 = vmul.f32 -1.442695, %v12276_v55  ;;  %v11765_v40 = vmul.f32 -1.442695, %v12340_v26  ;;  %v5601_v25 = vld [vmem:[%s14117_s28 + $0x78] sm:$0x8] }
 0x751   : > { %13249 = vpow2.f32 %v11761_v59 }
 0x752   : > { %13251 = vpow2.f32 %v11763_v6  ;;  %v15272_v38 = vpop.permute.xlu0 %7846  ;;  %v15274_v50 = vpop.permute.xlu1 %7849 }
 0x753   : > { %13253 = vtanh.f32 %v12337_v17  ;;  %17130 = vst [vmem:[#allocation30_spill] sm:$0xff] %v15272_v38  ;;  %17131 = vst [vmem:[#allocation31_spill] sm:$0xff] %v15274_v50  ;;  %v4941_v50 = vld [vmem:[%s14117_s28 + $0x28] sm:$0x4]  ;;  %v4956_v38 = vld [vmem:[%s14117_s28 + $0x50] sm:$0x4] }
 0x754   : > { %13255 = vpow2.f32 %v11764_v24 }
 0x755   : > { %13257 = vtanh.f32 %v12339_v18 }
 0x759   : > { %v13246_v7 = vpop.eup %13245 }
 0x75a   : > { %v13248_v16 = vpop.eup %13247  ;;  %v4649_v8 = vadd.f32 1.0, %v13246_v7 }
 0x75b   : > { %v4661_v39 = vadd.f32 1.0, %v13248_v16  ;;  %v13250_v29 = vpop.eup %13249  ;;  %v15279_v16 = vpop.permute.xlu0 %9100 }
 0x75c   : > { %13259 = vrcp.f32 %v4649_v8  ;;  %v4650_v47 = vadd.f32 1.0, %v13250_v29  ;;  %v13252_v11 = vpop.eup %13251  ;;  %17132 = vst [vmem:[#allocation32_spill] sm:$0xff] %v15279_v16  ;;  %v15281_v8 = vpop.permute.xlu1 %9103 }
 0x75d   : > { %13261 = vrcp.f32 %v4661_v39  ;;  %v4662_v14 = vadd.f32 1.0, %v13252_v11  ;;  %v13254_v34 = vpop.eup %13253  ;;  %17133 = vst [vmem:[#allocation33_spill] sm:$0xff] %v15281_v8 }
 0x75e   : > { %13263 = vpow2.f32 %v11765_v40  ;;  %v13256_v60 = vpop.eup %13255 }
 0x75f   : > { %13265 = vrcp.f32 %v4650_v47  ;;  %v13258_v44 = vpop.eup %13257  ;;  %v4675_v17 = vadd.f32 1.0, %v13256_v60 }
 0x760   : > { %13267 = vrcp.f32 %v4662_v14  ;;  %v15290_v29 = vpop.permute.xlu1 %10357 }
 0x761   : > { %17135 = vst [vmem:[#allocation35_spill] sm:$0xff] %v15290_v29 }
 0x764   : > { %v4708_v14 = vpop.permute.xlu1 %4707 }
 0x765   : > { %vm4710_vm4 = vcmp.eq.s32.totalorder %v4708_v14, 1 }
 0x766   : > { %v13260_v62 = vpop.eup %13259 }
 0x767   : > { %v13262_v53 = vpop.eup %13261  ;;  %v4685_v55 = vmul.f32 %v13260_v62, %v13254_v34 }
 0x768   : > { %v13264_v59 = vpop.eup %13263  ;;  %v4683_v6 = vmul.f32 %v13262_v53, %v15081_v61  ;;  %v15288_v61 = vpop.permute.xlu0 %10354 }
 0x769   : > { %v13266_v51 = vpop.eup %13265  ;;  %v4676_v7 = vadd.f32 1.0, %v13264_v59  ;;  %17134 = vst [vmem:[#allocation34_spill] sm:$0xff] %v15288_v61 }
 0x76a   : > { %v4686_v24 = vmul.f32 %v13266_v51, %v13258_v44  ;;  %v15277_v26 = vadd.f32 %v4685_v55, %v4683_v6  ;;  %v13268_v18 = vpop.eup %13267 }
 0x76b   : > { %v4684_v40 = vmul.f32 %v13268_v18, %v15085_v58 }
 0x76c   : > { %13269 = vtanh.f32 %v15277_v26  ;;  %v4705_v11 = vpop.permute.xlu0 %4704 }
 0x76d   : > { %13271 = vrcp.f32 %v4675_v17  ;;  %v15285_v39 = vadd.f32 %v4686_v24, %v4684_v40  ;;  %vm4709_vm3 = vcmp.eq.s32.totalorder %v4705_v11, 1 }
 0x76e   : > { %13273 = vrcp.f32 %v4676_v7 }
 0x76f   : > { %13275 = vtanh.f32 %v15285_v39 }
 0x776   : > { %v13270_v47 = vpop.eup %13269 }
 0x777   : > { %v13272_v34 = vpop.eup %13271 }
 0x778   : > { %v13274_v60 = vpop.eup %13273  ;;  %v4691_v44 = vmul.f32 %v13272_v34, %v13270_v47 }
 0x779   : > { %v13276_v62 = vpop.eup %13275 }
 0x77a   : > { %v4692_v58 = vmul.f32 %v13276_v62, %v13274_v60  ;;  %v4711_v53 = vsel %vm4709_vm3, %v4691_v44, 0.0 }
 0x77c   : > { %v4712_v55 = vsel %vm4710_vm4, %v4692_v58, 0.0  ;;  %v4985_v59 = vpack.c.bf16 %v4692_v58, %v4691_v44 }
 0x77d   : > { %v4713_v6 = vpack.c.bf16 %v4712_v55, %v4711_v53  ;;  %v11766_v51 = vpack.c.bf16 %v4712_v55, %v4712_v55 }
 0x77e   : > { %5211 = vmatmul.mubr.bf16.vlgmr.msra.gmra.mrb[24].mxu0 %v4985_v59  ;;  %5254 = vmatmul.mubr.bf16.vlgmr.msra.gmra.mrb[24].mxu1 %v4985_v59 }
 0x77f   : > { %v4722_v17 = vrot.slane %v4713_v6, %v14348_v42  ;;  %v4729_v24 = vrot.slane %v11766_v51, %v14348_v42  ;;  %5809 = vmatpush1.bf16.msra.mxu0 %v15182_v54  ;;  %5852 = vmatpush1.bf16.msra.mxu1 %v15184_v31 }
 0x780   : > { %5810 = vmatprep.subr.bf16.mxu0 %v15188_v27  ;;  %5853 = vmatprep.subr.bf16.mxu1 %v15190_v9 }
 0x781   : > { %v4730_v18 = vcombine.high %v4722_v17, %v4722_v17  ;;  %v4731_v7 = vcombine.high %v4729_v24, %v4729_v24  ;;  %v4738_v40 = vrot.slane %v4722_v17, %v14348_v42  ;;  %v4745_v47 = vrot.slane %v4729_v24, %v14348_v42  ;;  %5840 = vmatprep.mubr.bf16.mxu0 %v17063_v3 }
 0x782   : > { %5883 = vmatprep.mubr.bf16.mxu1 %v17063_v3 }
 0x783   : > { %v4752_v11 = vrot.slane %v4730_v18, %v14348_v42  ;;  %v4759_v54 = vrot.slane %v4731_v7, %v14348_v42  ;;  %v4760_v31 = vcombine.high %v4738_v40, %v4738_v40  ;;  %v4761_v14 = vcombine.high %v4745_v47, %v4745_v47  ;;  %5811 = vmatpush1.bf16.msra.mxu0 %v15192_v10 }
 0x784   : > { %v4765_v34 = vunpack.i.h.s16 %v4738_v40  ;;  %v4773_v60 = vunpack.i.h.s16 %v4745_v47  ;;  %v11767_v44 = vpack.i.b16 %v4738_v40, %v4738_v40  ;;  %v11771_v62 = vpack.i.b16 %v4745_v47, %v4745_v47  ;;  %5854 = vmatpush1.bf16.msra.mxu1 %v15194_v28  ;;  %5812 = vmatprep.subr.bf16.mxu0 %v15202_v43 }
 0x785   : > { %v4762_v58 = vcombine.high %v4752_v11, %v4752_v11  ;;  %v4763_v53 = vcombine.high %v4759_v54, %v4759_v54  ;;  %v4767_v55 = vunpack.i.h.s16 %v4752_v11  ;;  %v4769_v59 = vunpack.i.h.s16 %v4760_v31  ;;  %5855 = vmatprep.subr.bf16.mxu1 %v15206_v33 }
 0x786   : > { %v4775_v6 = vunpack.i.h.s16 %v4759_v54  ;;  %v4777_v51 = vunpack.i.h.s16 %v4761_v14  ;;  %v4781_v17 = vpack.i.b16 %v4765_v34, %v4765_v34  ;;  %v11768_v24 = vpack.i.b16 %v4752_v11, %v4752_v11 }
 0x787   : > { %v4771_v18 = vunpack.i.h.s16 %v4762_v58  ;;  %v4779_v7 = vunpack.i.h.s16 %v4763_v53  ;;  %v4783_v3 = vpack.i.b16 %v4767_v55, %v4767_v55  ;;  %v11769_v29 = vpack.i.b16 %v4760_v31, %v4760_v31  ;;  %5813 = vmatpush1.bf16.msra.mxu0 %v15200_v4 }
 0x788   : > { %v4785_v40 = vpack.i.b16 %v4769_v59, %v4769_v59  ;;  %v11770_v47 = vpack.i.b16 %v4762_v58, %v4762_v58  ;;  %v4789_v61 = vpack.i.b16 %v4773_v60, %v4773_v60  ;;  %v11772_v49 = vpack.i.b16 %v4759_v54, %v4759_v54  ;;  %5856 = vmatpush1.bf16.msra.mxu1 %v15204_v13 }
 0x789   : > { %v4787_v8 = vpack.i.b16 %v4771_v18, %v4771_v18  ;;  %v15310_v16 = vpack.i.b16 %v4775_v6, %v4775_v6  ;;  %v11773_v19 = vpack.i.b16 %v4761_v14, %v4761_v14  ;;  %v15312_v22 = vpack.i.b16 %v4777_v51, %v4777_v51  ;;  %5814 = vmatprep.subr.bf16.mxu0 %v15209_v45 }
 0x78a   : > { %v11774_v11 = vpack.i.b16 %v4763_v53, %v4763_v53  ;;  %v15315_v31 = vpack.i.b16 %v4779_v7, %v4779_v7  ;;  %v4802_v34 = vrot.slane %v11767_v44, %v14357_v57  ;;  %v4809_v60 = vrot.slane %v4781_v17, %v14357_v57  ;;  %5857 = vmatprep.subr.bf16.mxu1 %v15211_v37  ;;  %v4926_v17 = vld [vmem:[%s14117_s28] sm:$0x4] }
 0x78b   : > { %v17136_v54 = vmov 0  ;;  %v4816_v14 = vrot.slane %v11768_v24, %v14357_v57  ;;  %v4823_v58 = vrot.slane %v4783_v3, %v14357_v57  ;;  %v4830_v53 = vrot.slane %v11769_v29, %v14357_v57  ;;  %5815 = vmatpush1.bf16.msra.mxu0 %v15215_v63  ;;  %v4929_v3 = vld [vmem:[%s14117_s28 + $0x8] sm:$0x4]  ;;  %v4938_v7 = vld [vmem:[%s14117_s28 + $0x20] sm:$0x4] }
 0x78c   : > { %v17137_v54 = vsel %vm15322_vm7, 4294967295, %v17136_v54  ;;  %v4837_v44 = vrot.slane %v4785_v40, %v14357_v57  ;;  %v4844_v55 = vrot.slane %v11770_v47, %v14357_v57  ;;  %v4851_v59 = vrot.slane %v4787_v8, %v14357_v57  ;;  %5858 = vmatpush1.bf16.msra.mxu1 %v15219_v0  ;;  %v4950_v40 = vld [vmem:[%s14117_s28 + $0x40] sm:$0x4]  ;;  %v4953_v47 = vld [vmem:[%s14117_s28 + $0x48] sm:$0x4] }
 0x78d   : > { %17138 = vst [vmem:[#allocation36_spill] sm:$0xff] %v17137_v54  ;;  %v4858_v6 = vrot.slane %v11771_v62, %v14357_v57  ;;  %v4865_v51 = vrot.slane %v4789_v61, %v14357_v57  ;;  %v4872_v29 = vrot.slane %v11772_v49, %v14357_v57  ;;  %v4879_v24 = vrot.slane %v15310_v16, %v14357_v57  ;;  %v4932_v62 = vld [vmem:[%s14117_s28 + $0x10] sm:$0x4]  ;;  %v4935_v61 = vld [vmem:[%s14117_s28 + $0x18] sm:$0x4] }
 0x78e   : > { %v4886_v18 = vrot.slane %v11773_v19, %v14357_v57  ;;  %v4893_v8 = vrot.slane %v15312_v22, %v14357_v57  ;;  %v4900_v49 = vrot.slane %v11774_v11, %v14357_v57  ;;  %v4907_v16 = vrot.slane %v15315_v31, %v14357_v57  ;;  %v5595_v54 = vld [vmem:[%s14117_s28 + $0x68] sm:$0x8] }
 0x78f   : > { %v4927_v19 = vsel %vm15322_vm7, %v4802_v34, %v4926_v17  ;;  %v4930_v22 = vsel %vm15322_vm7, %v4809_v60, %v4929_v3  ;;  %v4933_v11 = vsel %vm15322_vm7, %v4816_v14, %v4932_v62  ;;  %v4936_v31 = vsel %vm15322_vm7, %v4823_v58, %v4935_v61  ;;  %v4944_v17 = vld [vmem:[%s14117_s28 + $0x30] sm:$0x4]  ;;  %v4947_v3 = vld [vmem:[%s14117_s28 + $0x38] sm:$0x4]  ;;  %v4965_v14 = vld [vmem:[%s14117_s28 + $0x68] sm:$0x4] }
 0x790   : > { %4928 = vst [vmem:[%s14117_s28] sm:$0x4] %v4927_v19  ;;  %4931 = vst [vmem:[%s14117_s28 + $0x8] sm:$0x4] %v4930_v22  ;;  %v4939_v34 = vsel %vm15322_vm7, %v4830_v53, %v4938_v7  ;;  %v4942_v60 = vsel %vm15322_vm7, %v4837_v44, %v4941_v50  ;;  %v4959_v19 = vld [vmem:[%s14117_s28 + $0x58] sm:$0x4]  ;;  %v4945_v58 = vsel %vm15322_vm7, %v4844_v55, %v4944_v17 }
 0x791   : > { %v4962_v22 = vld [vmem:[%s14117_s28 + $0x60] sm:$0x4]  ;;  %4934 = vst [vmem:[%s14117_s28 + $0x10] sm:$0x4] %v4933_v11  ;;  %4937 = vst [vmem:[%s14117_s28 + $0x18] sm:$0x4] %v4936_v31  ;;  %v4948_v50 = vsel %vm15322_vm7, %v4851_v59, %v4947_v3  ;;  %v4951_v53 = vsel %vm15322_vm7, %v4858_v6, %v4950_v40  ;;  %v4954_v44 = vsel %vm15322_vm7, %v4865_v51, %v4953_v47  ;;  %v5957_v11 = vstv %s5956_s17 }
 0x792   : > { %4940 = vst [vmem:[%s14117_s28 + $0x20] sm:$0x4] %v4939_v34  ;;  %4943 = vst [vmem:[%s14117_s28 + $0x28] sm:$0x4] %v4942_v60  ;;  %v4968_v62 = vld [vmem:[%s14117_s28 + $0x70] sm:$0x4]  ;;  %v4957_v55 = vsel %vm15322_vm7, %v4872_v29, %v4956_v38  ;;  %v4960_v59 = vsel %vm15322_vm7, %v4879_v24, %v4959_v19  ;;  %v4963_v6 = vsel %vm15322_vm7, %v4886_v18, %v4962_v22 }
 0x793   : > { %v4971_v61 = vld [vmem:[%s14117_s28 + $0x78] sm:$0x4]  ;;  %4946 = vst [vmem:[%s14117_s28 + $0x30] sm:$0x4] %v4945_v58  ;;  %4949 = vst [vmem:[%s14117_s28 + $0x38] sm:$0x4] %v4948_v50  ;;  %v4966_v51 = vsel %vm15322_vm7, %v4893_v8, %v4965_v14  ;;  %v4969_v7 = vsel %vm15322_vm7, %v4900_v49, %v4968_v62 }
 0x794   : > { %4952 = vst [vmem:[%s14117_s28 + $0x40] sm:$0x4] %v4951_v53  ;;  %4955 = vst [vmem:[%s14117_s28 + $0x48] sm:$0x4] %v4954_v44  ;;  %v4972_v40 = vsel %vm15322_vm7, %v4907_v16, %v4971_v61  ;;  %v15409_v38 = vld [vmem:[#allocation11 + $0x84] ss:$16 sps:$4 sm:$0xff]  }
 0x795   : > { %4958 = vst [vmem:[%s14117_s28 + $0x50] sm:$0x4] %v4957_v55  ;;  %4961 = vst [vmem:[%s14117_s28 + $0x58] sm:$0x4] %v4960_v59  ;;  %v15411_v29 = vld [vmem:[#allocation11 + $0x8c] ss:$16 sps:$4 sm:$0xff]   ;;  %5816 = vmatprep.subr.bf16.mxu0 %v15409_v38 }
 0x796   : > { %4964 = vst [vmem:[%s14117_s28 + $0x60] sm:$0x4] %v4963_v6  ;;  %4967 = vst [vmem:[%s14117_s28 + $0x68] sm:$0x4] %v4966_v51  ;;  %v15413_v24 = vld [vmem:[#allocation11 + $0x80] ss:$16 sps:$4 sm:$0xff]   ;;  %5859 = vmatprep.subr.bf16.mxu1 %v15411_v29 }
 0x797   : > { %4970 = vst [vmem:[%s14117_s28 + $0x70] sm:$0x4] %v4969_v7  ;;  %4973 = vst [vmem:[%s14117_s28 + $0x78] sm:$0x4] %v4972_v40  ;;  %v15415_v18 = vld [vmem:[#allocation11 + $0x88] ss:$16 sps:$4 sm:$0xff]   ;;  %5817 = vmatpush1.bf16.msra.mxu0 %v15413_v24 }
 0x798   : > { %5860 = vmatpush1.bf16.msra.mxu1 %v15415_v18  ;;  %v15421_v8 = vld [vmem:[#allocation11 + $0xa4] ss:$16 sps:$4 sm:$0xff]   ;;  %v15423_v47 = vld [vmem:[#allocation11 + $0xac] ss:$16 sps:$4 sm:$0xff]   ;;  %v15425_v49 = vld [vmem:[#allocation11 + $0xa0] ss:$16 sps:$4 sm:$0xff]  }
 0x799   : > { %v15427_v16 = vld [vmem:[#allocation11 + $0xa8] ss:$16 sps:$4 sm:$0xff]   ;;  %5818 = vmatprep.subr.bf16.mxu0 %v15421_v8  ;;  %5861 = vmatprep.subr.bf16.mxu1 %v15423_v47  ;;  %v15442_v31 = vld [vmem:[#allocation5] sm:$0xff] }
 0x79a   : > { %17139 = vst [vmem:[#allocation37_spill] sm:$0xff] %v15442_v31  ;;  %vm5958_vm9 = vcmp.gt.s32.totalorder %v15442_v31, %v5957_v11  ;;  %v5565_v31 = vld [vmem:[%s14117_s28 + $0x18] sm:$0x8] }
 0x79b   : > { %5819 = vmatpush1.bf16.msra.mxu0 %v15425_v49 }
 0x79c   : > { %5862 = vmatpush1.bf16.msra.mxu1 %v15427_v16  ;;  %5820 = vmatprep.subr.bf16.mxu0 %v15232_v1  ;;  %v15445_v1 = vld [vmem:[#allocation5 + $0x8] sm:$0xff] }
 0x79d   : > { %5863 = vmatprep.subr.bf16.mxu1 %v15234_v2  ;;  %17140 = vst [vmem:[#allocation38_spill] sm:$0xff] %v15445_v1  ;;  %vm5959_vm10 = vcmp.gt.s32.totalorder %v15445_v1, %v5957_v11  ;;  %v17141_v2 = vmov 0  }
 0x79f   : > { %5821 = vmatpush1.bf16.msra.mxu0 %v15236_v48  ;;  %v5960_v48 = vsel %vm5958_vm9, 1, %v17141_v2  ;;  %vm15656_vm9 = vmand %vm5553_vm15, %vm6183_vm6 }
 0x7a0   : > { %5864 = vmatpush1.bf16.msra.mxu1 %v15238_v30  ;;  %5822 = vmatprep.subr.bf16.mxu0 %v15244_v5  ;;  %v5961_v30 = vsel %vm5959_vm10, 1, %v17141_v2 }
 0x7a1   : > { %5865 = vmatprep.subr.bf16.mxu1 %v15246_v20  ;;  %5963 = vperm.xlu0 %12635, %v5960_v48  }
 0x7a2   : > { %5966 = vperm.xlu1 %12636, %v5961_v30  }
 0x7a3   : > { %5823 = vmatpush1.bf16.msra.mxu0 %v15248_v46 }
 0x7a4   : > { %5866 = vmatpush1.bf16.msra.mxu1 %v15250_v41 }
 0x851   : > { %v5212_v5 = vpop.f32.mrb[24].mxu0  ;;  %v5255_v20 = vpop.f32.mrb[24].mxu1 }
 0x852   : > { %v12277_v46 = vadd.f32 %v5212_v5, %v14323_v35  ;;  %v5214_v41 = vpop.f32.mrb[25].mxu0  ;;  %v5257_v34 = vpop.f32.mrb[25].mxu1  ;;  %v12341_v55 = vadd.f32 %v5255_v20, %v14335_v56 }
 0x853   : > { %v12278_v60 = vadd.f32 %v5214_v41, %v14325_v36  ;;  %v5216_v17 = vpop.f32.mrb[26].mxu0  ;;  %v5259_v3 = vpop.f32.mrb[26].mxu1  ;;  %v12342_v61 = vadd.f32 %v5257_v34, %v14332_v52 }
 0x854   : > { %v11807_v19 = vmul.f32 -1.442695, %v12277_v46  ;;  %v12279_v22 = vadd.f32 %v5216_v17, %v14323_v35  ;;  %v5218_v14 = vpop.f32.mrb[27].mxu0  ;;  %v5261_v58 = vpop.f32.mrb[27].mxu1  ;;  %v12343_v51 = vadd.f32 %v5259_v3, %v14335_v56 }
 0x855   : > { %v11809_v50 = vmul.f32 -1.442695, %v12278_v60  ;;  %v12280_v53 = vadd.f32 %v5218_v14, %v14325_v36  ;;  %v11811_v59 = vmul.f32 -1.442695, %v12342_v61  ;;  %v12344_v6 = vadd.f32 %v5261_v58, %v14332_v52 }
 0x856   : > { %13277 = vpow2.f32 %v11807_v19  ;;  %v11808_v44 = vmul.f32 -1.442695, %v12279_v22 }
 0x857   : > { %13279 = vpow2.f32 %v11809_v50  ;;  %v11810_v62 = vmul.f32 -1.442695, %v12280_v53  ;;  %v11812_v48 = vmul.f32 -1.442695, %v12344_v6 }
 0x858   : > { %13281 = vpow2.f32 %v11808_v44 }
 0x859   : > { %13283 = vpow2.f32 %v11810_v62 }
 0x85a   : > { %13285 = vtanh.f32 %v12341_v55 }
 0x85b   : > { %13287 = vpow2.f32 %v11811_v59 }
 0x85c   : > { %13289 = vtanh.f32 %v12343_v51 }
 0x860   : > { %v13278_v7 = vpop.eup %13277 }
 0x861   : > { %v13280_v40 = vpop.eup %13279  ;;  %v5278_v11 = vadd.f32 1.0, %v13278_v7 }
 0x862   : > { %v5290_v30 = vadd.f32 1.0, %v13280_v40  ;;  %v13282_v5 = vpop.eup %13281 }
 0x863   : > { %13291 = vrcp.f32 %v5278_v11  ;;  %v5279_v46 = vadd.f32 1.0, %v13282_v5  ;;  %v13284_v41 = vpop.eup %13283 }
 0x864   : > { %13293 = vrcp.f32 %v5290_v30  ;;  %v5291_v20 = vadd.f32 1.0, %v13284_v41  ;;  %v13286_v34 = vpop.eup %13285 }
 0x865   : > { %13295 = vpow2.f32 %v11812_v48  ;;  %v13288_v60 = vpop.eup %13287 }
 0x866   : > { %13297 = vrcp.f32 %v5279_v46  ;;  %v13290_v17 = vpop.eup %13289  ;;  %v5304_v14 = vadd.f32 1.0, %v13288_v60 }
 0x867   : > { %13299 = vrcp.f32 %v5291_v20 }
 0x868   : > { %13301 = vrcp.f32 %v5304_v14 }
 0x86d   : > { %v13292_v3 = vpop.eup %13291 }
 0x86e   : > { %v13294_v19 = vpop.eup %13293  ;;  %v5314_v22 = vmul.f32 %v13292_v3, %v13286_v34 }
 0x86f   : > { %v13296_v58 = vpop.eup %13295  ;;  %v5312_v50 = vmul.f32 %v13294_v19, %v15277_v26 }
 0x870   : > { %v13298_v53 = vpop.eup %13297  ;;  %v5305_v55 = vadd.f32 1.0, %v13296_v58 }
 0x871   : > { %v15459_v44 = vadd.f32 %v5314_v22, %v5312_v50  ;;  %v5315_v62 = vmul.f32 %v13298_v53, %v13290_v17  ;;  %v13300_v61 = vpop.eup %13299 }
 0x872   : > { %v5313_v59 = vmul.f32 %v13300_v61, %v15285_v39  ;;  %v13302_v51 = vpop.eup %13301 }
 0x873   : > { %13303 = vtanh.f32 %v15459_v44 }
 0x874   : > { %v15463_v6 = vadd.f32 %v5315_v62, %v5313_v59  ;;  %13305 = vrcp.f32 %v5305_v55 }
 0x876   : > { %13307 = vtanh.f32 %v15463_v6 }
 0x87d   : > { %v13304_v7 = vpop.eup %13303 }
 0x87e   : > { %v5320_v26 = vmul.f32 %v13304_v7, %v13302_v51  ;;  %v13306_v40 = vpop.eup %13305 }
 0x880   : > { %v5340_v11 = vsel %vm5338_vm11, %v5320_v26, 0.0  ;;  %v13308_v48 = vpop.eup %13307 }
 0x881   : > { %v5321_v30 = vmul.f32 %v13308_v48, %v13306_v40 }
 0x883   : > { %v5341_v5 = vsel %vm5339_vm13, %v5321_v30, 0.0  ;;  %v5615_v46 = vpack.c.bf16 %v5321_v30, %v5320_v26 }
 0x884   : > { %v5342_v41 = vpack.c.bf16 %v5341_v5, %v5340_v11  ;;  %v11813_v39 = vpack.c.bf16 %v5341_v5, %v5341_v5 }
 0x885   : > { %5841 = vmatmul.mubr.bf16.vlgmr.msra.gmra.mrb[28].mxu0 %v5615_v46  ;;  %5884 = vmatmul.mubr.bf16.vlgmr.msra.gmra.mrb[28].mxu1 %v5615_v46 }
 0x886   : > { %v5351_v20 = vrot.slane %v5342_v41, %v14348_v42  ;;  %v5358_v34 = vrot.slane %v11813_v39, %v14348_v42  ;;  %6469 = vmatprep.mubr.bf16.mxu0 %v17141_v2  ;;  %6512 = vmatprep.mubr.bf16.mxu1 %v17141_v2  ;;  %v5571_v2 = vld [vmem:[%s14117_s28 + $0x28] sm:$0x8] }
 0x888   : > { %v5359_v12 = vcombine.high %v5351_v20, %v5351_v20  ;;  %v5360_v60 = vcombine.high %v5358_v34, %v5358_v34  ;;  %v5367_v17 = vrot.slane %v5351_v20, %v14348_v42  ;;  %v5374_v21 = vrot.slane %v5358_v34, %v14348_v42 }
 0x88a   : > { %v5381_v3 = vrot.slane %v5359_v12, %v14348_v42  ;;  %v5388_v19 = vrot.slane %v5360_v60, %v14348_v42  ;;  %v5389_v22 = vcombine.high %v5367_v17, %v5367_v17  ;;  %v5390_v14 = vcombine.high %v5374_v21, %v5374_v21  ;;  %v5577_v42 = vld [vmem:[%s14117_s28 + $0x38] sm:$0x8] }
 0x88b   : > { %v5394_v58 = vunpack.i.h.s16 %v5367_v17  ;;  %v5402_v50 = vunpack.i.h.s16 %v5374_v21  ;;  %v11814_v53 = vpack.i.b16 %v5367_v17, %v5367_v17  ;;  %v11818_v62 = vpack.i.b16 %v5374_v21, %v5374_v21 }
 0x88c   : > { %v5391_v61 = vcombine.high %v5381_v3, %v5381_v3  ;;  %v5392_v55 = vcombine.high %v5388_v19, %v5388_v19  ;;  %v5396_v59 = vunpack.i.h.s16 %v5381_v3  ;;  %v5398_v51 = vunpack.i.h.s16 %v5389_v22 }
 0x88d   : > { %v5404_v7 = vunpack.i.h.s16 %v5388_v19  ;;  %v5406_v26 = vunpack.i.h.s16 %v5390_v14  ;;  %v15476_v40 = vpack.i.b16 %v5394_v58, %v5394_v58  ;;  %v11815_v11 = vpack.i.b16 %v5381_v3, %v5381_v3 }
 0x88e   : > { %v5400_v48 = vunpack.i.h.s16 %v5391_v61  ;;  %v5408_v30 = vunpack.i.h.s16 %v5392_v55  ;;  %v15478_v5 = vpack.i.b16 %v5396_v59, %v5396_v59  ;;  %v11816_v46 = vpack.i.b16 %v5389_v22, %v5389_v22 }
 0x88f   : > { %v15480_v41 = vpack.i.b16 %v5398_v51, %v5398_v51  ;;  %v11817_v39 = vpack.i.b16 %v5391_v61, %v5391_v61  ;;  %v5418_v20 = vpack.i.b16 %v5402_v50, %v5402_v50  ;;  %v11819_v34 = vpack.i.b16 %v5388_v19, %v5388_v19  ;;  %v5580_v50 = vld [vmem:[%s14117_s28 + $0x40] sm:$0x8] }
 0x890   : > { %v15482_v12 = vpack.i.b16 %v5400_v48, %v5400_v48  ;;  %v5420_v60 = vpack.i.b16 %v5404_v7, %v5404_v7  ;;  %v11820_v17 = vpack.i.b16 %v5390_v14, %v5390_v14  ;;  %v5422_v21 = vpack.i.b16 %v5406_v26, %v5406_v26  ;;  %v5556_v51 = vld [vmem:[%s14117_s28] sm:$0x8]  ;;  %v5559_v7 = vld [vmem:[%s14117_s28 + $0x8] sm:$0x8] }
 0x891   : > { %v11821_v3 = vpack.i.b16 %v5392_v55, %v5392_v55  ;;  %v5424_v58 = vpack.i.b16 %v5408_v30, %v5408_v30  ;;  %v5431_v59 = vrot.slane %v11814_v53, %v14357_v57  ;;  %v5438_v22 = vrot.slane %v15476_v40, %v14357_v57  ;;  %v5583_v26 = vld [vmem:[%s14117_s28 + $0x48] sm:$0x8]  ;;  %v5586_v40 = vld [vmem:[%s14117_s28 + $0x50] sm:$0x8] }
 0x892   : > { %v17142_v19 = vmov 0  ;;  %v5445_v14 = vrot.slane %v11815_v11, %v14357_v57  ;;  %v5452_v61 = vrot.slane %v15478_v5, %v14357_v57  ;;  %v5459_v53 = vrot.slane %v11816_v46, %v14357_v57  ;;  %v5589_v46 = vld [vmem:[%s14117_s28 + $0x58] sm:$0x8] }
 0x893   : > { %v17143_v19 = vsel %vm15489_vm1, 4294967295, %v17142_v19  ;;  %v5466_v55 = vrot.slane %v15480_v41, %v14357_v57  ;;  %v5473_v48 = vrot.slane %v11817_v39, %v14357_v57  ;;  %v5480_v11 = vrot.slane %v15482_v12, %v14357_v57  ;;  %v5592_v41 = vld [vmem:[%s14117_s28 + $0x60] sm:$0x8] }
 0x894   : > { %17144 = vst [vmem:[#allocation39_spill] sm:$0xff] %v17143_v19  ;;  %v5487_v30 = vrot.slane %v11818_v62, %v14357_v57  ;;  %v5494_v5 = vrot.slane %v5418_v20, %v14357_v57  ;;  %v5501_v32 = vrot.slane %v11819_v34, %v14357_v57  ;;  %v5508_v39 = vrot.slane %v5420_v60, %v14357_v57  ;;  %v5598_v62 = vld [vmem:[%s14117_s28 + $0x70] sm:$0x8]  ;;  %v5568_v34 = vld [vmem:[%s14117_s28 + $0x20] sm:$0x8] }
 0x895   : > { %v5515_v23 = vrot.slane %v11820_v17, %v14357_v57  ;;  %v5522_v12 = vrot.slane %v5422_v21, %v14357_v57  ;;  %v5529_v20 = vrot.slane %v11821_v3, %v14357_v57  ;;  %v5536_v1 = vrot.slane %v5424_v58, %v14357_v57  ;;  %v5574_v21 = vld [vmem:[%s14117_s28 + $0x30] sm:$0x8]  ;;  %v6827_v19 = vld [vmem:[%s14117_s28 + $0x2c] sm:$0x1] }
 0x896   : > { %v5581_v60 = vsel %vm15489_vm1, %v5487_v30, %v5580_v50  ;;  %v5584_v17 = vsel %vm15489_vm1, %v5494_v5, %v5583_v26  ;;  %v5587_v3 = vsel %vm15489_vm1, %v5501_v32, %v5586_v40  ;;  %v5590_v58 = vsel %vm15489_vm1, %v5508_v39, %v5589_v46 }
 0x897   : > { %5582 = vst [vmem:[%s14117_s28 + $0x40] sm:$0x8] %v5581_v60  ;;  %5585 = vst [vmem:[%s14117_s28 + $0x48] sm:$0x8] %v5584_v17  ;;  %v5593_v50 = vsel %vm15489_vm1, %v5515_v23, %v5592_v41  ;;  %v5596_v26 = vsel %vm15489_vm1, %v5522_v12, %v5595_v54  ;;  %v5599_v32 = vsel %vm15489_vm1, %v5529_v20, %v5598_v62 }
 0x898   : > { %5588 = vst [vmem:[%s14117_s28 + $0x50] sm:$0x8] %v5587_v3  ;;  %5591 = vst [vmem:[%s14117_s28 + $0x58] sm:$0x8] %v5590_v58  ;;  %v5602_v40 = vsel %vm15489_vm1, %v5536_v1, %v5601_v25  ;;  %v5557_v23 = vsel %vm15489_vm1, %v5431_v59, %v5556_v51  ;;  %v5560_v54 = vsel %vm15489_vm1, %v5438_v22, %v5559_v7 }
 0x899   : > { %5594 = vst [vmem:[%s14117_s28 + $0x60] sm:$0x8] %v5593_v50  ;;  %5597 = vst [vmem:[%s14117_s28 + $0x68] sm:$0x8] %v5596_v26  ;;  %v5563_v30 = vsel %vm15489_vm1, %v5445_v14, %v5562_v15  ;;  %v5566_v5 = vsel %vm15489_vm1, %v5452_v61, %v5565_v31  ;;  %v5569_v25 = vsel %vm15489_vm1, %v5459_v53, %v5568_v34  ;;  %v12895_v15 = vld [vmem:[#allocation11 + $0x4] ss:$16 sps:$4 sm:$0xff]  }
 0x89a   : > { %5600 = vst [vmem:[%s14117_s28 + $0x70] sm:$0x8] %v5599_v32  ;;  %5603 = vst [vmem:[%s14117_s28 + $0x78] sm:$0x8] %v5602_v40  ;;  %v5572_v1 = vsel %vm15489_vm1, %v5466_v55, %v5571_v2  ;;  %v5575_v59 = vsel %vm15489_vm1, %v5473_v48, %v5574_v21  ;;  %v5578_v22 = vsel %vm15489_vm1, %v5480_v11, %v5577_v42  ;;  %v12898_v31 = vld [vmem:[#allocation11 + $0xc] ss:$16 sps:$4 sm:$0xff]   ;;  %6437 = vmatprep.subr.bf16.mxu0 %v12895_v15 }
 0x89b   : > { %5558 = vst [vmem:[%s14117_s28] sm:$0x8] %v5557_v23  ;;  %5561 = vst [vmem:[%s14117_s28 + $0x8] sm:$0x8] %v5560_v54  ;;  %v15574_v14 = vld [vmem:[#allocation11] ss:$16 sps:$4 sm:$0xff]   ;;  %6480 = vmatprep.subr.bf16.mxu1 %v12898_v31 }
 0x89c   : > { %5564 = vst [vmem:[%s14117_s28 + $0x10] sm:$0x8] %v5563_v30  ;;  %5567 = vst [vmem:[%s14117_s28 + $0x18] sm:$0x8] %v5566_v5  ;;  %v15576_v61 = vld [vmem:[#allocation11 + $0x8] ss:$16 sps:$4 sm:$0xff]   ;;  %6438 = vmatpush1.bf16.msra.mxu0 %v15574_v14 }
 0x89d   : > { %5570 = vst [vmem:[%s14117_s28 + $0x20] sm:$0x8] %v5569_v25  ;;  %5573 = vst [vmem:[%s14117_s28 + $0x28] sm:$0x8] %v5572_v1  ;;  %6481 = vmatpush1.bf16.msra.mxu1 %v15576_v61  ;;  %6439 = vmatprep.subr.bf16.mxu0 %v15188_v27  ;;  %v15600_v42 = vld [vmem:[#allocation11 + $0xc4] ss:$16 sps:$4 sm:$0xff]  }
 0x89e   : > { %5576 = vst [vmem:[%s14117_s28 + $0x30] sm:$0x8] %v5575_v59  ;;  %5579 = vst [vmem:[%s14117_s28 + $0x38] sm:$0x8] %v5578_v22  ;;  %6482 = vmatprep.subr.bf16.mxu1 %v15190_v9  ;;  %v15602_v27 = vld [vmem:[#allocation11 + $0xcc] ss:$16 sps:$4 sm:$0xff]  }
 0x89f   : > { %v15604_v9 = vld [vmem:[#allocation11 + $0xc0] ss:$16 sps:$4 sm:$0xff]  }
 0x8a0   : > { %6440 = vmatpush1.bf16.msra.mxu0 %v15192_v10  ;;  %v15606_v10 = vld [vmem:[#allocation11 + $0xc8] ss:$16 sps:$4 sm:$0xff]  }
 0x8a1   : > { %6483 = vmatpush1.bf16.msra.mxu1 %v15194_v28  ;;  %6441 = vmatprep.subr.bf16.mxu0 %v15202_v43  ;;  %v15612_v28 = vld [vmem:[#allocation11 + $0xe4] ss:$16 sps:$4 sm:$0xff]   ;;  %v15616_v43 = vld [vmem:[#allocation11 + $0xe0] ss:$16 sps:$4 sm:$0xff]  }
 0x8a2   : > { %6484 = vmatprep.subr.bf16.mxu1 %v15206_v33 }
 0x8a4   : > { %6442 = vmatpush1.bf16.msra.mxu0 %v15200_v4  ;;  %v15614_v4 = vld [vmem:[#allocation11 + $0xec] ss:$16 sps:$4 sm:$0xff]  }
 0x8a5   : > { %6485 = vmatpush1.bf16.msra.mxu1 %v15204_v13  ;;  %6443 = vmatprep.subr.bf16.mxu0 %v15209_v45  ;;  %v15618_v13 = vld [vmem:[#allocation11 + $0xe8] ss:$16 sps:$4 sm:$0xff]  }
 0x8a6   : > { %6486 = vmatprep.subr.bf16.mxu1 %v15211_v37 }
 0x8a8   : > { %6444 = vmatpush1.bf16.msra.mxu0 %v15215_v63 }
 0x8a9   : > { %6487 = vmatpush1.bf16.msra.mxu1 %v15219_v0  ;;  %6445 = vmatprep.subr.bf16.mxu0 %v15409_v38 }
 0x8aa   : > { %6488 = vmatprep.subr.bf16.mxu1 %v15411_v29 }
 0x8ac   : > { %6446 = vmatpush1.bf16.msra.mxu0 %v15413_v24 }
 0x8ad   : > { %6489 = vmatpush1.bf16.msra.mxu1 %v15415_v18  ;;  %6447 = vmatprep.subr.bf16.mxu0 %v15421_v8 }
 0x8ae   : > { %6490 = vmatprep.subr.bf16.mxu1 %v15423_v47 }
 0x8b0   : > { %6448 = vmatpush1.bf16.msra.mxu0 %v15425_v49 }
 0x8b1   : > { %6491 = vmatpush1.bf16.msra.mxu1 %v15427_v16  ;;  %6449 = vmatprep.subr.bf16.mxu0 %v15600_v42 }
 0x8b2   : > { %6492 = vmatprep.subr.bf16.mxu1 %v15602_v27 }
 0x8b4   : > { %6450 = vmatpush1.bf16.msra.mxu0 %v15604_v9 }
 0x8b5   : > { %6493 = vmatpush1.bf16.msra.mxu1 %v15606_v10  ;;  %6451 = vmatprep.subr.bf16.mxu0 %v15612_v28 }
 0x8b6   : > { %6494 = vmatprep.subr.bf16.mxu1 %v15614_v4 }
 0x8b8   : > { %6452 = vmatpush1.bf16.msra.mxu0 %v15616_v43 }
 0x8b9   : > { %6495 = vmatpush1.bf16.msra.mxu1 %v15618_v13  ;;  %7064 = vmatprep.subr.bf16.mxu0 %v12895_v15 }
 0x8ba   : > { %7107 = vmatprep.subr.bf16.mxu1 %v12898_v31 }
 0x958   : > { %v5842_v33 = vpop.f32.mrb[28].mxu0  ;;  %v5885_v45 = vpop.f32.mrb[28].mxu1 }
 0x959   : > { %v12281_v37 = vadd.f32 %v5842_v33, %v14323_v35  ;;  %v5844_v63 = vpop.f32.mrb[29].mxu0  ;;  %v5887_v0 = vpop.f32.mrb[29].mxu1  ;;  %v12345_v7 = vadd.f32 %v5885_v45, %v14335_v56 }
 0x95a   : > { %v12282_v38 = vadd.f32 %v5844_v63, %v14325_v36  ;;  %v5846_v29 = vpop.f32.mrb[30].mxu0  ;;  %v5889_v24 = vpop.f32.mrb[30].mxu1  ;;  %v12346_v51 = vadd.f32 %v5887_v0, %v14332_v52 }
 0x95b   : > { %v11854_v18 = vmul.f32 -1.442695, %v12281_v37  ;;  %v12283_v8 = vadd.f32 %v5846_v29, %v14323_v35  ;;  %v5848_v47 = vpop.f32.mrb[31].mxu0  ;;  %v5891_v49 = vpop.f32.mrb[31].mxu1  ;;  %v12347_v46 = vadd.f32 %v5889_v24, %v14335_v56 }
 0x95c   : > { %v11856_v16 = vmul.f32 -1.442695, %v12282_v38  ;;  %v12284_v2 = vadd.f32 %v5848_v47, %v14325_v36  ;;  %v11858_v48 = vmul.f32 -1.442695, %v12346_v51  ;;  %v12348_v11 = vadd.f32 %v5891_v49, %v14332_v52  ;;  %v5964_v45 = vpop.permute.xlu0 %5963  ;;  %v17145_v49 = vld [vmem:[#allocation22_spill] sm:$0xff] }
 0x95d   : > { %13309 = vpow2.f32 %v11854_v18  ;;  %v11855_v53 = vmul.f32 -1.442695, %v12283_v8  ;;  %vm5968_vm3 = vcmp.eq.s32.totalorder %v5964_v45, 1 }
 0x95e   : > { %13311 = vpow2.f32 %v11856_v16  ;;  %v11857_v55 = vmul.f32 -1.442695, %v12284_v2  ;;  %v11859_v62 = vmul.f32 -1.442695, %v12348_v11 }
 0x95f   : > { %13313 = vpow2.f32 %v11855_v53  ;;  %v17146_v53 = vmov 0  }
 0x960   : > { %13315 = vpow2.f32 %v11857_v55 }
 0x961   : > { %13317 = vtanh.f32 %v12345_v7 }
 0x962   : > { %13319 = vpow2.f32 %v11858_v48 }
 0x963   : > { %13321 = vtanh.f32 %v12347_v46 }
 0x967   : > { %v13310_v41 = vpop.eup %13309 }
 0x968   : > { %v13312_v39 = vpop.eup %13311  ;;  %v5908_v12 = vadd.f32 1.0, %v13310_v41 }
 0x969   : > { %v5920_v20 = vadd.f32 1.0, %v13312_v39  ;;  %v13314_v34 = vpop.eup %13313 }
 0x96a   : > { %13323 = vrcp.f32 %v5908_v12  ;;  %v5909_v60 = vadd.f32 1.0, %v13314_v34  ;;  %v13316_v17 = vpop.eup %13315 }
 0x96b   : > { %13325 = vrcp.f32 %v5920_v20  ;;  %v5921_v21 = vadd.f32 1.0, %v13316_v17  ;;  %v13318_v3 = vpop.eup %13317 }
 0x96c   : > { %13327 = vpow2.f32 %v11859_v62  ;;  %v13320_v58 = vpop.eup %13319 }
 0x96d   : > { %13329 = vrcp.f32 %v5909_v60  ;;  %v13322_v50 = vpop.eup %13321  ;;  %v5934_v5 = vadd.f32 1.0, %v13320_v58 }
 0x96e   : > { %13331 = vrcp.f32 %v5921_v21 }
 0x974   : > { %v13324_v26 = vpop.eup %13323 }
 0x975   : > { %v13326_v32 = vpop.eup %13325  ;;  %v5944_v40 = vmul.f32 %v13324_v26, %v13318_v3 }
 0x976   : > { %v13328_v23 = vpop.eup %13327  ;;  %v5942_v54 = vmul.f32 %v13326_v32, %v15459_v44  ;;  %v5967_v44 = vpop.permute.xlu1 %5966 }
 0x977   : > { %v13330_v30 = vpop.eup %13329  ;;  %v5935_v22 = vadd.f32 1.0, %v13328_v23  ;;  %vm5969_vm4 = vcmp.eq.s32.totalorder %v5967_v44, 1 }
 0x978   : > { %v5945_v25 = vmul.f32 %v13330_v30, %v13322_v50  ;;  %v15633_v1 = vadd.f32 %v5944_v40, %v5942_v54  ;;  %v13332_v59 = vpop.eup %13331 }
 0x979   : > { %v5943_v15 = vmul.f32 %v13332_v59, %v15463_v6 }
 0x97a   : > { %13333 = vtanh.f32 %v15633_v1 }
 0x97b   : > { %13335 = vrcp.f32 %v5934_v5  ;;  %v15637_v31 = vadd.f32 %v5945_v25, %v5943_v15 }
 0x97c   : > { %13337 = vrcp.f32 %v5935_v22 }
 0x97d   : > { %13339 = vtanh.f32 %v15637_v31 }
 0x984   : > { %v13334_v33 = vpop.eup %13333 }
 0x985   : > { %v13336_v37 = vpop.eup %13335 }
 0x986   : > { %v13338_v63 = vpop.eup %13337  ;;  %v5950_v0 = vmul.f32 %v13336_v37, %v13334_v33 }
 0x987   : > { %v13340_v38 = vpop.eup %13339 }
 0x988   : > { %v5951_v29 = vmul.f32 %v13340_v38, %v13338_v63  ;;  %v5970_v24 = vsel %vm5968_vm3, %v5950_v0, 0.0 }
 0x98a   : > { %v5971_v6 = vsel %vm5969_vm4, %v5951_v29, 0.0  ;;  %v6244_v18 = vpack.c.bf16 %v5951_v29, %v5950_v0  ;;  %v17147_v0 = vmov 0 }
 0x98b   : > { %v5972_v8 = vpack.c.bf16 %v5971_v6, %v5970_v24  ;;  %v11860_v47 = vpack.c.bf16 %v5971_v6, %v5971_v6  ;;  %v17148_v0 = vsel %vm15656_vm9, 4294967295, %v17147_v0 }
 0x98c   : > { %6470 = vmatmul.mubr.bf16.vlgmr.msra.gmra.mrb[32].mxu0 %v6244_v18  ;;  %6513 = vmatmul.mubr.bf16.vlgmr.msra.gmra.mrb[32].mxu1 %v6244_v18  ;;  %17149 = vst [vmem:[#allocation40_spill] sm:$0xff] %v17148_v0  ;;  %v6821_v0 = vld [vmem:[%s14117_s28 + $0x1c] sm:$0x1] }
 0x98d   : > { %v5981_v16 = vrot.slane %v5972_v8, %v17145_v49  ;;  %v5988_v2 = vrot.slane %v11860_v47, %v17145_v49  ;;  %7065 = vmatpush1.bf16.msra.mxu0 %v15574_v14  ;;  %7108 = vmatpush1.bf16.msra.mxu1 %v15576_v61 }
 0x98e   : > { %7096 = vmatprep.mubr.bf16.mxu0 %v17146_v53  ;;  %7139 = vmatprep.mubr.bf16.mxu1 %v17146_v53 }
 0x98f   : > { %v5989_v55 = vcombine.high %v5981_v16, %v5981_v16  ;;  %v5990_v51 = vcombine.high %v5988_v2, %v5988_v2  ;;  %v5997_v7 = vrot.slane %v5981_v16, %v17145_v49  ;;  %v6004_v48 = vrot.slane %v5988_v2, %v17145_v49  ;;  %v6209_v2 = vld [vmem:[%s14117_s28 + $0x40] sm:$0x8] }
 0x991   : > { %v6011_v11 = vrot.slane %v5989_v55, %v17145_v49  ;;  %v6018_v46 = vrot.slane %v5990_v51, %v17145_v49  ;;  %v6019_v41 = vcombine.high %v5997_v7, %v5997_v7  ;;  %v6020_v39 = vcombine.high %v6004_v48, %v6004_v48  ;;  %v6212_v55 = vld [vmem:[%s14117_s28 + $0x48] sm:$0x8] }
 0x992   : > { %v6024_v14 = vunpack.i.h.s16 %v5997_v7  ;;  %v6032_v12 = vunpack.i.h.s16 %v6004_v48  ;;  %v11861_v61 = vpack.i.b16 %v5997_v7, %v5997_v7  ;;  %v11865_v62 = vpack.i.b16 %v6004_v48, %v6004_v48 }
 0x993   : > { %v6021_v20 = vcombine.high %v6011_v11, %v6011_v11  ;;  %v6022_v34 = vcombine.high %v6018_v46, %v6018_v46  ;;  %v6026_v60 = vunpack.i.h.s16 %v6011_v11  ;;  %v6028_v17 = vunpack.i.h.s16 %v6019_v41 }
 0x994   : > { %v6034_v21 = vunpack.i.h.s16 %v6018_v46  ;;  %v6036_v3 = vunpack.i.h.s16 %v6020_v39  ;;  %v6040_v58 = vpack.i.b16 %v6024_v14, %v6024_v14  ;;  %v11862_v50 = vpack.i.b16 %v6011_v11, %v6011_v11 }
 0x995   : > { %v6030_v26 = vunpack.i.h.s16 %v6021_v20  ;;  %v6038_v32 = vunpack.i.h.s16 %v6022_v34  ;;  %v6042_v40 = vpack.i.b16 %v6026_v60, %v6026_v60  ;;  %v11863_v23 = vpack.i.b16 %v6019_v41, %v6019_v41  ;;  %v6188_v41 = vld [vmem:[%s14117_s28 + $0x8] sm:$0x8] }
 0x996   : > { %v6044_v54 = vpack.i.b16 %v6028_v17, %v6028_v17  ;;  %v11864_v30 = vpack.i.b16 %v6021_v20, %v6021_v20  ;;  %v6048_v5 = vpack.i.b16 %v6032_v12, %v6032_v12  ;;  %v11866_v25 = vpack.i.b16 %v6018_v46, %v6018_v46  ;;  %v6185_v46 = vld [vmem:[%s14117_s28] sm:$0x8]  ;;  %v6194_v20 = vld [vmem:[%s14117_s28 + $0x18] sm:$0x8]  ;;  %v6200_v60 = vld [vmem:[%s14117_s28 + $0x28] sm:$0x8] }
 0x997   : > { %v6046_v59 = vpack.i.b16 %v6030_v26, %v6030_v26  ;;  %v6050_v22 = vpack.i.b16 %v6034_v21, %v6034_v21  ;;  %v11867_v15 = vpack.i.b16 %v6020_v39, %v6020_v39  ;;  %v6052_v33 = vpack.i.b16 %v6036_v3, %v6036_v3  ;;  %v6191_v39 = vld [vmem:[%s14117_s28 + $0x10] sm:$0x8] }
 0x998   : > { %v11868_v45 = vpack.i.b16 %v6022_v34, %v6022_v34  ;;  %v15650_v44 = vpack.i.b16 %v6038_v32, %v6038_v32  ;;  %v6061_v37 = vrot.slane %v11861_v61, %v14357_v57  ;;  %v6068_v63 = vrot.slane %v6040_v58, %v14357_v57  ;;  %v6197_v34 = vld [vmem:[%s14117_s28 + $0x20] sm:$0x8]  ;;  %v6215_v17 = vld [vmem:[%s14117_s28 + $0x50] sm:$0x8]  ;;  %v6206_v32 = vld [vmem:[%s14117_s28 + $0x38] sm:$0x8] }
 0x999   : > { %v6075_v38 = vrot.slane %v11862_v50, %v14357_v57  ;;  %v6082_v29 = vrot.slane %v6042_v40, %v14357_v57  ;;  %v6089_v24 = vrot.slane %v11863_v23, %v14357_v57  ;;  %v6096_v6 = vrot.slane %v6044_v54, %v14357_v57  ;;  %v6203_v26 = vld [vmem:[%s14117_s28 + $0x30] sm:$0x8]  ;;  %v6218_v40 = vld [vmem:[%s14117_s28 + $0x58] sm:$0x8]  ;;  %v6221_v23 = vld [vmem:[%s14117_s28 + $0x60] sm:$0x8] }
 0x99a   : > { %v6103_v18 = vrot.slane %v11864_v30, %v14357_v57  ;;  %v6110_v8 = vrot.slane %v6046_v59, %v14357_v57  ;;  %v6117_v47 = vrot.slane %v11865_v62, %v14357_v57  ;;  %v6124_v16 = vrot.slane %v6048_v5, %v14357_v57  ;;  %v6224_v54 = vld [vmem:[%s14117_s28 + $0x68] sm:$0x8] }
 0x99b   : > { %v6131_v51 = vrot.slane %v11866_v25, %v14357_v57  ;;  %v6138_v7 = vrot.slane %v6050_v22, %v14357_v57  ;;  %v6145_v48 = vrot.slane %v11867_v15, %v14357_v57  ;;  %v6152_v11 = vrot.slane %v6052_v33, %v14357_v57  ;;  %v6227_v22 = vld [vmem:[%s14117_s28 + $0x70] sm:$0x8]  ;;  %v6230_v15 = vld [vmem:[%s14117_s28 + $0x78] sm:$0x8] }
 0x99c   : > { %v6159_v14 = vrot.slane %v11868_v45, %v14357_v57  ;;  %v6166_v12 = vrot.slane %v15650_v44, %v14357_v57  ;;  %v6186_v61 = vsel %vm15656_vm9, %v6061_v37, %v6185_v46  ;;  %v6189_v62 = vsel %vm15656_vm9, %v6068_v63, %v6188_v41  ;;  %v15777_v46 = vld [vmem:[#allocation11 + $0x8c] ss:$16 sps:$4 sm:$0xff]   ;;  %v15779_v41 = vld [vmem:[#allocation11 + $0x80] ss:$16 sps:$4 sm:$0xff]  }
 0x99d   : > { %6187 = vst [vmem:[%s14117_s28] sm:$0x8] %v6186_v61  ;;  %6190 = vst [vmem:[%s14117_s28 + $0x8] sm:$0x8] %v6189_v62  ;;  %v6192_v21 = vsel %vm15656_vm9, %v6075_v38, %v6191_v39  ;;  %v6195_v3 = vsel %vm15656_vm9, %v6082_v29, %v6194_v20  ;;  %v6198_v58 = vsel %vm15656_vm9, %v6089_v24, %v6197_v34  ;;  %v15739_v29 = vld [vmem:[#allocation11 + $0x24] ss:$16 sps:$4 sm:$0xff]   ;;  %v7213_v20 = vstv %s7212_s9  ;;  %v17150_v34 = vld [vmem:[#allocation37_spill] sm:$0xff] }
 0x99e   : > { %v6201_v50 = vsel %vm15656_vm9, %v6096_v6, %v6200_v60  ;;  %6193 = vst [vmem:[%s14117_s28 + $0x10] sm:$0x8] %v6192_v21  ;;  %6196 = vst [vmem:[%s14117_s28 + $0x18] sm:$0x8] %v6195_v3  ;;  %v6204_v30 = vsel %vm15656_vm9, %v6103_v18, %v6203_v26  ;;  %v6207_v5 = vsel %vm15656_vm9, %v6110_v8, %v6206_v32  ;;  %v15741_v24 = vld [vmem:[#allocation11 + $0x2c] ss:$16 sps:$4 sm:$0xff]   ;;  %7066 = vmatprep.subr.bf16.mxu0 %v15739_v29 }
 0x99f   : > { %6199 = vst [vmem:[%s14117_s28 + $0x20] sm:$0x8] %v6198_v58  ;;  %6202 = vst [vmem:[%s14117_s28 + $0x28] sm:$0x8] %v6201_v50  ;;  %v6210_v25 = vsel %vm15656_vm9, %v6117_v47, %v6209_v2  ;;  %v6213_v59 = vsel %vm15656_vm9, %v6124_v16, %v6212_v55  ;;  %v6216_v33 = vsel %vm15656_vm9, %v6131_v51, %v6215_v17  ;;  %v15743_v6 = vld [vmem:[#allocation11 + $0x20] ss:$16 sps:$4 sm:$0xff]   ;;  %7109 = vmatprep.subr.bf16.mxu1 %v15741_v24 }
 0x9a0   : > { %6205 = vst [vmem:[%s14117_s28 + $0x30] sm:$0x8] %v6204_v30  ;;  %6208 = vst [vmem:[%s14117_s28 + $0x38] sm:$0x8] %v6207_v5  ;;  %v6219_v45 = vsel %vm15656_vm9, %v6138_v7, %v6218_v40  ;;  %v6222_v44 = vsel %vm15656_vm9, %v6145_v48, %v6221_v23  ;;  %v6225_v37 = vsel %vm15656_vm9, %v6152_v11, %v6224_v54  ;;  %v15745_v18 = vld [vmem:[#allocation11 + $0x28] ss:$16 sps:$4 sm:$0xff]   ;;  %7067 = vmatpush1.bf16.msra.mxu0 %v15743_v6 }
 0x9a1   : > { %6211 = vst [vmem:[%s14117_s28 + $0x40] sm:$0x8] %v6210_v25  ;;  %6214 = vst [vmem:[%s14117_s28 + $0x48] sm:$0x8] %v6213_v59  ;;  %v6228_v63 = vsel %vm15656_vm9, %v6159_v14, %v6227_v22  ;;  %v6231_v38 = vsel %vm15656_vm9, %v6166_v12, %v6230_v15  ;;  %7110 = vmatpush1.bf16.msra.mxu1 %v15745_v18  ;;  %v15751_v8 = vld [vmem:[#allocation11 + $0x44] ss:$16 sps:$4 sm:$0xff]   ;;  %vm7214_vm10 = vcmp.gt.s32.totalorder %v17150_v34, %v7213_v20 }
 0x9a2   : > { %6217 = vst [vmem:[%s14117_s28 + $0x50] sm:$0x8] %v6216_v33  ;;  %6220 = vst [vmem:[%s14117_s28 + $0x58] sm:$0x8] %v6219_v45  ;;  %v15753_v47 = vld [vmem:[#allocation11 + $0x4c] ss:$16 sps:$4 sm:$0xff]   ;;  %7068 = vmatprep.subr.bf16.mxu0 %v15751_v8 }
 0x9a3   : > { %6223 = vst [vmem:[%s14117_s28 + $0x60] sm:$0x8] %v6222_v44  ;;  %6226 = vst [vmem:[%s14117_s28 + $0x68] sm:$0x8] %v6225_v37  ;;  %v15755_v16 = vld [vmem:[#allocation11 + $0x40] ss:$16 sps:$4 sm:$0xff]   ;;  %7111 = vmatprep.subr.bf16.mxu1 %v15753_v47 }
 0x9a4   : > { %6229 = vst [vmem:[%s14117_s28 + $0x70] sm:$0x8] %v6228_v63  ;;  %6232 = vst [vmem:[%s14117_s28 + $0x78] sm:$0x8] %v6231_v38  ;;  %v15757_v2 = vld [vmem:[#allocation11 + $0x48] ss:$16 sps:$4 sm:$0xff]   ;;  %7069 = vmatpush1.bf16.msra.mxu0 %v15755_v16 }
 0x9a5   : > { %7112 = vmatpush1.bf16.msra.mxu1 %v15757_v2  ;;  %v15763_v55 = vld [vmem:[#allocation11 + $0x64] ss:$16 sps:$4 sm:$0xff]   ;;  %v15765_v51 = vld [vmem:[#allocation11 + $0x6c] ss:$16 sps:$4 sm:$0xff]   ;;  %v15767_v7 = vld [vmem:[#allocation11 + $0x60] ss:$16 sps:$4 sm:$0xff]  }
 0x9a6   : > { %v15769_v48 = vld [vmem:[#allocation11 + $0x68] ss:$16 sps:$4 sm:$0xff]   ;;  %7070 = vmatprep.subr.bf16.mxu0 %v15763_v55  ;;  %7113 = vmatprep.subr.bf16.mxu1 %v15765_v51  ;;  %v15775_v11 = vld [vmem:[#allocation11 + $0x84] ss:$16 sps:$4 sm:$0xff]   ;;  %v15789_v12 = vld [vmem:[#allocation11 + $0xac] ss:$16 sps:$4 sm:$0xff]  }
 0x9a7   : > { %v15781_v39 = vld [vmem:[#allocation11 + $0x88] ss:$16 sps:$4 sm:$0xff]   ;;  %v15787_v14 = vld [vmem:[#allocation11 + $0xa4] ss:$16 sps:$4 sm:$0xff]   ;;  %v15791_v61 = vld [vmem:[#allocation11 + $0xa0] ss:$16 sps:$4 sm:$0xff]  }
 0x9a8   : > { %7071 = vmatpush1.bf16.msra.mxu0 %v15767_v7  ;;  %v15793_v62 = vld [vmem:[#allocation11 + $0xa8] ss:$16 sps:$4 sm:$0xff]  }
 0x9a9   : > { %7114 = vmatpush1.bf16.msra.mxu1 %v15769_v48  ;;  %7072 = vmatprep.subr.bf16.mxu0 %v15775_v11  ;;  %v17151_v60 = vld [vmem:[#allocation38_spill] sm:$0xff] }
 0x9aa   : > { %7115 = vmatprep.subr.bf16.mxu1 %v15777_v46  ;;  %vm7215_vm11 = vcmp.gt.s32.totalorder %v17151_v60, %v7213_v20 }
 0x9ac   : > { %7073 = vmatpush1.bf16.msra.mxu0 %v15779_v41 }
 0x9ad   : > { %7116 = vmatpush1.bf16.msra.mxu1 %v15781_v39  ;;  %7074 = vmatprep.subr.bf16.mxu0 %v15787_v14 }
 0x9ae   : > { %7117 = vmatprep.subr.bf16.mxu1 %v15789_v12 }
 0x9b0   : > { %7075 = vmatpush1.bf16.msra.mxu0 %v15791_v61 }
 0x9b1   : > { %7118 = vmatpush1.bf16.msra.mxu1 %v15793_v62  ;;  %7076 = vmatprep.subr.bf16.mxu0 %v15600_v42  ;;  %v7216_v42 = vsel %vm7214_vm10, 1, %v17146_v53 }
 0x9b2   : > { %7119 = vmatprep.subr.bf16.mxu1 %v15602_v27  ;;  %v7217_v27 = vsel %vm7215_vm11, 1, %v17146_v53  ;;  %7219 = vperm.xlu0 %12635, %v7216_v42  }
 0x9b3   : > { %7222 = vperm.xlu1 %12636, %v7217_v27  }
 0x9b4   : > { %7077 = vmatpush1.bf16.msra.mxu0 %v15604_v9 }
 0x9b5   : > { %7120 = vmatpush1.bf16.msra.mxu1 %v15606_v10  ;;  %7078 = vmatprep.subr.bf16.mxu0 %v15612_v28 }
 0x9b6   : > { %7121 = vmatprep.subr.bf16.mxu1 %v15614_v4 }
 0x9b8   : > { %7079 = vmatpush1.bf16.msra.mxu0 %v15616_v43 }
 0x9b9   : > { %7122 = vmatpush1.bf16.msra.mxu1 %v15618_v13 }
 0xa5f   : > { %v6471_v9 = vpop.f32.mrb[32].mxu0  ;;  %v6514_v10 = vpop.f32.mrb[32].mxu1 }
 0xa60   : > { %v12285_v28 = vadd.f32 %v6471_v9, %v14323_v35  ;;  %v6473_v4 = vpop.f32.mrb[33].mxu0  ;;  %v6516_v43 = vpop.f32.mrb[33].mxu1  ;;  %v12349_v5 = vadd.f32 %v6514_v10, %v14335_v56 }
 0xa61   : > { %v12286_v13 = vadd.f32 %v6473_v4, %v14325_v36  ;;  %v6475_v17 = vpop.f32.mrb[34].mxu0  ;;  %v6518_v21 = vpop.f32.mrb[34].mxu1  ;;  %v12350_v30 = vadd.f32 %v6516_v43, %v14332_v52 }
 0xa62   : > { %v11901_v3 = vmul.f32 -1.442695, %v12285_v28  ;;  %v12287_v58 = vadd.f32 %v6475_v17, %v14323_v35  ;;  %v6477_v50 = vpop.f32.mrb[35].mxu0  ;;  %v6520_v26 = vpop.f32.mrb[35].mxu1  ;;  %v12351_v22 = vadd.f32 %v6518_v21, %v14335_v56 }
 0xa63   : > { %v11903_v32 = vmul.f32 -1.442695, %v12286_v13  ;;  %v12288_v40 = vadd.f32 %v6477_v50, %v14325_v36  ;;  %v11905_v25 = vmul.f32 -1.442695, %v12350_v30  ;;  %v12352_v59 = vadd.f32 %v6520_v26, %v14332_v52 }
 0xa64   : > { %13341 = vpow2.f32 %v11901_v3  ;;  %v11902_v23 = vmul.f32 -1.442695, %v12287_v58 }
 0xa65   : > { %13343 = vpow2.f32 %v11903_v32  ;;  %v11904_v54 = vmul.f32 -1.442695, %v12288_v40  ;;  %v11906_v44 = vmul.f32 -1.442695, %v12352_v59  ;;  %v17153_v59 = vld [vmem:[#allocation29_spill] sm:$0xff] }
 0xa66   : > { %13345 = vpow2.f32 %v11902_v23  ;;  %vm6598_vm15 = vcmp.eq.s32.totalorder %v17153_v59, 1 }
 0xa67   : > { %13347 = vpow2.f32 %v11904_v54  ;;  %v17152_v54 = vld [vmem:[#allocation28_spill] sm:$0xff] }
 0xa68   : > { %13349 = vtanh.f32 %v12349_v5  ;;  %vm6597_vm13 = vcmp.eq.s32.totalorder %v17152_v54, 1 }
 0xa69   : > { %13351 = vpow2.f32 %v11905_v25 }
 0xa6a   : > { %13353 = vtanh.f32 %v12351_v22 }
 0xa6e   : > { %v13342_v15 = vpop.eup %13341 }
 0xa6f   : > { %v13344_v33 = vpop.eup %13343  ;;  %v6537_v45 = vadd.f32 1.0, %v13342_v15 }
 0xa70   : > { %v6549_v37 = vadd.f32 1.0, %v13344_v33  ;;  %v13346_v63 = vpop.eup %13345 }
 0xa71   : > { %13355 = vrcp.f32 %v6537_v45  ;;  %v6538_v38 = vadd.f32 1.0, %v13346_v63  ;;  %v13348_v20 = vpop.eup %13347 }
 0xa72   : > { %13357 = vrcp.f32 %v6549_v37  ;;  %v6550_v34 = vadd.f32 1.0, %v13348_v20  ;;  %v13350_v60 = vpop.eup %13349 }
 0xa73   : > { %13359 = vpow2.f32 %v11906_v44  ;;  %v13352_v42 = vpop.eup %13351 }
 0xa74   : > { %13361 = vrcp.f32 %v6538_v38  ;;  %v13354_v27 = vpop.eup %13353  ;;  %v6563_v4 = vadd.f32 1.0, %v13352_v42 }
 0xa75   : > { %13363 = vrcp.f32 %v6550_v34 }
 0xa76   : > { %13365 = vrcp.f32 %v6563_v4 }
 0xa7b   : > { %v13356_v9 = vpop.eup %13355 }
 0xa7c   : > { %v13358_v10 = vpop.eup %13357  ;;  %v6573_v28 = vmul.f32 %v13356_v9, %v13350_v60 }
 0xa7d   : > { %v13360_v43 = vpop.eup %13359  ;;  %v6571_v13 = vmul.f32 %v13358_v10, %v15633_v1 }
 0xa7e   : > { %v13362_v17 = vpop.eup %13361  ;;  %v6564_v50 = vadd.f32 1.0, %v13360_v43 }
 0xa7f   : > { %v15821_v21 = vadd.f32 %v6573_v28, %v6571_v13  ;;  %v6574_v3 = vmul.f32 %v13362_v17, %v13354_v27  ;;  %v13364_v58 = vpop.eup %13363 }
 0xa80   : > { %v6572_v26 = vmul.f32 %v13364_v58, %v15637_v31  ;;  %v13366_v40 = vpop.eup %13365 }
 0xa81   : > { %13367 = vtanh.f32 %v15821_v21 }
 0xa82   : > { %v15825_v32 = vadd.f32 %v6574_v3, %v6572_v26  ;;  %13369 = vrcp.f32 %v6564_v50 }
 0xa84   : > { %13371 = vtanh.f32 %v15825_v32 }
 0xa8b   : > { %v13368_v23 = vpop.eup %13367 }
 0xa8c   : > { %v6579_v1 = vmul.f32 %v13368_v23, %v13366_v40  ;;  %v13370_v30 = vpop.eup %13369 }
 0xa8e   : > { %v6599_v5 = vsel %vm6597_vm13, %v6579_v1, 0.0  ;;  %v13372_v25 = vpop.eup %13371 }
 0xa8f   : > { %v6580_v22 = vmul.f32 %v13372_v25, %v13370_v30 }
 0xa91   : > { %v6600_v15 = vsel %vm6598_vm15, %v6580_v22, 0.0  ;;  %v6871_v33 = vpack.c.bf16 %v6580_v22, %v6579_v1 }
 0xa92   : > { %v6601_v45 = vpack.c.bf16 %v6600_v15, %v6599_v5  ;;  %v11907_v31 = vpack.c.bf16 %v6600_v15, %v6600_v15 }
 0xa93   : > { %7097 = vmatmul.mubr.bf16.vlgmr.msra.gmra.mrb[36].mxu0 %v6871_v33  ;;  %7140 = vmatmul.mubr.bf16.vlgmr.msra.gmra.mrb[36].mxu1 %v6871_v33 }
 0xa94   : > { %v6610_v44 = vrot.slane %v6601_v45, %v17145_v49  ;;  %v6617_v37 = vrot.slane %v11907_v31, %v17145_v49  ;;  %7723 = vmatprep.mubr.bf16.mxu0 %v17146_v53  ;;  %7766 = vmatprep.mubr.bf16.mxu1 %v17146_v53 }
 0xa96   : > { %v6618_v63 = vcombine.high %v6610_v44, %v6610_v44  ;;  %v6619_v38 = vcombine.high %v6617_v37, %v6617_v37  ;;  %v6626_v20 = vrot.slane %v6610_v44, %v17145_v49  ;;  %v6633_v34 = vrot.slane %v6617_v37, %v17145_v49 }
 0xa98   : > { %v6640_v60 = vrot.slane %v6618_v63, %v17145_v49  ;;  %v6647_v42 = vrot.slane %v6619_v38, %v17145_v49  ;;  %v6648_v27 = vcombine.high %v6626_v20, %v6626_v20  ;;  %v6649_v9 = vcombine.high %v6633_v34, %v6633_v34  ;;  %v6833_v49 = vld [vmem:[%s14117_s28 + $0x3c] sm:$0x1] }
 0xa99   : > { %v6653_v10 = vunpack.i.h.s16 %v6626_v20  ;;  %v6661_v28 = vunpack.i.h.s16 %v6633_v34  ;;  %v11908_v4 = vpack.i.b16 %v6626_v20, %v6626_v20  ;;  %v11912_v43 = vpack.i.b16 %v6633_v34, %v6633_v34  ;;  %v6836_v34 = vld [vmem:[%s14117_s28 + $0x44] sm:$0x1] }
 0xa9a   : > { %v6650_v13 = vcombine.high %v6640_v60, %v6640_v60  ;;  %v6651_v17 = vcombine.high %v6647_v42, %v6647_v42  ;;  %v6655_v3 = vunpack.i.h.s16 %v6640_v60  ;;  %v6657_v58 = vunpack.i.h.s16 %v6648_v27 }
 0xa9b   : > { %v6663_v50 = vunpack.i.h.s16 %v6647_v42  ;;  %v6665_v26 = vunpack.i.h.s16 %v6649_v9  ;;  %v15838_v40 = vpack.i.b16 %v6653_v10, %v6653_v10  ;;  %v11909_v23 = vpack.i.b16 %v6640_v60, %v6640_v60  ;;  %v6812_v10 = vld [vmem:[%s14117_s28 + $0x4] sm:$0x1] }
 0xa9c   : > { %v6659_v54 = vunpack.i.h.s16 %v6650_v13  ;;  %v6667_v1 = vunpack.i.h.s16 %v6651_v17  ;;  %v15840_v30 = vpack.i.b16 %v6655_v3, %v6655_v3  ;;  %v11910_v5 = vpack.i.b16 %v6648_v27, %v6648_v27 }
 0xa9d   : > { %v15842_v25 = vpack.i.b16 %v6657_v58, %v6657_v58  ;;  %v11911_v59 = vpack.i.b16 %v6650_v13, %v6650_v13  ;;  %v6677_v22 = vpack.i.b16 %v6661_v28, %v6661_v28  ;;  %v11913_v15 = vpack.i.b16 %v6647_v42, %v6647_v42  ;;  %v6815_v28 = vld [vmem:[%s14117_s28 + $0xc] sm:$0x1]  ;;  %v6842_v13 = vld [vmem:[%s14117_s28 + $0x54] sm:$0x1] }
 0xa9e   : > { %v15844_v33 = vpack.i.b16 %v6659_v54, %v6659_v54  ;;  %v6679_v45 = vpack.i.b16 %v6663_v50, %v6663_v50  ;;  %v11914_v31 = vpack.i.b16 %v6649_v9, %v6649_v9  ;;  %v6681_v44 = vpack.i.b16 %v6665_v26, %v6665_v26  ;;  %v6845_v26 = vld [vmem:[%s14117_s28 + $0x5c] sm:$0x1] }
 0xa9f   : > { %v11915_v37 = vpack.i.b16 %v6651_v17, %v6651_v17  ;;  %v6683_v63 = vpack.i.b16 %v6667_v1, %v6667_v1  ;;  %v6690_v38 = vrot.slane %v11908_v4, %v14357_v57  ;;  %v6697_v20 = vrot.slane %v15838_v40, %v14357_v57  ;;  %v6839_v4 = vld [vmem:[%s14117_s28 + $0x4c] sm:$0x1]  ;;  %v6848_v40 = vld [vmem:[%s14117_s28 + $0x64] sm:$0x1] }
 0xaa0   : > { %v6704_v60 = vrot.slane %v11909_v23, %v14357_v57  ;;  %v6711_v42 = vrot.slane %v15840_v30, %v14357_v57  ;;  %v6718_v27 = vrot.slane %v11910_v5, %v14357_v57  ;;  %v6725_v9 = vrot.slane %v15842_v25, %v14357_v57  ;;  %v6851_v23 = vld [vmem:[%s14117_s28 + $0x6c] sm:$0x1]  ;;  %v6818_v25 = vld [vmem:[%s14117_s28 + $0x14] sm:$0x1] }
 0xaa1   : > { %v6732_v17 = vrot.slane %v11911_v59, %v14357_v57  ;;  %v6739_v3 = vrot.slane %v15844_v33, %v14357_v57  ;;  %v6746_v58 = vrot.slane %v11912_v43, %v14357_v57  ;;  %v6753_v50 = vrot.slane %v6677_v22, %v14357_v57  ;;  %v6854_v43 = vld [vmem:[%s14117_s28 + $0x74] sm:$0x1]  ;;  %v6857_v59 = vld [vmem:[%s14117_s28 + $0x7c] sm:$0x1] }
 0xaa2   : > { %v6760_v54 = vrot.slane %v11913_v15, %v14357_v57  ;;  %v6767_v1 = vrot.slane %v6679_v45, %v14357_v57  ;;  %v6774_v30 = vrot.slane %v11914_v31, %v14357_v57  ;;  %v6781_v5 = vrot.slane %v6681_v44, %v14357_v57  ;;  %v6824_v15 = vld [vmem:[%s14117_s28 + $0x24] sm:$0x1]  ;;  %v6830_v44 = vld [vmem:[%s14117_s28 + $0x34] sm:$0x1] }
 0xaa3   : > { %v6788_v22 = vrot.slane %v11915_v37, %v14357_v57  ;;  %v6795_v33 = vrot.slane %v6683_v63, %v14357_v57  ;;  %v6837_v53 = vsel %vm14363_vm8, %v6746_v58, %v6836_v34  ;;  %v6840_v31 = vsel %vm14363_vm8, %v6753_v50, %v6839_v4 }
 0xaa4   : > { %6838 = vst [vmem:[%s14117_s28 + $0x44] sm:$0x1] %v6837_v53  ;;  %6841 = vst [vmem:[%s14117_s28 + $0x4c] sm:$0x1] %v6840_v31  ;;  %v6843_v37 = vsel %vm14363_vm8, %v6760_v54, %v6842_v13  ;;  %v6846_v63 = vsel %vm14363_vm8, %v6767_v1, %v6845_v26  ;;  %v6849_v34 = vsel %vm14363_vm8, %v6774_v30, %v6848_v40 }
 0xaa5   : > { %v6852_v4 = vsel %vm14363_vm8, %v6781_v5, %v6851_v23  ;;  %6844 = vst [vmem:[%s14117_s28 + $0x54] sm:$0x1] %v6843_v37  ;;  %6847 = vst [vmem:[%s14117_s28 + $0x5c] sm:$0x1] %v6846_v63  ;;  %v6855_v53 = vsel %vm14363_vm8, %v6788_v22, %v6854_v43  ;;  %v6858_v13 = vsel %vm14363_vm8, %v6795_v33, %v6857_v59 }
 0xaa6   : > { %6850 = vst [vmem:[%s14117_s28 + $0x64] sm:$0x1] %v6849_v34  ;;  %6853 = vst [vmem:[%s14117_s28 + $0x6c] sm:$0x1] %v6852_v4  ;;  %v6813_v58 = vsel %vm14363_vm8, %v6690_v38, %v6812_v10  ;;  %v6816_v50 = vsel %vm14363_vm8, %v6697_v20, %v6815_v28  ;;  %v6819_v26 = vsel %vm14363_vm8, %v6704_v60, %v6818_v25  ;;  %v12943_v60 = vld [vmem:[#allocation11 + $0x4] ss:$16 sps:$4 sm:$0xff]  }
 0xaa7   : > { %6856 = vst [vmem:[%s14117_s28 + $0x74] sm:$0x1] %v6855_v53  ;;  %6859 = vst [vmem:[%s14117_s28 + $0x7c] sm:$0x1] %v6858_v13  ;;  %v6822_v40 = vsel %vm14363_vm8, %v6711_v42, %v6821_v0  ;;  %v6825_v23 = vsel %vm14363_vm8, %v6718_v27, %v6824_v15  ;;  %v6828_v38 = vsel %vm14363_vm8, %v6725_v9, %v6827_v19  ;;  %v12946_v0 = vld [vmem:[#allocation11 + $0xc] ss:$16 sps:$4 sm:$0xff]   ;;  %7691 = vmatprep.subr.bf16.mxu0 %v12943_v60 }
 0xaa8   : > { %6814 = vst [vmem:[%s14117_s28 + $0x4] sm:$0x1] %v6813_v58  ;;  %6817 = vst [vmem:[%s14117_s28 + $0xc] sm:$0x1] %v6816_v50  ;;  %v6831_v20 = vsel %vm14363_vm8, %v6732_v17, %v6830_v44  ;;  %v6834_v10 = vsel %vm14363_vm8, %v6739_v3, %v6833_v49  ;;  %v15930_v42 = vld [vmem:[#allocation11] ss:$16 sps:$4 sm:$0xff]   ;;  %7734 = vmatprep.subr.bf16.mxu1 %v12946_v0 }
 0xaa9   : > { %6820 = vst [vmem:[%s14117_s28 + $0x14] sm:$0x1] %v6819_v26  ;;  %6823 = vst [vmem:[%s14117_s28 + $0x1c] sm:$0x1] %v6822_v40  ;;  %v15932_v27 = vld [vmem:[#allocation11 + $0x8] ss:$16 sps:$4 sm:$0xff]   ;;  %7692 = vmatpush1.bf16.msra.mxu0 %v15930_v42 }
 0xaaa   : > { %6826 = vst [vmem:[%s14117_s28 + $0x24] sm:$0x1] %v6825_v23  ;;  %6829 = vst [vmem:[%s14117_s28 + $0x2c] sm:$0x1] %v6828_v38  ;;  %7735 = vmatpush1.bf16.msra.mxu1 %v15932_v27  ;;  %7693 = vmatprep.subr.bf16.mxu0 %v15739_v29  ;;  %v15956_v19 = vld [vmem:[#allocation11 + $0xc4] ss:$16 sps:$4 sm:$0xff]  }
 0xaab   : > { %6832 = vst [vmem:[%s14117_s28 + $0x34] sm:$0x1] %v6831_v20  ;;  %6835 = vst [vmem:[%s14117_s28 + $0x3c] sm:$0x1] %v6834_v10  ;;  %7736 = vmatprep.subr.bf16.mxu1 %v15741_v24  ;;  %v15958_v49 = vld [vmem:[#allocation11 + $0xcc] ss:$16 sps:$4 sm:$0xff]  }
 0xaac   : > { %v15960_v29 = vld [vmem:[#allocation11 + $0xc0] ss:$16 sps:$4 sm:$0xff]   ;;  %v15962_v24 = vld [vmem:[#allocation11 + $0xc8] ss:$16 sps:$4 sm:$0xff]  }
 0xaad   : > { %7694 = vmatpush1.bf16.msra.mxu0 %v15743_v6  ;;  %v15968_v6 = vld [vmem:[#allocation11 + $0xe4] ss:$16 sps:$4 sm:$0xff]  }
 0xaae   : > { %7737 = vmatpush1.bf16.msra.mxu1 %v15745_v18  ;;  %7695 = vmatprep.subr.bf16.mxu0 %v15751_v8  ;;  %v15970_v18 = vld [vmem:[#allocation11 + $0xec] ss:$16 sps:$4 sm:$0xff]   ;;  %v15972_v8 = vld [vmem:[#allocation11 + $0xe0] ss:$16 sps:$4 sm:$0xff]  }
 0xaaf   : > { %7738 = vmatprep.subr.bf16.mxu1 %v15753_v47  ;;  %v15974_v47 = vld [vmem:[#allocation11 + $0xe8] ss:$16 sps:$4 sm:$0xff]  }
 0xab1   : > { %7696 = vmatpush1.bf16.msra.mxu0 %v15755_v16 }
 0xab2   : > { %7739 = vmatpush1.bf16.msra.mxu1 %v15757_v2  ;;  %7697 = vmatprep.subr.bf16.mxu0 %v15763_v55 }
 0xab3   : > { %7740 = vmatprep.subr.bf16.mxu1 %v15765_v51 }
 0xab5   : > { %7698 = vmatpush1.bf16.msra.mxu0 %v15767_v7 }
 0xab6   : > { %7741 = vmatpush1.bf16.msra.mxu1 %v15769_v48  ;;  %7699 = vmatprep.subr.bf16.mxu0 %v15775_v11 }
 0xab7   : > { %7742 = vmatprep.subr.bf16.mxu1 %v15777_v46 }
 0xab9   : > { %7700 = vmatpush1.bf16.msra.mxu0 %v15779_v41 }
 0xaba   : > { %7743 = vmatpush1.bf16.msra.mxu1 %v15781_v39  ;;  %7701 = vmatprep.subr.bf16.mxu0 %v15787_v14 }
 0xabb   : > { %7744 = vmatprep.subr.bf16.mxu1 %v15789_v12 }
 0xabd   : > { %7702 = vmatpush1.bf16.msra.mxu0 %v15791_v61 }
 0xabe   : > { %7745 = vmatpush1.bf16.msra.mxu1 %v15793_v62  ;;  %7703 = vmatprep.subr.bf16.mxu0 %v15956_v19 }
 0xabf   : > { %7746 = vmatprep.subr.bf16.mxu1 %v15958_v49 }
 0xac1   : > { %7704 = vmatpush1.bf16.msra.mxu0 %v15960_v29 }
 0xac2   : > { %7747 = vmatpush1.bf16.msra.mxu1 %v15962_v24  ;;  %7705 = vmatprep.subr.bf16.mxu0 %v15968_v6 }
 0xac3   : > { %7748 = vmatprep.subr.bf16.mxu1 %v15970_v18 }
 0xac5   : > { %7706 = vmatpush1.bf16.msra.mxu0 %v15972_v8 }
 0xac6   : > { %7749 = vmatpush1.bf16.msra.mxu1 %v15974_v47  ;;  %8318 = vmatprep.subr.bf16.mxu0 %v12943_v60 }
 0xac7   : > { %8361 = vmatprep.subr.bf16.mxu1 %v12946_v0 }
 0xb66   : > { %v7098_v16 = vpop.f32.mrb[36].mxu0  ;;  %v7141_v2 = vpop.f32.mrb[36].mxu1 }
 0xb67   : > { %v12289_v55 = vadd.f32 %v7098_v16, %v14323_v35  ;;  %v7100_v51 = vpop.f32.mrb[37].mxu0  ;;  %v7143_v7 = vpop.f32.mrb[37].mxu1  ;;  %v12353_v3 = vadd.f32 %v7141_v2, %v14335_v56 }
 0xb68   : > { %v12290_v48 = vadd.f32 %v7100_v51, %v14325_v36  ;;  %v7102_v11 = vpop.f32.mrb[38].mxu0  ;;  %v7145_v46 = vpop.f32.mrb[38].mxu1  ;;  %v12354_v17 = vadd.f32 %v7143_v7, %v14332_v52 }
 0xb69   : > { %v11948_v41 = vmul.f32 -1.442695, %v12289_v55  ;;  %v12291_v39 = vadd.f32 %v7102_v11, %v14323_v35  ;;  %v7104_v14 = vpop.f32.mrb[39].mxu0  ;;  %v7147_v12 = vpop.f32.mrb[39].mxu1  ;;  %v12355_v30 = vadd.f32 %v7145_v46, %v14335_v56 }
 0xb6a   : > { %v11950_v61 = vmul.f32 -1.442695, %v12290_v48  ;;  %v12292_v62 = vadd.f32 %v7104_v14, %v14325_v36  ;;  %v11952_v54 = vmul.f32 -1.442695, %v12354_v17  ;;  %v12356_v1 = vadd.f32 %v7147_v12, %v14332_v52  ;;  %v7220_v16 = vpop.permute.xlu0 %7219  ;;  %v17155_v14 = vld [vmem:[#allocation22_spill] sm:$0xff] }
 0xb6b   : > { %13373 = vpow2.f32 %v11948_v41  ;;  %v11949_v9 = vmul.f32 -1.442695, %v12291_v39  ;;  %vm7224_vm8 = vcmp.eq.s32.totalorder %v7220_v16, 1 }
 0xb6c   : > { %13375 = vpow2.f32 %v11950_v61  ;;  %v11951_v28 = vmul.f32 -1.442695, %v12292_v62  ;;  %v11953_v59 = vmul.f32 -1.442695, %v12356_v1  ;;  %v17156_v62 = vmov 0  }
 0xb6d   : > { %13377 = vpow2.f32 %v11949_v9 }
 0xb6e   : > { %13379 = vpow2.f32 %v11951_v28 }
 0xb6f   : > { %13381 = vtanh.f32 %v12353_v3 }
 0xb70   : > { %13383 = vpow2.f32 %v11952_v54 }
 0xb71   : > { %13385 = vtanh.f32 %v12355_v30 }
 0xb75   : > { %v13374_v5 = vpop.eup %13373 }
 0xb76   : > { %v13376_v25 = vpop.eup %13375  ;;  %v7164_v43 = vadd.f32 1.0, %v13374_v5 }
 0xb77   : > { %v7176_v22 = vadd.f32 1.0, %v13376_v25  ;;  %v13378_v33 = vpop.eup %13377 }
 0xb78   : > { %13387 = vrcp.f32 %v7164_v43  ;;  %v7165_v15 = vadd.f32 1.0, %v13378_v33  ;;  %v13380_v45 = vpop.eup %13379 }
 0xb79   : > { %13389 = vrcp.f32 %v7176_v22  ;;  %v7177_v31 = vadd.f32 1.0, %v13380_v45  ;;  %v13382_v44 = vpop.eup %13381 }
 0xb7a   : > { %13391 = vpow2.f32 %v11953_v59  ;;  %v13384_v37 = vpop.eup %13383 }
 0xb7b   : > { %13393 = vrcp.f32 %v7165_v15  ;;  %v13386_v63 = vpop.eup %13385  ;;  %v7190_v26 = vadd.f32 1.0, %v13384_v37 }
 0xb7c   : > { %13395 = vrcp.f32 %v7177_v31 }
 0xb82   : > { %v13388_v34 = vpop.eup %13387 }
 0xb83   : > { %v13390_v4 = vpop.eup %13389  ;;  %v7200_v53 = vmul.f32 %v13388_v34, %v13382_v44 }
 0xb84   : > { %v13392_v13 = vpop.eup %13391  ;;  %v7198_v58 = vmul.f32 %v13390_v4, %v15821_v21  ;;  %v7223_v21 = vpop.permute.xlu1 %7222 }
 0xb85   : > { %v13394_v50 = vpop.eup %13393  ;;  %v7191_v20 = vadd.f32 1.0, %v13392_v13  ;;  %vm7225_vm0 = vcmp.eq.s32.totalorder %v7223_v21, 1 }
 0xb86   : > { %v7201_v40 = vmul.f32 %v13394_v50, %v13386_v63  ;;  %v15989_v23 = vadd.f32 %v7200_v53, %v7198_v58  ;;  %v13396_v38 = vpop.eup %13395 }
 0xb87   : > { %v7199_v10 = vmul.f32 %v13396_v38, %v15825_v32 }
 0xb88   : > { %13397 = vtanh.f32 %v15989_v23 }
 0xb89   : > { %13399 = vrcp.f32 %v7190_v26  ;;  %v15993_v60 = vadd.f32 %v7201_v40, %v7199_v10 }
 0xb8a   : > { %13401 = vrcp.f32 %v7191_v20 }
 0xb8b   : > { %13403 = vtanh.f32 %v15993_v60 }
 0xb92   : > { %v13398_v0 = vpop.eup %13397 }
 0xb93   : > { %v13400_v2 = vpop.eup %13399 }
 0xb94   : > { %v13402_v55 = vpop.eup %13401  ;;  %v7206_v51 = vmul.f32 %v13400_v2, %v13398_v0 }
 0xb95   : > { %v13404_v7 = vpop.eup %13403 }
 0xb96   : > { %v7207_v48 = vmul.f32 %v13404_v7, %v13402_v55  ;;  %v7226_v11 = vsel %vm7224_vm8, %v7206_v51, 0.0 }
 0xb98   : > { %v7227_v32 = vsel %vm7225_vm0, %v7207_v48, 0.0  ;;  %v7498_v46 = vpack.c.bf16 %v7207_v48, %v7206_v51 }
 0xb99   : > { %v7228_v41 = vpack.c.bf16 %v7227_v32, %v7226_v11  ;;  %v11954_v39 = vpack.c.bf16 %v7227_v32, %v7227_v32 }
 0xb9a   : > { %7724 = vmatmul.mubr.bf16.vlgmr.msra.gmra.mrb[40].mxu0 %v7498_v46  ;;  %7767 = vmatmul.mubr.bf16.vlgmr.msra.gmra.mrb[40].mxu1 %v7498_v46 }
 0xb9b   : > { %v7237_v12 = vrot.slane %v7228_v41, %v17155_v14  ;;  %v7244_v61 = vrot.slane %v11954_v39, %v17155_v14  ;;  %8319 = vmatpush1.bf16.msra.mxu0 %v15930_v42  ;;  %8362 = vmatpush1.bf16.msra.mxu1 %v15932_v27  ;;  %v7463_v39 = vld [vmem:[%s14117_s28 + $0x44] sm:$0x1] }
 0xb9c   : > { %8350 = vmatprep.mubr.bf16.mxu0 %v17156_v62  ;;  %8393 = vmatprep.mubr.bf16.mxu1 %v17156_v62 }
 0xb9d   : > { %v7245_v9 = vcombine.high %v7237_v12, %v7237_v12  ;;  %v7246_v28 = vcombine.high %v7244_v61, %v7244_v61  ;;  %v7253_v17 = vrot.slane %v7237_v12, %v17155_v14  ;;  %v7260_v3 = vrot.slane %v7244_v61, %v17155_v14  ;;  %v7466_v12 = vld [vmem:[%s14117_s28 + $0x4c] sm:$0x1] }
 0xb9f   : > { %v7267_v54 = vrot.slane %v7245_v9, %v17155_v14  ;;  %v7274_v1 = vrot.slane %v7246_v28, %v17155_v14  ;;  %v7275_v30 = vcombine.high %v7253_v17, %v7253_v17  ;;  %v7276_v5 = vcombine.high %v7260_v3, %v7260_v3 }
 0xba0   : > { %v7280_v25 = vunpack.i.h.s16 %v7253_v17  ;;  %v7288_v42 = vunpack.i.h.s16 %v7260_v3  ;;  %v11955_v43 = vpack.i.b16 %v7253_v17, %v7253_v17  ;;  %v11959_v27 = vpack.i.b16 %v7260_v3, %v7260_v3  ;;  %v7439_v3 = vld [vmem:[%s14117_s28 + $0x4] sm:$0x1] }
 0xba1   : > { %v7277_v59 = vcombine.high %v7267_v54, %v7267_v54  ;;  %v7278_v22 = vcombine.high %v7274_v1, %v7274_v1  ;;  %v7282_v33 = vunpack.i.h.s16 %v7267_v54  ;;  %v7284_v15 = vunpack.i.h.s16 %v7275_v30 }
 0xba2   : > { %v7290_v45 = vunpack.i.h.s16 %v7274_v1  ;;  %v7292_v31 = vunpack.i.h.s16 %v7276_v5  ;;  %v7296_v44 = vpack.i.b16 %v7280_v25, %v7280_v25  ;;  %v11956_v37 = vpack.i.b16 %v7267_v54, %v7267_v54  ;;  %v7442_v54 = vld [vmem:[%s14117_s28 + $0xc] sm:$0x1]  ;;  %v16143_v25 = vld [vmem:[#allocation11 + $0xa8] ss:$16 sps:$4 sm:$0xff]  }
 0xba3   : > { %v7286_v63 = vunpack.i.h.s16 %v7277_v59  ;;  %v7294_v34 = vunpack.i.h.s16 %v7278_v22  ;;  %v7298_v4 = vpack.i.b16 %v7282_v33, %v7282_v33  ;;  %v11957_v53 = vpack.i.b16 %v7275_v30, %v7275_v30  ;;  %v7469_v33 = vld [vmem:[%s14117_s28 + $0x54] sm:$0x1] }
 0xba4   : > { %v7300_v13 = vpack.i.b16 %v7284_v15, %v7284_v15  ;;  %v11958_v58 = vpack.i.b16 %v7277_v59, %v7277_v59  ;;  %v7304_v50 = vpack.i.b16 %v7288_v42, %v7288_v42  ;;  %v11960_v26 = vpack.i.b16 %v7274_v1, %v7274_v1  ;;  %v7445_v1 = vld [vmem:[%s14117_s28 + $0x14] sm:$0x1]  ;;  %v7451_v59 = vld [vmem:[%s14117_s28 + $0x24] sm:$0x1] }
 0xba5   : > { %v7302_v40 = vpack.i.b16 %v7286_v63, %v7286_v63  ;;  %v7306_v38 = vpack.i.b16 %v7290_v45, %v7290_v45  ;;  %v11961_v20 = vpack.i.b16 %v7276_v5, %v7276_v5  ;;  %v7308_v10 = vpack.i.b16 %v7292_v31, %v7292_v31  ;;  %v7460_v63 = vld [vmem:[%s14117_s28 + $0x3c] sm:$0x1] }
 0xba6   : > { %v11962_v0 = vpack.i.b16 %v7278_v22, %v7278_v22  ;;  %v16006_v16 = vpack.i.b16 %v7294_v34, %v7294_v34  ;;  %v7317_v21 = vrot.slane %v11955_v43, %v14357_v57  ;;  %v7324_v2 = vrot.slane %v7296_v44, %v14357_v57  ;;  %v7454_v22 = vld [vmem:[%s14117_s28 + $0x2c] sm:$0x1]  ;;  %v7472_v34 = vld [vmem:[%s14117_s28 + $0x5c] sm:$0x1] }
 0xba7   : > { %v7331_v55 = vrot.slane %v11956_v37, %v14357_v57  ;;  %v7338_v51 = vrot.slane %v7298_v4, %v14357_v57  ;;  %v7345_v7 = vrot.slane %v11957_v53, %v14357_v57  ;;  %v7352_v48 = vrot.slane %v7300_v13, %v14357_v57  ;;  %v7457_v37 = vld [vmem:[%s14117_s28 + $0x34] sm:$0x1]  ;;  %v7475_v4 = vld [vmem:[%s14117_s28 + $0x64] sm:$0x1]  ;;  %v7478_v53 = vld [vmem:[%s14117_s28 + $0x6c] sm:$0x1] }
 0xba8   : > { %v7359_v11 = vrot.slane %v11958_v58, %v14357_v57  ;;  %v7366_v32 = vrot.slane %v7302_v40, %v14357_v57  ;;  %v7373_v46 = vrot.slane %v11959_v27, %v14357_v57  ;;  %v7380_v41 = vrot.slane %v7304_v50, %v14357_v57  ;;  %v7448_v27 = vld [vmem:[%s14117_s28 + $0x1c] sm:$0x1]  ;;  %v7481_v40 = vld [vmem:[%s14117_s28 + $0x74] sm:$0x1] }
 0xba9   : > { %v7387_v61 = vrot.slane %v11960_v26, %v14357_v57  ;;  %v7394_v9 = vrot.slane %v7306_v38, %v14357_v57  ;;  %v7401_v28 = vrot.slane %v11961_v20, %v14357_v57  ;;  %v7408_v17 = vrot.slane %v7308_v10, %v14357_v57  ;;  %v7484_v38 = vld [vmem:[%s14117_s28 + $0x7c] sm:$0x1] }
 0xbaa   : > { %v7415_v30 = vrot.slane %v11962_v0, %v14357_v57  ;;  %v7422_v5 = vrot.slane %v16006_v16, %v14357_v57  ;;  %v7440_v42 = vsel %vm14576_vm14, %v7317_v21, %v7439_v3  ;;  %v7443_v43 = vsel %vm14576_vm14, %v7324_v2, %v7442_v54  ;;  %v16129_v3 = vld [vmem:[#allocation11 + $0x80] ss:$16 sps:$4 sm:$0xff]   ;;  %v16131_v54 = vld [vmem:[#allocation11 + $0x88] ss:$16 sps:$4 sm:$0xff]  }
 0xbab   : > { %7441 = vst [vmem:[%s14117_s28 + $0x4] sm:$0x1] %v7440_v42  ;;  %7444 = vst [vmem:[%s14117_s28 + $0xc] sm:$0x1] %v7443_v43  ;;  %v7446_v15 = vsel %vm14576_vm14, %v7331_v55, %v7445_v1  ;;  %v7449_v45 = vsel %vm14576_vm14, %v7338_v51, %v7448_v27  ;;  %v7452_v31 = vsel %vm14576_vm14, %v7345_v7, %v7451_v59  ;;  %v16089_v55 = vld [vmem:[#allocation11 + $0x24] ss:$16 sps:$4 sm:$0xff]   ;;  %v8467_v42 = vstv %s8466_s8 }
 0xbac   : > { %v7455_v44 = vsel %vm14576_vm14, %v7352_v48, %v7454_v22  ;;  %7447 = vst [vmem:[%s14117_s28 + $0x14] sm:$0x1] %v7446_v15  ;;  %7450 = vst [vmem:[%s14117_s28 + $0x1c] sm:$0x1] %v7449_v45  ;;  %v7458_v13 = vsel %vm14576_vm14, %v7359_v11, %v7457_v37  ;;  %v7461_v58 = vsel %vm14576_vm14, %v7366_v32, %v7460_v63  ;;  %v16091_v51 = vld [vmem:[#allocation11 + $0x2c] ss:$16 sps:$4 sm:$0xff]   ;;  %8320 = vmatprep.subr.bf16.mxu0 %v16089_v55 }
 0xbad   : > { %7453 = vst [vmem:[%s14117_s28 + $0x24] sm:$0x1] %v7452_v31  ;;  %7456 = vst [vmem:[%s14117_s28 + $0x2c] sm:$0x1] %v7455_v44  ;;  %v7464_v50 = vsel %vm14576_vm14, %v7373_v46, %v7463_v39  ;;  %v7467_v26 = vsel %vm14576_vm14, %v7380_v41, %v7466_v12  ;;  %v7470_v20 = vsel %vm14576_vm14, %v7387_v61, %v7469_v33  ;;  %v16093_v7 = vld [vmem:[#allocation11 + $0x20] ss:$16 sps:$4 sm:$0xff]   ;;  %8363 = vmatprep.subr.bf16.mxu1 %v16091_v51 }
 0xbae   : > { %7459 = vst [vmem:[%s14117_s28 + $0x34] sm:$0x1] %v7458_v13  ;;  %7462 = vst [vmem:[%s14117_s28 + $0x3c] sm:$0x1] %v7461_v58  ;;  %v7473_v10 = vsel %vm14576_vm14, %v7394_v9, %v7472_v34  ;;  %v7476_v0 = vsel %vm14576_vm14, %v7401_v28, %v7475_v4  ;;  %v7479_v16 = vsel %vm14576_vm14, %v7408_v17, %v7478_v53  ;;  %v16095_v48 = vld [vmem:[#allocation11 + $0x28] ss:$16 sps:$4 sm:$0xff]   ;;  %8321 = vmatpush1.bf16.msra.mxu0 %v16093_v7 }
 0xbaf   : > { %7465 = vst [vmem:[%s14117_s28 + $0x44] sm:$0x1] %v7464_v50  ;;  %7468 = vst [vmem:[%s14117_s28 + $0x4c] sm:$0x1] %v7467_v26  ;;  %v7482_v21 = vsel %vm14576_vm14, %v7415_v30, %v7481_v40  ;;  %v7485_v2 = vsel %vm14576_vm14, %v7422_v5, %v7484_v38  ;;  %8364 = vmatpush1.bf16.msra.mxu1 %v16095_v48  ;;  %v16101_v11 = vld [vmem:[#allocation11 + $0x44] ss:$16 sps:$4 sm:$0xff]  }
 0xbb0   : > { %7471 = vst [vmem:[%s14117_s28 + $0x54] sm:$0x1] %v7470_v20  ;;  %7474 = vst [vmem:[%s14117_s28 + $0x5c] sm:$0x1] %v7473_v10  ;;  %v16103_v32 = vld [vmem:[#allocation11 + $0x4c] ss:$16 sps:$4 sm:$0xff]   ;;  %8322 = vmatprep.subr.bf16.mxu0 %v16101_v11 }
 0xbb1   : > { %7477 = vst [vmem:[%s14117_s28 + $0x64] sm:$0x1] %v7476_v0  ;;  %7480 = vst [vmem:[%s14117_s28 + $0x6c] sm:$0x1] %v7479_v16  ;;  %v16105_v46 = vld [vmem:[#allocation11 + $0x40] ss:$16 sps:$4 sm:$0xff]   ;;  %8365 = vmatprep.subr.bf16.mxu1 %v16103_v32 }
 0xbb2   : > { %7483 = vst [vmem:[%s14117_s28 + $0x74] sm:$0x1] %v7482_v21  ;;  %7486 = vst [vmem:[%s14117_s28 + $0x7c] sm:$0x1] %v7485_v2  ;;  %v16107_v41 = vld [vmem:[#allocation11 + $0x48] ss:$16 sps:$4 sm:$0xff]   ;;  %8323 = vmatpush1.bf16.msra.mxu0 %v16105_v46 }
 0xbb3   : > { %8366 = vmatpush1.bf16.msra.mxu1 %v16107_v41  ;;  %v16113_v39 = vld [vmem:[#allocation11 + $0x64] ss:$16 sps:$4 sm:$0xff]   ;;  %v16115_v12 = vld [vmem:[#allocation11 + $0x6c] ss:$16 sps:$4 sm:$0xff]   ;;  %v16117_v61 = vld [vmem:[#allocation11 + $0x60] ss:$16 sps:$4 sm:$0xff]  }
 0xbb4   : > { %v16119_v9 = vld [vmem:[#allocation11 + $0x68] ss:$16 sps:$4 sm:$0xff]   ;;  %8324 = vmatprep.subr.bf16.mxu0 %v16113_v39  ;;  %8367 = vmatprep.subr.bf16.mxu1 %v16115_v12  ;;  %v16125_v28 = vld [vmem:[#allocation11 + $0x84] ss:$16 sps:$4 sm:$0xff]   ;;  %v16127_v17 = vld [vmem:[#allocation11 + $0x8c] ss:$16 sps:$4 sm:$0xff]  }
 0xbb5   : > { %v16137_v1 = vld [vmem:[#allocation11 + $0xa4] ss:$16 sps:$4 sm:$0xff]   ;;  %v16139_v30 = vld [vmem:[#allocation11 + $0xac] ss:$16 sps:$4 sm:$0xff]   ;;  %v16141_v5 = vld [vmem:[#allocation11 + $0xa0] ss:$16 sps:$4 sm:$0xff]  }
 0xbb6   : > { %8325 = vmatpush1.bf16.msra.mxu0 %v16117_v61  ;;  %v16158_v43 = vld [vmem:[#allocation5] sm:$0xff] }
 0xbb7   : > { %8368 = vmatpush1.bf16.msra.mxu1 %v16119_v9  ;;  %8326 = vmatprep.subr.bf16.mxu0 %v16125_v28  ;;  %17158 = vst [vmem:[#allocation37_spill] sm:$0xff] %v16158_v43  ;;  %vm8468_vm14 = vcmp.gt.s32.totalorder %v16158_v43, %v8467_v42  ;;  %v8081_v43 = vld [vmem:[%s14117_s28 + $0x2c] sm:$0x2] }
 0xbb8   : > { %8369 = vmatprep.subr.bf16.mxu1 %v16127_v17 }
 0xbba   : > { %8327 = vmatpush1.bf16.msra.mxu0 %v16129_v3 }
 0xbbb   : > { %8370 = vmatpush1.bf16.msra.mxu1 %v16131_v54  ;;  %8328 = vmatprep.subr.bf16.mxu0 %v16137_v1 }
 0xbbc   : > { %8371 = vmatprep.subr.bf16.mxu1 %v16139_v30 }
 0xbbe   : > { %8329 = vmatpush1.bf16.msra.mxu0 %v16141_v5 }
 0xbbf   : > { %8372 = vmatpush1.bf16.msra.mxu1 %v16143_v25  ;;  %8330 = vmatprep.subr.bf16.mxu0 %v15956_v19  ;;  %v16161_v19 = vld [vmem:[#allocation5 + $0x8] sm:$0xff] }
 0xbc0   : > { %8373 = vmatprep.subr.bf16.mxu1 %v15958_v49  ;;  %17159 = vst [vmem:[#allocation38_spill] sm:$0xff] %v16161_v19  ;;  %vm8469_vm3 = vcmp.gt.s32.totalorder %v16161_v19, %v8467_v42  ;;  %v8470_v49 = vsel %vm8468_vm14, 1, %v17156_v62  ;;  %v8075_v19 = vld [vmem:[%s14117_s28 + $0x1c] sm:$0x2] }
 0xbc1   : > { %8473 = vperm.xlu0 %12635, %v8470_v49  }
 0xbc2   : > { %8331 = vmatpush1.bf16.msra.mxu0 %v15960_v29  ;;  %v8471_v29 = vsel %vm8469_vm3, 1, %v17156_v62 }
 0xbc3   : > { %8374 = vmatpush1.bf16.msra.mxu1 %v15962_v24  ;;  %8332 = vmatprep.subr.bf16.mxu0 %v15968_v6 }
 0xbc4   : > { %8375 = vmatprep.subr.bf16.mxu1 %v15970_v18  ;;  %8476 = vperm.xlu1 %12636, %v8471_v29  }
 0xbc6   : > { %8333 = vmatpush1.bf16.msra.mxu0 %v15972_v8 }
 0xbc7   : > { %8376 = vmatpush1.bf16.msra.mxu1 %v15974_v47 }
 0xc6d   : > { %v7725_v24 = vpop.f32.mrb[40].mxu0  ;;  %v7768_v6 = vpop.f32.mrb[40].mxu1 }
 0xc6e   : > { %v12293_v18 = vadd.f32 %v7725_v24, %v14323_v35  ;;  %v7727_v8 = vpop.f32.mrb[41].mxu0  ;;  %v7770_v47 = vpop.f32.mrb[41].mxu1  ;;  %v12357_v53 = vadd.f32 %v7768_v6, %v14335_v56 }
 0xc6f   : > { %v12294_v27 = vadd.f32 %v7727_v8, %v14325_v36  ;;  %v7729_v59 = vpop.f32.mrb[42].mxu0  ;;  %v7772_v22 = vpop.f32.mrb[42].mxu1  ;;  %v12358_v4 = vadd.f32 %v7770_v47, %v14332_v52 }
 0xc70   : > { %v11995_v33 = vmul.f32 -1.442695, %v12293_v18  ;;  %v12295_v15 = vadd.f32 %v7729_v59, %v14323_v35  ;;  %v7731_v45 = vpop.f32.mrb[43].mxu0  ;;  %v7774_v31 = vpop.f32.mrb[43].mxu1  ;;  %v12359_v50 = vadd.f32 %v7772_v22, %v14335_v56 }
 0xc71   : > { %v11997_v44 = vmul.f32 -1.442695, %v12294_v27  ;;  %v12296_v37 = vadd.f32 %v7731_v45, %v14325_v36  ;;  %v11999_v13 = vmul.f32 -1.442695, %v12358_v4  ;;  %v12360_v58 = vadd.f32 %v7774_v31, %v14332_v52 }
 0xc72   : > { %13405 = vpow2.f32 %v11995_v33  ;;  %v11996_v63 = vmul.f32 -1.442695, %v12295_v15 }
 0xc73   : > { %13407 = vpow2.f32 %v11997_v44  ;;  %v11998_v34 = vmul.f32 -1.442695, %v12296_v37  ;;  %v12000_v20 = vmul.f32 -1.442695, %v12360_v58  ;;  %v17161_v58 = vld [vmem:[#allocation31_spill] sm:$0xff] }
 0xc74   : > { %13409 = vpow2.f32 %v11996_v63  ;;  %vm7852_vm6 = vcmp.eq.s32.totalorder %v17161_v58, 1 }
 0xc75   : > { %13411 = vpow2.f32 %v11998_v34  ;;  %v17160_v34 = vld [vmem:[#allocation30_spill] sm:$0xff] }
 0xc76   : > { %13413 = vtanh.f32 %v12357_v53  ;;  %vm7851_vm4 = vcmp.eq.s32.totalorder %v17160_v34, 1 }
 0xc77   : > { %13415 = vpow2.f32 %v11999_v13 }
 0xc78   : > { %13417 = vtanh.f32 %v12359_v50 }
 0xc7c   : > { %v13406_v26 = vpop.eup %13405 }
 0xc7d   : > { %v13408_v40 = vpop.eup %13407  ;;  %v7791_v38 = vadd.f32 1.0, %v13406_v26 }
 0xc7e   : > { %v7803_v10 = vadd.f32 1.0, %v13408_v40  ;;  %v13410_v0 = vpop.eup %13409 }
 0xc7f   : > { %13419 = vrcp.f32 %v7791_v38  ;;  %v7792_v16 = vadd.f32 1.0, %v13410_v0  ;;  %v13412_v21 = vpop.eup %13411 }
 0xc80   : > { %13421 = vrcp.f32 %v7803_v10  ;;  %v7804_v2 = vadd.f32 1.0, %v13412_v21  ;;  %v13414_v42 = vpop.eup %13413 }
 0xc81   : > { %13423 = vpow2.f32 %v12000_v20  ;;  %v13416_v49 = vpop.eup %13415 }
 0xc82   : > { %13425 = vrcp.f32 %v7792_v16  ;;  %v13418_v29 = vpop.eup %13417  ;;  %v7817_v8 = vadd.f32 1.0, %v13416_v49 }
 0xc83   : > { %13427 = vrcp.f32 %v7804_v2 }
 0xc84   : > { %13429 = vrcp.f32 %v7817_v8 }
 0xc89   : > { %v13420_v24 = vpop.eup %13419 }
 0xc8a   : > { %v13422_v6 = vpop.eup %13421  ;;  %v7827_v18 = vmul.f32 %v13420_v24, %v13414_v42 }
 0xc8b   : > { %v13424_v47 = vpop.eup %13423  ;;  %v7825_v27 = vmul.f32 %v13422_v6, %v15989_v23 }
 0xc8c   : > { %v13426_v59 = vpop.eup %13425  ;;  %v7818_v45 = vadd.f32 1.0, %v13424_v47 }
 0xc8d   : > { %v16175_v22 = vadd.f32 %v7827_v18, %v7825_v27  ;;  %v7828_v33 = vmul.f32 %v13426_v59, %v13418_v29  ;;  %v13428_v15 = vpop.eup %13427 }
 0xc8e   : > { %v7826_v31 = vmul.f32 %v13428_v15, %v15993_v60  ;;  %v13430_v37 = vpop.eup %13429 }
 0xc8f   : > { %13431 = vtanh.f32 %v16175_v22 }
 0xc90   : > { %v16179_v44 = vadd.f32 %v7828_v33, %v7826_v31  ;;  %13433 = vrcp.f32 %v7818_v45 }
 0xc92   : > { %13435 = vtanh.f32 %v16179_v44 }
 0xc99   : > { %v13432_v63 = vpop.eup %13431 }
 0xc9a   : > { %v7833_v23 = vmul.f32 %v13432_v63, %v13430_v37  ;;  %v13434_v4 = vpop.eup %13433 }
 0xc9c   : > { %v7853_v53 = vsel %vm7851_vm4, %v7833_v23, 0.0  ;;  %v13436_v13 = vpop.eup %13435 }
 0xc9d   : > { %v7834_v50 = vmul.f32 %v13436_v13, %v13434_v4 }
 0xc9f   : > { %v7854_v26 = vsel %vm7852_vm6, %v7834_v50, 0.0  ;;  %v8125_v40 = vpack.c.bf16 %v7834_v50, %v7833_v23 }
 0xca0   : > { %v7855_v38 = vpack.c.bf16 %v7854_v26, %v7853_v53  ;;  %v12001_v60 = vpack.c.bf16 %v7854_v26, %v7854_v26 }
 0xca1   : > { %8351 = vmatmul.mubr.bf16.vlgmr.msra.gmra.mrb[44].mxu0 %v8125_v40  ;;  %8394 = vmatmul.mubr.bf16.vlgmr.msra.gmra.mrb[44].mxu1 %v8125_v40 }
 0xca2   : > { %v7864_v20 = vrot.slane %v7855_v38, %v17155_v14  ;;  %v7871_v10 = vrot.slane %v12001_v60, %v17155_v14  ;;  %8977 = vmatprep.mubr.bf16.mxu0 %v17156_v62  ;;  %9020 = vmatprep.mubr.bf16.mxu1 %v17156_v62 }
 0xca4   : > { %v7872_v0 = vcombine.high %v7864_v20, %v7864_v20  ;;  %v7873_v16 = vcombine.high %v7871_v10, %v7871_v10  ;;  %v7880_v21 = vrot.slane %v7864_v20, %v17155_v14  ;;  %v7887_v2 = vrot.slane %v7871_v10, %v17155_v14 }
 0xca6   : > { %v7894_v42 = vrot.slane %v7872_v0, %v17155_v14  ;;  %v7901_v49 = vrot.slane %v7873_v16, %v17155_v14  ;;  %v7902_v29 = vcombine.high %v7880_v21, %v7880_v21  ;;  %v7903_v24 = vcombine.high %v7887_v2, %v7887_v2  ;;  %v8087_v14 = vld [vmem:[%s14117_s28 + $0x3c] sm:$0x2] }
 0xca7   : > { %v7907_v6 = vunpack.i.h.s16 %v7880_v21  ;;  %v7915_v18 = vunpack.i.h.s16 %v7887_v2  ;;  %v12002_v8 = vpack.i.b16 %v7880_v21, %v7880_v21  ;;  %v12006_v47 = vpack.i.b16 %v7887_v2, %v7887_v2  ;;  %v8090_v2 = vld [vmem:[%s14117_s28 + $0x44] sm:$0x2] }
 0xca8   : > { %v7904_v27 = vcombine.high %v7894_v42, %v7894_v42  ;;  %v7905_v59 = vcombine.high %v7901_v49, %v7901_v49  ;;  %v7909_v33 = vunpack.i.h.s16 %v7894_v42  ;;  %v7911_v15 = vunpack.i.h.s16 %v7902_v29 }
 0xca9   : > { %v7917_v45 = vunpack.i.h.s16 %v7901_v49  ;;  %v7919_v31 = vunpack.i.h.s16 %v7903_v24  ;;  %v16192_v37 = vpack.i.b16 %v7907_v6, %v7907_v6  ;;  %v12003_v63 = vpack.i.b16 %v7894_v42, %v7894_v42  ;;  %v8066_v6 = vld [vmem:[%s14117_s28 + $0x4] sm:$0x2] }
 0xcaa   : > { %v7913_v34 = vunpack.i.h.s16 %v7904_v27  ;;  %v7921_v23 = vunpack.i.h.s16 %v7905_v59  ;;  %v16194_v4 = vpack.i.b16 %v7909_v33, %v7909_v33  ;;  %v12004_v53 = vpack.i.b16 %v7902_v29, %v7902_v29 }
 0xcab   : > { %v16196_v13 = vpack.i.b16 %v7911_v15, %v7911_v15  ;;  %v12005_v58 = vpack.i.b16 %v7904_v27, %v7904_v27  ;;  %v7931_v50 = vpack.i.b16 %v7915_v18, %v7915_v18  ;;  %v12007_v26 = vpack.i.b16 %v7901_v49, %v7901_v49  ;;  %v8069_v18 = vld [vmem:[%s14117_s28 + $0xc] sm:$0x2]  ;;  %v8096_v27 = vld [vmem:[%s14117_s28 + $0x54] sm:$0x2] }
 0xcac   : > { %v16198_v40 = vpack.i.b16 %v7913_v34, %v7913_v34  ;;  %v7933_v38 = vpack.i.b16 %v7917_v45, %v7917_v45  ;;  %v12008_v60 = vpack.i.b16 %v7903_v24, %v7903_v24  ;;  %v7935_v20 = vpack.i.b16 %v7919_v31, %v7919_v31  ;;  %v8099_v31 = vld [vmem:[%s14117_s28 + $0x5c] sm:$0x2] }
 0xcad   : > { %v12009_v10 = vpack.i.b16 %v7905_v59, %v7905_v59  ;;  %v7937_v0 = vpack.i.b16 %v7921_v23, %v7921_v23  ;;  %v7944_v16 = vrot.slane %v12002_v8, %v14357_v57  ;;  %v7951_v21 = vrot.slane %v16192_v37, %v14357_v57  ;;  %v8093_v8 = vld [vmem:[%s14117_s28 + $0x4c] sm:$0x2]  ;;  %v8102_v37 = vld [vmem:[%s14117_s28 + $0x64] sm:$0x2] }
 0xcae   : > { %v7958_v42 = vrot.slane %v12003_v63, %v14357_v57  ;;  %v7965_v49 = vrot.slane %v16194_v4, %v14357_v57  ;;  %v7972_v29 = vrot.slane %v12004_v53, %v14357_v57  ;;  %v7979_v24 = vrot.slane %v16196_v13, %v14357_v57  ;;  %v8105_v63 = vld [vmem:[%s14117_s28 + $0x6c] sm:$0x2]  ;;  %v8072_v13 = vld [vmem:[%s14117_s28 + $0x14] sm:$0x2] }
 0xcaf   : > { %v7986_v59 = vrot.slane %v12005_v58, %v14357_v57  ;;  %v7993_v33 = vrot.slane %v16198_v40, %v14357_v57  ;;  %v8000_v15 = vrot.slane %v12006_v47, %v14357_v57  ;;  %v8007_v45 = vrot.slane %v7931_v50, %v14357_v57  ;;  %v8108_v47 = vld [vmem:[%s14117_s28 + $0x74] sm:$0x2]  ;;  %v8111_v58 = vld [vmem:[%s14117_s28 + $0x7c] sm:$0x2] }
 0xcb0   : > { %v8014_v34 = vrot.slane %v12007_v26, %v14357_v57  ;;  %v8021_v23 = vrot.slane %v7933_v38, %v14357_v57  ;;  %v8028_v4 = vrot.slane %v12008_v60, %v14357_v57  ;;  %v8035_v53 = vrot.slane %v7935_v20, %v14357_v57  ;;  %v8078_v26 = vld [vmem:[%s14117_s28 + $0x24] sm:$0x2]  ;;  %v8084_v20 = vld [vmem:[%s14117_s28 + $0x34] sm:$0x2] }
 0xcb1   : > { %v8042_v50 = vrot.slane %v12009_v10, %v14357_v57  ;;  %v8049_v40 = vrot.slane %v7937_v0, %v14357_v57  ;;  %v8091_v62 = vsel %vm14726_vm5, %v8000_v15, %v8090_v2  ;;  %v8094_v60 = vsel %vm14726_vm5, %v8007_v45, %v8093_v8 }
 0xcb2   : > { %8092 = vst [vmem:[%s14117_s28 + $0x44] sm:$0x2] %v8091_v62  ;;  %8095 = vst [vmem:[%s14117_s28 + $0x4c] sm:$0x2] %v8094_v60  ;;  %v8097_v10 = vsel %vm14726_vm5, %v8014_v34, %v8096_v27  ;;  %v8100_v0 = vsel %vm14726_vm5, %v8021_v23, %v8099_v31  ;;  %v8103_v2 = vsel %vm14726_vm5, %v8028_v4, %v8102_v37 }
 0xcb3   : > { %v8106_v8 = vsel %vm14726_vm5, %v8035_v53, %v8105_v63  ;;  %8098 = vst [vmem:[%s14117_s28 + $0x54] sm:$0x2] %v8097_v10  ;;  %8101 = vst [vmem:[%s14117_s28 + $0x5c] sm:$0x2] %v8100_v0  ;;  %v8109_v62 = vsel %vm14726_vm5, %v8042_v50, %v8108_v47  ;;  %v8112_v27 = vsel %vm14726_vm5, %v8049_v40, %v8111_v58 }
 0xcb4   : > { %8104 = vst [vmem:[%s14117_s28 + $0x64] sm:$0x2] %v8103_v2  ;;  %8107 = vst [vmem:[%s14117_s28 + $0x6c] sm:$0x2] %v8106_v8  ;;  %v8067_v15 = vsel %vm14726_vm5, %v7944_v16, %v8066_v6  ;;  %v8070_v45 = vsel %vm14726_vm5, %v7951_v21, %v8069_v18  ;;  %v8073_v31 = vsel %vm14726_vm5, %v7958_v42, %v8072_v13  ;;  %v12991_v42 = vld [vmem:[#allocation11 + $0x4] ss:$16 sps:$4 sm:$0xff]  }
 0xcb5   : > { %8110 = vst [vmem:[%s14117_s28 + $0x74] sm:$0x2] %v8109_v62  ;;  %8113 = vst [vmem:[%s14117_s28 + $0x7c] sm:$0x2] %v8112_v27  ;;  %v8076_v37 = vsel %vm14726_vm5, %v7965_v49, %v8075_v19  ;;  %v8079_v63 = vsel %vm14726_vm5, %v7972_v29, %v8078_v26  ;;  %v8082_v16 = vsel %vm14726_vm5, %v7979_v24, %v8081_v43  ;;  %v12994_v19 = vld [vmem:[#allocation11 + $0xc] ss:$16 sps:$4 sm:$0xff]   ;;  %8945 = vmatprep.subr.bf16.mxu0 %v12991_v42 }
 0xcb6   : > { %8068 = vst [vmem:[%s14117_s28 + $0x4] sm:$0x2] %v8067_v15  ;;  %8071 = vst [vmem:[%s14117_s28 + $0xc] sm:$0x2] %v8070_v45  ;;  %v8085_v21 = vsel %vm14726_vm5, %v7986_v59, %v8084_v20  ;;  %v8088_v6 = vsel %vm14726_vm5, %v7993_v33, %v8087_v14  ;;  %v16284_v49 = vld [vmem:[#allocation11] ss:$16 sps:$4 sm:$0xff]   ;;  %8988 = vmatprep.subr.bf16.mxu1 %v12994_v19 }
 0xcb7   : > { %8074 = vst [vmem:[%s14117_s28 + $0x14] sm:$0x2] %v8073_v31  ;;  %8077 = vst [vmem:[%s14117_s28 + $0x1c] sm:$0x2] %v8076_v37  ;;  %v16286_v29 = vld [vmem:[#allocation11 + $0x8] ss:$16 sps:$4 sm:$0xff]   ;;  %8946 = vmatpush1.bf16.msra.mxu0 %v16284_v49 }
 0xcb8   : > { %8080 = vst [vmem:[%s14117_s28 + $0x24] sm:$0x2] %v8079_v63  ;;  %8083 = vst [vmem:[%s14117_s28 + $0x2c] sm:$0x2] %v8082_v16  ;;  %8989 = vmatpush1.bf16.msra.mxu1 %v16286_v29  ;;  %8947 = vmatprep.subr.bf16.mxu0 %v16089_v55  ;;  %v16310_v14 = vld [vmem:[#allocation11 + $0xc4] ss:$16 sps:$4 sm:$0xff]  }
 0xcb9   : > { %8086 = vst [vmem:[%s14117_s28 + $0x34] sm:$0x2] %v8085_v21  ;;  %8089 = vst [vmem:[%s14117_s28 + $0x3c] sm:$0x2] %v8088_v6  ;;  %8990 = vmatprep.subr.bf16.mxu1 %v16091_v51  ;;  %v16312_v55 = vld [vmem:[#allocation11 + $0xcc] ss:$16 sps:$4 sm:$0xff]  }
 0xcba   : > { %v16314_v51 = vld [vmem:[#allocation11 + $0xc0] ss:$16 sps:$4 sm:$0xff]  }
 0xcbb   : > { %8948 = vmatpush1.bf16.msra.mxu0 %v16093_v7  ;;  %v16316_v7 = vld [vmem:[#allocation11 + $0xc8] ss:$16 sps:$4 sm:$0xff]  }
 0xcbc   : > { %8991 = vmatpush1.bf16.msra.mxu1 %v16095_v48  ;;  %8949 = vmatprep.subr.bf16.mxu0 %v16101_v11  ;;  %v16322_v48 = vld [vmem:[#allocation11 + $0xe4] ss:$16 sps:$4 sm:$0xff]   ;;  %v16324_v11 = vld [vmem:[#allocation11 + $0xec] ss:$16 sps:$4 sm:$0xff]  }
 0xcbd   : > { %8992 = vmatprep.subr.bf16.mxu1 %v16103_v32  ;;  %v16326_v32 = vld [vmem:[#allocation11 + $0xe0] ss:$16 sps:$4 sm:$0xff]  }
 0xcbf   : > { %8950 = vmatpush1.bf16.msra.mxu0 %v16105_v46  ;;  %v16328_v46 = vld [vmem:[#allocation11 + $0xe8] ss:$16 sps:$4 sm:$0xff]  }
 0xcc0   : > { %8993 = vmatpush1.bf16.msra.mxu1 %v16107_v41  ;;  %8951 = vmatprep.subr.bf16.mxu0 %v16113_v39 }
 0xcc1   : > { %8994 = vmatprep.subr.bf16.mxu1 %v16115_v12 }
 0xcc3   : > { %8952 = vmatpush1.bf16.msra.mxu0 %v16117_v61 }
 0xcc4   : > { %8995 = vmatpush1.bf16.msra.mxu1 %v16119_v9  ;;  %8953 = vmatprep.subr.bf16.mxu0 %v16125_v28 }
 0xcc5   : > { %8996 = vmatprep.subr.bf16.mxu1 %v16127_v17 }
 0xcc7   : > { %8954 = vmatpush1.bf16.msra.mxu0 %v16129_v3 }
 0xcc8   : > { %8997 = vmatpush1.bf16.msra.mxu1 %v16131_v54  ;;  %8955 = vmatprep.subr.bf16.mxu0 %v16137_v1 }
 0xcc9   : > { %8998 = vmatprep.subr.bf16.mxu1 %v16139_v30 }
 0xccb   : > { %8956 = vmatpush1.bf16.msra.mxu0 %v16141_v5 }
 0xccc   : > { %8999 = vmatpush1.bf16.msra.mxu1 %v16143_v25  ;;  %8957 = vmatprep.subr.bf16.mxu0 %v16310_v14 }
 0xccd   : > { %9000 = vmatprep.subr.bf16.mxu1 %v16312_v55 }
 0xccf   : > { %8958 = vmatpush1.bf16.msra.mxu0 %v16314_v51 }
 0xcd0   : > { %9001 = vmatpush1.bf16.msra.mxu1 %v16316_v7  ;;  %8959 = vmatprep.subr.bf16.mxu0 %v16322_v48 }
 0xcd1   : > { %9002 = vmatprep.subr.bf16.mxu1 %v16324_v11 }
 0xcd3   : > { %8960 = vmatpush1.bf16.msra.mxu0 %v16326_v32 }
 0xcd4   : > { %9003 = vmatpush1.bf16.msra.mxu1 %v16328_v46  ;;  %9572 = vmatprep.subr.bf16.mxu0 %v12991_v42 }
 0xcd5   : > { %9615 = vmatprep.subr.bf16.mxu1 %v12994_v19 }
 0xd74   : > { %v8352_v41 = vpop.f32.mrb[44].mxu0  ;;  %v8395_v39 = vpop.f32.mrb[44].mxu1 }
 0xd75   : > { %v12297_v12 = vadd.f32 %v8352_v41, %v14323_v35  ;;  %v8354_v61 = vpop.f32.mrb[45].mxu0  ;;  %v8397_v9 = vpop.f32.mrb[45].mxu1  ;;  %v12361_v33 = vadd.f32 %v8395_v39, %v14335_v56 }
 0xd76   : > { %v12298_v28 = vadd.f32 %v8354_v61, %v14325_v36  ;;  %v8356_v17 = vpop.f32.mrb[46].mxu0  ;;  %v8399_v3 = vpop.f32.mrb[46].mxu1  ;;  %v12362_v59 = vadd.f32 %v8397_v9, %v14332_v52 }
 0xd77   : > { %v12042_v54 = vmul.f32 -1.442695, %v12297_v12  ;;  %v12299_v1 = vadd.f32 %v8356_v17, %v14323_v35  ;;  %v8358_v30 = vpop.f32.mrb[47].mxu0  ;;  %v8401_v5 = vpop.f32.mrb[47].mxu1  ;;  %v12363_v4 = vadd.f32 %v8399_v3, %v14335_v56 }
 0xd78   : > { %v12044_v25 = vmul.f32 -1.442695, %v12298_v28  ;;  %v12300_v43 = vadd.f32 %v8358_v30, %v14325_v36  ;;  %v12046_v34 = vmul.f32 -1.442695, %v12362_v59  ;;  %v12364_v23 = vadd.f32 %v8401_v5, %v14332_v52  ;;  %v8474_v41 = vpop.permute.xlu0 %8473  ;;  %v17163_v30 = vld [vmem:[#allocation22_spill] sm:$0xff] }
 0xd79   : > { %13437 = vpow2.f32 %v12042_v54  ;;  %v12043_v24 = vmul.f32 -1.442695, %v12299_v1  ;;  %vm8478_vm5 = vcmp.eq.s32.totalorder %v8474_v41, 1 }
 0xd7a   : > { %13439 = vpow2.f32 %v12044_v25  ;;  %v12045_v18 = vmul.f32 -1.442695, %v12300_v43  ;;  %v12047_v58 = vmul.f32 -1.442695, %v12364_v23  ;;  %v17164_v43 = vmov 0  }
 0xd7b   : > { %13441 = vpow2.f32 %v12043_v24 }
 0xd7c   : > { %13443 = vpow2.f32 %v12045_v18 }
 0xd7d   : > { %13445 = vtanh.f32 %v12361_v33 }
 0xd7e   : > { %13447 = vpow2.f32 %v12046_v34 }
 0xd7f   : > { %13449 = vtanh.f32 %v12363_v4 }
 0xd83   : > { %v13438_v53 = vpop.eup %13437 }
 0xd84   : > { %v13440_v13 = vpop.eup %13439  ;;  %v8418_v47 = vadd.f32 1.0, %v13438_v53 }
 0xd85   : > { %v8430_v50 = vadd.f32 1.0, %v13440_v13  ;;  %v13442_v40 = vpop.eup %13441 }
 0xd86   : > { %13451 = vrcp.f32 %v8418_v47  ;;  %v8419_v26 = vadd.f32 1.0, %v13442_v40  ;;  %v13444_v38 = vpop.eup %13443 }
 0xd87   : > { %13453 = vrcp.f32 %v8430_v50  ;;  %v8431_v60 = vadd.f32 1.0, %v13444_v38  ;;  %v13446_v20 = vpop.eup %13445 }
 0xd88   : > { %13455 = vpow2.f32 %v12047_v58  ;;  %v13448_v10 = vpop.eup %13447 }
 0xd89   : > { %13457 = vrcp.f32 %v8419_v26  ;;  %v13450_v0 = vpop.eup %13449  ;;  %v8444_v31 = vadd.f32 1.0, %v13448_v10 }
 0xd8a   : > { %13459 = vrcp.f32 %v8431_v60 }
 0xd90   : > { %v13452_v2 = vpop.eup %13451 }
 0xd91   : > { %v13454_v8 = vpop.eup %13453  ;;  %v8454_v62 = vmul.f32 %v13452_v2, %v13446_v20 }
 0xd92   : > { %v13456_v27 = vpop.eup %13455  ;;  %v8452_v15 = vmul.f32 %v13454_v8, %v16175_v22  ;;  %v8477_v22 = vpop.permute.xlu1 %8476 }
 0xd93   : > { %v13458_v45 = vpop.eup %13457  ;;  %v8445_v21 = vadd.f32 1.0, %v13456_v27  ;;  %vm8479_vm10 = vcmp.eq.s32.totalorder %v8477_v22, 1 }
 0xd94   : > { %v8455_v37 = vmul.f32 %v13458_v45, %v13450_v0  ;;  %v16343_v63 = vadd.f32 %v8454_v62, %v8452_v15  ;;  %v13460_v16 = vpop.eup %13459 }
 0xd95   : > { %v8453_v6 = vmul.f32 %v13460_v16, %v16179_v44 }
 0xd96   : > { %13461 = vtanh.f32 %v16343_v63 }
 0xd97   : > { %13463 = vrcp.f32 %v8444_v31  ;;  %v16347_v42 = vadd.f32 %v8455_v37, %v8453_v6 }
 0xd98   : > { %13465 = vrcp.f32 %v8445_v21 }
 0xd99   : > { %13467 = vtanh.f32 %v16347_v42 }
 0xda0   : > { %v13462_v19 = vpop.eup %13461 }
 0xda1   : > { %v13464_v39 = vpop.eup %13463 }
 0xda2   : > { %v13466_v12 = vpop.eup %13465  ;;  %v8460_v61 = vmul.f32 %v13464_v39, %v13462_v19 }
 0xda3   : > { %v13468_v9 = vpop.eup %13467 }
 0xda4   : > { %v8461_v28 = vmul.f32 %v13468_v9, %v13466_v12  ;;  %v8480_v17 = vsel %vm8478_vm5, %v8460_v61, 0.0 }
 0xda6   : > { %v8481_v44 = vsel %vm8479_vm10, %v8461_v28, 0.0  ;;  %v8752_v3 = vpack.c.bf16 %v8461_v28, %v8460_v61 }
 0xda7   : > { %v8482_v54 = vpack.c.bf16 %v8481_v44, %v8480_v17  ;;  %v12048_v1 = vpack.c.bf16 %v8481_v44, %v8481_v44 }
 0xda8   : > { %8978 = vmatmul.mubr.bf16.vlgmr.msra.gmra.mrb[48].mxu0 %v8752_v3  ;;  %9021 = vmatmul.mubr.bf16.vlgmr.msra.gmra.mrb[48].mxu1 %v8752_v3 }
 0xda9   : > { %v8491_v5 = vrot.slane %v8482_v54, %v17163_v30  ;;  %v8498_v25 = vrot.slane %v12048_v1, %v17163_v30  ;;  %9573 = vmatpush1.bf16.msra.mxu0 %v16284_v49  ;;  %9616 = vmatpush1.bf16.msra.mxu1 %v16286_v29  ;;  %v8717_v1 = vld [vmem:[%s14117_s28 + $0x44] sm:$0x2] }
 0xdaa   : > { %9604 = vmatprep.mubr.bf16.mxu0 %v17164_v43  ;;  %9647 = vmatprep.mubr.bf16.mxu1 %v17164_v43 }
 0xdab   : > { %v8499_v24 = vcombine.high %v8491_v5, %v8491_v5  ;;  %v8500_v18 = vcombine.high %v8498_v25, %v8498_v25  ;;  %v8507_v59 = vrot.slane %v8491_v5, %v17163_v30  ;;  %v8514_v33 = vrot.slane %v8498_v25, %v17163_v30  ;;  %v8720_v5 = vld [vmem:[%s14117_s28 + $0x4c] sm:$0x2] }
 0xdad   : > { %v8521_v34 = vrot.slane %v8499_v24, %v17163_v30  ;;  %v8528_v23 = vrot.slane %v8500_v18, %v17163_v30  ;;  %v8529_v4 = vcombine.high %v8507_v59, %v8507_v59  ;;  %v8530_v53 = vcombine.high %v8514_v33, %v8514_v33 }
 0xdae   : > { %v8534_v13 = vunpack.i.h.s16 %v8507_v59  ;;  %v8542_v49 = vunpack.i.h.s16 %v8514_v33  ;;  %v12049_v47 = vpack.i.b16 %v8507_v59, %v8507_v59  ;;  %v12053_v29 = vpack.i.b16 %v8514_v33, %v8514_v33  ;;  %v8693_v33 = vld [vmem:[%s14117_s28 + $0x4] sm:$0x2] }
 0xdaf   : > { %v8531_v58 = vcombine.high %v8521_v34, %v8521_v34  ;;  %v8532_v50 = vcombine.high %v8528_v23, %v8528_v23  ;;  %v8536_v40 = vunpack.i.h.s16 %v8521_v34  ;;  %v8538_v26 = vunpack.i.h.s16 %v8529_v4 }
 0xdb0   : > { %v8544_v38 = vunpack.i.h.s16 %v8528_v23  ;;  %v8546_v60 = vunpack.i.h.s16 %v8530_v53  ;;  %v8550_v20 = vpack.i.b16 %v8534_v13, %v8534_v13  ;;  %v12050_v10 = vpack.i.b16 %v8521_v34, %v8521_v34  ;;  %v8696_v34 = vld [vmem:[%s14117_s28 + $0xc] sm:$0x2]  ;;  %v16497_v13 = vld [vmem:[#allocation11 + $0xa8] ss:$16 sps:$4 sm:$0xff]  }
 0xdb1   : > { %v8540_v0 = vunpack.i.h.s16 %v8531_v58  ;;  %v8548_v2 = vunpack.i.h.s16 %v8532_v50  ;;  %v8552_v8 = vpack.i.b16 %v8536_v40, %v8536_v40  ;;  %v12051_v62 = vpack.i.b16 %v8529_v4, %v8529_v4  ;;  %v8723_v40 = vld [vmem:[%s14117_s28 + $0x54] sm:$0x2] }
 0xdb2   : > { %v8554_v27 = vpack.i.b16 %v8538_v26, %v8538_v26  ;;  %v12052_v15 = vpack.i.b16 %v8531_v58, %v8531_v58  ;;  %v8558_v45 = vpack.i.b16 %v8542_v49, %v8542_v49  ;;  %v12054_v31 = vpack.i.b16 %v8528_v23, %v8528_v23  ;;  %v8699_v23 = vld [vmem:[%s14117_s28 + $0x14] sm:$0x2]  ;;  %v8705_v58 = vld [vmem:[%s14117_s28 + $0x24] sm:$0x2] }
 0xdb3   : > { %v8556_v37 = vpack.i.b16 %v8540_v0, %v8540_v0  ;;  %v8560_v16 = vpack.i.b16 %v8544_v38, %v8544_v38  ;;  %v12055_v21 = vpack.i.b16 %v8530_v53, %v8530_v53  ;;  %v8562_v6 = vpack.i.b16 %v8546_v60, %v8546_v60  ;;  %v8714_v0 = vld [vmem:[%s14117_s28 + $0x3c] sm:$0x2] }
 0xdb4   : > { %v12056_v19 = vpack.i.b16 %v8532_v50, %v8532_v50  ;;  %v16360_v41 = vpack.i.b16 %v8548_v2, %v8548_v2  ;;  %v8571_v22 = vrot.slane %v12049_v47, %v14357_v57  ;;  %v8578_v39 = vrot.slane %v8550_v20, %v14357_v57  ;;  %v8708_v50 = vld [vmem:[%s14117_s28 + $0x2c] sm:$0x2]  ;;  %v8726_v2 = vld [vmem:[%s14117_s28 + $0x5c] sm:$0x2] }
 0xdb5   : > { %v8585_v12 = vrot.slane %v12050_v10, %v14357_v57  ;;  %v8592_v61 = vrot.slane %v8552_v8, %v14357_v57  ;;  %v8599_v9 = vrot.slane %v12051_v62, %v14357_v57  ;;  %v8606_v28 = vrot.slane %v8554_v27, %v14357_v57  ;;  %v8711_v10 = vld [vmem:[%s14117_s28 + $0x34] sm:$0x2]  ;;  %v8729_v8 = vld [vmem:[%s14117_s28 + $0x64] sm:$0x2]  ;;  %v8732_v62 = vld [vmem:[%s14117_s28 + $0x6c] sm:$0x2] }
 0xdb6   : > { %v8613_v17 = vrot.slane %v12052_v15, %v14357_v57  ;;  %v8620_v44 = vrot.slane %v8556_v37, %v14357_v57  ;;  %v8627_v3 = vrot.slane %v12053_v29, %v14357_v57  ;;  %v8634_v54 = vrot.slane %v8558_v45, %v14357_v57  ;;  %v8702_v29 = vld [vmem:[%s14117_s28 + $0x1c] sm:$0x2]  ;;  %v8735_v37 = vld [vmem:[%s14117_s28 + $0x74] sm:$0x2] }
 0xdb7   : > { %v8641_v25 = vrot.slane %v12054_v31, %v14357_v57  ;;  %v8648_v24 = vrot.slane %v8560_v16, %v14357_v57  ;;  %v8655_v18 = vrot.slane %v12055_v21, %v14357_v57  ;;  %v8662_v59 = vrot.slane %v8562_v6, %v14357_v57  ;;  %v8738_v16 = vld [vmem:[%s14117_s28 + $0x7c] sm:$0x2] }
 0xdb8   : > { %v8669_v4 = vrot.slane %v12056_v19, %v14357_v57  ;;  %v8676_v53 = vrot.slane %v16360_v41, %v14357_v57  ;;  %v8694_v49 = vsel %vm14935_vm12, %v8571_v22, %v8693_v33  ;;  %v8697_v47 = vsel %vm14935_vm12, %v8578_v39, %v8696_v34  ;;  %v16483_v33 = vld [vmem:[#allocation11 + $0x80] ss:$16 sps:$4 sm:$0xff]   ;;  %v16485_v34 = vld [vmem:[#allocation11 + $0x88] ss:$16 sps:$4 sm:$0xff]  }
 0xdb9   : > { %8695 = vst [vmem:[%s14117_s28 + $0x4] sm:$0x2] %v8694_v49  ;;  %8698 = vst [vmem:[%s14117_s28 + $0xc] sm:$0x2] %v8697_v47  ;;  %v8700_v26 = vsel %vm14935_vm12, %v8585_v12, %v8699_v23  ;;  %v8703_v38 = vsel %vm14935_vm12, %v8592_v61, %v8702_v29  ;;  %v8706_v60 = vsel %vm14935_vm12, %v8599_v9, %v8705_v58  ;;  %v16443_v12 = vld [vmem:[#allocation11 + $0x24] ss:$16 sps:$4 sm:$0xff]   ;;  %v9721_v49 = vstv %s9720_s26 }
 0xdba   : > { %v8709_v20 = vsel %vm14935_vm12, %v8606_v28, %v8708_v50  ;;  %8701 = vst [vmem:[%s14117_s28 + $0x14] sm:$0x2] %v8700_v26  ;;  %8704 = vst [vmem:[%s14117_s28 + $0x1c] sm:$0x2] %v8703_v38  ;;  %v8712_v27 = vsel %vm14935_vm12, %v8613_v17, %v8711_v10  ;;  %v8715_v15 = vsel %vm14935_vm12, %v8620_v44, %v8714_v0  ;;  %v16445_v61 = vld [vmem:[#allocation11 + $0x2c] ss:$16 sps:$4 sm:$0xff]   ;;  %9574 = vmatprep.subr.bf16.mxu0 %v16443_v12 }
 0xdbb   : > { %8707 = vst [vmem:[%s14117_s28 + $0x24] sm:$0x2] %v8706_v60  ;;  %8710 = vst [vmem:[%s14117_s28 + $0x2c] sm:$0x2] %v8709_v20  ;;  %v8718_v45 = vsel %vm14935_vm12, %v8627_v3, %v8717_v1  ;;  %v8721_v31 = vsel %vm14935_vm12, %v8634_v54, %v8720_v5  ;;  %v8724_v21 = vsel %vm14935_vm12, %v8641_v25, %v8723_v40  ;;  %v16447_v9 = vld [vmem:[#allocation11 + $0x20] ss:$16 sps:$4 sm:$0xff]   ;;  %9617 = vmatprep.subr.bf16.mxu1 %v16445_v61 }
 0xdbc   : > { %8713 = vst [vmem:[%s14117_s28 + $0x34] sm:$0x2] %v8712_v27  ;;  %8716 = vst [vmem:[%s14117_s28 + $0x3c] sm:$0x2] %v8715_v15  ;;  %v8727_v6 = vsel %vm14935_vm12, %v8648_v24, %v8726_v2  ;;  %v8730_v19 = vsel %vm14935_vm12, %v8655_v18, %v8729_v8  ;;  %v8733_v41 = vsel %vm14935_vm12, %v8662_v59, %v8732_v62  ;;  %v16449_v28 = vld [vmem:[#allocation11 + $0x28] ss:$16 sps:$4 sm:$0xff]   ;;  %9575 = vmatpush1.bf16.msra.mxu0 %v16447_v9 }
 0xdbd   : > { %8719 = vst [vmem:[%s14117_s28 + $0x44] sm:$0x2] %v8718_v45  ;;  %8722 = vst [vmem:[%s14117_s28 + $0x4c] sm:$0x2] %v8721_v31  ;;  %v8736_v22 = vsel %vm14935_vm12, %v8669_v4, %v8735_v37  ;;  %v8739_v39 = vsel %vm14935_vm12, %v8676_v53, %v8738_v16  ;;  %9618 = vmatpush1.bf16.msra.mxu1 %v16449_v28  ;;  %v16455_v17 = vld [vmem:[#allocation11 + $0x44] ss:$16 sps:$4 sm:$0xff]  }
 0xdbe   : > { %8725 = vst [vmem:[%s14117_s28 + $0x54] sm:$0x2] %v8724_v21  ;;  %8728 = vst [vmem:[%s14117_s28 + $0x5c] sm:$0x2] %v8727_v6  ;;  %v16457_v44 = vld [vmem:[#allocation11 + $0x4c] ss:$16 sps:$4 sm:$0xff]   ;;  %9576 = vmatprep.subr.bf16.mxu0 %v16455_v17 }
 0xdbf   : > { %8731 = vst [vmem:[%s14117_s28 + $0x64] sm:$0x2] %v8730_v19  ;;  %8734 = vst [vmem:[%s14117_s28 + $0x6c] sm:$0x2] %v8733_v41  ;;  %v16459_v3 = vld [vmem:[#allocation11 + $0x40] ss:$16 sps:$4 sm:$0xff]   ;;  %9619 = vmatprep.subr.bf16.mxu1 %v16457_v44 }
 0xdc0   : > { %8737 = vst [vmem:[%s14117_s28 + $0x74] sm:$0x2] %v8736_v22  ;;  %8740 = vst [vmem:[%s14117_s28 + $0x7c] sm:$0x2] %v8739_v39  ;;  %v16461_v54 = vld [vmem:[#allocation11 + $0x48] ss:$16 sps:$4 sm:$0xff]   ;;  %9577 = vmatpush1.bf16.msra.mxu0 %v16459_v3 }
 0xdc1   : > { %9620 = vmatpush1.bf16.msra.mxu1 %v16461_v54  ;;  %v16467_v1 = vld [vmem:[#allocation11 + $0x64] ss:$16 sps:$4 sm:$0xff]   ;;  %v16469_v5 = vld [vmem:[#allocation11 + $0x6c] ss:$16 sps:$4 sm:$0xff]   ;;  %v16471_v25 = vld [vmem:[#allocation11 + $0x60] ss:$16 sps:$4 sm:$0xff]  }
 0xdc2   : > { %v16473_v24 = vld [vmem:[#allocation11 + $0x68] ss:$16 sps:$4 sm:$0xff]   ;;  %9578 = vmatprep.subr.bf16.mxu0 %v16467_v1  ;;  %9621 = vmatprep.subr.bf16.mxu1 %v16469_v5  ;;  %v16479_v18 = vld [vmem:[#allocation11 + $0x84] ss:$16 sps:$4 sm:$0xff]   ;;  %v16481_v59 = vld [vmem:[#allocation11 + $0x8c] ss:$16 sps:$4 sm:$0xff]  }
 0xdc3   : > { %v16491_v23 = vld [vmem:[#allocation11 + $0xa4] ss:$16 sps:$4 sm:$0xff]   ;;  %v16493_v4 = vld [vmem:[#allocation11 + $0xac] ss:$16 sps:$4 sm:$0xff]   ;;  %v16495_v53 = vld [vmem:[#allocation11 + $0xa0] ss:$16 sps:$4 sm:$0xff]  }
 0xdc4   : > { %9579 = vmatpush1.bf16.msra.mxu0 %v16471_v25  ;;  %v17166_v47 = vld [vmem:[#allocation37_spill] sm:$0xff]  ;;  %v17167_v29 = vld [vmem:[#allocation38_spill] sm:$0xff] }
 0xdc5   : > { %9622 = vmatpush1.bf16.msra.mxu1 %v16473_v24  ;;  %9580 = vmatprep.subr.bf16.mxu0 %v16479_v18  ;;  %vm9722_vm12 = vcmp.gt.s32.totalorder %v17166_v47, %v9721_v49  ;;  %vm9723_vm11 = vcmp.gt.s32.totalorder %v17167_v29, %v9721_v49 }
 0xdc6   : > { %9623 = vmatprep.subr.bf16.mxu1 %v16481_v59 }
 0xdc8   : > { %9581 = vmatpush1.bf16.msra.mxu0 %v16483_v33 }
 0xdc9   : > { %9624 = vmatpush1.bf16.msra.mxu1 %v16485_v34  ;;  %9582 = vmatprep.subr.bf16.mxu0 %v16491_v23 }
 0xdca   : > { %9625 = vmatprep.subr.bf16.mxu1 %v16493_v4 }
 0xdcc   : > { %9583 = vmatpush1.bf16.msra.mxu0 %v16495_v53 }
 0xdcd   : > { %9626 = vmatpush1.bf16.msra.mxu1 %v16497_v13  ;;  %9584 = vmatprep.subr.bf16.mxu0 %v16310_v14  ;;  %v9724_v14 = vsel %vm9722_vm12, 1, %v17164_v43 }
 0xdce   : > { %9627 = vmatprep.subr.bf16.mxu1 %v16312_v55  ;;  %v9725_v55 = vsel %vm9723_vm11, 1, %v17164_v43  ;;  %9727 = vperm.xlu0 %12635, %v9724_v14  }
 0xdcf   : > { %9730 = vperm.xlu1 %12636, %v9725_v55  }
 0xdd0   : > { %9585 = vmatpush1.bf16.msra.mxu0 %v16314_v51 }
 0xdd1   : > { %9628 = vmatpush1.bf16.msra.mxu1 %v16316_v7  ;;  %9586 = vmatprep.subr.bf16.mxu0 %v16322_v48 }
 0xdd2   : > { %9629 = vmatprep.subr.bf16.mxu1 %v16324_v11 }
 0xdd4   : > { %9587 = vmatpush1.bf16.msra.mxu0 %v16326_v32 }
 0xdd5   : > { %9630 = vmatpush1.bf16.msra.mxu1 %v16328_v46 }
 0xe7b   : > { %v8979_v51 = vpop.f32.mrb[48].mxu0  ;;  %v9022_v7 = vpop.f32.mrb[48].mxu1 }
 0xe7c   : > { %v12301_v48 = vadd.f32 %v8979_v51, %v14323_v35  ;;  %v8981_v11 = vpop.f32.mrb[49].mxu0  ;;  %v9024_v32 = vpop.f32.mrb[49].mxu1  ;;  %v12365_v62 = vadd.f32 %v9022_v7, %v14335_v56 }
 0xe7d   : > { %v12302_v46 = vadd.f32 %v8981_v11, %v14325_v36  ;;  %v8983_v58 = vpop.f32.mrb[50].mxu0  ;;  %v9026_v50 = vpop.f32.mrb[50].mxu1  ;;  %v12366_v8 = vadd.f32 %v9024_v32, %v14332_v52 }
 0xe7e   : > { %v12089_v40 = vmul.f32 -1.442695, %v12301_v48  ;;  %v12303_v26 = vadd.f32 %v8983_v58, %v14323_v35  ;;  %v8985_v38 = vpop.f32.mrb[51].mxu0  ;;  %v9028_v60 = vpop.f32.mrb[51].mxu1  ;;  %v12367_v45 = vadd.f32 %v9026_v50, %v14335_v56 }
 0xe7f   : > { %v12091_v20 = vmul.f32 -1.442695, %v12302_v46  ;;  %v12304_v10 = vadd.f32 %v8985_v38, %v14325_v36  ;;  %v12093_v27 = vmul.f32 -1.442695, %v12366_v8  ;;  %v12368_v15 = vadd.f32 %v9028_v60, %v14332_v52 }
 0xe80   : > { %13469 = vpow2.f32 %v12089_v40  ;;  %v12090_v0 = vmul.f32 -1.442695, %v12303_v26 }
 0xe81   : > { %13471 = vpow2.f32 %v12091_v20  ;;  %v12092_v2 = vmul.f32 -1.442695, %v12304_v10  ;;  %v12094_v21 = vmul.f32 -1.442695, %v12368_v15  ;;  %v17168_v10 = vld [vmem:[#allocation32_spill] sm:$0xff] }
 0xe82   : > { %13473 = vpow2.f32 %v12090_v0  ;;  %vm9105_vm13 = vcmp.eq.s32.totalorder %v17168_v10, 1 }
 0xe83   : > { %13475 = vpow2.f32 %v12092_v2 }
 0xe84   : > { %13477 = vtanh.f32 %v12365_v62  ;;  %v17169_v62 = vld [vmem:[#allocation33_spill] sm:$0xff] }
 0xe85   : > { %13479 = vpow2.f32 %v12093_v27  ;;  %vm9106_vm15 = vcmp.eq.s32.totalorder %v17169_v62, 1 }
 0xe86   : > { %13481 = vtanh.f32 %v12367_v45 }
 0xe8a   : > { %v13470_v31 = vpop.eup %13469 }
 0xe8b   : > { %v13472_v37 = vpop.eup %13471  ;;  %v9045_v16 = vadd.f32 1.0, %v13470_v31 }
 0xe8c   : > { %v9057_v6 = vadd.f32 1.0, %v13472_v37  ;;  %v13474_v19 = vpop.eup %13473 }
 0xe8d   : > { %13483 = vrcp.f32 %v9045_v16  ;;  %v9046_v41 = vadd.f32 1.0, %v13474_v19  ;;  %v13476_v22 = vpop.eup %13475 }
 0xe8e   : > { %13485 = vrcp.f32 %v9057_v6  ;;  %v9058_v39 = vadd.f32 1.0, %v13476_v22  ;;  %v13478_v49 = vpop.eup %13477 }
 0xe8f   : > { %13487 = vpow2.f32 %v12094_v21  ;;  %v13480_v47 = vpop.eup %13479 }
 0xe90   : > { %13489 = vrcp.f32 %v9046_v41  ;;  %v13482_v29 = vpop.eup %13481  ;;  %v9071_v7 = vadd.f32 1.0, %v13480_v47 }
 0xe91   : > { %13491 = vrcp.f32 %v9058_v39 }
 0xe92   : > { %13493 = vrcp.f32 %v9071_v7 }
 0xe97   : > { %v13484_v14 = vpop.eup %13483 }
 0xe98   : > { %v13486_v55 = vpop.eup %13485  ;;  %v9081_v51 = vmul.f32 %v13484_v14, %v13478_v49 }
 0xe99   : > { %v13488_v48 = vpop.eup %13487  ;;  %v9079_v11 = vmul.f32 %v13486_v55, %v16343_v63 }
 0xe9a   : > { %v13490_v32 = vpop.eup %13489  ;;  %v9072_v40 = vadd.f32 1.0, %v13488_v48 }
 0xe9b   : > { %v16525_v46 = vadd.f32 %v9081_v51, %v9079_v11  ;;  %v9082_v58 = vmul.f32 %v13490_v32, %v13482_v29  ;;  %v13492_v50 = vpop.eup %13491 }
 0xe9c   : > { %v9080_v26 = vmul.f32 %v13492_v50, %v16347_v42  ;;  %v13494_v60 = vpop.eup %13493 }
 0xe9d   : > { %13495 = vtanh.f32 %v16525_v46 }
 0xe9e   : > { %v16529_v38 = vadd.f32 %v9082_v58, %v9080_v26  ;;  %13497 = vrcp.f32 %v9072_v40 }
 0xea0   : > { %13499 = vtanh.f32 %v16529_v38 }
 0xea7   : > { %v13496_v20 = vpop.eup %13495 }
 0xea8   : > { %v9087_v63 = vmul.f32 %v13496_v20, %v13494_v60  ;;  %v13498_v0 = vpop.eup %13497 }
 0xeaa   : > { %v9107_v2 = vsel %vm9105_vm13, %v9087_v63, 0.0  ;;  %v13500_v8 = vpop.eup %13499 }
 0xeab   : > { %v9088_v27 = vmul.f32 %v13500_v8, %v13498_v0 }
 0xead   : > { %v9108_v15 = vsel %vm9106_vm15, %v9088_v27, 0.0  ;;  %v9379_v45 = vpack.c.bf16 %v9088_v27, %v9087_v63 }
 0xeae   : > { %v9109_v31 = vpack.c.bf16 %v9108_v15, %v9107_v2  ;;  %v12095_v42 = vpack.c.bf16 %v9108_v15, %v9108_v15 }
 0xeaf   : > { %9605 = vmatmul.mubr.bf16.vlgmr.msra.gmra.mrb[52].mxu0 %v9379_v45  ;;  %9648 = vmatmul.mubr.bf16.vlgmr.msra.gmra.mrb[52].mxu1 %v9379_v45 }
 0xeb0   : > { %v9118_v37 = vrot.slane %v9109_v31, %v17163_v30  ;;  %v9125_v16 = vrot.slane %v12095_v42, %v17163_v30  ;;  %10231 = vmatprep.mubr.bf16.mxu0 %v17164_v43  ;;  %10274 = vmatprep.mubr.bf16.mxu1 %v17164_v43 }
 0xeb2   : > { %v9126_v21 = vcombine.high %v9118_v37, %v9118_v37  ;;  %v9127_v6 = vcombine.high %v9125_v16, %v9125_v16  ;;  %v9134_v19 = vrot.slane %v9118_v37, %v17163_v30  ;;  %v9141_v41 = vrot.slane %v9125_v16, %v17163_v30 }
 0xeb4   : > { %v9148_v22 = vrot.slane %v9126_v21, %v17163_v30  ;;  %v9155_v39 = vrot.slane %v9127_v6, %v17163_v30  ;;  %v9156_v49 = vcombine.high %v9134_v19, %v9134_v19  ;;  %v9157_v47 = vcombine.high %v9141_v41, %v9141_v41  ;;  %v9344_v6 = vld [vmem:[%s14117_s28 + $0x44] sm:$0x4]  ;;  %v9341_v30 = vld [vmem:[%s14117_s28 + $0x3c] sm:$0x4] }
 0xeb5   : > { %v9161_v29 = vunpack.i.h.s16 %v9134_v19  ;;  %v9169_v14 = vunpack.i.h.s16 %v9141_v41  ;;  %v12096_v55 = vpack.i.b16 %v9134_v19, %v9134_v19  ;;  %v12100_v51 = vpack.i.b16 %v9141_v41, %v9141_v41 }
 0xeb6   : > { %v9158_v7 = vcombine.high %v9148_v22, %v9148_v22  ;;  %v9159_v48 = vcombine.high %v9155_v39, %v9155_v39  ;;  %v9163_v11 = vunpack.i.h.s16 %v9148_v22  ;;  %v9165_v32 = vunpack.i.h.s16 %v9156_v49 }
 0xeb7   : > { %v9171_v58 = vunpack.i.h.s16 %v9155_v39  ;;  %v9173_v50 = vunpack.i.h.s16 %v9157_v47  ;;  %v16542_v40 = vpack.i.b16 %v9161_v29, %v9161_v29  ;;  %v12097_v26 = vpack.i.b16 %v9148_v22, %v9148_v22  ;;  %v9347_v29 = vld [vmem:[%s14117_s28 + $0x4c] sm:$0x4] }
 0xeb8   : > { %v9167_v60 = vunpack.i.h.s16 %v9158_v7  ;;  %v9175_v20 = vunpack.i.h.s16 %v9159_v48  ;;  %v16544_v10 = vpack.i.b16 %v9163_v11, %v9163_v11  ;;  %v12098_v63 = vpack.i.b16 %v9156_v49, %v9156_v49  ;;  %v9320_v49 = vld [vmem:[%s14117_s28 + $0x4] sm:$0x4] }
 0xeb9   : > { %v16546_v0 = vpack.i.b16 %v9165_v32, %v9165_v32  ;;  %v12099_v2 = vpack.i.b16 %v9158_v7, %v9158_v7  ;;  %v9185_v8 = vpack.i.b16 %v9169_v14, %v9169_v14  ;;  %v12101_v62 = vpack.i.b16 %v9155_v39, %v9155_v39  ;;  %v9350_v14 = vld [vmem:[%s14117_s28 + $0x54] sm:$0x4]  ;;  %v9353_v32 = vld [vmem:[%s14117_s28 + $0x5c] sm:$0x4] }
 0xeba   : > { %v16548_v27 = vpack.i.b16 %v9167_v60, %v9167_v60  ;;  %v9187_v15 = vpack.i.b16 %v9171_v58, %v9171_v58  ;;  %v12102_v45 = vpack.i.b16 %v9157_v47, %v9157_v47  ;;  %v9189_v31 = vpack.i.b16 %v9173_v50, %v9173_v50  ;;  %v9323_v47 = vld [vmem:[%s14117_s28 + $0xc] sm:$0x4]  ;;  %v9356_v58 = vld [vmem:[%s14117_s28 + $0x64] sm:$0x4] }
 0xebb   : > { %v12103_v42 = vpack.i.b16 %v9159_v48, %v9159_v48  ;;  %v9191_v37 = vpack.i.b16 %v9175_v20, %v9175_v20  ;;  %v9198_v16 = vrot.slane %v12096_v55, %v14357_v57  ;;  %v9205_v21 = vrot.slane %v16542_v40, %v14357_v57  ;;  %v9359_v50 = vld [vmem:[%s14117_s28 + $0x6c] sm:$0x4] }
 0xebc   : > { %v9212_v19 = vrot.slane %v12097_v26, %v14357_v57  ;;  %v9219_v41 = vrot.slane %v16544_v10, %v14357_v57  ;;  %v9226_v22 = vrot.slane %v12098_v63, %v14357_v57  ;;  %v9233_v39 = vrot.slane %v16546_v0, %v14357_v57  ;;  %v9326_v10 = vld [vmem:[%s14117_s28 + $0x14] sm:$0x4]  ;;  %v9365_v63 = vld [vmem:[%s14117_s28 + $0x7c] sm:$0x4] }
 0xebd   : > { %v9240_v55 = vrot.slane %v12099_v2, %v14357_v57  ;;  %v9247_v7 = vrot.slane %v16548_v27, %v14357_v57  ;;  %v9254_v48 = vrot.slane %v12100_v51, %v14357_v57  ;;  %v9261_v11 = vrot.slane %v9185_v8, %v14357_v57  ;;  %v9362_v51 = vld [vmem:[%s14117_s28 + $0x74] sm:$0x4]  ;;  %v9329_v8 = vld [vmem:[%s14117_s28 + $0x1c] sm:$0x4]  ;;  %v9335_v27 = vld [vmem:[%s14117_s28 + $0x2c] sm:$0x4] }
 0xebe   : > { %v9268_v40 = vrot.slane %v12101_v62, %v14357_v57  ;;  %v9275_v26 = vrot.slane %v9187_v15, %v14357_v57  ;;  %v9282_v60 = vrot.slane %v12102_v45, %v14357_v57  ;;  %v9289_v20 = vrot.slane %v9189_v31, %v14357_v57  ;;  %v9332_v62 = vld [vmem:[%s14117_s28 + $0x24] sm:$0x4]  ;;  %v9338_v31 = vld [vmem:[%s14117_s28 + $0x34] sm:$0x4] }
 0xebf   : > { %v9296_v0 = vrot.slane %v12103_v42, %v14357_v57  ;;  %v9303_v2 = vrot.slane %v9191_v37, %v14357_v57  ;;  %v9345_v43 = vsel %vm15098_vm2, %v9254_v48, %v9344_v6  ;;  %v9348_v45 = vsel %vm15098_vm2, %v9261_v11, %v9347_v29 }
 0xec0   : > { %9346 = vst [vmem:[%s14117_s28 + $0x44] sm:$0x4] %v9345_v43  ;;  %9349 = vst [vmem:[%s14117_s28 + $0x4c] sm:$0x4] %v9348_v45  ;;  %v9351_v42 = vsel %vm15098_vm2, %v9268_v40, %v9350_v14  ;;  %v9354_v37 = vsel %vm15098_vm2, %v9275_v26, %v9353_v32  ;;  %v9357_v6 = vsel %vm15098_vm2, %v9282_v60, %v9356_v58 }
 0xec1   : > { %v9360_v29 = vsel %vm15098_vm2, %v9289_v20, %v9359_v50  ;;  %9352 = vst [vmem:[%s14117_s28 + $0x54] sm:$0x4] %v9351_v42  ;;  %9355 = vst [vmem:[%s14117_s28 + $0x5c] sm:$0x4] %v9354_v37  ;;  %v9363_v43 = vsel %vm15098_vm2, %v9296_v0, %v9362_v51  ;;  %v9366_v14 = vsel %vm15098_vm2, %v9303_v2, %v9365_v63 }
 0xec2   : > { %9358 = vst [vmem:[%s14117_s28 + $0x64] sm:$0x4] %v9357_v6  ;;  %9361 = vst [vmem:[%s14117_s28 + $0x6c] sm:$0x4] %v9360_v29  ;;  %v9321_v48 = vsel %vm15098_vm2, %v9198_v16, %v9320_v49  ;;  %v9324_v11 = vsel %vm15098_vm2, %v9205_v21, %v9323_v47  ;;  %v9327_v32 = vsel %vm15098_vm2, %v9212_v19, %v9326_v10  ;;  %v13039_v19 = vld [vmem:[#allocation11 + $0x4] ss:$16 sps:$4 sm:$0xff]  }
 0xec3   : > { %9364 = vst [vmem:[%s14117_s28 + $0x74] sm:$0x4] %v9363_v43  ;;  %9367 = vst [vmem:[%s14117_s28 + $0x7c] sm:$0x4] %v9366_v14  ;;  %v9330_v58 = vsel %vm15098_vm2, %v9219_v41, %v9329_v8  ;;  %v9333_v50 = vsel %vm15098_vm2, %v9226_v22, %v9332_v62  ;;  %v9336_v16 = vsel %vm15098_vm2, %v9233_v39, %v9335_v27  ;;  %v13042_v41 = vld [vmem:[#allocation11 + $0xc] ss:$16 sps:$4 sm:$0xff]   ;;  %10199 = vmatprep.subr.bf16.mxu0 %v13039_v19 }
 0xec4   : > { %9322 = vst [vmem:[%s14117_s28 + $0x4] sm:$0x4] %v9321_v48  ;;  %9325 = vst [vmem:[%s14117_s28 + $0xc] sm:$0x4] %v9324_v11  ;;  %v9339_v21 = vsel %vm15098_vm2, %v9240_v55, %v9338_v31  ;;  %v9342_v49 = vsel %vm15098_vm2, %v9247_v7, %v9341_v30  ;;  %v16634_v47 = vld [vmem:[#allocation11] ss:$16 sps:$4 sm:$0xff]   ;;  %10242 = vmatprep.subr.bf16.mxu1 %v13042_v41 }
 0xec5   : > { %9328 = vst [vmem:[%s14117_s28 + $0x14] sm:$0x4] %v9327_v32  ;;  %9331 = vst [vmem:[%s14117_s28 + $0x1c] sm:$0x4] %v9330_v58  ;;  %v16636_v22 = vld [vmem:[#allocation11 + $0x8] ss:$16 sps:$4 sm:$0xff]   ;;  %10200 = vmatpush1.bf16.msra.mxu0 %v16634_v47 }
 0xec6   : > { %9334 = vst [vmem:[%s14117_s28 + $0x24] sm:$0x4] %v9333_v50  ;;  %9337 = vst [vmem:[%s14117_s28 + $0x2c] sm:$0x4] %v9336_v16  ;;  %10243 = vmatpush1.bf16.msra.mxu1 %v16636_v22  ;;  %10201 = vmatprep.subr.bf16.mxu0 %v16443_v12  ;;  %v16660_v30 = vld [vmem:[#allocation11 + $0xc4] ss:$16 sps:$4 sm:$0xff]  }
 0xec7   : > { %9340 = vst [vmem:[%s14117_s28 + $0x34] sm:$0x4] %v9339_v21  ;;  %9343 = vst [vmem:[%s14117_s28 + $0x3c] sm:$0x4] %v9342_v49  ;;  %10244 = vmatprep.subr.bf16.mxu1 %v16445_v61  ;;  %v16662_v12 = vld [vmem:[#allocation11 + $0xcc] ss:$16 sps:$4 sm:$0xff]  }
 0xec8   : > { %v16664_v61 = vld [vmem:[#allocation11 + $0xc0] ss:$16 sps:$4 sm:$0xff]  }
 0xec9   : > { %10202 = vmatpush1.bf16.msra.mxu0 %v16447_v9  ;;  %v16666_v9 = vld [vmem:[#allocation11 + $0xc8] ss:$16 sps:$4 sm:$0xff]  }
 0xeca   : > { %10245 = vmatpush1.bf16.msra.mxu1 %v16449_v28  ;;  %10203 = vmatprep.subr.bf16.mxu0 %v16455_v17  ;;  %v16672_v28 = vld [vmem:[#allocation11 + $0xe4] ss:$16 sps:$4 sm:$0xff]   ;;  %v16674_v17 = vld [vmem:[#allocation11 + $0xec] ss:$16 sps:$4 sm:$0xff]  }
 0xecb   : > { %10246 = vmatprep.subr.bf16.mxu1 %v16457_v44  ;;  %v16676_v44 = vld [vmem:[#allocation11 + $0xe0] ss:$16 sps:$4 sm:$0xff]  }
 0xecd   : > { %10204 = vmatpush1.bf16.msra.mxu0 %v16459_v3  ;;  %v16678_v3 = vld [vmem:[#allocation11 + $0xe8] ss:$16 sps:$4 sm:$0xff]  }
 0xece   : > { %10247 = vmatpush1.bf16.msra.mxu1 %v16461_v54  ;;  %10205 = vmatprep.subr.bf16.mxu0 %v16467_v1 }
 0xecf   : > { %10248 = vmatprep.subr.bf16.mxu1 %v16469_v5 }
 0xed1   : > { %10206 = vmatpush1.bf16.msra.mxu0 %v16471_v25 }
 0xed2   : > { %10249 = vmatpush1.bf16.msra.mxu1 %v16473_v24  ;;  %10207 = vmatprep.subr.bf16.mxu0 %v16479_v18 }
 0xed3   : > { %10250 = vmatprep.subr.bf16.mxu1 %v16481_v59 }
 0xed5   : > { %10208 = vmatpush1.bf16.msra.mxu0 %v16483_v33 }
 0xed6   : > { %10251 = vmatpush1.bf16.msra.mxu1 %v16485_v34  ;;  %10209 = vmatprep.subr.bf16.mxu0 %v16491_v23 }
 0xed7   : > { %10252 = vmatprep.subr.bf16.mxu1 %v16493_v4 }
 0xed9   : > { %10210 = vmatpush1.bf16.msra.mxu0 %v16495_v53 }
 0xeda   : > { %10253 = vmatpush1.bf16.msra.mxu1 %v16497_v13  ;;  %10211 = vmatprep.subr.bf16.mxu0 %v16660_v30 }
 0xedb   : > { %10254 = vmatprep.subr.bf16.mxu1 %v16662_v12 }
 0xedd   : > { %10212 = vmatpush1.bf16.msra.mxu0 %v16664_v61 }
 0xede   : > { %10255 = vmatpush1.bf16.msra.mxu1 %v16666_v9  ;;  %10213 = vmatprep.subr.bf16.mxu0 %v16672_v28 }
 0xedf   : > { %10256 = vmatprep.subr.bf16.mxu1 %v16674_v17 }
 0xee1   : > { %10214 = vmatpush1.bf16.msra.mxu0 %v16676_v44 }
 0xee2   : > { %10257 = vmatpush1.bf16.msra.mxu1 %v16678_v3  ;;  %10826 = vmatprep.subr.bf16.mxu0 %v13039_v19 }
 0xee3   : > { %10869 = vmatprep.subr.bf16.mxu1 %v13042_v41 }
 0xf82   : > { %v9606_v54 = vpop.f32.mrb[52].mxu0  ;;  %v9649_v1 = vpop.f32.mrb[52].mxu1 }
 0xf83   : > { %v12305_v5 = vadd.f32 %v9606_v54, %v14323_v35  ;;  %v9608_v25 = vpop.f32.mrb[53].mxu0  ;;  %v9651_v24 = vpop.f32.mrb[53].mxu1  ;;  %v12369_v26 = vadd.f32 %v9649_v1, %v14335_v56 }
 0xf84   : > { %v12306_v18 = vadd.f32 %v9608_v25, %v14325_v36  ;;  %v9610_v59 = vpop.f32.mrb[54].mxu0  ;;  %v9653_v33 = vpop.f32.mrb[54].mxu1  ;;  %v12370_v40 = vadd.f32 %v9651_v24, %v14332_v52 }
 0xf85   : > { %v12136_v34 = vmul.f32 -1.442695, %v12305_v5  ;;  %v12307_v23 = vadd.f32 %v9610_v59, %v14323_v35  ;;  %v9612_v4 = vpop.f32.mrb[55].mxu0  ;;  %v9655_v53 = vpop.f32.mrb[55].mxu1  ;;  %v12371_v10 = vadd.f32 %v9653_v33, %v14335_v56 }
 0xf86   : > { %v12138_v13 = vmul.f32 -1.442695, %v12306_v18  ;;  %v12308_v39 = vadd.f32 %v9612_v4, %v14325_v36  ;;  %v12140_v60 = vmul.f32 -1.442695, %v12370_v40  ;;  %v12372_v20 = vadd.f32 %v9655_v53, %v14332_v52  ;;  %v9728_v54 = vpop.permute.xlu0 %9727  ;;  %v17171_v4 = vld [vmem:[#allocation22_spill] sm:$0xff] }
 0xf87   : > { %13501 = vpow2.f32 %v12136_v34  ;;  %v12137_v55 = vmul.f32 -1.442695, %v12307_v23  ;;  %vm9732_vm2 = vcmp.eq.s32.totalorder %v9728_v54, 1 }
 0xf88   : > { %13503 = vpow2.f32 %v12138_v13  ;;  %v12139_v7 = vmul.f32 -1.442695, %v12308_v39  ;;  %v12141_v2 = vmul.f32 -1.442695, %v12372_v20  ;;  %v17172_v39 = vmov 0  }
 0xf89   : > { %13505 = vpow2.f32 %v12137_v55 }
 0xf8a   : > { %13507 = vpow2.f32 %v12139_v7 }
 0xf8b   : > { %13509 = vtanh.f32 %v12369_v26 }
 0xf8c   : > { %13511 = vpow2.f32 %v12140_v60 }
 0xf8d   : > { %13513 = vtanh.f32 %v12371_v10 }
 0xf91   : > { %v13502_v51 = vpop.eup %13501 }
 0xf92   : > { %v13504_v63 = vpop.eup %13503  ;;  %v9672_v0 = vadd.f32 1.0, %v13502_v51 }
 0xf93   : > { %v9684_v8 = vadd.f32 1.0, %v13504_v63  ;;  %v13506_v62 = vpop.eup %13505 }
 0xf94   : > { %13515 = vrcp.f32 %v9672_v0  ;;  %v9673_v27 = vadd.f32 1.0, %v13506_v62  ;;  %v13508_v15 = vpop.eup %13507 }
 0xf95   : > { %13517 = vrcp.f32 %v9684_v8  ;;  %v9685_v45 = vadd.f32 1.0, %v13508_v15  ;;  %v13510_v31 = vpop.eup %13509 }
 0xf96   : > { %13519 = vpow2.f32 %v12141_v2  ;;  %v13512_v42 = vpop.eup %13511 }
 0xf97   : > { %13521 = vrcp.f32 %v9673_v27  ;;  %v13514_v37 = vpop.eup %13513  ;;  %v9698_v32 = vadd.f32 1.0, %v13512_v42 }
 0xf98   : > { %13523 = vrcp.f32 %v9685_v45 }
 0xf9e   : > { %v13516_v6 = vpop.eup %13515 }
 0xf9f   : > { %v13518_v29 = vpop.eup %13517  ;;  %v9708_v43 = vmul.f32 %v13516_v6, %v13510_v31 }
 0xfa0   : > { %v13520_v14 = vpop.eup %13519  ;;  %v9706_v48 = vmul.f32 %v13518_v29, %v16525_v46  ;;  %v9731_v46 = vpop.permute.xlu1 %9730 }
 0xfa1   : > { %v13522_v11 = vpop.eup %13521  ;;  %v9699_v21 = vadd.f32 1.0, %v13520_v14  ;;  %vm9733_vm8 = vcmp.eq.s32.totalorder %v9731_v46, 1 }
 0xfa2   : > { %v9709_v58 = vmul.f32 %v13522_v11, %v13514_v37  ;;  %v16693_v50 = vadd.f32 %v9708_v43, %v9706_v48  ;;  %v13524_v16 = vpop.eup %13523 }
 0xfa3   : > { %v9707_v49 = vmul.f32 %v13524_v16, %v16529_v38 }
 0xfa4   : > { %13525 = vtanh.f32 %v16693_v50 }
 0xfa5   : > { %13527 = vrcp.f32 %v9698_v32  ;;  %v16697_v19 = vadd.f32 %v9709_v58, %v9707_v49 }
 0xfa6   : > { %13529 = vrcp.f32 %v9699_v21 }
 0xfa7   : > { %13531 = vtanh.f32 %v16697_v19 }
 0xfae   : > { %v13526_v41 = vpop.eup %13525 }
 0xfaf   : > { %v13528_v1 = vpop.eup %13527 }
 0xfb0   : > { %v13530_v5 = vpop.eup %13529  ;;  %v9714_v25 = vmul.f32 %v13528_v1, %v13526_v41 }
 0xfb1   : > { %v13532_v24 = vpop.eup %13531 }
 0xfb2   : > { %v9715_v18 = vmul.f32 %v13532_v24, %v13530_v5  ;;  %v9734_v59 = vsel %vm9732_vm2, %v9714_v25, 0.0 }
 0xfb4   : > { %v9735_v38 = vsel %vm9733_vm8, %v9715_v18, 0.0  ;;  %v10006_v33 = vpack.c.bf16 %v9715_v18, %v9714_v25 }
 0xfb5   : > { %v9736_v34 = vpack.c.bf16 %v9735_v38, %v9734_v59  ;;  %v12142_v23 = vpack.c.bf16 %v9735_v38, %v9735_v38 }
 0xfb6   : > { %10232 = vmatmul.mubr.bf16.vlgmr.msra.gmra.mrb[56].mxu0 %v10006_v33  ;;  %10275 = vmatmul.mubr.bf16.vlgmr.msra.gmra.mrb[56].mxu1 %v10006_v33 }
 0xfb7   : > { %v9745_v53 = vrot.slane %v9736_v34, %v17171_v4  ;;  %v9752_v13 = vrot.slane %v12142_v23, %v17171_v4  ;;  %10827 = vmatpush1.bf16.msra.mxu0 %v16634_v47  ;;  %10870 = vmatpush1.bf16.msra.mxu1 %v16636_v22  ;;  %v9971_v23 = vld [vmem:[%s14117_s28 + $0x44] sm:$0x4] }
 0xfb8   : > { %10858 = vmatprep.mubr.bf16.mxu0 %v17172_v39  ;;  %10901 = vmatprep.mubr.bf16.mxu1 %v17172_v39 }
 0xfb9   : > { %v9753_v55 = vcombine.high %v9745_v53, %v9745_v53  ;;  %v9754_v7 = vcombine.high %v9752_v13, %v9752_v13  ;;  %v9761_v40 = vrot.slane %v9745_v53, %v17171_v4  ;;  %v9768_v26 = vrot.slane %v9752_v13, %v17171_v4  ;;  %v9974_v53 = vld [vmem:[%s14117_s28 + $0x4c] sm:$0x4] }
 0xfbb   : > { %v9775_v60 = vrot.slane %v9753_v55, %v17171_v4  ;;  %v9782_v20 = vrot.slane %v9754_v7, %v17171_v4  ;;  %v9783_v10 = vcombine.high %v9761_v40, %v9761_v40  ;;  %v9784_v51 = vcombine.high %v9768_v26, %v9768_v26 }
 0xfbc   : > { %v9788_v63 = vunpack.i.h.s16 %v9761_v40  ;;  %v9796_v47 = vunpack.i.h.s16 %v9768_v26  ;;  %v12143_v0 = vpack.i.b16 %v9761_v40, %v9761_v40  ;;  %v12147_v22 = vpack.i.b16 %v9768_v26, %v9768_v26  ;;  %v9947_v26 = vld [vmem:[%s14117_s28 + $0x4] sm:$0x4] }
 0xfbd   : > { %v9785_v2 = vcombine.high %v9775_v60, %v9775_v60  ;;  %v9786_v8 = vcombine.high %v9782_v20, %v9782_v20  ;;  %v9790_v62 = vunpack.i.h.s16 %v9775_v60  ;;  %v9792_v27 = vunpack.i.h.s16 %v9783_v10 }
 0xfbe   : > { %v9798_v15 = vunpack.i.h.s16 %v9782_v20  ;;  %v9800_v45 = vunpack.i.h.s16 %v9784_v51  ;;  %v9804_v31 = vpack.i.b16 %v9788_v63, %v9788_v63  ;;  %v12144_v42 = vpack.i.b16 %v9775_v60, %v9775_v60  ;;  %v9950_v60 = vld [vmem:[%s14117_s28 + $0xc] sm:$0x4]  ;;  %v13082_v63 = vld [vmem:[#allocation11 + $0xa8] ss:$16 sps:$4 sm:$0xff]  }
 0xfbf   : > { %v9794_v37 = vunpack.i.h.s16 %v9785_v2  ;;  %v9802_v6 = vunpack.i.h.s16 %v9786_v8  ;;  %v9806_v29 = vpack.i.b16 %v9790_v62, %v9790_v62  ;;  %v12145_v43 = vpack.i.b16 %v9783_v10, %v9783_v10  ;;  %v9977_v62 = vld [vmem:[%s14117_s28 + $0x54] sm:$0x4] }
 0xfc0   : > { %v9808_v14 = vpack.i.b16 %v9792_v27, %v9792_v27  ;;  %v12146_v48 = vpack.i.b16 %v9785_v2, %v9785_v2  ;;  %v9812_v11 = vpack.i.b16 %v9796_v47, %v9796_v47  ;;  %v12148_v32 = vpack.i.b16 %v9782_v20, %v9782_v20  ;;  %v9953_v20 = vld [vmem:[%s14117_s28 + $0x14] sm:$0x4]  ;;  %v9959_v2 = vld [vmem:[%s14117_s28 + $0x24] sm:$0x4] }
 0xfc1   : > { %v9810_v58 = vpack.i.b16 %v9794_v37, %v9794_v37  ;;  %v9814_v16 = vpack.i.b16 %v9798_v15, %v9798_v15  ;;  %v12149_v21 = vpack.i.b16 %v9784_v51, %v9784_v51  ;;  %v9816_v49 = vpack.i.b16 %v9800_v45, %v9800_v45  ;;  %v9968_v37 = vld [vmem:[%s14117_s28 + $0x3c] sm:$0x4] }
 0xfc2   : > { %v12150_v41 = vpack.i.b16 %v9786_v8, %v9786_v8  ;;  %v16710_v54 = vpack.i.b16 %v9802_v6, %v9802_v6  ;;  %v9825_v46 = vrot.slane %v12143_v0, %v14357_v57  ;;  %v9832_v1 = vrot.slane %v9804_v31, %v14357_v57  ;;  %v9962_v8 = vld [vmem:[%s14117_s28 + $0x2c] sm:$0x4]  ;;  %v9980_v6 = vld [vmem:[%s14117_s28 + $0x5c] sm:$0x4] }
 0xfc3   : > { %v9839_v5 = vrot.slane %v12144_v42, %v14357_v57  ;;  %v9846_v25 = vrot.slane %v9806_v29, %v14357_v57  ;;  %v9853_v24 = vrot.slane %v12145_v43, %v14357_v57  ;;  %v9860_v18 = vrot.slane %v9808_v14, %v14357_v57  ;;  %v9965_v42 = vld [vmem:[%s14117_s28 + $0x34] sm:$0x4]  ;;  %v9983_v29 = vld [vmem:[%s14117_s28 + $0x64] sm:$0x4]  ;;  %v9986_v43 = vld [vmem:[%s14117_s28 + $0x6c] sm:$0x4] }
 0xfc4   : > { %v9867_v59 = vrot.slane %v12146_v48, %v14357_v57  ;;  %v9874_v38 = vrot.slane %v9810_v58, %v14357_v57  ;;  %v9881_v33 = vrot.slane %v12147_v22, %v14357_v57  ;;  %v9888_v34 = vrot.slane %v9812_v11, %v14357_v57  ;;  %v9956_v22 = vld [vmem:[%s14117_s28 + $0x1c] sm:$0x4]  ;;  %v9989_v58 = vld [vmem:[%s14117_s28 + $0x74] sm:$0x4] }
 0xfc5   : > { %v9895_v13 = vrot.slane %v12148_v32, %v14357_v57  ;;  %v9902_v55 = vrot.slane %v9814_v16, %v14357_v57  ;;  %v9909_v7 = vrot.slane %v12149_v21, %v14357_v57  ;;  %v9916_v40 = vrot.slane %v9816_v49, %v14357_v57  ;;  %v9992_v16 = vld [vmem:[%s14117_s28 + $0x7c] sm:$0x4] }
 0xfc6   : > { %v9923_v10 = vrot.slane %v12150_v41, %v14357_v57  ;;  %v9930_v51 = vrot.slane %v16710_v54, %v14357_v57  ;;  %v9948_v47 = vsel %vm15322_vm7, %v9825_v46, %v9947_v26  ;;  %v9951_v0 = vsel %vm15322_vm7, %v9832_v1, %v9950_v60  ;;  %v13073_v26 = vld [vmem:[#allocation11 + $0x80] ss:$16 sps:$4 sm:$0xff]   ;;  %v13076_v60 = vld [vmem:[#allocation11 + $0x88] ss:$16 sps:$4 sm:$0xff]  }
 0xfc7   : > { %9949 = vst [vmem:[%s14117_s28 + $0x4] sm:$0x4] %v9948_v47  ;;  %9952 = vst [vmem:[%s14117_s28 + $0xc] sm:$0x4] %v9951_v0  ;;  %v9954_v27 = vsel %vm15322_vm7, %v9839_v5, %v9953_v20  ;;  %v9957_v15 = vsel %vm15322_vm7, %v9846_v25, %v9956_v22  ;;  %v9960_v45 = vsel %vm15322_vm7, %v9853_v24, %v9959_v2  ;;  %v13057_v5 = vld [vmem:[#allocation11 + $0x24] ss:$16 sps:$4 sm:$0xff]   ;;  %v10975_v47 = vstv %s10974_s30 }
 0xfc8   : > { %v9963_v31 = vsel %vm15322_vm7, %v9860_v18, %v9962_v8  ;;  %9955 = vst [vmem:[%s14117_s28 + $0x14] sm:$0x4] %v9954_v27  ;;  %9958 = vst [vmem:[%s14117_s28 + $0x1c] sm:$0x4] %v9957_v15  ;;  %v9966_v14 = vsel %vm15322_vm7, %v9867_v59, %v9965_v42  ;;  %v9969_v48 = vsel %vm15322_vm7, %v9874_v38, %v9968_v37  ;;  %v13060_v25 = vld [vmem:[#allocation11 + $0x2c] ss:$16 sps:$4 sm:$0xff]   ;;  %10828 = vmatprep.subr.bf16.mxu0 %v13057_v5 }
 0xfc9   : > { %9961 = vst [vmem:[%s14117_s28 + $0x24] sm:$0x4] %v9960_v45  ;;  %9964 = vst [vmem:[%s14117_s28 + $0x2c] sm:$0x4] %v9963_v31  ;;  %v9972_v11 = vsel %vm15322_vm7, %v9881_v33, %v9971_v23  ;;  %v9975_v32 = vsel %vm15322_vm7, %v9888_v34, %v9974_v53  ;;  %v9978_v21 = vsel %vm15322_vm7, %v9895_v13, %v9977_v62  ;;  %v13055_v24 = vld [vmem:[#allocation11 + $0x20] ss:$16 sps:$4 sm:$0xff]   ;;  %10871 = vmatprep.subr.bf16.mxu1 %v13060_v25 }
 0xfca   : > { %9967 = vst [vmem:[%s14117_s28 + $0x34] sm:$0x4] %v9966_v14  ;;  %9970 = vst [vmem:[%s14117_s28 + $0x3c] sm:$0x4] %v9969_v48  ;;  %v9981_v49 = vsel %vm15322_vm7, %v9902_v55, %v9980_v6  ;;  %v9984_v41 = vsel %vm15322_vm7, %v9909_v7, %v9983_v29  ;;  %v9987_v54 = vsel %vm15322_vm7, %v9916_v40, %v9986_v43  ;;  %v13058_v18 = vld [vmem:[#allocation11 + $0x28] ss:$16 sps:$4 sm:$0xff]   ;;  %10829 = vmatpush1.bf16.msra.mxu0 %v13055_v24 }
 0xfcb   : > { %9973 = vst [vmem:[%s14117_s28 + $0x44] sm:$0x4] %v9972_v11  ;;  %9976 = vst [vmem:[%s14117_s28 + $0x4c] sm:$0x4] %v9975_v32  ;;  %v9990_v46 = vsel %vm15322_vm7, %v9923_v10, %v9989_v58  ;;  %v9993_v1 = vsel %vm15322_vm7, %v9930_v51, %v9992_v16  ;;  %10872 = vmatpush1.bf16.msra.mxu1 %v13058_v18  ;;  %v13063_v59 = vld [vmem:[#allocation11 + $0x44] ss:$16 sps:$4 sm:$0xff]  }
 0xfcc   : > { %9979 = vst [vmem:[%s14117_s28 + $0x54] sm:$0x4] %v9978_v21  ;;  %9982 = vst [vmem:[%s14117_s28 + $0x5c] sm:$0x4] %v9981_v49  ;;  %v13066_v38 = vld [vmem:[#allocation11 + $0x4c] ss:$16 sps:$4 sm:$0xff]   ;;  %10830 = vmatprep.subr.bf16.mxu0 %v13063_v59 }
 0xfcd   : > { %9985 = vst [vmem:[%s14117_s28 + $0x64] sm:$0x4] %v9984_v41  ;;  %9988 = vst [vmem:[%s14117_s28 + $0x6c] sm:$0x4] %v9987_v54  ;;  %v13061_v33 = vld [vmem:[#allocation11 + $0x40] ss:$16 sps:$4 sm:$0xff]   ;;  %10873 = vmatprep.subr.bf16.mxu1 %v13066_v38 }
 0xfce   : > { %9991 = vst [vmem:[%s14117_s28 + $0x74] sm:$0x4] %v9990_v46  ;;  %9994 = vst [vmem:[%s14117_s28 + $0x7c] sm:$0x4] %v9993_v1  ;;  %v13064_v34 = vld [vmem:[#allocation11 + $0x48] ss:$16 sps:$4 sm:$0xff]   ;;  %10831 = vmatpush1.bf16.msra.mxu0 %v13061_v33 }
 0xfcf   : > { %10874 = vmatpush1.bf16.msra.mxu1 %v13064_v34  ;;  %v13069_v23 = vld [vmem:[#allocation11 + $0x64] ss:$16 sps:$4 sm:$0xff]   ;;  %v13072_v53 = vld [vmem:[#allocation11 + $0x6c] ss:$16 sps:$4 sm:$0xff]   ;;  %v13067_v13 = vld [vmem:[#allocation11 + $0x60] ss:$16 sps:$4 sm:$0xff]  }
 0xfd0   : > { %v13070_v55 = vld [vmem:[#allocation11 + $0x68] ss:$16 sps:$4 sm:$0xff]   ;;  %10832 = vmatprep.subr.bf16.mxu0 %v13069_v23  ;;  %10875 = vmatprep.subr.bf16.mxu1 %v13072_v53  ;;  %v13075_v7 = vld [vmem:[#allocation11 + $0x84] ss:$16 sps:$4 sm:$0xff]   ;;  %v13078_v40 = vld [vmem:[#allocation11 + $0x8c] ss:$16 sps:$4 sm:$0xff]  }
 0xfd1   : > { %v13081_v20 = vld [vmem:[#allocation11 + $0xa4] ss:$16 sps:$4 sm:$0xff]   ;;  %v13084_v10 = vld [vmem:[#allocation11 + $0xac] ss:$16 sps:$4 sm:$0xff]   ;;  %v13079_v51 = vld [vmem:[#allocation11 + $0xa0] ss:$16 sps:$4 sm:$0xff]  }
 0xfd2   : > { %10833 = vmatpush1.bf16.msra.mxu0 %v13067_v13  ;;  %v13613_v0 = vld [vmem:[#allocation5 + $0x8] sm:$0xff]  ;;  %v13614_v22 = vld [vmem:[#allocation5] sm:$0xff] }
 0xfd3   : > { %10876 = vmatpush1.bf16.msra.mxu1 %v13070_v55  ;;  %10834 = vmatprep.subr.bf16.mxu0 %v13075_v7  ;;  %vm10977_vm7 = vcmp.gt.s32.totalorder %v13613_v0, %v10975_v47  ;;  %vm10976_vm0 = vcmp.gt.s32.totalorder %v13614_v22, %v10975_v47  ;;  %v17175_v0 = vld [vmem:[#allocation35_spill] sm:$0xff] }
 0xfd4   : > { %10877 = vmatprep.subr.bf16.mxu1 %v13078_v40  ;;  %vm10360_vm3 = vcmp.eq.s32.totalorder %v17175_v0, 1 }
 0xfd6   : > { %10835 = vmatpush1.bf16.msra.mxu0 %v13073_v26 }
 0xfd7   : > { %10878 = vmatpush1.bf16.msra.mxu1 %v13076_v60  ;;  %10836 = vmatprep.subr.bf16.mxu0 %v13081_v20 }
 0xfd8   : > { %10879 = vmatprep.subr.bf16.mxu1 %v13084_v10  ;;  %v17174_v10 = vld [vmem:[#allocation34_spill] sm:$0xff] }
 0xfd9   : > { %vm10359_vm14 = vcmp.eq.s32.totalorder %v17174_v10, 1  ;;  %v10586_v10 = vld [vmem:[%s14117_s28 + $0x24] sm:$0x8] }
 0xfda   : > { %10837 = vmatpush1.bf16.msra.mxu0 %v13079_v51 }
 0xfdb   : > { %10880 = vmatpush1.bf16.msra.mxu1 %v13082_v63  ;;  %10838 = vmatprep.subr.bf16.mxu0 %v16660_v30  ;;  %v10979_v30 = vsel %vm10977_vm7, 1, %v17172_v39 }
 0xfdc   : > { %10881 = vmatprep.subr.bf16.mxu1 %v16662_v12  ;;  %v10978_v12 = vsel %vm10976_vm0, 1, %v17172_v39  ;;  %10984 = vperm.xlu1 %12636, %v10979_v30  }
 0xfdd   : > { %10981 = vperm.xlu0 %12635, %v10978_v12  }
 0xfde   : > { %10839 = vmatpush1.bf16.msra.mxu0 %v16664_v61 }
 0xfdf   : > { %10882 = vmatpush1.bf16.msra.mxu1 %v16666_v9  ;;  %10840 = vmatprep.subr.bf16.mxu0 %v16672_v28 }
 0xfe0   : > { %10883 = vmatprep.subr.bf16.mxu1 %v16674_v17 }
 0xfe2   : > { %10841 = vmatpush1.bf16.msra.mxu0 %v16676_v44 }
 0xfe3   : > { %10884 = vmatpush1.bf16.msra.mxu1 %v16678_v3 }
0x1089   : > { %v10233_v61 = vpop.f32.mrb[56].mxu0  ;;  %v10276_v9 = vpop.f32.mrb[56].mxu1 }
0x108a   : > { %v12309_v28 = vadd.f32 %v10233_v61, %v14323_v35  ;;  %v10235_v17 = vpop.f32.mrb[57].mxu0  ;;  %v10278_v44 = vpop.f32.mrb[57].mxu1  ;;  %v12373_v29 = vadd.f32 %v10276_v9, %v14335_v56 }
0x108b   : > { %v12310_v3 = vadd.f32 %v10235_v17, %v14325_v36  ;;  %v10237_v2 = vpop.f32.mrb[58].mxu0  ;;  %v10280_v8 = vpop.f32.mrb[58].mxu1  ;;  %v12374_v6 = vadd.f32 %v10278_v44, %v14332_v52 }
0x108c   : > { %v12183_v62 = vmul.f32 -1.442695, %v12309_v28  ;;  %v12311_v27 = vadd.f32 %v10237_v2, %v14323_v35  ;;  %v10239_v15 = vpop.f32.mrb[59].mxu0  ;;  %v10282_v45 = vpop.f32.mrb[59].mxu1  ;;  %v12375_v48 = vadd.f32 %v10280_v8, %v14335_v56 }
0x108d   : > { %v12185_v31 = vmul.f32 -1.442695, %v12310_v3  ;;  %v12312_v39 = vadd.f32 %v10239_v15, %v14325_v36  ;;  %v12187_v43 = vmul.f32 -1.442695, %v12374_v6  ;;  %v12376_v14 = vadd.f32 %v10282_v45, %v14332_v52 }
0x108e   : > { %13533 = vpow2.f32 %v12183_v62  ;;  %v12184_v42 = vmul.f32 -1.442695, %v12311_v27 }
0x108f   : > { %13535 = vpow2.f32 %v12185_v31  ;;  %v12186_v37 = vmul.f32 -1.442695, %v12312_v39  ;;  %v12188_v16 = vmul.f32 -1.442695, %v12376_v14 }
0x1090   : > { %13537 = vpow2.f32 %v12184_v42 }
0x1091   : > { %13539 = vpow2.f32 %v12186_v37 }
0x1092   : > { %13541 = vtanh.f32 %v12373_v29 }
0x1093   : > { %13543 = vpow2.f32 %v12187_v43 }
0x1094   : > { %13545 = vtanh.f32 %v12375_v48 }
0x1098   : > { %v13534_v11 = vpop.eup %13533 }
0x1099   : > { %v13536_v32 = vpop.eup %13535  ;;  %v10299_v58 = vadd.f32 1.0, %v13534_v11 }
0x109a   : > { %v10311_v21 = vadd.f32 1.0, %v13536_v32  ;;  %v13538_v49 = vpop.eup %13537 }
0x109b   : > { %13547 = vrcp.f32 %v10299_v58  ;;  %v10300_v41 = vadd.f32 1.0, %v13538_v49  ;;  %v13540_v54 = vpop.eup %13539 }
0x109c   : > { %13549 = vrcp.f32 %v10311_v21  ;;  %v10312_v46 = vadd.f32 1.0, %v13540_v54  ;;  %v13542_v1 = vpop.eup %13541 }
0x109d   : > { %13551 = vpow2.f32 %v12188_v16  ;;  %v13544_v5 = vpop.eup %13543 }
0x109e   : > { %13553 = vrcp.f32 %v10300_v41  ;;  %v13546_v25 = vpop.eup %13545  ;;  %v10325_v38 = vadd.f32 1.0, %v13544_v5 }
0x109f   : > { %13555 = vrcp.f32 %v10312_v46 }
0x10a0   : > { %13557 = vrcp.f32 %v10325_v38 }
0x10a5   : > { %v13548_v24 = vpop.eup %13547 }
0x10a6   : > { %v13550_v18 = vpop.eup %13549  ;;  %v10335_v59 = vmul.f32 %v13548_v24, %v13542_v1 }
0x10a7   : > { %v13552_v33 = vpop.eup %13551  ;;  %v10333_v34 = vmul.f32 %v13550_v18, %v16693_v50 }
0x10a8   : > { %v13554_v23 = vpop.eup %13553  ;;  %v10326_v7 = vadd.f32 1.0, %v13552_v33 }
0x10a9   : > { %v16813_v53 = vadd.f32 %v10335_v59, %v10333_v34  ;;  %v10336_v13 = vmul.f32 %v13554_v23, %v13546_v25  ;;  %v13556_v55 = vpop.eup %13555  ;;  %v10574_v23 = vld [vmem:[%s14117_s28 + $0x4] sm:$0x8] }
0x10aa   : > { %v10334_v40 = vmul.f32 %v13556_v55, %v16697_v19  ;;  %v13558_v60 = vpop.eup %13557 }
0x10ab   : > { %13559 = vtanh.f32 %v16813_v53 }
0x10ac   : > { %v16817_v26 = vadd.f32 %v10336_v13, %v10334_v40  ;;  %13561 = vrcp.f32 %v10326_v7 }
0x10ae   : > { %13563 = vtanh.f32 %v16817_v26 }
0x10b5   : > { %v13560_v20 = vpop.eup %13559 }
0x10b6   : > { %v10341_v50 = vmul.f32 %v13560_v20, %v13558_v60  ;;  %v13562_v51 = vpop.eup %13561  ;;  %v10577_v60 = vld [vmem:[%s14117_s28 + $0xc] sm:$0x8]  ;;  %v10580_v20 = vld [vmem:[%s14117_s28 + $0x14] sm:$0x8] }
0x10b8   : > { %v10361_v63 = vsel %vm10359_vm14, %v10341_v50, 0.0  ;;  %v13564_v47 = vpop.eup %13563 }
0x10b9   : > { %v10342_v22 = vmul.f32 %v13564_v47, %v13562_v51 }
0x10bb   : > { %v10362_v30 = vsel %vm10360_vm3, %v10342_v22, 0.0  ;;  %v10633_v12 = vpack.c.bf16 %v10342_v22, %v10341_v50  ;;  %v10598_v50 = vld [vmem:[%s14117_s28 + $0x44] sm:$0x8]  ;;  %v10583_v22 = vld [vmem:[%s14117_s28 + $0x1c] sm:$0x8] }
0x10bc   : > { %v10363_v61 = vpack.c.bf16 %v10362_v30, %v10361_v63  ;;  %v12189_v19 = vpack.c.bf16 %v10362_v30, %v10362_v30  ;;  %v10589_v30 = vld [vmem:[%s14117_s28 + $0x2c] sm:$0x8] }
0x10bd   : > { %10859 = vmatmul.mubr.bf16.vlgmr.msra.gmra.mrb[60].mxu0 %v10633_v12  ;;  %10902 = vmatmul.mubr.bf16.vlgmr.msra.gmra.mrb[60].mxu1 %v10633_v12  ;;  %v10592_v12 = vld [vmem:[%s14117_s28 + $0x34] sm:$0x8] }
0x10be   : > { %v10372_v9 = vrot.slane %v10363_v61, %v17171_v4  ;;  %v10379_v28 = vrot.slane %v12189_v19, %v17171_v4 }
0x10c0   : > { %v10380_v17 = vcombine.high %v10372_v9, %v10372_v9  ;;  %v10381_v44 = vcombine.high %v10379_v28, %v10379_v28  ;;  %v10388_v3 = vrot.slane %v10372_v9, %v17171_v4  ;;  %v10395_v2 = vrot.slane %v10379_v28, %v17171_v4 }
0x10c2   : > { %v10402_v8 = vrot.slane %v10380_v17, %v17171_v4  ;;  %v10409_v62 = vrot.slane %v10381_v44, %v17171_v4  ;;  %v10410_v27 = vcombine.high %v10388_v3, %v10388_v3  ;;  %v10411_v15 = vcombine.high %v10395_v2, %v10395_v2  ;;  %v10595_v17 = vld [vmem:[%s14117_s28 + $0x3c] sm:$0x8]  ;;  %v10601_v44 = vld [vmem:[%s14117_s28 + $0x4c] sm:$0x8] }
0x10c3   : > { %v10415_v45 = vunpack.i.h.s16 %v10388_v3  ;;  %v10423_v31 = vunpack.i.h.s16 %v10395_v2  ;;  %v12190_v39 = vpack.i.b16 %v10388_v3, %v10388_v3  ;;  %v12194_v42 = vpack.i.b16 %v10395_v2, %v10395_v2  ;;  %v10604_v3 = vld [vmem:[%s14117_s28 + $0x54] sm:$0x8] }
0x10c4   : > { %v10412_v37 = vcombine.high %v10402_v8, %v10402_v8  ;;  %v10413_v6 = vcombine.high %v10409_v62, %v10409_v62  ;;  %v10417_v29 = vunpack.i.h.s16 %v10402_v8  ;;  %v10419_v43 = vunpack.i.h.s16 %v10410_v27 }
0x10c5   : > { %v10425_v14 = vunpack.i.h.s16 %v10409_v62  ;;  %v10427_v48 = vunpack.i.h.s16 %v10411_v15  ;;  %v10431_v11 = vpack.i.b16 %v10415_v45, %v10415_v45  ;;  %v12191_v32 = vpack.i.b16 %v10402_v8, %v10402_v8  ;;  %v10607_v45 = vld [vmem:[%s14117_s28 + $0x5c] sm:$0x8] }
0x10c6   : > { %v10421_v58 = vunpack.i.h.s16 %v10412_v37  ;;  %v10429_v16 = vunpack.i.h.s16 %v10413_v6  ;;  %v10433_v21 = vpack.i.b16 %v10417_v29, %v10417_v29  ;;  %v12192_v49 = vpack.i.b16 %v10410_v27, %v10410_v27 }
0x10c7   : > { %v10435_v41 = vpack.i.b16 %v10419_v43, %v10419_v43  ;;  %v12193_v54 = vpack.i.b16 %v10412_v37, %v10412_v37  ;;  %v10439_v46 = vpack.i.b16 %v10423_v31, %v10423_v31  ;;  %v12195_v1 = vpack.i.b16 %v10409_v62, %v10409_v62  ;;  %v10610_v31 = vld [vmem:[%s14117_s28 + $0x64] sm:$0x8]  ;;  %v10616_v43 = vld [vmem:[%s14117_s28 + $0x74] sm:$0x8] }
0x10c8   : > { %v10437_v5 = vpack.i.b16 %v10421_v58, %v10421_v58  ;;  %v10441_v25 = vpack.i.b16 %v10425_v14, %v10425_v14  ;;  %v12196_v24 = vpack.i.b16 %v10411_v15, %v10411_v15  ;;  %v10443_v18 = vpack.i.b16 %v10427_v48, %v10427_v48  ;;  %v10619_v14 = vld [vmem:[%s14117_s28 + $0x7c] sm:$0x8] }
0x10c9   : > { %v12197_v59 = vpack.i.b16 %v10413_v6, %v10413_v6  ;;  %v16828_v38 = vpack.i.b16 %v10429_v16, %v10429_v16  ;;  %v10452_v33 = vrot.slane %v12190_v39, %v14357_v57  ;;  %v10459_v34 = vrot.slane %v10431_v11, %v14357_v57  ;;  %v10613_v39 = vld [vmem:[%s14117_s28 + $0x6c] sm:$0x8] }
0x10ca   : > { %v10466_v13 = vrot.slane %v12191_v32, %v14357_v57  ;;  %v10473_v55 = vrot.slane %v10433_v21, %v14357_v57  ;;  %v10480_v7 = vrot.slane %v12192_v49, %v14357_v57  ;;  %v10487_v40 = vrot.slane %v10435_v41, %v14357_v57 }
0x10cb   : > { %v10494_v51 = vrot.slane %v12193_v54, %v14357_v57  ;;  %v10501_v63 = vrot.slane %v10437_v5, %v14357_v57  ;;  %v10508_v47 = vrot.slane %v12194_v42, %v14357_v57  ;;  %v10515_v0 = vrot.slane %v10439_v46, %v14357_v57 }
0x10cc   : > { %v10522_v61 = vrot.slane %v12195_v1, %v14357_v57  ;;  %v10529_v19 = vrot.slane %v10441_v25, %v14357_v57  ;;  %v10536_v9 = vrot.slane %v12196_v24, %v14357_v57  ;;  %v10543_v28 = vrot.slane %v10443_v18, %v14357_v57 }
0x10cd   : > { %v10550_v2 = vrot.slane %v12197_v59, %v14357_v57  ;;  %v10557_v8 = vrot.slane %v16828_v38, %v14357_v57  ;;  %v10575_v27 = vsel %vm15489_vm1, %v10452_v33, %v10574_v23  ;;  %v10578_v15 = vsel %vm15489_vm1, %v10459_v34, %v10577_v60 }
0x10ce   : > { %10576 = vst [vmem:[%s14117_s28 + $0x4] sm:$0x8] %v10575_v27  ;;  %10579 = vst [vmem:[%s14117_s28 + $0xc] sm:$0x8] %v10578_v15  ;;  %v10581_v42 = vsel %vm15489_vm1, %v10466_v13, %v10580_v20  ;;  %v10584_v37 = vsel %vm15489_vm1, %v10473_v55, %v10583_v22  ;;  %v10587_v6 = vsel %vm15489_vm1, %v10480_v7, %v10586_v10 }
0x10cf   : > { %v10590_v29 = vsel %vm15489_vm1, %v10487_v40, %v10589_v30  ;;  %10582 = vst [vmem:[%s14117_s28 + $0x14] sm:$0x8] %v10581_v42  ;;  %10585 = vst [vmem:[%s14117_s28 + $0x1c] sm:$0x8] %v10584_v37  ;;  %v10593_v48 = vsel %vm15489_vm1, %v10494_v51, %v10592_v12  ;;  %v10596_v11 = vsel %vm15489_vm1, %v10501_v63, %v10595_v17 }
0x10d0   : > { %10588 = vst [vmem:[%s14117_s28 + $0x24] sm:$0x8] %v10587_v6  ;;  %10591 = vst [vmem:[%s14117_s28 + $0x2c] sm:$0x8] %v10590_v29  ;;  %v10599_v32 = vsel %vm15489_vm1, %v10508_v47, %v10598_v50  ;;  %v10602_v58 = vsel %vm15489_vm1, %v10515_v0, %v10601_v44  ;;  %v10605_v16 = vsel %vm15489_vm1, %v10522_v61, %v10604_v3 }
0x10d1   : > { %10594 = vst [vmem:[%s14117_s28 + $0x34] sm:$0x8] %v10593_v48  ;;  %10597 = vst [vmem:[%s14117_s28 + $0x3c] sm:$0x8] %v10596_v11  ;;  %v10608_v21 = vsel %vm15489_vm1, %v10529_v19, %v10607_v45  ;;  %v10611_v49 = vsel %vm15489_vm1, %v10536_v9, %v10610_v31  ;;  %v10614_v41 = vsel %vm15489_vm1, %v10543_v28, %v10613_v39  ;;  %v10985_v48 = vpop.permute.xlu1 %10984 }
0x10d2   : > { %10600 = vst [vmem:[%s14117_s28 + $0x44] sm:$0x8] %v10599_v32  ;;  %10603 = vst [vmem:[%s14117_s28 + $0x4c] sm:$0x8] %v10602_v58  ;;  %v10617_v54 = vsel %vm15489_vm1, %v10550_v2, %v10616_v43  ;;  %v10620_v46 = vsel %vm15489_vm1, %v10557_v8, %v10619_v14  ;;  %vm10987_vm1 = vcmp.eq.s32.totalorder %v10985_v48, 1 }
0x10d3   : > { %10606 = vst [vmem:[%s14117_s28 + $0x54] sm:$0x8] %v10605_v16  ;;  %10609 = vst [vmem:[%s14117_s28 + $0x5c] sm:$0x8] %v10608_v21 }
0x10d4   : > { %10612 = vst [vmem:[%s14117_s28 + $0x64] sm:$0x8] %v10611_v49  ;;  %10615 = vst [vmem:[%s14117_s28 + $0x6c] sm:$0x8] %v10614_v41 }
0x10d5   : > { %10618 = vst [vmem:[%s14117_s28 + $0x74] sm:$0x8] %v10617_v54  ;;  %10621 = vst [vmem:[%s14117_s28 + $0x7c] sm:$0x8] %v10620_v46 }
0x1190   : > { %v10860_v1 = vpop.f32.mrb[60].mxu0  ;;  %v10903_v5 = vpop.f32.mrb[60].mxu1 }
0x1191   : > { %v12313_v25 = vadd.f32 %v10860_v1, %v14323_v35  ;;  %v10862_v24 = vpop.f32.mrb[61].mxu0  ;;  %v10905_v18 = vpop.f32.mrb[61].mxu1  ;;  %v12377_v50 = vadd.f32 %v10903_v5, %v14335_v56 }
0x1192   : > { %v12314_v59 = vadd.f32 %v10862_v24, %v14325_v36  ;;  %v10864_v38 = vpop.f32.mrb[62].mxu0  ;;  %v10907_v33 = vpop.f32.mrb[62].mxu1  ;;  %v12378_v10 = vadd.f32 %v10905_v18, %v14332_v52 }
0x1193   : > { %v12230_v34 = vmul.f32 -1.442695, %v12313_v25  ;;  %v12315_v23 = vadd.f32 %v10864_v38, %v14323_v35  ;;  %v10866_v13 = vpop.f32.mrb[63].mxu0  ;;  %v10909_v55 = vpop.f32.mrb[63].mxu1  ;;  %v12379_v35 = vadd.f32 %v10907_v33, %v14335_v56 }
0x1194   : > { %v12232_v7 = vmul.f32 -1.442695, %v12314_v59  ;;  %v12316_v40 = vadd.f32 %v10866_v13, %v14325_v36  ;;  %v12234_v51 = vmul.f32 -1.442695, %v12378_v10  ;;  %v12380_v63 = vadd.f32 %v10909_v55, %v14332_v52 }
0x1195   : > { %13565 = vpow2.f32 %v12230_v34  ;;  %v12231_v60 = vmul.f32 -1.442695, %v12315_v23 }
0x1196   : > { %13567 = vpow2.f32 %v12232_v7  ;;  %v12233_v20 = vmul.f32 -1.442695, %v12316_v40  ;;  %v12235_v36 = vmul.f32 -1.442695, %v12380_v63 }
0x1197   : > { %13569 = vpow2.f32 %v12231_v60 }
0x1198   : > { %13571 = vpow2.f32 %v12233_v20 }
0x1199   : > { %13573 = vtanh.f32 %v12377_v50 }
0x119a   : > { %13575 = vpow2.f32 %v12234_v51 }
0x119b   : > { %13577 = vtanh.f32 %v12379_v35 }
0x119f   : > { %v13566_v47 = vpop.eup %13565 }
0x11a0   : > { %v13568_v0 = vpop.eup %13567  ;;  %v10926_v22 = vadd.f32 1.0, %v13566_v47 }
0x11a1   : > { %v10938_v30 = vadd.f32 1.0, %v13568_v0  ;;  %v13570_v12 = vpop.eup %13569 }
0x11a2   : > { %13579 = vrcp.f32 %v10926_v22  ;;  %v10927_v61 = vadd.f32 1.0, %v13570_v12  ;;  %v13572_v19 = vpop.eup %13571 }
0x11a3   : > { %13581 = vrcp.f32 %v10938_v30  ;;  %v10939_v9 = vadd.f32 1.0, %v13572_v19  ;;  %v13574_v52 = vpop.eup %13573 }
0x11a4   : > { %13583 = vpow2.f32 %v12235_v36  ;;  %v13576_v28 = vpop.eup %13575 }
0x11a5   : > { %13585 = vrcp.f32 %v10927_v61  ;;  %v13578_v56 = vpop.eup %13577  ;;  %v10952_v2 = vadd.f32 1.0, %v13576_v28 }
0x11a6   : > { %13587 = vrcp.f32 %v10939_v9 }
0x11a7   : > { %13589 = vrcp.f32 %v10952_v2 }
0x11ac   : > { %v13580_v17 = vpop.eup %13579 }
0x11ad   : > { %v13582_v44 = vpop.eup %13581  ;;  %v10962_v3 = vmul.f32 %v13580_v17, %v13574_v52 }
0x11ae   : > { %v13584_v8 = vpop.eup %13583  ;;  %v10960_v62 = vmul.f32 %v13582_v44, %v16813_v53  ;;  %v10982_v53 = vpop.permute.xlu0 %10981 }
0x11af   : > { %v13586_v27 = vpop.eup %13585  ;;  %v10953_v39 = vadd.f32 1.0, %v13584_v8  ;;  %vm10986_vm4 = vcmp.eq.s32.totalorder %v10982_v53, 1 }
0x11b0   : > { %v10964_v15 = vadd.f32 %v10962_v3, %v10960_v62  ;;  %v10963_v45 = vmul.f32 %v13586_v27, %v13578_v56  ;;  %v13588_v31 = vpop.eup %13587 }
0x11b1   : > { %v10961_v42 = vmul.f32 %v13588_v31, %v16817_v26  ;;  %v13590_v6 = vpop.eup %13589  ;;  %v11204_v31 = vld [vmem:[%s14117_s28 + $0xc] sm:$0x8] }
0x11b2   : > { %13591 = vtanh.f32 %v10964_v15  ;;  %10972 = vst [vmem:[#allocation3] sm:$0xff] %v10964_v15 }
0x11b3   : > { %v10965_v37 = vadd.f32 %v10963_v45, %v10961_v42  ;;  %13593 = vrcp.f32 %v10953_v39  ;;  %v11201_v45 = vld [vmem:[%s14117_s28 + $0x4] sm:$0x8] }
0x11b5   : > { %13595 = vtanh.f32 %v10965_v37  ;;  %10973 = vst [vmem:[#allocation3 + $0x8] sm:$0xff] %v10965_v37 }
0x11bc   : > { %v13592_v29 = vpop.eup %13591 }
0x11bd   : > { %v10968_v43 = vmul.f32 %v13592_v29, %v13590_v6  ;;  %v13594_v14 = vpop.eup %13593  ;;  %v11207_v29 = vld [vmem:[%s14117_s28 + $0x14] sm:$0x8] }
0x11bf   : > { %10970 = vst [vmem:[#allocation2] sm:$0xff] %v10968_v43  ;;  %v13596_v11 = vpop.eup %13595  ;;  %v10988_v58 = vsel %vm10986_vm4, %v10968_v43, 0.0  ;;  %v11210_v43 = vld [vmem:[%s14117_s28 + $0x1c] sm:$0x8] }
0x11c0   : > { %v10969_v32 = vmul.f32 %v13596_v11, %v13594_v14  ;;  %v11213_v14 = vld [vmem:[%s14117_s28 + $0x24] sm:$0x8] }
0x11c2   : > { %10971 = vst [vmem:[#allocation2 + $0x8] sm:$0xff] %v10969_v32  ;;  %v10989_v16 = vsel %vm10987_vm1, %v10969_v32, 0.0 }
0x11c3   : > { %v10990_v21 = vpack.c.bf16 %v10989_v16, %v10988_v58  ;;  %v12236_v26 = vpack.c.bf16 %v10989_v16, %v10989_v16  ;;  %v11216_v16 = vld [vmem:[%s14117_s28 + $0x2c] sm:$0x8] }
0x11c5   : > { %v10999_v49 = vrot.slane %v10990_v21, %v17171_v4  ;;  %v11006_v41 = vrot.slane %v12236_v26, %v17171_v4  ;;  %v11219_v21 = vld [vmem:[%s14117_s28 + $0x34] sm:$0x8]  ;;  %v11222_v26 = vld [vmem:[%s14117_s28 + $0x3c] sm:$0x8] }
0x11c7   : > { %v11007_v54 = vcombine.high %v10999_v49, %v10999_v49  ;;  %v11008_v46 = vcombine.high %v11006_v41, %v11006_v41  ;;  %v11015_v1 = vrot.slane %v10999_v49, %v17171_v4  ;;  %v11022_v5 = vrot.slane %v11006_v41, %v17171_v4 }
0x11c9   : > { %v11029_v25 = vrot.slane %v11007_v54, %v17171_v4  ;;  %v11036_v24 = vrot.slane %v11008_v46, %v17171_v4  ;;  %v11037_v18 = vcombine.high %v11015_v1, %v11015_v1  ;;  %v11038_v59 = vcombine.high %v11022_v5, %v11022_v5  ;;  %v11225_v46 = vld [vmem:[%s14117_s28 + $0x44] sm:$0x8] }
0x11ca   : > { %v11042_v38 = vunpack.i.h.s16 %v11015_v1  ;;  %v11050_v33 = vunpack.i.h.s16 %v11022_v5  ;;  %v12237_v34 = vpack.i.b16 %v11015_v1, %v11015_v1  ;;  %v12241_v23 = vpack.i.b16 %v11022_v5, %v11022_v5  ;;  %v11228_v1 = vld [vmem:[%s14117_s28 + $0x4c] sm:$0x8]  ;;  %v11231_v5 = vld [vmem:[%s14117_s28 + $0x54] sm:$0x8] }
0x11cb   : > { %v11039_v13 = vcombine.high %v11029_v25, %v11029_v25  ;;  %v11040_v55 = vcombine.high %v11036_v24, %v11036_v24  ;;  %v11044_v7 = vunpack.i.h.s16 %v11029_v25  ;;  %v11046_v40 = vunpack.i.h.s16 %v11037_v18 }
0x11cc   : > { %v11052_v60 = vunpack.i.h.s16 %v11036_v24  ;;  %v11054_v20 = vunpack.i.h.s16 %v11038_v59  ;;  %v11058_v10 = vpack.i.b16 %v11042_v38, %v11042_v38  ;;  %v12238_v50 = vpack.i.b16 %v11029_v25, %v11029_v25  ;;  %v11234_v38 = vld [vmem:[%s14117_s28 + $0x5c] sm:$0x8] }
0x11cd   : > { %v11048_v51 = vunpack.i.h.s16 %v11039_v13  ;;  %v11056_v63 = vunpack.i.h.s16 %v11040_v55  ;;  %v11060_v35 = vpack.i.b16 %v11044_v7, %v11044_v7  ;;  %v12239_v47 = vpack.i.b16 %v11037_v18, %v11037_v18 }
0x11ce   : > { %v11062_v0 = vpack.i.b16 %v11046_v40, %v11046_v40  ;;  %v12240_v4 = vpack.i.b16 %v11039_v13, %v11039_v13  ;;  %v11066_v22 = vpack.i.b16 %v11050_v33, %v11050_v33  ;;  %v12242_v36 = vpack.i.b16 %v11036_v24, %v11036_v24  ;;  %v11237_v33 = vld [vmem:[%s14117_s28 + $0x64] sm:$0x8]  ;;  %v11243_v40 = vld [vmem:[%s14117_s28 + $0x74] sm:$0x8] }
0x11cf   : > { %v11064_v30 = vpack.i.b16 %v11048_v51, %v11048_v51  ;;  %v11068_v12 = vpack.i.b16 %v11052_v60, %v11052_v60  ;;  %v12243_v61 = vpack.i.b16 %v11038_v59, %v11038_v59  ;;  %v11070_v19 = vpack.i.b16 %v11054_v20, %v11054_v20  ;;  %v11246_v60 = vld [vmem:[%s14117_s28 + $0x7c] sm:$0x8] }
0x11d0   : > { %v12244_v9 = vpack.i.b16 %v11040_v55, %v11040_v55  ;;  %v16927_v52 = vpack.i.b16 %v11056_v63, %v11056_v63  ;;  %v11079_v28 = vrot.slane %v12237_v34, %v14357_v57  ;;  %v11086_v56 = vrot.slane %v11058_v10, %v14357_v57  ;;  %v11240_v34 = vld [vmem:[%s14117_s28 + $0x6c] sm:$0x8] }
0x11d1   : > { %v11093_v17 = vrot.slane %v12238_v50, %v14357_v57  ;;  %v11100_v44 = vrot.slane %v11060_v35, %v14357_v57  ;;  %v11107_v3 = vrot.slane %v12239_v47, %v14357_v57  ;;  %v11114_v2 = vrot.slane %v11062_v0, %v14357_v57 }
0x11d2   : > { %v11121_v8 = vrot.slane %v12240_v4, %v14357_v57  ;;  %v11128_v62 = vrot.slane %v11064_v30, %v14357_v57  ;;  %v11135_v27 = vrot.slane %v12241_v23, %v14357_v57  ;;  %v11142_v15 = vrot.slane %v11066_v22, %v14357_v57 }
0x11d3   : > { %v11149_v39 = vrot.slane %v12242_v36, %v14357_v57  ;;  %v11156_v42 = vrot.slane %v11068_v12, %v14357_v57  ;;  %v11163_v37 = vrot.slane %v12243_v61, %v14357_v57  ;;  %v11170_v6 = vrot.slane %v11070_v19, %v14357_v57 }
0x11d4   : > { %v11177_v48 = vrot.slane %v12244_v9, %v14357_v57  ;;  %v11184_v53 = vrot.slane %v16927_v52, %v14357_v57  ;;  %v11202_v32 = vsel %vm15656_vm9, %v11079_v28, %v11201_v45  ;;  %v11205_v58 = vsel %vm15656_vm9, %v11086_v56, %v11204_v31 }
0x11d5   : > { %11203 = vst [vmem:[%s14117_s28 + $0x4] sm:$0x8] %v11202_v32  ;;  %11206 = vst [vmem:[%s14117_s28 + $0xc] sm:$0x8] %v11205_v58  ;;  %v11208_v49 = vsel %vm15656_vm9, %v11093_v17, %v11207_v29  ;;  %v11211_v57 = vsel %vm15656_vm9, %v11100_v44, %v11210_v43  ;;  %v11214_v41 = vsel %vm15656_vm9, %v11107_v3, %v11213_v14 }
0x11d6   : > { %v11217_v54 = vsel %vm15656_vm9, %v11114_v2, %v11216_v16  ;;  %11209 = vst [vmem:[%s14117_s28 + $0x14] sm:$0x8] %v11208_v49  ;;  %11212 = vst [vmem:[%s14117_s28 + $0x1c] sm:$0x8] %v11211_v57  ;;  %v11220_v25 = vsel %vm15656_vm9, %v11121_v8, %v11219_v21  ;;  %v11223_v24 = vsel %vm15656_vm9, %v11128_v62, %v11222_v26 }
0x11d7   : > { %11215 = vst [vmem:[%s14117_s28 + $0x24] sm:$0x8] %v11214_v41  ;;  %11218 = vst [vmem:[%s14117_s28 + $0x2c] sm:$0x8] %v11217_v54  ;;  %v11226_v18 = vsel %vm15656_vm9, %v11135_v27, %v11225_v46  ;;  %v11229_v59 = vsel %vm15656_vm9, %v11142_v15, %v11228_v1  ;;  %v11232_v23 = vsel %vm15656_vm9, %v11149_v39, %v11231_v5 }
0x11d8   : > { %11221 = vst [vmem:[%s14117_s28 + $0x34] sm:$0x8] %v11220_v25  ;;  %11224 = vst [vmem:[%s14117_s28 + $0x3c] sm:$0x8] %v11223_v24  ;;  %v11235_v13 = vsel %vm15656_vm9, %v11156_v42, %v11234_v38  ;;  %v11238_v55 = vsel %vm15656_vm9, %v11163_v37, %v11237_v33  ;;  %v11241_v7 = vsel %vm15656_vm9, %v11170_v6, %v11240_v34 }
0x11d9   : > { %11227 = vst [vmem:[%s14117_s28 + $0x44] sm:$0x8] %v11226_v18  ;;  %11230 = vst [vmem:[%s14117_s28 + $0x4c] sm:$0x8] %v11229_v59  ;;  %v11244_v20 = vsel %vm15656_vm9, %v11177_v48, %v11243_v40  ;;  %v11247_v10 = vsel %vm15656_vm9, %v11184_v53, %v11246_v60 }
0x11da   : > { %11233 = vst [vmem:[%s14117_s28 + $0x54] sm:$0x8] %v11232_v23  ;;  %11236 = vst [vmem:[%s14117_s28 + $0x5c] sm:$0x8] %v11235_v13 }
0x11db   : > { %11239 = vst [vmem:[%s14117_s28 + $0x64] sm:$0x8] %v11238_v55  ;;  %11242 = vst [vmem:[%s14117_s28 + $0x6c] sm:$0x8] %v11241_v7 }
0x11dc   : > { %11245 = vst [vmem:[%s14117_s28 + $0x74] sm:$0x8] %v11244_v20  ;;  %11248 = vst [vmem:[%s14117_s28 + $0x7c] sm:$0x8] %v11247_v10 }
0x11dd   : > { %s12252_s25 = sshll.u32 %s13815_s21, 7  ;;  %s11282_s29 = sshll.u32 %s14117_s28, 4  ;;  %s11283_s29 = int_to_ptr.vmem [resolvable:$true] %s11282_s29 }
0x11de   : > { %s11265_s7 = scalar_lea.hbm %s17059_s5, %s12252_s25  ;;  %s13840_s2 = smov 128  }
0x11df   : > { %12527 = sst [smem:[#allocation16]] (%p14042_p5), %s13840_s2  ;;  %s13841_s16 = smov 256  }
0x11e0   : > { %12528 = sst [smem:[#allocation16 + $0x1]] (%p14042_p5), %s13841_s16  ;;  %s13842_s12 = smov 2  }
0x11e1   : > { %12529 = sst [smem:[#allocation16 + $0x2]] (%p14042_p5), %s13842_s12  ;;  %s13843_s10 = smov 64  }
0x11e2   : > { %12530 = sst [smem:[#allocation16 + $0x3]] (%p14042_p5), %s13843_s10  ;;  %s13844_s21 = smov 4  }
0x11e3   : > { %12531 = sst [smem:[#allocation16 + $0x4]] (%p14042_p5), %s13843_s10  ;;  %s13845_s28 = smov [#allocation15]  }
0x11e4   : > { %12532 = sst [smem:[#allocation16 + $0x5]] (%p14042_p5), %s13844_s21  ;;  %s13846_s17 = smov 0  }
0x11e5   : > { %12533 = dma.general (%p14042_p5), %s11283_s29, 2048, %s11265_s7, %s11250_s24, %s13845_s28, [#allocation16], %s13846_s17, 0  }
0x11e6 PF: > { %s11310_s9 = sand.u32 1, %s13803_s18   ;;  %p17178_p0 = scmp.ne.s32.totalorder %s17096_s27, 0 }
0x11e7   : > { %p17179_p1 = scmp.ge.s32.totalorder %s13823_s23, 2  ;;  %s11311_s8 = scalar_lea.sflag [#allocation7], %s11310_s9 }
0x11e9   : > { %p12553_p13 = pnand %p17179_p1, %p17178_p0 }
0x11eb   : > { %13798 = dma.done.wait (!%p12553_p13), %s11311_s8, 2048  }
0x11ec   : > { %13800 = vsyncadd (!%p12553_p13), %s11311_s8, 4294965248  ;;  %s23_s23 = sadd.s32 1, %s13823_s23   ;;  %s17180_s18 = smov %s13807_s19 }
0x11ed   : > { %p20_p4 = scmp.ge.s32.totalorder %s23_s23, 4   ;;  %s17181_s19 = smov %s13811_s20 }
0x11ee   : > { %s17182_s20 = smov %s14052_s13  ;;  %s17183_s21 = smov %s13819_s22 }
0x11ef   : > { %s17184_s22 = smov %s17186_s14  ;;  %22 = sbr.rel (!%p20_p4) target bundleno = 10 (0xa), region = 127 }
0x11f6   :  { %11316 = vsyncpa [#allocation6], 1 }
0x11f7   :  { %11318 = vsyncpa [#allocation6 + $0x1], 1 }
0x11f8   :  { %11319 = vsyncpa [#allocation9], 1 }
0x11f9   :  { %11321 = vsyncpa [#allocation9 + $0x1], 1 }
0x11fa   :  { %11322 = vsyncpa [#allocation12], 1 }
0x11fb   :  { %11323 = vsyncpa [#allocation7], 1 }
0x11fc   :  { %11325 = vsyncpa [#allocation7 + $0x1], 1 }

</bundles_post_ra>
